<compile_context>
chip_gen: v5e
topology: v5e:2x2
jax: 0.10.0
libtpu: 0.0.40
codegen_flags: <defaults>
</compile_context>

<pallas_src>
import numpy as np
import jax
import jax.numpy as jnp
from jax import lax
from jax.experimental import pallas as pl
from jax.experimental.pallas import tpu as pltpu

# ----------------- configuration (mirrors __init__ / update_grid_config) -----------------
N_RAYS = 512                # demo ray count (multiple of TR -> grid = (2,))
TR = 256                    # rays per kernel block
CLASS_NUM = 8
HIDDEN = 32
CIN_MLP = 8                 # real MLP input: xyz(3) + viewdirs(3) + pad(2)
CIN_PACK = 16               # packed per-sample input slab rows (MLP(8) | z | in_bbox | pad)
DOUT = 1 + 3 + CLASS_NUM    # fused density | rgb | semantic head ('IF' shading)
DOUT_PAD = 16               # head padded to 16 rows with zero weights (8-aligned sublanes)
OUT_W = 16                  # packed per-ray output slab rows
NEAR_FAR = (0.1, 6.0)
AABB = np.array([[-1.5, -1.5, -1.5], [1.5, 1.5, 1.5]], dtype=np.float32)
GRID_SIZE = np.array([16, 16, 16], dtype=np.float32)
STEP_RATIO = 1.0
N_SAMPLES_MAX = 16
OCC_THRES = 0.1
DENSITY_SHIFT = 0.0
WHITE_BG = True             # forward defaults: white_bg=True, is_train=False
LN2 = float(np.log(2.0))

AABB_SIZE = AABB[1] - AABB[0]
INV_AABB_SIZE = (2.0 / AABB_SIZE).astype(np.float32)
UNITS = AABB_SIZE / (GRID_SIZE - 1.0)
STEP_SIZE = float(np.mean(UNITS) * STEP_RATIO)
AABB_DIAG = float(np.sqrt(np.sum(AABB_SIZE ** 2)))
N_SAMPLES = min(N_SAMPLES_MAX, int(AABB_DIAG / STEP_SIZE) + 1)
MAX_ENV = float(np.max(AABB[1]))
FAR = float(NEAR_FAR[1])
S = N_SAMPLES
TRS = TR * S


# ----------------------------------- helpers ---------------------------------------------
def _softplus(x):
    # matches torch.nn.functional.softplus (beta=1, threshold=20)
    return jnp.where(x > 20.0, x, jnp.log1p(jnp.exp(jnp.minimum(x, 20.0))))


def _xlogx(v):
    return jnp.where(v > 0.0, v * jnp.log(jnp.maximum(v, 1e-30)), 0.0)


def sample_ray(rays_o, rays_d):
    """Plain-JAX port of SemanticNeRF.sample_ray (is_train=False, n_samples=-1)."""
    near, far = NEAR_FAR
    aabb0 = jnp.asarray(AABB[0])
    aabb1 = jnp.asarray(AABB[1])
    vec = jnp.where(rays_d == 0, 1e-6, rays_d)
    rate_a = (aabb1 - rays_o) / vec
    rate_b = (aabb0 - rays_o) / vec
    t_min = jnp.clip(jnp.max(jnp.minimum(rate_a, rate_b), axis=-1), near, far)
    rng = jnp.arange(S, dtype=jnp.float32)[None, :]
    interpx = t_min[:, None] + STEP_SIZE * rng                               # [N, S]
    rays_pts = rays_o[:, None, :] + rays_d[:, None, :] * interpx[..., None]  # [N, S, 3]
    mask_outbbox = jnp.any((aabb0 > rays_pts) | (rays_pts > aabb1), axis=-1)
    mask_outradius = jnp.linalg.norm(rays_pts, axis=-1) > MAX_ENV
    mask_out = mask_outbbox | mask_outradius
    return rays_pts, interpx, ~mask_out


# ----------------------------------- Pallas kernel ----------------------------------------
def nerf_render_kernel(x_ref, w1_ref, b1_ref, w2_ref, b2_ref, out_ref):
    # x: [CIN_PACK=16, TRS] f32, feature-major; lane = s*TR + r within this ray block.
    #    rows: 0-2 xyz_norm | 3-5 viewdirs | 6-7 pad | 8 z | 9 in_bbox | 10-15 pad
    x = x_ref[...]
    z = x[8:9, :]
    in_bbox = x[9:10, :]

    # ---- shared MLP trunk + fused (density|rgb|semantic) head: bf16 MXU, f32 accumulate
    # aux rows (z, in_bbox, pad) hit zero columns of w1, so no slicing before the matmul.
    xb = x.astype(jnp.bfloat16)
    h = jnp.maximum(
        jnp.dot(w1_ref[...], xb, preferred_element_type=jnp.float32) + b1_ref[...], 0.0)
    feats = jnp.dot(w2_ref[...], h.astype(jnp.bfloat16),
                    preferred_element_type=jnp.float32) + b2_ref[...]     # [16, TRS]

    # ---- feature2occ, validity threshold, class-0 delete mask (full-lane f32 VPU/EUP)
    sigma = _softplus(feats[0:1, :] + DENSITY_SHIFT)
    occ = (1.0 - jnp.exp(-sigma)) * in_bbox                               # [1, TRS]
    rv = (occ > OCC_THRES).astype(jnp.float32)                            # pre-delete
    fm = feats * rv                                                       # mask once
    sem = fm[4:4 + CLASS_NUM, :]
    sem_max = jnp.max(sem, axis=0, keepdims=True)
    delete = (fm[4:5, :] >= sem_max).astype(jnp.float32)   # argmax==0 (first-index ties)
    occ = occ * (1.0 - delete)

    log1m = jnp.log(1.0 - occ + 1e-10)
    ent = -(_xlogx(occ) + _xlogx(1.0 - occ)) / LN2         # Bernoulli entropy (bits)
    wf = occ * fm                                          # weighted rgb|sem (row 0 unused)
    wz = occ * z

    # ---- compositing: exclusive transmittance + all per-ray reductions, unrolled over S.
    # Lane slices are TR-aligned (multiples of 128), so every step is a plain FMA.
    acc_f = jnp.zeros((DOUT_PAD, TR), jnp.float32)
    acc_w = jnp.zeros((1, TR), jnp.float32)
    acc_z = jnp.zeros((1, TR), jnp.float32)
    acc_e = jnp.zeros((1, TR), jnp.float32)
    nvalid = jnp.zeros((1, TR), jnp.float32)
    tlog = jnp.zeros((1, TR), jnp.float32)                 # cumulative log(1-occ), exclusive
    for s in range(S):                                     # S = 16, static unrolled
        lo = s * TR
        t_s = jnp.exp(tlog)
        acc_w = acc_w + t_s * occ[:, lo:lo + TR]
        acc_f = acc_f + t_s * wf[:, lo:lo + TR]
        acc_z = acc_z + t_s * wz[:, lo:lo + TR]
        acc_e = acc_e + t_s * ent[:, lo:lo + TR]
        nvalid = nvalid + rv[:, lo:lo + TR]
        tlog = tlog + log1m[:, lo:lo + TR]

    acc_map = jnp.clip(acc_w, 0.0, 1.0)                    # [1, TR]
    rgb_map = acc_f[1:4, :]
    if WHITE_BG:                                           # white_bg and not is_train
        rgb_map = rgb_map + (1.0 - acc_map)
    rgb_map = jnp.clip(rgb_map, 0.0, 1.0)

    sem_sum = acc_f[4:4 + CLASS_NUM, :]
    m = jnp.max(sem_sum, axis=0, keepdims=True)
    e = jnp.exp(sem_sum - m)
    sem_map = e / jnp.sum(e, axis=0, keepdims=True)        # softmax over classes

    depth = jnp.clip(acc_z, 0.0, FAR)
    valid_pixel = (nvalid > 0.0) & (acc_map > 0.01)
    unc = jnp.where(valid_pixel, 1.0 - jnp.exp(-acc_e), 0.0)

    # lane-dense output block: rows rgb(3) | sem(8) | depth | acc | unc | pad(2)
    out_ref[0:3, :] = rgb_map
    out_ref[3:3 + CLASS_NUM, :] = sem_map
    out_ref[11:12, :] = depth
    out_ref[12:13, :] = acc_map
    out_ref[13:14, :] = unc
    out_ref[14:OUT_W, :] = jnp.zeros((OUT_W - 14, TR), jnp.float32)


# ----------------------------------- wrapper ----------------------------------------------
@jax.jit
def semantic_nerf_forward(rays_chunk, w1, b1, w2, b2):
    n = rays_chunk.shape[0]
    nb = (n + TR - 1) // TR
    n_pad = nb * TR
    if n_pad != n:  # pad by replicating the last ray; padded rays are sliced off below
        rays_chunk = jnp.concatenate(
            [rays_chunk,
             jnp.broadcast_to(rays_chunk[-1:], (n_pad - n, rays_chunk.shape[1]))], axis=0)

    rays_o = rays_chunk[:, :3]
    viewdirs = rays_chunk[:, 3:6]
    # depths = rays_chunk[:, -1]   # read but unused by the reference forward

    rays_pts, z_vals, ray_valid = sample_ray(rays_o, viewdirs)
    viewdirs_e = jnp.broadcast_to(viewdirs[:, None, :], rays_pts.shape)
    xyz = (rays_pts - jnp.asarray(AABB[0])) * jnp.asarray(INV_AABB_SIZE) - 1.0

    # fused per-sample slab [n_pad, S, 16] (f32 so z / in_bbox keep full precision)
    x = jnp.concatenate(
        [xyz, viewdirs_e, jnp.zeros((n_pad, S, 2), jnp.float32),
         z_vals[..., None], ray_valid.astype(jnp.float32)[..., None],
         jnp.zeros((n_pad, S, CIN_PACK - 10), jnp.float32)], axis=-1).astype(jnp.float32)
    # feature-major, sample-major lanes: xt[c, b*TRS + s*TR + r] = x[b*TR + r, s, c]
    xt = (x.reshape(nb, TR, S, CIN_PACK)
            .transpose(3, 0, 2, 1)
            .reshape(CIN_PACK, nb * S * TR))

    # transposed bf16 weights; K padded 8 -> 16 and head padded 12 -> 16 with zeros
    w1t = jnp.concatenate(
        [w1.T, jnp.zeros((HIDDEN, CIN_PACK - CIN_MLP), jnp.float32)], axis=1
    ).astype(jnp.bfloat16)                                                # [32, 16]
    b1t = b1.reshape(HIDDEN, 1)                                           # [32, 1]
    w2t = jnp.concatenate(
        [w2.T, jnp.zeros((DOUT_PAD - DOUT, HIDDEN), jnp.float32)], axis=0
    ).astype(jnp.bfloat16)                                                # [16, 32]
    b2t = jnp.concatenate(
        [b2.reshape(DOUT, 1), jnp.zeros((DOUT_PAD - DOUT, 1), jnp.float32)], axis=0)

    matmul_flops = 2 * n_pad * S * (CIN_PACK * HIDDEN + HIDDEN * DOUT_PAD)
    cost = pl.CostEstimate(
        flops=matmul_flops + 80 * n_pad * S,
        transcendentals=7 * n_pad * S + 12 * n_pad,
        bytes_accessed=(n_pad * S * CIN_PACK * 4 + n_pad * OUT_W * 4
                        + (CIN_PACK * HIDDEN + HIDDEN * DOUT_PAD) * 2
                        + (HIDDEN + DOUT_PAD) * 4))

    out = pl.pallas_call(
        nerf_render_kernel,
        out_shape=jax.ShapeDtypeStruct((OUT_W, n_pad), jnp.float32),
        grid_spec=pltpu.PrefetchScalarGridSpec(
            num_scalar_prefetch=0,
            grid=(nb,),
            in_specs=[
                pl.BlockSpec((CIN_PACK, TRS), lambda i: (0, i)),
                pl.BlockSpec((HIDDEN, CIN_PACK), lambda i: (0, 0)),
                pl.BlockSpec((HIDDEN, 1), lambda i: (0, 0)),
                pl.BlockSpec((DOUT_PAD, HIDDEN), lambda i: (0, 0)),
                pl.BlockSpec((DOUT_PAD, 1), lambda i: (0, 0)),
            ],
            out_specs=pl.BlockSpec((OUT_W, TR), lambda i: (0, i)),
        ),
        compiler_params=pltpu.CompilerParams(dimension_semantics=("parallel",)),
        cost_estimate=cost,
    )(xt, w1t, b1t, w2t, b2t)

    rgb_map = out[0:3, :n].T
    sem_map = out[3:3 + CLASS_NUM, :n].T
    depth_map = out[11, :n]
    acc_map = out[12, :n]
    unc_map = out[13, :n]
    semantic_unc_map = jnp.zeros((n,), jnp.float32)
    max_unknown_map = jnp.zeros((n,), jnp.float32)
    return (rgb_map, depth_map, sem_map, unc_map,
            semantic_unc_map, acc_map, max_unknown_map)


# --------------------------- pure-JAX reference for sanity check ---------------------------
def reference_forward(rays_chunk, w1, b1, w2, b2):
    n = rays_chunk.shape[0]
    rays_o = rays_chunk[:, :3]
    viewdirs = rays_chunk[:, 3:6]
    rays_pts, z_vals, ray_valid = sample_ray(rays_o, viewdirs)
    viewdirs_e = jnp.broadcast_to(viewdirs[:, None, :], rays_pts.shape)
    xyz = (rays_pts - jnp.asarray(AABB[0])) * jnp.asarray(INV_AABB_SIZE) - 1.0
    x = jnp.concatenate([xyz, viewdirs_e, jnp.zeros((n, S, 2), jnp.float32)], -1)
    x = x.reshape(n * S, CIN_MLP)
    # same bf16-input / f32-accumulate trunk as the kernel's MXU path
    h = jnp.maximum(jnp.dot(x.astype(jnp.bfloat16), w1.astype(jnp.bfloat16),
                            preferred_element_type=jnp.float32) + b1[0], 0.0)
    feats = (jnp.dot(h.astype(jnp.bfloat16), w2.astype(jnp.bfloat16),
                     preferred_element_type=jnp.float32) + b2[0]).reshape(n, S, DOUT)
    sigma = _softplus(feats[..., 0] + DENSITY_SHIFT)
    occ = (1.0 - jnp.exp(-sigma)) * ray_valid
    rv = occ > OCC_THRES
    rgb = feats[..., 1:4] * rv[..., None]
    sem = feats[..., 4:4 + CLASS_NUM] * rv[..., None]
    occ = jnp.where(jnp.argmax(sem, axis=-1) == 0, 0.0, occ)
    log1m = jnp.log(1.0 - occ + 1e-10)
    trans = jnp.exp(jnp.cumsum(log1m, axis=-1) - log1m)
    weight = occ * trans
    acc = jnp.clip(weight.sum(-1), 0.0, 1.0)
    rgb_map = jnp.clip((weight[..., None] * rgb).sum(-2) + (1.0 - acc)[..., None], 0.0, 1.0)
    sem_map = jax.nn.softmax((weight[..., None] * sem).sum(-2), axis=-1)
    depth = jnp.clip((weight * z_vals).sum(-1), 0.0, FAR)
    valid_pixel = (rv.sum(-1) > 0) & (acc > 0.01)
    ent = -(_xlogx(occ) + _xlogx(1.0 - occ)) / LN2
    unc = jnp.where(valid_pixel, 1.0 - jnp.exp(-(ent * trans).sum(-1)), 0.0)
    return rgb_map, depth, sem_map, unc, acc


# ----------------------------------------- main --------------------------------------------
if __name__ == "__main__":
    key = jax.random.PRNGKey(0)
    k_o, k_d, k_dep, k_w1, k_b1, k_w2, k_b2 = jax.random.split(key, 7)

    rays_o = jax.random.normal(k_o, (N_RAYS, 3), jnp.float32)
    rays_o = rays_o / (jnp.linalg.norm(rays_o, axis=-1, keepdims=True) + 1e-8) * 2.2
    target = 0.3 * jax.random.normal(k_d, (N_RAYS, 3), jnp.float32)
    rays_d = target - rays_o
    rays_d = rays_d / jnp.linalg.norm(rays_d, axis=-1, keepdims=True)
    depths = jax.random.uniform(k_dep, (N_RAYS, 1), jnp.float32, 0.5, 3.0)
    rays_chunk = jnp.concatenate([rays_o, rays_d, depths], axis=-1)   # [N_RAYS, 7]

    w1 = 0.5 * jax.random.normal(k_w1, (CIN_MLP, HIDDEN), jnp.float32)
    b1 = 0.1 * jax.random.normal(k_b1, (1, HIDDEN), jnp.float32)
    w2 = 0.3 * jax.random.normal(k_w2, (HIDDEN, DOUT), jnp.float32)
    b2 = 0.1 * jax.random.normal(k_b2, (1, DOUT), jnp.float32)

    outs = semantic_nerf_forward(rays_chunk, w1, b1, w2, b2)
    outs = jax.block_until_ready(outs)
    rgb_map, depth_map, sem_map, unc_map, sem_unc_map, acc_map, max_unk_map = outs

    ref = reference_forward(rays_chunk, w1, b1, w2, b2)
    np.testing.assert_allclose(np.asarray(rgb_map), np.asarray(ref[0]), rtol=5e-3, atol=5e-3)
    np.testing.assert_allclose(np.asarray(depth_map), np.asarray(ref[1]), rtol=5e-3, atol=5e-3)
    np.testing.assert_allclose(np.asarray(sem_map), np.asarray(ref[2]), rtol=5e-3, atol=5e-3)
    np.testing.assert_allclose(np.asarray(unc_map), np.asarray(ref[3]), rtol=5e-3, atol=5e-3)
    np.testing.assert_allclose(np.asarray(acc_map), np.asarray(ref[4]), rtol=5e-3, atol=5e-3)

    print("KERNEL_OK")
</pallas_src>

<mosaic_0001>
module attributes {stable_mosaic.version = 11 : i64} {
  func.func @nerf_render_kernel(%arg0: i32, %arg1: memref<16x4096xf32, #tpu.memory_space<vmem>>, %arg2: memref<32x16xbf16, #tpu.memory_space<vmem>>, %arg3: memref<32x1xf32, #tpu.memory_space<vmem>>, %arg4: memref<16x32xbf16, #tpu.memory_space<vmem>>, %arg5: memref<16x1xf32, #tpu.memory_space<vmem>>, %arg6: memref<16x256xf32, #tpu.memory_space<vmem>>) attributes {dimension_semantics = [#tpu.dimension_semantics<parallel>], iteration_bounds = array<i64: 2>, scalar_prefetch = 0 : i64, scratch_operands = 0 : i64, tpu.core_type = #tpu.core_type<tc>, window_params = [{transform_indices = @transform_0, window_bounds = array<i64: 16, 4096>}, {pipeline_mode = #tpu.pipeline_mode<synchronous>, transform_indices = @transform_1, window_bounds = array<i64: 32, 16>}, {pipeline_mode = #tpu.pipeline_mode<synchronous>, transform_indices = @transform_2, window_bounds = array<i64: 32, 1>}, {pipeline_mode = #tpu.pipeline_mode<synchronous>, transform_indices = @transform_3, window_bounds = array<i64: 16, 32>}, {pipeline_mode = #tpu.pipeline_mode<synchronous>, transform_indices = @transform_4, window_bounds = array<i64: 16, 1>}, {transform_indices = @transform_5, window_bounds = array<i64: 16, 256>}]} {
    %c0 = arith.constant 0 : index
    %c0_0 = arith.constant 0 : index
    %0 = vector.load %arg1[%c0, %c0_0] : memref<16x4096xf32, #tpu.memory_space<vmem>>, vector<16x4096xf32>
    %1 = vector.extract_strided_slice %0 {offsets = [8, 0], sizes = [1, 4096], strides = [1, 1]} : vector<16x4096xf32> to vector<1x4096xf32>
    %2 = vector.extract_strided_slice %0 {offsets = [9, 0], sizes = [1, 4096], strides = [1, 1]} : vector<16x4096xf32> to vector<1x4096xf32>
    %3 = arith.truncf %0 : vector<16x4096xf32> to vector<16x4096xbf16>
    %c0_1 = arith.constant 0 : index
    %c0_2 = arith.constant 0 : index
    %4 = vector.load %arg2[%c0_1, %c0_2] : memref<32x16xbf16, #tpu.memory_space<vmem>>, vector<32x16xbf16>
    %cst = arith.constant dense<0.000000e+00> : vector<32x4096xf32>
    %5 = tpu.matmul %4, %3, %cst {dimension_numbers = #tpu.dot_dimension_numbers<[1], [0], [0], [1], [0, 0, 1, 1], [], []>} : vector<32x16xbf16>, vector<16x4096xbf16>, vector<32x4096xf32> -> vector<32x4096xf32>
    %c0_3 = arith.constant 0 : index
    %c0_4 = arith.constant 0 : index
    %6 = vector.load %arg3[%c0_3, %c0_4] : memref<32x1xf32, #tpu.memory_space<vmem>>, vector<32x1xf32>
    %7 = vector.broadcast %6 : vector<32x1xf32> to vector<32x4096xf32>
    %8 = arith.addf %5, %7 : vector<32x4096xf32>
    %cst_5 = arith.constant 0.000000e+00 : f32
    %9 = vector.broadcast %cst_5 : f32 to vector<32x4096xf32>
    %10 = arith.maximumf %8, %9 : vector<32x4096xf32>
    %c0_6 = arith.constant 0 : index
    %c0_7 = arith.constant 0 : index
    %11 = vector.load %arg4[%c0_6, %c0_7] : memref<16x32xbf16, #tpu.memory_space<vmem>>, vector<16x32xbf16>
    %12 = arith.truncf %10 : vector<32x4096xf32> to vector<32x4096xbf16>
    %cst_8 = arith.constant dense<0.000000e+00> : vector<16x4096xf32>
    %13 = tpu.matmul %11, %12, %cst_8 {dimension_numbers = #tpu.dot_dimension_numbers<[1], [0], [0], [1], [0, 0, 1, 1], [], []>} : vector<16x32xbf16>, vector<32x4096xbf16>, vector<16x4096xf32> -> vector<16x4096xf32>
    %c0_9 = arith.constant 0 : index
    %c0_10 = arith.constant 0 : index
    %14 = vector.load %arg5[%c0_9, %c0_10] : memref<16x1xf32, #tpu.memory_space<vmem>>, vector<16x1xf32>
    %15 = vector.broadcast %14 : vector<16x1xf32> to vector<16x4096xf32>
    %16 = arith.addf %13, %15 : vector<16x4096xf32>
    %17 = vector.extract_strided_slice %16 {offsets = [0, 0], sizes = [1, 4096], strides = [1, 1]} : vector<16x4096xf32> to vector<1x4096xf32>
    %cst_11 = arith.constant 0.000000e+00 : f32
    %18 = vector.broadcast %cst_11 : f32 to vector<1x4096xf32>
    %19 = arith.addf %17, %18 : vector<1x4096xf32>
    %cst_12 = arith.constant 2.000000e+01 : f32
    %20 = vector.broadcast %cst_12 : f32 to vector<1x4096xf32>
    %21 = arith.cmpf ogt, %19, %20 : vector<1x4096xf32>
    %cst_13 = arith.constant 2.000000e+01 : f32
    %22 = vector.broadcast %cst_13 : f32 to vector<1x4096xf32>
    %23 = arith.minimumf %19, %22 : vector<1x4096xf32>
    %24 = math.exp %23 : vector<1x4096xf32>
    %25 = math.log1p %24 : vector<1x4096xf32>
    %26 = arith.select %21, %19, %25 : vector<1x4096xi1>, vector<1x4096xf32>
    %cst_14 = arith.constant 0.000000e+00 : f32
    %27 = vector.broadcast %cst_14 : f32 to vector<1x4096xf32>
    %28 = arith.subf %27, %26 : vector<1x4096xf32>
    %29 = math.exp %28 : vector<1x4096xf32>
    %cst_15 = arith.constant 1.000000e+00 : f32
    %30 = vector.broadcast %cst_15 : f32 to vector<1x4096xf32>
    %31 = arith.subf %30, %29 : vector<1x4096xf32>
    %32 = arith.mulf %31, %2 : vector<1x4096xf32>
    %cst_16 = arith.constant 1.000000e-01 : f32
    %33 = vector.broadcast %cst_16 : f32 to vector<1x4096xf32>
    %34 = arith.cmpf ogt, %32, %33 : vector<1x4096xf32>
    %35 = arith.extui %34 : vector<1x4096xi1> to vector<1x4096xi32>
    %36 = arith.sitofp %35 : vector<1x4096xi32> to vector<1x4096xf32>
    %37 = vector.broadcast %36 : vector<1x4096xf32> to vector<16x4096xf32>
    %38 = arith.mulf %16, %37 : vector<16x4096xf32>
    %39 = vector.extract_strided_slice %38 {offsets = [4, 0], sizes = [8, 4096], strides = [1, 1]} : vector<16x4096xf32> to vector<8x4096xf32>
    %cst_17 = arith.constant dense<0xFF800000> : vector<4096xf32>
    %40 = vector.multi_reduction <maximumf>, %39, %cst_17 [0] : vector<8x4096xf32> to vector<4096xf32>
    %41 = vector.shape_cast %40 : vector<4096xf32> to vector<1x4096xf32>
    %42 = vector.extract_strided_slice %38 {offsets = [4, 0], sizes = [1, 4096], strides = [1, 1]} : vector<16x4096xf32> to vector<1x4096xf32>
    %43 = arith.cmpf oge, %42, %41 : vector<1x4096xf32>
    %44 = arith.extui %43 : vector<1x4096xi1> to vector<1x4096xi32>
    %45 = arith.sitofp %44 : vector<1x4096xi32> to vector<1x4096xf32>
    %cst_18 = arith.constant 1.000000e+00 : f32
    %46 = vector.broadcast %cst_18 : f32 to vector<1x4096xf32>
    %47 = arith.subf %46, %45 : vector<1x4096xf32>
    %48 = arith.mulf %32, %47 : vector<1x4096xf32>
    %cst_19 = arith.constant 1.000000e+00 : f32
    %49 = vector.broadcast %cst_19 : f32 to vector<1x4096xf32>
    %50 = arith.subf %49, %48 : vector<1x4096xf32>
    %cst_20 = arith.constant 1.000000e-10 : f32
    %51 = vector.broadcast %cst_20 : f32 to vector<1x4096xf32>
    %52 = arith.addf %50, %51 : vector<1x4096xf32>
    %53 = math.log %52 : vector<1x4096xf32>
    %cst_21 = arith.constant 0.000000e+00 : f32
    %54 = vector.broadcast %cst_21 : f32 to vector<1x4096xf32>
    %55 = arith.cmpf ogt, %48, %54 : vector<1x4096xf32>
    %cst_22 = arith.constant 1.000000e-30 : f32
    %56 = vector.broadcast %cst_22 : f32 to vector<1x4096xf32>
    %57 = arith.maximumf %48, %56 : vector<1x4096xf32>
    %58 = math.log %57 : vector<1x4096xf32>
    %59 = arith.mulf %48, %58 : vector<1x4096xf32>
    %cst_23 = arith.constant 0.000000e+00 : f32
    %60 = vector.broadcast %cst_23 : f32 to vector<1x4096xf32>
    %61 = arith.select %55, %59, %60 : vector<1x4096xi1>, vector<1x4096xf32>
    %cst_24 = arith.constant 1.000000e+00 : f32
    %62 = vector.broadcast %cst_24 : f32 to vector<1x4096xf32>
    %63 = arith.subf %62, %48 : vector<1x4096xf32>
    %cst_25 = arith.constant 0.000000e+00 : f32
    %64 = vector.broadcast %cst_25 : f32 to vector<1x4096xf32>
    %65 = arith.cmpf ogt, %63, %64 : vector<1x4096xf32>
    %cst_26 = arith.constant 1.000000e-30 : f32
    %66 = vector.broadcast %cst_26 : f32 to vector<1x4096xf32>
    %67 = arith.maximumf %63, %66 : vector<1x4096xf32>
    %68 = math.log %67 : vector<1x4096xf32>
    %69 = arith.mulf %63, %68 : vector<1x4096xf32>
    %cst_27 = arith.constant 0.000000e+00 : f32
    %70 = vector.broadcast %cst_27 : f32 to vector<1x4096xf32>
    %71 = arith.select %65, %69, %70 : vector<1x4096xi1>, vector<1x4096xf32>
    %72 = arith.addf %61, %71 : vector<1x4096xf32>
    %cst_28 = arith.constant 0.000000e+00 : f32
    %73 = vector.broadcast %cst_28 : f32 to vector<1x4096xf32>
    %74 = arith.subf %73, %72 : vector<1x4096xf32>
    %cst_29 = arith.constant 0.693147182 : f32
    %75 = vector.broadcast %cst_29 : f32 to vector<1x4096xf32>
    %76 = arith.divf %74, %75 : vector<1x4096xf32>
    %77 = vector.broadcast %48 : vector<1x4096xf32> to vector<16x4096xf32>
    %78 = arith.mulf %77, %38 : vector<16x4096xf32>
    %79 = arith.mulf %48, %1 : vector<1x4096xf32>
    %cst_30 = arith.constant 0.000000e+00 : f32
    %80 = vector.broadcast %cst_30 : f32 to vector<16x256xf32>
    %cst_31 = arith.constant 0.000000e+00 : f32
    %81 = vector.broadcast %cst_31 : f32 to vector<1x256xf32>
    %cst_32 = arith.constant 0.000000e+00 : f32
    %82 = vector.broadcast %cst_32 : f32 to vector<1x256xf32>
    %cst_33 = arith.constant 0.000000e+00 : f32
    %83 = vector.broadcast %cst_33 : f32 to vector<1x256xf32>
    %cst_34 = arith.constant 0.000000e+00 : f32
    %84 = vector.broadcast %cst_34 : f32 to vector<1x256xf32>
    %cst_35 = arith.constant 0.000000e+00 : f32
    %85 = vector.broadcast %cst_35 : f32 to vector<1x256xf32>
    %86 = math.exp %85 : vector<1x256xf32>
    %87 = vector.extract_strided_slice %48 {offsets = [0, 0], sizes = [1, 256], strides = [1, 1]} : vector<1x4096xf32> to vector<1x256xf32>
    %88 = arith.mulf %86, %87 : vector<1x256xf32>
    %89 = arith.addf %81, %88 : vector<1x256xf32>
    %90 = vector.extract_strided_slice %78 {offsets = [0, 0], sizes = [16, 256], strides = [1, 1]} : vector<16x4096xf32> to vector<16x256xf32>
    %91 = vector.broadcast %86 : vector<1x256xf32> to vector<16x256xf32>
    %92 = arith.mulf %91, %90 : vector<16x256xf32>
    %93 = arith.addf %80, %92 : vector<16x256xf32>
    %94 = vector.extract_strided_slice %79 {offsets = [0, 0], sizes = [1, 256], strides = [1, 1]} : vector<1x4096xf32> to vector<1x256xf32>
    %95 = arith.mulf %86, %94 : vector<1x256xf32>
    %96 = arith.addf %82, %95 : vector<1x256xf32>
    %97 = vector.extract_strided_slice %76 {offsets = [0, 0], sizes = [1, 256], strides = [1, 1]} : vector<1x4096xf32> to vector<1x256xf32>
    %98 = arith.mulf %86, %97 : vector<1x256xf32>
    %99 = arith.addf %83, %98 : vector<1x256xf32>
    %100 = vector.extract_strided_slice %36 {offsets = [0, 0], sizes = [1, 256], strides = [1, 1]} : vector<1x4096xf32> to vector<1x256xf32>
    %101 = arith.addf %84, %100 : vector<1x256xf32>
    %102 = vector.extract_strided_slice %53 {offsets = [0, 0], sizes = [1, 256], strides = [1, 1]} : vector<1x4096xf32> to vector<1x256xf32>
    %103 = arith.addf %85, %102 : vector<1x256xf32>
    %104 = math.exp %103 : vector<1x256xf32>
    %105 = vector.extract_strided_slice %48 {offsets = [0, 256], sizes = [1, 256], strides = [1, 1]} : vector<1x4096xf32> to vector<1x256xf32>
    %106 = arith.mulf %104, %105 : vector<1x256xf32>
    %107 = arith.addf %89, %106 : vector<1x256xf32>
    %108 = vector.extract_strided_slice %78 {offsets = [0, 256], sizes = [16, 256], strides = [1, 1]} : vector<16x4096xf32> to vector<16x256xf32>
    %109 = vector.broadcast %104 : vector<1x256xf32> to vector<16x256xf32>
    %110 = arith.mulf %109, %108 : vector<16x256xf32>
    %111 = arith.addf %93, %110 : vector<16x256xf32>
    %112 = vector.extract_strided_slice %79 {offsets = [0, 256], sizes = [1, 256], strides = [1, 1]} : vector<1x4096xf32> to vector<1x256xf32>
    %113 = arith.mulf %104, %112 : vector<1x256xf32>
    %114 = arith.addf %96, %113 : vector<1x256xf32>
    %115 = vector.extract_strided_slice %76 {offsets = [0, 256], sizes = [1, 256], strides = [1, 1]} : vector<1x4096xf32> to vector<1x256xf32>
    %116 = arith.mulf %104, %115 : vector<1x256xf32>
    %117 = arith.addf %99, %116 : vector<1x256xf32>
    %118 = vector.extract_strided_slice %36 {offsets = [0, 256], sizes = [1, 256], strides = [1, 1]} : vector<1x4096xf32> to vector<1x256xf32>
    %119 = arith.addf %101, %118 : vector<1x256xf32>
    %120 = vector.extract_strided_slice %53 {offsets = [0, 256], sizes = [1, 256], strides = [1, 1]} : vector<1x4096xf32> to vector<1x256xf32>
    %121 = arith.addf %103, %120 : vector<1x256xf32>
    %122 = math.exp %121 : vector<1x256xf32>
    %123 = vector.extract_strided_slice %48 {offsets = [0, 512], sizes = [1, 256], strides = [1, 1]} : vector<1x4096xf32> to vector<1x256xf32>
    %124 = arith.mulf %122, %123 : vector<1x256xf32>
    %125 = arith.addf %107, %124 : vector<1x256xf32>
    %126 = vector.extract_strided_slice %78 {offsets = [0, 512], sizes = [16, 256], strides = [1, 1]} : vector<16x4096xf32> to vector<16x256xf32>
    %127 = vector.broadcast %122 : vector<1x256xf32> to vector<16x256xf32>
    %128 = arith.mulf %127, %126 : vector<16x256xf32>
    %129 = arith.addf %111, %128 : vector<16x256xf32>
    %130 = vector.extract_strided_slice %79 {offsets = [0, 512], sizes = [1, 256], strides = [1, 1]} : vector<1x4096xf32> to vector<1x256xf32>
    %131 = arith.mulf %122, %130 : vector<1x256xf32>
    %132 = arith.addf %114, %131 : vector<1x256xf32>
    %133 = vector.extract_strided_slice %76 {offsets = [0, 512], sizes = [1, 256], strides = [1, 1]} : vector<1x4096xf32> to vector<1x256xf32>
    %134 = arith.mulf %122, %133 : vector<1x256xf32>
    %135 = arith.addf %117, %134 : vector<1x256xf32>
    %136 = vector.extract_strided_slice %36 {offsets = [0, 512], sizes = [1, 256], strides = [1, 1]} : vector<1x4096xf32> to vector<1x256xf32>
    %137 = arith.addf %119, %136 : vector<1x256xf32>
    %138 = vector.extract_strided_slice %53 {offsets = [0, 512], sizes = [1, 256], strides = [1, 1]} : vector<1x4096xf32> to vector<1x256xf32>
    %139 = arith.addf %121, %138 : vector<1x256xf32>
    %140 = math.exp %139 : vector<1x256xf32>
    %141 = vector.extract_strided_slice %48 {offsets = [0, 768], sizes = [1, 256], strides = [1, 1]} : vector<1x4096xf32> to vector<1x256xf32>
    %142 = arith.mulf %140, %141 : vector<1x256xf32>
    %143 = arith.addf %125, %142 : vector<1x256xf32>
    %144 = vector.extract_strided_slice %78 {offsets = [0, 768], sizes = [16, 256], strides = [1, 1]} : vector<16x4096xf32> to vector<16x256xf32>
    %145 = vector.broadcast %140 : vector<1x256xf32> to vector<16x256xf32>
    %146 = arith.mulf %145, %144 : vector<16x256xf32>
    %147 = arith.addf %129, %146 : vector<16x256xf32>
    %148 = vector.extract_strided_slice %79 {offsets = [0, 768], sizes = [1, 256], strides = [1, 1]} : vector<1x4096xf32> to vector<1x256xf32>
    %149 = arith.mulf %140, %148 : vector<1x256xf32>
    %150 = arith.addf %132, %149 : vector<1x256xf32>
    %151 = vector.extract_strided_slice %76 {offsets = [0, 768], sizes = [1, 256], strides = [1, 1]} : vector<1x4096xf32> to vector<1x256xf32>
    %152 = arith.mulf %140, %151 : vector<1x256xf32>
    %153 = arith.addf %135, %152 : vector<1x256xf32>
    %154 = vector.extract_strided_slice %36 {offsets = [0, 768], sizes = [1, 256], strides = [1, 1]} : vector<1x4096xf32> to vector<1x256xf32>
    %155 = arith.addf %137, %154 : vector<1x256xf32>
    %156 = vector.extract_strided_slice %53 {offsets = [0, 768], sizes = [1, 256], strides = [1, 1]} : vector<1x4096xf32> to vector<1x256xf32>
    %157 = arith.addf %139, %156 : vector<1x256xf32>
    %158 = math.exp %157 : vector<1x256xf32>
    %159 = vector.extract_strided_slice %48 {offsets = [0, 1024], sizes = [1, 256], strides = [1, 1]} : vector<1x4096xf32> to vector<1x256xf32>
    %160 = arith.mulf %158, %159 : vector<1x256xf32>
    %161 = arith.addf %143, %160 : vector<1x256xf32>
    %162 = vector.extract_strided_slice %78 {offsets = [0, 1024], sizes = [16, 256], strides = [1, 1]} : vector<16x4096xf32> to vector<16x256xf32>
    %163 = vector.broadcast %158 : vector<1x256xf32> to vector<16x256xf32>
    %164 = arith.mulf %163, %162 : vector<16x256xf32>
    %165 = arith.addf %147, %164 : vector<16x256xf32>
    %166 = vector.extract_strided_slice %79 {offsets = [0, 1024], sizes = [1, 256], strides = [1, 1]} : vector<1x4096xf32> to vector<1x256xf32>
    %167 = arith.mulf %158, %166 : vector<1x256xf32>
    %168 = arith.addf %150, %167 : vector<1x256xf32>
    %169 = vector.extract_strided_slice %76 {offsets = [0, 1024], sizes = [1, 256], strides = [1, 1]} : vector<1x4096xf32> to vector<1x256xf32>
    %170 = arith.mulf %158, %169 : vector<1x256xf32>
    %171 = arith.addf %153, %170 : vector<1x256xf32>
    %172 = vector.extract_strided_slice %36 {offsets = [0, 1024], sizes = [1, 256], strides = [1, 1]} : vector<1x4096xf32> to vector<1x256xf32>
    %173 = arith.addf %155, %172 : vector<1x256xf32>
    %174 = vector.extract_strided_slice %53 {offsets = [0, 1024], sizes = [1, 256], strides = [1, 1]} : vector<1x4096xf32> to vector<1x256xf32>
    %175 = arith.addf %157, %174 : vector<1x256xf32>
    %176 = math.exp %175 : vector<1x256xf32>
    %177 = vector.extract_strided_slice %48 {offsets = [0, 1280], sizes = [1, 256], strides = [1, 1]} : vector<1x4096xf32> to vector<1x256xf32>
    %178 = arith.mulf %176, %177 : vector<1x256xf32>
    %179 = arith.addf %161, %178 : vector<1x256xf32>
    %180 = vector.extract_strided_slice %78 {offsets = [0, 1280], sizes = [16, 256], strides = [1, 1]} : vector<16x4096xf32> to vector<16x256xf32>
    %181 = vector.broadcast %176 : vector<1x256xf32> to vector<16x256xf32>
    %182 = arith.mulf %181, %180 : vector<16x256xf32>
    %183 = arith.addf %165, %182 : vector<16x256xf32>
    %184 = vector.extract_strided_slice %79 {offsets = [0, 1280], sizes = [1, 256], strides = [1, 1]} : vector<1x4096xf32> to vector<1x256xf32>
    %185 = arith.mulf %176, %184 : vector<1x256xf32>
    %186 = arith.addf %168, %185 : vector<1x256xf32>
    %187 = vector.extract_strided_slice %76 {offsets = [0, 1280], sizes = [1, 256], strides = [1, 1]} : vector<1x4096xf32> to vector<1x256xf32>
    %188 = arith.mulf %176, %187 : vector<1x256xf32>
    %189 = arith.addf %171, %188 : vector<1x256xf32>
    %190 = vector.extract_strided_slice %36 {offsets = [0, 1280], sizes = [1, 256], strides = [1, 1]} : vector<1x4096xf32> to vector<1x256xf32>
    %191 = arith.addf %173, %190 : vector<1x256xf32>
    %192 = vector.extract_strided_slice %53 {offsets = [0, 1280], sizes = [1, 256], strides = [1, 1]} : vector<1x4096xf32> to vector<1x256xf32>
    %193 = arith.addf %175, %192 : vector<1x256xf32>
    %194 = math.exp %193 : vector<1x256xf32>
    %195 = vector.extract_strided_slice %48 {offsets = [0, 1536], sizes = [1, 256], strides = [1, 1]} : vector<1x4096xf32> to vector<1x256xf32>
    %196 = arith.mulf %194, %195 : vector<1x256xf32>
    %197 = arith.addf %179, %196 : vector<1x256xf32>
    %198 = vector.extract_strided_slice %78 {offsets = [0, 1536], sizes = [16, 256], strides = [1, 1]} : vector<16x4096xf32> to vector<16x256xf32>
    %199 = vector.broadcast %194 : vector<1x256xf32> to vector<16x256xf32>
    %200 = arith.mulf %199, %198 : vector<16x256xf32>
    %201 = arith.addf %183, %200 : vector<16x256xf32>
    %202 = vector.extract_strided_slice %79 {offsets = [0, 1536], sizes = [1, 256], strides = [1, 1]} : vector<1x4096xf32> to vector<1x256xf32>
    %203 = arith.mulf %194, %202 : vector<1x256xf32>
    %204 = arith.addf %186, %203 : vector<1x256xf32>
    %205 = vector.extract_strided_slice %76 {offsets = [0, 1536], sizes = [1, 256], strides = [1, 1]} : vector<1x4096xf32> to vector<1x256xf32>
    %206 = arith.mulf %194, %205 : vector<1x256xf32>
    %207 = arith.addf %189, %206 : vector<1x256xf32>
    %208 = vector.extract_strided_slice %36 {offsets = [0, 1536], sizes = [1, 256], strides = [1, 1]} : vector<1x4096xf32> to vector<1x256xf32>
    %209 = arith.addf %191, %208 : vector<1x256xf32>
    %210 = vector.extract_strided_slice %53 {offsets = [0, 1536], sizes = [1, 256], strides = [1, 1]} : vector<1x4096xf32> to vector<1x256xf32>
    %211 = arith.addf %193, %210 : vector<1x256xf32>
    %212 = math.exp %211 : vector<1x256xf32>
    %213 = vector.extract_strided_slice %48 {offsets = [0, 1792], sizes = [1, 256], strides = [1, 1]} : vector<1x4096xf32> to vector<1x256xf32>
    %214 = arith.mulf %212, %213 : vector<1x256xf32>
    %215 = arith.addf %197, %214 : vector<1x256xf32>
    %216 = vector.extract_strided_slice %78 {offsets = [0, 1792], sizes = [16, 256], strides = [1, 1]} : vector<16x4096xf32> to vector<16x256xf32>
    %217 = vector.broadcast %212 : vector<1x256xf32> to vector<16x256xf32>
    %218 = arith.mulf %217, %216 : vector<16x256xf32>
    %219 = arith.addf %201, %218 : vector<16x256xf32>
    %220 = vector.extract_strided_slice %79 {offsets = [0, 1792], sizes = [1, 256], strides = [1, 1]} : vector<1x4096xf32> to vector<1x256xf32>
    %221 = arith.mulf %212, %220 : vector<1x256xf32>
    %222 = arith.addf %204, %221 : vector<1x256xf32>
    %223 = vector.extract_strided_slice %76 {offsets = [0, 1792], sizes = [1, 256], strides = [1, 1]} : vector<1x4096xf32> to vector<1x256xf32>
    %224 = arith.mulf %212, %223 : vector<1x256xf32>
    %225 = arith.addf %207, %224 : vector<1x256xf32>
    %226 = vector.extract_strided_slice %36 {offsets = [0, 1792], sizes = [1, 256], strides = [1, 1]} : vector<1x4096xf32> to vector<1x256xf32>
    %227 = arith.addf %209, %226 : vector<1x256xf32>
    %228 = vector.extract_strided_slice %53 {offsets = [0, 1792], sizes = [1, 256], strides = [1, 1]} : vector<1x4096xf32> to vector<1x256xf32>
    %229 = arith.addf %211, %228 : vector<1x256xf32>
    %230 = math.exp %229 : vector<1x256xf32>
    %231 = vector.extract_strided_slice %48 {offsets = [0, 2048], sizes = [1, 256], strides = [1, 1]} : vector<1x4096xf32> to vector<1x256xf32>
    %232 = arith.mulf %230, %231 : vector<1x256xf32>
    %233 = arith.addf %215, %232 : vector<1x256xf32>
    %234 = vector.extract_strided_slice %78 {offsets = [0, 2048], sizes = [16, 256], strides = [1, 1]} : vector<16x4096xf32> to vector<16x256xf32>
    %235 = vector.broadcast %230 : vector<1x256xf32> to vector<16x256xf32>
    %236 = arith.mulf %235, %234 : vector<16x256xf32>
    %237 = arith.addf %219, %236 : vector<16x256xf32>
    %238 = vector.extract_strided_slice %79 {offsets = [0, 2048], sizes = [1, 256], strides = [1, 1]} : vector<1x4096xf32> to vector<1x256xf32>
    %239 = arith.mulf %230, %238 : vector<1x256xf32>
    %240 = arith.addf %222, %239 : vector<1x256xf32>
    %241 = vector.extract_strided_slice %76 {offsets = [0, 2048], sizes = [1, 256], strides = [1, 1]} : vector<1x4096xf32> to vector<1x256xf32>
    %242 = arith.mulf %230, %241 : vector<1x256xf32>
    %243 = arith.addf %225, %242 : vector<1x256xf32>
    %244 = vector.extract_strided_slice %36 {offsets = [0, 2048], sizes = [1, 256], strides = [1, 1]} : vector<1x4096xf32> to vector<1x256xf32>
    %245 = arith.addf %227, %244 : vector<1x256xf32>
    %246 = vector.extract_strided_slice %53 {offsets = [0, 2048], sizes = [1, 256], strides = [1, 1]} : vector<1x4096xf32> to vector<1x256xf32>
    %247 = arith.addf %229, %246 : vector<1x256xf32>
    %248 = math.exp %247 : vector<1x256xf32>
    %249 = vector.extract_strided_slice %48 {offsets = [0, 2304], sizes = [1, 256], strides = [1, 1]} : vector<1x4096xf32> to vector<1x256xf32>
    %250 = arith.mulf %248, %249 : vector<1x256xf32>
    %251 = arith.addf %233, %250 : vector<1x256xf32>
    %252 = vector.extract_strided_slice %78 {offsets = [0, 2304], sizes = [16, 256], strides = [1, 1]} : vector<16x4096xf32> to vector<16x256xf32>
    %253 = vector.broadcast %248 : vector<1x256xf32> to vector<16x256xf32>
    %254 = arith.mulf %253, %252 : vector<16x256xf32>
    %255 = arith.addf %237, %254 : vector<16x256xf32>
    %256 = vector.extract_strided_slice %79 {offsets = [0, 2304], sizes = [1, 256], strides = [1, 1]} : vector<1x4096xf32> to vector<1x256xf32>
    %257 = arith.mulf %248, %256 : vector<1x256xf32>
    %258 = arith.addf %240, %257 : vector<1x256xf32>
    %259 = vector.extract_strided_slice %76 {offsets = [0, 2304], sizes = [1, 256], strides = [1, 1]} : vector<1x4096xf32> to vector<1x256xf32>
    %260 = arith.mulf %248, %259 : vector<1x256xf32>
    %261 = arith.addf %243, %260 : vector<1x256xf32>
    %262 = vector.extract_strided_slice %36 {offsets = [0, 2304], sizes = [1, 256], strides = [1, 1]} : vector<1x4096xf32> to vector<1x256xf32>
    %263 = arith.addf %245, %262 : vector<1x256xf32>
    %264 = vector.extract_strided_slice %53 {offsets = [0, 2304], sizes = [1, 256], strides = [1, 1]} : vector<1x4096xf32> to vector<1x256xf32>
    %265 = arith.addf %247, %264 : vector<1x256xf32>
    %266 = math.exp %265 : vector<1x256xf32>
    %267 = vector.extract_strided_slice %48 {offsets = [0, 2560], sizes = [1, 256], strides = [1, 1]} : vector<1x4096xf32> to vector<1x256xf32>
    %268 = arith.mulf %266, %267 : vector<1x256xf32>
    %269 = arith.addf %251, %268 : vector<1x256xf32>
    %270 = vector.extract_strided_slice %78 {offsets = [0, 2560], sizes = [16, 256], strides = [1, 1]} : vector<16x4096xf32> to vector<16x256xf32>
    %271 = vector.broadcast %266 : vector<1x256xf32> to vector<16x256xf32>
    %272 = arith.mulf %271, %270 : vector<16x256xf32>
    %273 = arith.addf %255, %272 : vector<16x256xf32>
    %274 = vector.extract_strided_slice %79 {offsets = [0, 2560], sizes = [1, 256], strides = [1, 1]} : vector<1x4096xf32> to vector<1x256xf32>
    %275 = arith.mulf %266, %274 : vector<1x256xf32>
    %276 = arith.addf %258, %275 : vector<1x256xf32>
    %277 = vector.extract_strided_slice %76 {offsets = [0, 2560], sizes = [1, 256], strides = [1, 1]} : vector<1x4096xf32> to vector<1x256xf32>
    %278 = arith.mulf %266, %277 : vector<1x256xf32>
    %279 = arith.addf %261, %278 : vector<1x256xf32>
    %280 = vector.extract_strided_slice %36 {offsets = [0, 2560], sizes = [1, 256], strides = [1, 1]} : vector<1x4096xf32> to vector<1x256xf32>
    %281 = arith.addf %263, %280 : vector<1x256xf32>
    %282 = vector.extract_strided_slice %53 {offsets = [0, 2560], sizes = [1, 256], strides = [1, 1]} : vector<1x4096xf32> to vector<1x256xf32>
    %283 = arith.addf %265, %282 : vector<1x256xf32>
    %284 = math.exp %283 : vector<1x256xf32>
    %285 = vector.extract_strided_slice %48 {offsets = [0, 2816], sizes = [1, 256], strides = [1, 1]} : vector<1x4096xf32> to vector<1x256xf32>
    %286 = arith.mulf %284, %285 : vector<1x256xf32>
    %287 = arith.addf %269, %286 : vector<1x256xf32>
    %288 = vector.extract_strided_slice %78 {offsets = [0, 2816], sizes = [16, 256], strides = [1, 1]} : vector<16x4096xf32> to vector<16x256xf32>
    %289 = vector.broadcast %284 : vector<1x256xf32> to vector<16x256xf32>
    %290 = arith.mulf %289, %288 : vector<16x256xf32>
    %291 = arith.addf %273, %290 : vector<16x256xf32>
    %292 = vector.extract_strided_slice %79 {offsets = [0, 2816], sizes = [1, 256], strides = [1, 1]} : vector<1x4096xf32> to vector<1x256xf32>
    %293 = arith.mulf %284, %292 : vector<1x256xf32>
    %294 = arith.addf %276, %293 : vector<1x256xf32>
    %295 = vector.extract_strided_slice %76 {offsets = [0, 2816], sizes = [1, 256], strides = [1, 1]} : vector<1x4096xf32> to vector<1x256xf32>
    %296 = arith.mulf %284, %295 : vector<1x256xf32>
    %297 = arith.addf %279, %296 : vector<1x256xf32>
    %298 = vector.extract_strided_slice %36 {offsets = [0, 2816], sizes = [1, 256], strides = [1, 1]} : vector<1x4096xf32> to vector<1x256xf32>
    %299 = arith.addf %281, %298 : vector<1x256xf32>
    %300 = vector.extract_strided_slice %53 {offsets = [0, 2816], sizes = [1, 256], strides = [1, 1]} : vector<1x4096xf32> to vector<1x256xf32>
    %301 = arith.addf %283, %300 : vector<1x256xf32>
    %302 = math.exp %301 : vector<1x256xf32>
    %303 = vector.extract_strided_slice %48 {offsets = [0, 3072], sizes = [1, 256], strides = [1, 1]} : vector<1x4096xf32> to vector<1x256xf32>
    %304 = arith.mulf %302, %303 : vector<1x256xf32>
    %305 = arith.addf %287, %304 : vector<1x256xf32>
    %306 = vector.extract_strided_slice %78 {offsets = [0, 3072], sizes = [16, 256], strides = [1, 1]} : vector<16x4096xf32> to vector<16x256xf32>
    %307 = vector.broadcast %302 : vector<1x256xf32> to vector<16x256xf32>
    %308 = arith.mulf %307, %306 : vector<16x256xf32>
    %309 = arith.addf %291, %308 : vector<16x256xf32>
    %310 = vector.extract_strided_slice %79 {offsets = [0, 3072], sizes = [1, 256], strides = [1, 1]} : vector<1x4096xf32> to vector<1x256xf32>
    %311 = arith.mulf %302, %310 : vector<1x256xf32>
    %312 = arith.addf %294, %311 : vector<1x256xf32>
    %313 = vector.extract_strided_slice %76 {offsets = [0, 3072], sizes = [1, 256], strides = [1, 1]} : vector<1x4096xf32> to vector<1x256xf32>
    %314 = arith.mulf %302, %313 : vector<1x256xf32>
    %315 = arith.addf %297, %314 : vector<1x256xf32>
    %316 = vector.extract_strided_slice %36 {offsets = [0, 3072], sizes = [1, 256], strides = [1, 1]} : vector<1x4096xf32> to vector<1x256xf32>
    %317 = arith.addf %299, %316 : vector<1x256xf32>
    %318 = vector.extract_strided_slice %53 {offsets = [0, 3072], sizes = [1, 256], strides = [1, 1]} : vector<1x4096xf32> to vector<1x256xf32>
    %319 = arith.addf %301, %318 : vector<1x256xf32>
    %320 = math.exp %319 : vector<1x256xf32>
    %321 = vector.extract_strided_slice %48 {offsets = [0, 3328], sizes = [1, 256], strides = [1, 1]} : vector<1x4096xf32> to vector<1x256xf32>
    %322 = arith.mulf %320, %321 : vector<1x256xf32>
    %323 = arith.addf %305, %322 : vector<1x256xf32>
    %324 = vector.extract_strided_slice %78 {offsets = [0, 3328], sizes = [16, 256], strides = [1, 1]} : vector<16x4096xf32> to vector<16x256xf32>
    %325 = vector.broadcast %320 : vector<1x256xf32> to vector<16x256xf32>
    %326 = arith.mulf %325, %324 : vector<16x256xf32>
    %327 = arith.addf %309, %326 : vector<16x256xf32>
    %328 = vector.extract_strided_slice %79 {offsets = [0, 3328], sizes = [1, 256], strides = [1, 1]} : vector<1x4096xf32> to vector<1x256xf32>
    %329 = arith.mulf %320, %328 : vector<1x256xf32>
    %330 = arith.addf %312, %329 : vector<1x256xf32>
    %331 = vector.extract_strided_slice %76 {offsets = [0, 3328], sizes = [1, 256], strides = [1, 1]} : vector<1x4096xf32> to vector<1x256xf32>
    %332 = arith.mulf %320, %331 : vector<1x256xf32>
    %333 = arith.addf %315, %332 : vector<1x256xf32>
    %334 = vector.extract_strided_slice %36 {offsets = [0, 3328], sizes = [1, 256], strides = [1, 1]} : vector<1x4096xf32> to vector<1x256xf32>
    %335 = arith.addf %317, %334 : vector<1x256xf32>
    %336 = vector.extract_strided_slice %53 {offsets = [0, 3328], sizes = [1, 256], strides = [1, 1]} : vector<1x4096xf32> to vector<1x256xf32>
    %337 = arith.addf %319, %336 : vector<1x256xf32>
    %338 = math.exp %337 : vector<1x256xf32>
    %339 = vector.extract_strided_slice %48 {offsets = [0, 3584], sizes = [1, 256], strides = [1, 1]} : vector<1x4096xf32> to vector<1x256xf32>
    %340 = arith.mulf %338, %339 : vector<1x256xf32>
    %341 = arith.addf %323, %340 : vector<1x256xf32>
    %342 = vector.extract_strided_slice %78 {offsets = [0, 3584], sizes = [16, 256], strides = [1, 1]} : vector<16x4096xf32> to vector<16x256xf32>
    %343 = vector.broadcast %338 : vector<1x256xf32> to vector<16x256xf32>
    %344 = arith.mulf %343, %342 : vector<16x256xf32>
    %345 = arith.addf %327, %344 : vector<16x256xf32>
    %346 = vector.extract_strided_slice %79 {offsets = [0, 3584], sizes = [1, 256], strides = [1, 1]} : vector<1x4096xf32> to vector<1x256xf32>
    %347 = arith.mulf %338, %346 : vector<1x256xf32>
    %348 = arith.addf %330, %347 : vector<1x256xf32>
    %349 = vector.extract_strided_slice %76 {offsets = [0, 3584], sizes = [1, 256], strides = [1, 1]} : vector<1x4096xf32> to vector<1x256xf32>
    %350 = arith.mulf %338, %349 : vector<1x256xf32>
    %351 = arith.addf %333, %350 : vector<1x256xf32>
    %352 = vector.extract_strided_slice %36 {offsets = [0, 3584], sizes = [1, 256], strides = [1, 1]} : vector<1x4096xf32> to vector<1x256xf32>
    %353 = arith.addf %335, %352 : vector<1x256xf32>
    %354 = vector.extract_strided_slice %53 {offsets = [0, 3584], sizes = [1, 256], strides = [1, 1]} : vector<1x4096xf32> to vector<1x256xf32>
    %355 = arith.addf %337, %354 : vector<1x256xf32>
    %356 = math.exp %355 : vector<1x256xf32>
    %357 = vector.extract_strided_slice %48 {offsets = [0, 3840], sizes = [1, 256], strides = [1, 1]} : vector<1x4096xf32> to vector<1x256xf32>
    %358 = arith.mulf %356, %357 : vector<1x256xf32>
    %359 = arith.addf %341, %358 : vector<1x256xf32>
    %360 = vector.extract_strided_slice %78 {offsets = [0, 3840], sizes = [16, 256], strides = [1, 1]} : vector<16x4096xf32> to vector<16x256xf32>
    %361 = vector.broadcast %356 : vector<1x256xf32> to vector<16x256xf32>
    %362 = arith.mulf %361, %360 : vector<16x256xf32>
    %363 = arith.addf %345, %362 : vector<16x256xf32>
    %364 = vector.extract_strided_slice %79 {offsets = [0, 3840], sizes = [1, 256], strides = [1, 1]} : vector<1x4096xf32> to vector<1x256xf32>
    %365 = arith.mulf %356, %364 : vector<1x256xf32>
    %366 = arith.addf %348, %365 : vector<1x256xf32>
    %367 = vector.extract_strided_slice %76 {offsets = [0, 3840], sizes = [1, 256], strides = [1, 1]} : vector<1x4096xf32> to vector<1x256xf32>
    %368 = arith.mulf %356, %367 : vector<1x256xf32>
    %369 = arith.addf %351, %368 : vector<1x256xf32>
    %370 = vector.extract_strided_slice %36 {offsets = [0, 3840], sizes = [1, 256], strides = [1, 1]} : vector<1x4096xf32> to vector<1x256xf32>
    %371 = arith.addf %353, %370 : vector<1x256xf32>
    %cst_36 = arith.constant 0.000000e+00 : f32
    %cst_37 = arith.constant 1.000000e+00 : f32
    %372 = vector.broadcast %cst_36 : f32 to vector<1x256xf32>
    %373 = arith.maximumf %372, %359 : vector<1x256xf32>
    %374 = vector.broadcast %cst_37 : f32 to vector<1x256xf32>
    %375 = arith.minimumf %374, %373 : vector<1x256xf32>
    %376 = vector.extract_strided_slice %363 {offsets = [1, 0], sizes = [3, 256], strides = [1, 1]} : vector<16x256xf32> to vector<3x256xf32>
    %cst_38 = arith.constant 1.000000e+00 : f32
    %377 = vector.broadcast %cst_38 : f32 to vector<1x256xf32>
    %378 = arith.subf %377, %375 : vector<1x256xf32>
    %379 = vector.broadcast %378 : vector<1x256xf32> to vector<3x256xf32>
    %380 = arith.addf %376, %379 : vector<3x256xf32>
    %cst_39 = arith.constant 0.000000e+00 : f32
    %cst_40 = arith.constant 1.000000e+00 : f32
    %381 = vector.broadcast %cst_39 : f32 to vector<3x256xf32>
    %382 = arith.maximumf %381, %380 : vector<3x256xf32>
    %383 = vector.broadcast %cst_40 : f32 to vector<3x256xf32>
    %384 = arith.minimumf %383, %382 : vector<3x256xf32>
    %385 = vector.extract_strided_slice %363 {offsets = [4, 0], sizes = [8, 256], strides = [1, 1]} : vector<16x256xf32> to vector<8x256xf32>
    %cst_41 = arith.constant dense<0xFF800000> : vector<256xf32>
    %386 = vector.multi_reduction <maximumf>, %385, %cst_41 [0] : vector<8x256xf32> to vector<256xf32>
    %387 = vector.shape_cast %386 : vector<256xf32> to vector<1x256xf32>
    %388 = vector.broadcast %387 : vector<1x256xf32> to vector<8x256xf32>
    %389 = arith.subf %385, %388 : vector<8x256xf32>
    %390 = math.exp %389 : vector<8x256xf32>
    %cst_42 = arith.constant dense<0.000000e+00> : vector<256xf32>
    %391 = vector.multi_reduction <add>, %390, %cst_42 [0] : vector<8x256xf32> to vector<256xf32>
    %392 = vector.shape_cast %391 : vector<256xf32> to vector<1x256xf32>
    %393 = vector.broadcast %392 : vector<1x256xf32> to vector<8x256xf32>
    %394 = arith.divf %390, %393 : vector<8x256xf32>
    %cst_43 = arith.constant 0.000000e+00 : f32
    %cst_44 = arith.constant 6.000000e+00 : f32
    %395 = vector.broadcast %cst_43 : f32 to vector<1x256xf32>
    %396 = arith.maximumf %395, %366 : vector<1x256xf32>
    %397 = vector.broadcast %cst_44 : f32 to vector<1x256xf32>
    %398 = arith.minimumf %397, %396 : vector<1x256xf32>
    %cst_45 = arith.constant 0.000000e+00 : f32
    %399 = vector.broadcast %cst_45 : f32 to vector<1x256xf32>
    %400 = arith.cmpf ogt, %371, %399 : vector<1x256xf32>
    %cst_46 = arith.constant 0.00999999977 : f32
    %401 = vector.broadcast %cst_46 : f32 to vector<1x256xf32>
    %402 = arith.cmpf ogt, %375, %401 : vector<1x256xf32>
    %403 = arith.andi %400, %402 : vector<1x256xi1>
    %cst_47 = arith.constant 0.000000e+00 : f32
    %404 = vector.broadcast %cst_47 : f32 to vector<1x256xf32>
    %405 = arith.subf %404, %369 : vector<1x256xf32>
    %406 = math.exp %405 : vector<1x256xf32>
    %cst_48 = arith.constant 1.000000e+00 : f32
    %407 = vector.broadcast %cst_48 : f32 to vector<1x256xf32>
    %408 = arith.subf %407, %406 : vector<1x256xf32>
    %cst_49 = arith.constant 0.000000e+00 : f32
    %409 = vector.broadcast %cst_49 : f32 to vector<1x256xf32>
    %410 = arith.select %403, %408, %409 : vector<1x256xi1>, vector<1x256xf32>
    %c0_50 = arith.constant 0 : index
    %c0_51 = arith.constant 0 : index
    %411 = vector.load %arg6[%c0_50, %c0_51] : memref<16x256xf32, #tpu.memory_space<vmem>>, vector<3x256xf32>
    tpu.vector_store %arg6[%c0_50, %c0_51], %384 {strides = array<i32>} : memref<16x256xf32, #tpu.memory_space<vmem>>, vector<3x256xf32>,
    %c3 = arith.constant 3 : index
    %c0_52 = arith.constant 0 : index
    %412 = vector.load %arg6[%c3, %c0_52] : memref<16x256xf32, #tpu.memory_space<vmem>>, vector<8x256xf32>
    tpu.vector_store %arg6[%c3, %c0_52], %394 {strides = array<i32>} : memref<16x256xf32, #tpu.memory_space<vmem>>, vector<8x256xf32>,
    %c11 = arith.constant 11 : index
    %c0_53 = arith.constant 0 : index
    %413 = vector.load %arg6[%c11, %c0_53] : memref<16x256xf32, #tpu.memory_space<vmem>>, vector<1x256xf32>
    tpu.vector_store %arg6[%c11, %c0_53], %398 {strides = array<i32>} : memref<16x256xf32, #tpu.memory_space<vmem>>, vector<1x256xf32>,
    %c12 = arith.constant 12 : index
    %c0_54 = arith.constant 0 : index
    %414 = vector.load %arg6[%c12, %c0_54] : memref<16x256xf32, #tpu.memory_space<vmem>>, vector<1x256xf32>
    tpu.vector_store %arg6[%c12, %c0_54], %375 {strides = array<i32>} : memref<16x256xf32, #tpu.memory_space<vmem>>, vector<1x256xf32>,
    %c13 = arith.constant 13 : index
    %c0_55 = arith.constant 0 : index
    %415 = vector.load %arg6[%c13, %c0_55] : memref<16x256xf32, #tpu.memory_space<vmem>>, vector<1x256xf32>
    tpu.vector_store %arg6[%c13, %c0_55], %410 {strides = array<i32>} : memref<16x256xf32, #tpu.memory_space<vmem>>, vector<1x256xf32>,
    %cst_56 = arith.constant 0.000000e+00 : f32
    %416 = vector.broadcast %cst_56 : f32 to vector<2x256xf32>
    %c14 = arith.constant 14 : index
    %c0_57 = arith.constant 0 : index
    %417 = vector.load %arg6[%c14, %c0_57] : memref<16x256xf32, #tpu.memory_space<vmem>>, vector<2x256xf32>
    tpu.vector_store %arg6[%c14, %c0_57], %416 {strides = array<i32>} : memref<16x256xf32, #tpu.memory_space<vmem>>, vector<2x256xf32>,
    return
  }
  func.func @transform_0(%arg0: i32) -> (i32, i32) {
    %c0_i32 = arith.constant 0 : i32
    %c0_i32_0 = arith.constant 0 : i32
    return %c0_i32, %arg0 : i32, i32
  }
  func.func @transform_1(%arg0: i32) -> (i32, i32) {
    %c0_i32 = arith.constant 0 : i32
    %c0_i32_0 = arith.constant 0 : i32
    %c0_i32_1 = arith.constant 0 : i32
    return %c0_i32, %c0_i32_0 : i32, i32
  }
  func.func @transform_2(%arg0: i32) -> (i32, i32) {
    %c0_i32 = arith.constant 0 : i32
    %c0_i32_0 = arith.constant 0 : i32
    %c0_i32_1 = arith.constant 0 : i32
    return %c0_i32, %c0_i32_0 : i32, i32
  }
  func.func @transform_3(%arg0: i32) -> (i32, i32) {
    %c0_i32 = arith.constant 0 : i32
    %c0_i32_0 = arith.constant 0 : i32
    %c0_i32_1 = arith.constant 0 : i32
    return %c0_i32, %c0_i32_0 : i32, i32
  }
  func.func @transform_4(%arg0: i32) -> (i32, i32) {
    %c0_i32 = arith.constant 0 : i32
    %c0_i32_0 = arith.constant 0 : i32
    %c0_i32_1 = arith.constant 0 : i32
    return %c0_i32, %c0_i32_0 : i32, i32
  }
  func.func @transform_5(%arg0: i32) -> (i32, i32) {
    %c0_i32 = arith.constant 0 : i32
    %c0_i32_0 = arith.constant 0 : i32
    return %c0_i32, %arg0 : i32, i32
  }
}

</mosaic_0001>

<bundles_post_ra>
// kernel: semantic_nerf_forward.1
= control target key start
LH: loop header
LB: loop body
LE: loop exit
PB: predicated region body
PF: predicated region fallthrough
CT: control target
= control target key end

     0   :  { %s5509_s18 = smov 0   ;;  %s5511_s19 = smov 0   ;;  %s9038_s0 = inlined_call_operand.vmem [shape: f32[16,8192], index: 0, kind: input, shape index: {}]   ;;  %s9039_s1 = inlined_call_operand.vmem [shape: bf16[32,16], index: 1, kind: input, shape index: {}]   ;;  %s9040_s2 = inlined_call_operand.vmem [shape: f32[32,1], index: 2, kind: input, shape index: {}]   ;;  %s9041_s3 = inlined_call_operand.vmem [shape: bf16[16,32], index: 3, kind: input, shape index: {}]   ;;  %s9042_s4 = inlined_call_operand.vmem [shape: f32[16,1], index: 4, kind: input, shape index: {}]   ;;  %s9043_s5 = inlined_call_operand.vmem [shape: f32[16,512], index: 5, kind: output, shape index: {}]  }
   0x1   :  { %s5513_s20 = smov 0  }
   0x2 LB: > { %s4720_s21 = sadd.s32 4294967295, %s5474_s20   ;;  %s5526_s22 = sadd.s32 1, %s5474_s20   ;;  %s5474_s20 = sphi %s5513_s20, %s9491_s20   ;;  %s5470_s19 = sphi %s5511_s19, %s9490_s19   ;;  %s5466_s18 = sphi %s5509_s18, %s9489_s18  }
   0x3   : > { %s19_s23 = ssub.s32 %s5474_s20, %s5526_s22  ;;  %s22_s24 = sadd.s32 1, %s5470_s19 }
   0x4   : > { %p20_p0 = scmp.eq.s32.totalorder %s19_s23, 0  ;;  %p29_p1 = scmp.ne.s32.totalorder %s5470_s19, %s5466_s18 }
   0x5   : > { %p30_p2 = scmp.eq.s32.totalorder %s5474_s20, 0  ;;  %p143_p3 = scmp.eq.s32.totalorder %s4720_s21, 1 }
   0x6   : > { %s5537_s25 = scalar_select %p20_p0, %s5470_s19, %s22_s24  }
   0x7   : > { %p31_p4 = por %p30_p2, %p29_p1  ;;  %p5539_p5 = por %p143_p3, %p29_p1 }
   0x8   : > { %p4723_p6 = scmp.ge.s32.totalorder %s5474_s20, 2 }
   0xa   : > { %177 = sbr.rel (%p4723_p6) target bundleno = 83 (0x53), region = 32 }
   0xf   : > { %180 = sbr.rel (!%p31_p4) target bundleno = 83 (0x53), region = 36  ;;  %s182_s27 = sand.u32 (%p31_p4), 1, %s5470_s19  }
  0x10   : > { %s4910_s28 = sshll.u32 (%p31_p4), %s5474_s20, 8  ;;  %s4724_s29 = sshll.u32 (%p31_p4), %s182_s27, 9 }
  0x11   : > { %s5549_s7 = scalar_lea.vmem (%p31_p4), %s9038_s0, %s4910_s28  ;;  %s5554_s8 = scalar_lea.vmem (%p31_p4), [#allocation2], %s4724_s29 }
  0x12   : > { %v200_v0 = vld [vmem:[%s5549_s7] sm:$0xff] (%p31_p4)  ;;  %v202_v1 = vld [vmem:[%s5549_s7 + $0x8] sm:$0xff] (%p31_p4)  ;;  %v204_v2 = vld [vmem:[%s5549_s7 + $0x10] sm:$0xff] (%p31_p4) }
  0x13   : > { %201 = vst [vmem:[%s5554_s8] sm:$0xff] (%p31_p4), %v200_v0  ;;  %v206_v3 = vld [vmem:[%s5549_s7 + $0x18] sm:$0xff] (%p31_p4)  ;;  %v208_v4 = vld [vmem:[%s5549_s7 + $0x20] sm:$0xff] (%p31_p4)  ;;  %v210_v5 = vld [vmem:[%s5549_s7 + $0x28] sm:$0xff] (%p31_p4) }
  0x14   : > { %203 = vst [vmem:[%s5554_s8 + $0x8] sm:$0xff] %v202_v1  ;;  %v212_v6 = vld [vmem:[%s5549_s7 + $0x30] sm:$0xff]  ;;  %v214_v7 = vld [vmem:[%s5549_s7 + $0x38] sm:$0xff]  ;;  %v216_v8 = vld [vmem:[%s5549_s7 + $0x40] sm:$0xff] }
  0x15   : > { %205 = vst [vmem:[%s5554_s8 + $0x10] sm:$0xff] %v204_v2  ;;  %v218_v9 = vld [vmem:[%s5549_s7 + $0x48] sm:$0xff]  ;;  %v220_v10 = vld [vmem:[%s5549_s7 + $0x50] sm:$0xff]  ;;  %v222_v11 = vld [vmem:[%s5549_s7 + $0x58] sm:$0xff] }
  0x16   : > { %207 = vst [vmem:[%s5554_s8 + $0x18] sm:$0xff] %v206_v3  ;;  %v224_v12 = vld [vmem:[%s5549_s7 + $0x60] sm:$0xff]  ;;  %v226_v13 = vld [vmem:[%s5549_s7 + $0x68] sm:$0xff]  ;;  %v228_v14 = vld [vmem:[%s5549_s7 + $0x70] sm:$0xff] }
  0x17   : > { %209 = vst [vmem:[%s5554_s8 + $0x20] sm:$0xff] %v208_v4  ;;  %v230_v15 = vld [vmem:[%s5549_s7 + $0x78] sm:$0xff]  ;;  %v232_v16 = vld [vmem:[%s5549_s7 + $0x80] sm:$0xff]  ;;  %v234_v17 = vld [vmem:[%s5549_s7 + $0x88] sm:$0xff] }
  0x18   : > { %211 = vst [vmem:[%s5554_s8 + $0x28] sm:$0xff] %v210_v5  ;;  %v236_v18 = vld [vmem:[%s5549_s7 + $0x90] sm:$0xff]  ;;  %v238_v19 = vld [vmem:[%s5549_s7 + $0x98] sm:$0xff]  ;;  %v240_v20 = vld [vmem:[%s5549_s7 + $0xa0] sm:$0xff] }
  0x19   : > { %213 = vst [vmem:[%s5554_s8 + $0x30] sm:$0xff] %v212_v6  ;;  %v242_v21 = vld [vmem:[%s5549_s7 + $0xa8] sm:$0xff]  ;;  %v244_v22 = vld [vmem:[%s5549_s7 + $0xb0] sm:$0xff]  ;;  %v246_v23 = vld [vmem:[%s5549_s7 + $0xb8] sm:$0xff] }
  0x1a   : > { %215 = vst [vmem:[%s5554_s8 + $0x38] sm:$0xff] %v214_v7  ;;  %v248_v24 = vld [vmem:[%s5549_s7 + $0xc0] sm:$0xff]  ;;  %v250_v25 = vld [vmem:[%s5549_s7 + $0xc8] sm:$0xff]  ;;  %v252_v26 = vld [vmem:[%s5549_s7 + $0xd0] sm:$0xff] }
  0x1b   : > { %217 = vst [vmem:[%s5554_s8 + $0x40] sm:$0xff] %v216_v8  ;;  %v254_v27 = vld [vmem:[%s5549_s7 + $0xd8] sm:$0xff]  ;;  %v256_v28 = vld [vmem:[%s5549_s7 + $0xe0] sm:$0xff]  ;;  %v258_v29 = vld [vmem:[%s5549_s7 + $0xe8] sm:$0xff] }
  0x1c   : > { %219 = vst [vmem:[%s5554_s8 + $0x48] sm:$0xff] %v218_v9  ;;  %v260_v30 = vld [vmem:[%s5549_s7 + $0xf0] sm:$0xff]  ;;  %v262_v31 = vld [vmem:[%s5549_s7 + $0xf8] sm:$0xff]  ;;  %v264_v32 = vld [vmem:[%s5549_s7 + $0x200] sm:$0xff] }
  0x1d   : > { %221 = vst [vmem:[%s5554_s8 + $0x50] sm:$0xff] %v220_v10  ;;  %v266_v33 = vld [vmem:[%s5549_s7 + $0x208] sm:$0xff]  ;;  %v268_v34 = vld [vmem:[%s5549_s7 + $0x210] sm:$0xff]  ;;  %v270_v35 = vld [vmem:[%s5549_s7 + $0x218] sm:$0xff] }
  0x1e   : > { %223 = vst [vmem:[%s5554_s8 + $0x58] sm:$0xff] %v222_v11  ;;  %v272_v36 = vld [vmem:[%s5549_s7 + $0x220] sm:$0xff]  ;;  %v274_v37 = vld [vmem:[%s5549_s7 + $0x228] sm:$0xff]  ;;  %v276_v38 = vld [vmem:[%s5549_s7 + $0x230] sm:$0xff] }
  0x1f   : > { %225 = vst [vmem:[%s5554_s8 + $0x60] sm:$0xff] %v224_v12  ;;  %v278_v39 = vld [vmem:[%s5549_s7 + $0x238] sm:$0xff]  ;;  %v280_v40 = vld [vmem:[%s5549_s7 + $0x240] sm:$0xff]  ;;  %v282_v41 = vld [vmem:[%s5549_s7 + $0x248] sm:$0xff] }
  0x20   : > { %227 = vst [vmem:[%s5554_s8 + $0x68] sm:$0xff] %v226_v13  ;;  %v284_v42 = vld [vmem:[%s5549_s7 + $0x250] sm:$0xff]  ;;  %v286_v43 = vld [vmem:[%s5549_s7 + $0x258] sm:$0xff]  ;;  %v288_v44 = vld [vmem:[%s5549_s7 + $0x260] sm:$0xff] }
  0x21   : > { %229 = vst [vmem:[%s5554_s8 + $0x70] sm:$0xff] %v228_v14  ;;  %v290_v45 = vld [vmem:[%s5549_s7 + $0x268] sm:$0xff]  ;;  %v292_v46 = vld [vmem:[%s5549_s7 + $0x270] sm:$0xff]  ;;  %v294_v47 = vld [vmem:[%s5549_s7 + $0x278] sm:$0xff] }
  0x22   : > { %231 = vst [vmem:[%s5554_s8 + $0x78] sm:$0xff] %v230_v15  ;;  %v296_v48 = vld [vmem:[%s5549_s7 + $0x280] sm:$0xff]  ;;  %v298_v49 = vld [vmem:[%s5549_s7 + $0x288] sm:$0xff]  ;;  %v300_v50 = vld [vmem:[%s5549_s7 + $0x290] sm:$0xff] }
  0x23   : > { %233 = vst [vmem:[%s5554_s8 + $0x80] sm:$0xff] %v232_v16  ;;  %v302_v51 = vld [vmem:[%s5549_s7 + $0x298] sm:$0xff]  ;;  %v304_v52 = vld [vmem:[%s5549_s7 + $0x2a0] sm:$0xff]  ;;  %v306_v53 = vld [vmem:[%s5549_s7 + $0x2a8] sm:$0xff] }
  0x24   : > { %235 = vst [vmem:[%s5554_s8 + $0x88] sm:$0xff] %v234_v17  ;;  %v308_v54 = vld [vmem:[%s5549_s7 + $0x2b0] sm:$0xff]  ;;  %v310_v55 = vld [vmem:[%s5549_s7 + $0x2b8] sm:$0xff]  ;;  %v312_v56 = vld [vmem:[%s5549_s7 + $0x2c0] sm:$0xff] }
  0x25   : > { %237 = vst [vmem:[%s5554_s8 + $0x90] sm:$0xff] %v236_v18  ;;  %v314_v57 = vld [vmem:[%s5549_s7 + $0x2c8] sm:$0xff]  ;;  %v316_v58 = vld [vmem:[%s5549_s7 + $0x2d0] sm:$0xff]  ;;  %v318_v59 = vld [vmem:[%s5549_s7 + $0x2d8] sm:$0xff] }
  0x26   : > { %239 = vst [vmem:[%s5554_s8 + $0x98] sm:$0xff] %v238_v19  ;;  %v320_v60 = vld [vmem:[%s5549_s7 + $0x2e0] sm:$0xff]  ;;  %v322_v61 = vld [vmem:[%s5549_s7 + $0x2e8] sm:$0xff]  ;;  %v324_v62 = vld [vmem:[%s5549_s7 + $0x2f0] sm:$0xff] }
  0x27   : > { %241 = vst [vmem:[%s5554_s8 + $0xa0] sm:$0xff] %v240_v20  ;;  %v326_v63 = vld [vmem:[%s5549_s7 + $0x2f8] sm:$0xff] }
  0x28   : > { %243 = vst [vmem:[%s5554_s8 + $0xa8] sm:$0xff] %v242_v21 }
  0x29   : > { %245 = vst [vmem:[%s5554_s8 + $0xb0] sm:$0xff] %v244_v22 }
  0x2a   : > { %247 = vst [vmem:[%s5554_s8 + $0xb8] sm:$0xff] %v246_v23 }
  0x2b   : > { %249 = vst [vmem:[%s5554_s8 + $0xc0] sm:$0xff] %v248_v24 }
  0x2c   : > { %251 = vst [vmem:[%s5554_s8 + $0xc8] sm:$0xff] %v250_v25 }
  0x2d   : > { %253 = vst [vmem:[%s5554_s8 + $0xd0] sm:$0xff] %v252_v26 }
  0x2e   : > { %255 = vst [vmem:[%s5554_s8 + $0xd8] sm:$0xff] %v254_v27 }
  0x2f   : > { %257 = vst [vmem:[%s5554_s8 + $0xe0] sm:$0xff] %v256_v28 }
  0x30   : > { %259 = vst [vmem:[%s5554_s8 + $0xe8] sm:$0xff] %v258_v29 }
  0x31   : > { %261 = vst [vmem:[%s5554_s8 + $0xf0] sm:$0xff] %v260_v30 }
  0x32   : > { %263 = vst [vmem:[%s5554_s8 + $0xf8] sm:$0xff] %v262_v31 }
  0x33   : > { %265 = vst [vmem:[%s5554_s8 + $0x100] sm:$0xff] %v264_v32 }
  0x34   : > { %267 = vst [vmem:[%s5554_s8 + $0x108] sm:$0xff] %v266_v33 }
  0x35   : > { %269 = vst [vmem:[%s5554_s8 + $0x110] sm:$0xff] %v268_v34 }
  0x36   : > { %271 = vst [vmem:[%s5554_s8 + $0x118] sm:$0xff] %v270_v35 }
  0x37   : > { %273 = vst [vmem:[%s5554_s8 + $0x120] sm:$0xff] %v272_v36 }
  0x38   : > { %275 = vst [vmem:[%s5554_s8 + $0x128] sm:$0xff] %v274_v37 }
  0x39   : > { %277 = vst [vmem:[%s5554_s8 + $0x130] sm:$0xff] %v276_v38 }
  0x3a   : > { %279 = vst [vmem:[%s5554_s8 + $0x138] sm:$0xff] %v278_v39 }
  0x3b   : > { %281 = vst [vmem:[%s5554_s8 + $0x140] sm:$0xff] %v280_v40 }
  0x3c   : > { %283 = vst [vmem:[%s5554_s8 + $0x148] sm:$0xff] %v282_v41 }
  0x3d   : > { %285 = vst [vmem:[%s5554_s8 + $0x150] sm:$0xff] %v284_v42 }
  0x3e   : > { %287 = vst [vmem:[%s5554_s8 + $0x158] sm:$0xff] %v286_v43 }
  0x3f   : > { %289 = vst [vmem:[%s5554_s8 + $0x160] sm:$0xff] %v288_v44 }
  0x40   : > { %291 = vst [vmem:[%s5554_s8 + $0x168] sm:$0xff] %v290_v45 }
  0x41   : > { %293 = vst [vmem:[%s5554_s8 + $0x170] sm:$0xff] %v292_v46 }
  0x42   : > { %295 = vst [vmem:[%s5554_s8 + $0x178] sm:$0xff] %v294_v47 }
  0x43   : > { %297 = vst [vmem:[%s5554_s8 + $0x180] sm:$0xff] %v296_v48 }
  0x44   : > { %299 = vst [vmem:[%s5554_s8 + $0x188] sm:$0xff] %v298_v49 }
  0x45   : > { %301 = vst [vmem:[%s5554_s8 + $0x190] sm:$0xff] %v300_v50 }
  0x46   : > { %303 = vst [vmem:[%s5554_s8 + $0x198] sm:$0xff] %v302_v51 }
  0x47   : > { %305 = vst [vmem:[%s5554_s8 + $0x1a0] sm:$0xff] %v304_v52 }
  0x48   : > { %307 = vst [vmem:[%s5554_s8 + $0x1a8] sm:$0xff] %v306_v53 }
  0x49   : > { %309 = vst [vmem:[%s5554_s8 + $0x1b0] sm:$0xff] %v308_v54 }
  0x4a   : > { %311 = vst [vmem:[%s5554_s8 + $0x1b8] sm:$0xff] %v310_v55 }
  0x4b   : > { %313 = vst [vmem:[%s5554_s8 + $0x1c0] sm:$0xff] %v312_v56 }
  0x4c   : > { %315 = vst [vmem:[%s5554_s8 + $0x1c8] sm:$0xff] %v314_v57 }
  0x4d   : > { %317 = vst [vmem:[%s5554_s8 + $0x1d0] sm:$0xff] %v316_v58 }
  0x4e   : > { %319 = vst [vmem:[%s5554_s8 + $0x1d8] sm:$0xff] %v318_v59 }
  0x4f   : > { %321 = vst [vmem:[%s5554_s8 + $0x1e0] sm:$0xff] %v320_v60 }
  0x50   : > { %323 = vst [vmem:[%s5554_s8 + $0x1e8] sm:$0xff] %v322_v61 }
  0x51   : > { %325 = vst [vmem:[%s5554_s8 + $0x1f0] sm:$0xff] %v324_v62 }
  0x52   : > { %327 = vst [vmem:[%s5554_s8 + $0x1f8] sm:$0xff] %v326_v63 }
  0x53 PF: > { %p4727_p7 = scmp.ge.s32.totalorder %s5474_s20, 1  ;;  %p332_p8 = scmp.lt.s32.totalorder %s5474_s20, 3 }
  0x55   : > { %p333_p9 = pnand %p4727_p7, %p332_p8 }
  0x57   : > { %336 = sbr.rel (%p333_p9) target bundleno = 1220 (0x4c4), region = 59 }
  0x5c   : > { %s339_s9 = sand.u32 1, %s5466_s18   ;;  %v468_v0 = vld [vmem:[%s9040_s2] sm:$0xff]  ;;  %v5476_v1 = vmov 0   ;;  %v470_v2 = vld [vmem:[%s9040_s2 + $0x10] sm:$0xff]  ;;  %vm502_vm0 = vcmask 130048   ;;  %v469_v27 = vld [vmem:[%s9040_s2 + $0x8] sm:$0xff] }
  0x5d   : > { %s4728_s12 = sshll.u32 %s339_s9, 9  ;;  %4943 = vset.pattern.permute.xlu1 %v5476_v1  ;;  %4942 = vset.pattern.permute.xlu0 %v5476_v1  ;;  %v5700_v6 = vld [vmem:[%s9039_s1] sm:$0xff]  ;;  %v471_v29 = vld [vmem:[%s9040_s2 + $0x18] sm:$0xff]  ;;  %v5736_v36 = vld [vmem:[%s9039_s1 + $0x8] sm:$0xff]  ;;  %vm1328_vm1 = vcmask 261120   ;;  %vm2708_vm10 = vcmask 1047556  }
  0x5e   : > { %474 = vperm.xlu1 %4943, %v468_v0   ;;  %484 = vperm.xlu0 %4942, %v470_v2   ;;  %s5692_s15 = scalar_lea.vmem [#allocation2], %s4728_s12  ;;  %s4729_s13 = sshll.u32 %s339_s9, 5 }
  0x5f   : > { %v368_v3 = vld [vmem:[%s5692_s15] sm:$0xff]  ;;  %v369_v5 = vld [vmem:[%s5692_s15 + $0x8] sm:$0xff]  ;;  %4944 = vset.pattern.permute.xlu2 %v5476_v1  ;;  %v370_v9 = vld [vmem:[%s5692_s15 + $0x10] sm:$0xff]  ;;  %s7898_s18 = scalar_lea.vmem [#allocation3], %s4729_s13  ;;  %s4914_s9 = sshll.u32 (%p5539_p5), %s4720_s21, 4 }
  0x60   : > { %v400_v4 = vld [vmem:[%s5692_s15 + $0x100] sm:$0xff]  ;;  %v401_v8 = vld [vmem:[%s5692_s15 + $0x108] sm:$0xff]  ;;  %v402_v10 = vld [vmem:[%s5692_s15 + $0x110] sm:$0xff]  ;;  %s4640_s16 = scalar_lea.vmem (%p5539_p5), %s9043_s5, %s4914_s9 }
  0x61   : > { %v432_v7 = vpack.c.bf16 %v400_v4, %v368_v3  ;;  %v433_v11 = vpack.c.bf16 %v401_v8, %v369_v5  ;;  %v434_v12 = vpack.c.bf16 %v402_v10, %v370_v9  ;;  %v371_v13 = vld [vmem:[%s5692_s15 + $0x18] sm:$0xff]  ;;  %v372_v15 = vld [vmem:[%s5692_s15 + $0x20] sm:$0xff]  ;;  %v373_v18 = vld [vmem:[%s5692_s15 + $0x28] sm:$0xff] }
  0x62   : > { %v403_v14 = vld [vmem:[%s5692_s15 + $0x118] sm:$0xff]  ;;  %v404_v17 = vld [vmem:[%s5692_s15 + $0x120] sm:$0xff]  ;;  %v405_v19 = vld [vmem:[%s5692_s15 + $0x128] sm:$0xff] }
  0x63   : > { %516 = vmatpush.bf16.msra.mxu0 %v432_v7  ;;  %v435_v16 = vpack.c.bf16 %v403_v14, %v371_v13  ;;  %535 = vmatpush.bf16.msra.mxu1 %v433_v11  ;;  %v436_v20 = vpack.c.bf16 %v404_v17, %v372_v15  ;;  %v437_v21 = vpack.c.bf16 %v405_v19, %v373_v18  ;;  %v374_v22 = vld [vmem:[%s5692_s15 + $0x30] sm:$0xff]  ;;  %v375_v24 = vld [vmem:[%s5692_s15 + $0x38] sm:$0xff]  ;;  %v376_v30 = vld [vmem:[%s5692_s15 + $0x40] sm:$0xff] }
  0x64   : > { %554 = vmatpush.bf16.msra.mxu2 %v434_v12  ;;  %v406_v23 = vld [vmem:[%s5692_s15 + $0x130] sm:$0xff]  ;;  %v407_v26 = vld [vmem:[%s5692_s15 + $0x138] sm:$0xff]  ;;  %v408_v31 = vld [vmem:[%s5692_s15 + $0x140] sm:$0xff] }
  0x65   : > { %573 = vmatpush.bf16.msra.mxu3 %v435_v16  ;;  %v438_v25 = vpack.c.bf16 %v406_v23, %v374_v22  ;;  %v439_v28 = vpack.c.bf16 %v407_v26, %v375_v24  ;;  %v440_v32 = vpack.c.bf16 %v408_v31, %v376_v30  ;;  %v377_v33 = vld [vmem:[%s5692_s15 + $0x48] sm:$0xff]  ;;  %v378_v37 = vld [vmem:[%s5692_s15 + $0x50] sm:$0xff]  ;;  %v379_v39 = vld [vmem:[%s5692_s15 + $0x58] sm:$0xff] }
  0x66   : > { %4738 = vmatmul.msk.bf16.vlgmr.msra.gmra.mxu0 %vm502_vm0, %v5700_v6  ;;  %4740 = vmatmul.msk.bf16.vlgmr.msra.gmra.mxu1 %vm502_vm0, %v5700_v6  ;;  %v409_v34 = vld [vmem:[%s5692_s15 + $0x148] sm:$0xff]  ;;  %v410_v38 = vld [vmem:[%s5692_s15 + $0x150] sm:$0xff]  ;;  %v411_v41 = vld [vmem:[%s5692_s15 + $0x158] sm:$0xff] }
  0x67   : > { %611 = vmatpush.bf16.msrb.mxu1 %v437_v21  ;;  %4742 = vmatmul.msk.bf16.vlgmr.msra.gmra.mxu2 %vm502_vm0, %v5700_v6  ;;  %v441_v35 = vpack.c.bf16 %v409_v34, %v377_v33  ;;  %v442_v40 = vpack.c.bf16 %v410_v38, %v378_v37  ;;  %v443_v42 = vpack.c.bf16 %v411_v41, %v379_v39  ;;  %v380_v43 = vld [vmem:[%s5692_s15 + $0x60] sm:$0xff]  ;;  %v381_v45 = vld [vmem:[%s5692_s15 + $0x68] sm:$0xff]  ;;  %v382_v49 = vld [vmem:[%s5692_s15 + $0x70] sm:$0xff] }
  0x68   : > { %4744 = vmatmul.msk.bf16.vlgmr.msra.gmra.mxu3 %vm502_vm0, %v5700_v6  ;;  %592 = vmatpush.bf16.msrb.mxu0 %v436_v20  ;;  %v412_v44 = vld [vmem:[%s5692_s15 + $0x160] sm:$0xff]  ;;  %v413_v47 = vld [vmem:[%s5692_s15 + $0x168] sm:$0xff]  ;;  %v414_v50 = vld [vmem:[%s5692_s15 + $0x170] sm:$0xff] }
  0x69   : > { %479 = vperm.xlu1 %4943, %v469_v27   ;;  %630 = vmatpush.bf16.msrb.mxu2 %v438_v25  ;;  %v444_v46 = vpack.c.bf16 %v412_v44, %v380_v43  ;;  %v445_v48 = vpack.c.bf16 %v413_v47, %v381_v45  ;;  %v383_v51 = vld [vmem:[%s5692_s15 + $0x78] sm:$0xff]  ;;  %v446_v52 = vpack.c.bf16 %v414_v50, %v382_v49  ;;  %v384_v55 = vld [vmem:[%s5692_s15 + $0x80] sm:$0xff]  ;;  %v385_v57 = vld [vmem:[%s5692_s15 + $0x88] sm:$0xff] }
  0x6a   : > { %649 = vmatpush.bf16.msrb.mxu3 %v439_v28  ;;  %489 = vperm.xlu0 %4942, %v471_v29   ;;  %v415_v53 = vld [vmem:[%s5692_s15 + $0x178] sm:$0xff]  ;;  %v416_v56 = vld [vmem:[%s5692_s15 + $0x180] sm:$0xff]  ;;  %v417_v59 = vld [vmem:[%s5692_s15 + $0x188] sm:$0xff] }
  0x6b   : > { %687 = vmatpush.bf16.msra.mxu1 %v441_v35  ;;  %v447_v54 = vpack.c.bf16 %v415_v53, %v383_v51  ;;  %v448_v58 = vpack.c.bf16 %v416_v56, %v384_v55  ;;  %v449_v60 = vpack.c.bf16 %v417_v59, %v385_v57  ;;  %v386_v61 = vld [vmem:[%s5692_s15 + $0x90] sm:$0xff]  ;;  %v387_v63 = vld [vmem:[%s5692_s15 + $0x98] sm:$0xff]  ;;  %v388_v3 = vld [vmem:[%s5692_s15 + $0xa0] sm:$0xff] }
  0x6c   : > { %668 = vmatpush.bf16.msra.mxu0 %v440_v32  ;;  %v418_v62 = vld [vmem:[%s5692_s15 + $0x190] sm:$0xff]  ;;  %v419_v1 = vld [vmem:[%s5692_s15 + $0x198] sm:$0xff]  ;;  %v420_v4 = vld [vmem:[%s5692_s15 + $0x1a0] sm:$0xff] }
  0x6d   : > { %706 = vmatpush.bf16.msra.mxu2 %v442_v40  ;;  %v450_v0 = vpack.c.bf16 %v418_v62, %v386_v61  ;;  %v451_v2 = vpack.c.bf16 %v419_v1, %v387_v63  ;;  %v389_v5 = vld [vmem:[%s5692_s15 + $0xa8] sm:$0xff]  ;;  %v452_v7 = vpack.c.bf16 %v420_v4, %v388_v3  ;;  %v390_v10 = vld [vmem:[%s5692_s15 + $0xb0] sm:$0xff]  ;;  %v391_v12 = vld [vmem:[%s5692_s15 + $0xb8] sm:$0xff] }
  0x6e   : > { %725 = vmatpush.bf16.msra.mxu3 %v443_v42  ;;  %v421_v8 = vld [vmem:[%s5692_s15 + $0x1a8] sm:$0xff]  ;;  %v422_v11 = vld [vmem:[%s5692_s15 + $0x1b0] sm:$0xff]  ;;  %v423_v14 = vld [vmem:[%s5692_s15 + $0x1b8] sm:$0xff] }
  0x6f   : > { %v453_v9 = vpack.c.bf16 %v421_v8, %v389_v5  ;;  %v454_v13 = vpack.c.bf16 %v422_v11, %v390_v10  ;;  %v455_v15 = vpack.c.bf16 %v423_v14, %v391_v12  ;;  %v392_v22 = vld [vmem:[%s5692_s15 + $0xc0] sm:$0xff]  ;;  %v393_v24 = vld [vmem:[%s5692_s15 + $0xc8] sm:$0xff]  ;;  %v394_v37 = vld [vmem:[%s5692_s15 + $0xd0] sm:$0xff] }
  0x70   : > { %v424_v23 = vld [vmem:[%s5692_s15 + $0x1c0] sm:$0xff]  ;;  %v425_v26 = vld [vmem:[%s5692_s15 + $0x1c8] sm:$0xff]  ;;  %v426_v38 = vld [vmem:[%s5692_s15 + $0x1d0] sm:$0xff] }
  0x71   : > { %v456_v25 = vpack.c.bf16 %v424_v23, %v392_v22  ;;  %v457_v27 = vpack.c.bf16 %v425_v26, %v393_v24  ;;  %v395_v39 = vld [vmem:[%s5692_s15 + $0xd8] sm:$0xff]  ;;  %v458_v40 = vpack.c.bf16 %v426_v38, %v394_v37  ;;  %v396_v47 = vld [vmem:[%s5692_s15 + $0xe0] sm:$0xff]  ;;  %v397_v49 = vld [vmem:[%s5692_s15 + $0xe8] sm:$0xff] }
  0x72   : > { %v427_v41 = vld [vmem:[%s5692_s15 + $0x1d8] sm:$0xff]  ;;  %v429_v51 = vld [vmem:[%s5692_s15 + $0x1e8] sm:$0xff]  ;;  %v430_v53 = vld [vmem:[%s5692_s15 + $0x1f0] sm:$0xff] }
  0x73   : > { %v459_v42 = vpack.c.bf16 %v427_v41, %v395_v39  ;;  %v399_v56 = vld [vmem:[%s5692_s15 + $0xf8] sm:$0xff] }
  0x74   : > { %v431_v57 = vld [vmem:[%s5692_s15 + $0x1f8] sm:$0xff] }
  0x76   : > { %4739 = vmatmul.msk.bf16.gmra.mxu0 %vm502_vm0, %v5736_v36  ;;  %4741 = vmatmul.msk.bf16.gmra.mxu1 %vm502_vm0, %v5736_v36 }
  0x77   : > { %4743 = vmatmul.msk.bf16.gmra.mxu2 %vm502_vm0, %v5736_v36 }
  0x78   : > { %4745 = vmatmul.msk.bf16.gmra.mxu3 %vm502_vm0, %v5736_v36 }
  0x86   : > { %4746 = vmatmul.msk.bf16.vlgmr.msrb.gmra.mxu0 %vm502_vm0, %v5700_v6  ;;  %4748 = vmatmul.msk.bf16.vlgmr.msrb.gmra.mxu1 %vm502_vm0, %v5700_v6 }
  0x87   : > { %4750 = vmatmul.msk.bf16.vlgmr.msrb.gmra.mxu2 %vm502_vm0, %v5700_v6  ;;  %744 = vmatpush.bf16.msrb.mxu0 %v444_v46 }
  0x88   : > { %4752 = vmatmul.msk.bf16.vlgmr.msrb.gmra.mxu3 %vm502_vm0, %v5700_v6  ;;  %763 = vmatpush.bf16.msrb.mxu1 %v445_v48  ;;  %v428_v48 = vld [vmem:[%s5692_s15 + $0x1e0] sm:$0xff] }
  0x89   : > { %782 = vmatpush.bf16.msrb.mxu2 %v446_v52  ;;  %801 = vmatpush.bf16.msrb.mxu3 %v447_v54  ;;  %v460_v50 = vpack.c.bf16 %v428_v48, %v396_v47  ;;  %v398_v52 = vld [vmem:[%s5692_s15 + $0xf0] sm:$0xff]  ;;  %v461_v54 = vpack.c.bf16 %v429_v51, %v397_v49 }
  0x8a   : > { %v462_v55 = vpack.c.bf16 %v430_v53, %v398_v52 }
  0x96   : > { %4747 = vmatmul.msk.bf16.gmra.mxu0 %vm502_vm0, %v5736_v36  ;;  %4749 = vmatmul.msk.bf16.gmra.mxu1 %vm502_vm0, %v5736_v36 }
  0x97   : > { %4751 = vmatmul.msk.bf16.gmra.mxu2 %vm502_vm0, %v5736_v36 }
  0x98   : > { %4753 = vmatmul.msk.bf16.gmra.mxu3 %vm502_vm0, %v5736_v36 }
  0xa6   : > { %4754 = vmatmul.msk.bf16.vlgmr.msra.gmra.mxu0 %vm502_vm0, %v5700_v6  ;;  %4756 = vmatmul.msk.bf16.vlgmr.msra.gmra.mxu1 %vm502_vm0, %v5700_v6 }
  0xa7   : > { %4758 = vmatmul.msk.bf16.vlgmr.msra.gmra.mxu2 %vm502_vm0, %v5700_v6  ;;  %820 = vmatpush.bf16.msra.mxu0 %v448_v58  ;;  %v463_v58 = vpack.c.bf16 %v431_v57, %v399_v56 }
  0xa8   : > { %4760 = vmatmul.msk.bf16.vlgmr.msra.gmra.mxu3 %vm502_vm0, %v5700_v6  ;;  %839 = vmatpush.bf16.msra.mxu1 %v449_v60 }
  0xa9   : > { %858 = vmatpush.bf16.msra.mxu2 %v450_v0  ;;  %877 = vmatpush.bf16.msra.mxu3 %v451_v2 }
  0xb6   : > { %4755 = vmatmul.msk.bf16.gmra.mxu0 %vm502_vm0, %v5736_v36  ;;  %4757 = vmatmul.msk.bf16.gmra.mxu1 %vm502_vm0, %v5736_v36 }
  0xb7   : > { %4759 = vmatmul.msk.bf16.gmra.mxu2 %vm502_vm0, %v5736_v36 }
  0xb8   : > { %4761 = vmatmul.msk.bf16.gmra.mxu3 %vm502_vm0, %v5736_v36 }
  0xc6   : > { %4762 = vmatmul.msk.bf16.vlgmr.msrb.gmra.mxu0 %vm502_vm0, %v5700_v6  ;;  %4764 = vmatmul.msk.bf16.vlgmr.msrb.gmra.mxu1 %vm502_vm0, %v5700_v6 }
  0xc7   : > { %4766 = vmatmul.msk.bf16.vlgmr.msrb.gmra.mxu2 %vm502_vm0, %v5700_v6  ;;  %896 = vmatpush.bf16.msrb.mxu0 %v452_v7 }
  0xc8   : > { %4768 = vmatmul.msk.bf16.vlgmr.msrb.gmra.mxu3 %vm502_vm0, %v5700_v6  ;;  %915 = vmatpush.bf16.msrb.mxu1 %v453_v9 }
  0xc9   : > { %934 = vmatpush.bf16.msrb.mxu2 %v454_v13  ;;  %953 = vmatpush.bf16.msrb.mxu3 %v455_v15 }
  0xd0   : > { %v5894_v63 = vpop.permute.xlu0 %484  ;;  %v5904_v4 = vpop.permute.xlu1 %474 }
  0xd6   : > { %4763 = vmatmul.msk.bf16.gmra.mxu0 %vm502_vm0, %v5736_v36  ;;  %4765 = vmatmul.msk.bf16.gmra.mxu1 %vm502_vm0, %v5736_v36 }
  0xd7   : > { %4767 = vmatmul.msk.bf16.gmra.mxu2 %vm502_vm0, %v5736_v36 }
  0xd8   : > { %4769 = vmatmul.msk.bf16.gmra.mxu3 %vm502_vm0, %v5736_v36 }
  0xdb   : > { %v5925_v12 = vpop.permute.xlu1 %479 }
  0xdc   : > { %v5914_v5 = vpop.permute.xlu0 %489 }
  0xe3   : > { %v5822_v16 = vpop.f32.mrf.mxu0  ;;  %v5824_v17 = vpop.f32.mrf.mxu1 }
  0xe6   : > { %4770 = vmatmul.msk.bf16.vlgmr.msra.gmra.mxu0 %vm502_vm0, %v5700_v6  ;;  %4772 = vmatmul.msk.bf16.vlgmr.msra.gmra.mxu1 %vm502_vm0, %v5700_v6 }
  0xe7   : > { %4774 = vmatmul.msk.bf16.vlgmr.msra.gmra.mxu2 %vm502_vm0, %v5700_v6  ;;  %972 = vmatpush.bf16.msra.mxu0 %v456_v25  ;;  %v519_v25 = vadd.f32 %v5822_v16, %v5904_v4 }
  0xe8   : > { %4776 = vmatmul.msk.bf16.vlgmr.msra.gmra.mxu3 %vm502_vm0, %v5700_v6  ;;  %991 = vmatpush.bf16.msra.mxu1 %v457_v27 }
  0xe9   : > { %1010 = vmatpush.bf16.msra.mxu2 %v458_v40  ;;  %1029 = vmatpush.bf16.msra.mxu3 %v459_v42 }
  0xea   : > { %v5834_v18 = vpop.f32.mrf.mxu2 }
  0xeb   : > { %v5836_v19 = vpop.f32.mrf.mxu3  ;;  %v5838_v20 = vpop.f32.mrf.mxu0  ;;  %v557_v26 = vadd.f32 %v5834_v18, %v5904_v4 }
  0xec   : > { %v5840_v21 = vpop.f32.mrf.mxu1 }
  0xf2   : > { %v5846_v28 = vpop.f32.mrf.mxu2 }
  0xf3   : > { %v5848_v29 = vpop.f32.mrf.mxu3  ;;  %v5850_v30 = vpop.f32.mrf.mxu0  ;;  %v559_v16 = vadd.f32 %v5846_v28, %v5925_v12 }
  0xf4   : > { %v5852_v31 = vpop.f32.mrf.mxu1  ;;  %v524_v22 = vadd.f32 %v5850_v30, %v5894_v63  ;;  %v540_v30 = vadd.f32 %v5840_v21, %v5925_v12  ;;  %v538_v21 = vadd.f32 %v5824_v17, %v5904_v4 }
  0xf5   : > { %v543_v27 = vadd.f32 %v5852_v31, %v5894_v63  ;;  %v1151_v49 = vmax.f32 %v559_v16, 0.0 }
  0xf6   : > { %4771 = vmatmul.msk.bf16.gmra.mxu0 %vm502_vm0, %v5736_v36  ;;  %4773 = vmatmul.msk.bf16.gmra.mxu1 %vm502_vm0, %v5736_v36  ;;  %v1181_v31 = vmax.f32 %v524_v22, 0.0  ;;  %v1150_v48 = vmax.f32 %v540_v30, 0.0 }
  0xf7   : > { %4775 = vmatmul.msk.bf16.gmra.mxu2 %vm502_vm0, %v5736_v36 }
  0xf8   : > { %4777 = vmatmul.msk.bf16.gmra.mxu3 %vm502_vm0, %v5736_v36 }
  0xfa   : > { %v561_v32 = vpop.f32.mrf.mxu2 }
  0xfb   : > { %v580_v33 = vpop.f32.mrf.mxu3  ;;  %v525_v34 = vpop.f32.mrf.mxu0  ;;  %v562_v13 = vadd.f32 %v561_v32, %v5894_v63  ;;  %v576_v32 = vadd.f32 %v5836_v19, %v5904_v4  ;;  %v578_v19 = vadd.f32 %v5848_v29, %v5925_v12  ;;  %v1117_v29 = vmax.f32 %v519_v25, 0.0 }
  0xfc   : > { %v544_v35 = vpop.f32.mrf.mxu1  ;;  %v526_v11 = vadd.f32 %v525_v34, %v5914_v5  ;;  %v581_v23 = vadd.f32 %v580_v33, %v5894_v63  ;;  %v521_v34 = vadd.f32 %v5838_v20, %v5925_v12 }
  0xfd   : > { %v545_v14 = vadd.f32 %v544_v35, %v5914_v5  ;;  %v1183_v37 = vmax.f32 %v562_v13, 0.0  ;;  %v1120_v52 = vmax.f32 %v576_v32, 0.0  ;;  %v1152_v17 = vmax.f32 %v578_v19, 0.0 }
  0xfe   : > { %v1213_v33 = vmax.f32 %v526_v11, 0.0  ;;  %v1184_v41 = vmax.f32 %v581_v23, 0.0  ;;  %v1149_v28 = vmax.f32 %v521_v34, 0.0 }
  0xff   : > { %v1214_v38 = vmax.f32 %v545_v14, 0.0  ;;  %v1250_v14 = vpack.c.bf16 %v1152_v17, %v1120_v52 }
 0x100   : > { %v1279_v47 = vpack.c.bf16 %v1213_v33, %v1181_v31  ;;  %v1247_v56 = vpack.c.bf16 %v1149_v28, %v1117_v29 }
 0x102   : > { %v563_v43 = vpop.f32.mrf.mxu2 }
 0x103   : > { %v582_v44 = vpop.f32.mrf.mxu3  ;;  %v5866_v45 = vpop.f32.mrf.mxu0  ;;  %v564_v15 = vadd.f32 %v563_v43, %v5914_v5  ;;  %v1182_v43 = vmax.f32 %v543_v27, 0.0 }
 0x104   : > { %v5868_v46 = vpop.f32.mrf.mxu1  ;;  %v583_v24 = vadd.f32 %v582_v44, %v5914_v5  ;;  %v1119_v44 = vmax.f32 %v557_v26, 0.0  ;;  %v595_v31 = vadd.f32 %v5866_v45, %v5904_v4 }
 0x105   : > { %v1215_v18 = vmax.f32 %v564_v15, 0.0 }
 0x106   : > { %4778 = vmatmul.msk.bf16.vlgmr.msrb.gmra.mxu0 %vm502_vm0, %v5700_v6  ;;  %4780 = vmatmul.msk.bf16.vlgmr.msrb.gmra.mxu1 %vm502_vm0, %v5700_v6  ;;  %v1216_v20 = vmax.f32 %v583_v24, 0.0  ;;  %v1249_v11 = vpack.c.bf16 %v1151_v49, %v1119_v44 }
 0x107   : > { %4782 = vmatmul.msk.bf16.vlgmr.msrb.gmra.mxu2 %vm502_vm0, %v5700_v6  ;;  %1048 = vmatpush.bf16.msrb.mxu0 %v460_v50  ;;  %v1280_v50 = vpack.c.bf16 %v1214_v38, %v1182_v43  ;;  %v1281_v51 = vpack.c.bf16 %v1215_v18, %v1183_v37 }
 0x108   : > { %4784 = vmatmul.msk.bf16.vlgmr.msrb.gmra.mxu3 %vm502_vm0, %v5700_v6  ;;  %1067 = vmatpush.bf16.msrb.mxu1 %v461_v54  ;;  %v1282_v53 = vpack.c.bf16 %v1216_v20, %v1184_v41  ;;  %v1118_v54 = vmax.f32 %v538_v21, 0.0 }
 0x109   : > { %1086 = vmatpush.bf16.msrb.mxu2 %v462_v55  ;;  %1105 = vmatpush.bf16.msrb.mxu3 %v463_v58 }
 0x10a   : > { %v5886_v59 = vpop.f32.mrf.mxu2  ;;  %v1248_v58 = vpack.c.bf16 %v1150_v48, %v1118_v54 }
 0x10b   : > { %v5888_v60 = vpop.f32.mrf.mxu3  ;;  %v5890_v61 = vpop.f32.mrf.mxu0 }
 0x10c   : > { %v5892_v62 = vpop.f32.mrf.mxu1 }
 0x112   : > { %v5896_v0 = vpop.f32.mrf.mxu2 }
 0x113   : > { %v5898_v1 = vpop.f32.mrf.mxu3  ;;  %v5900_v2 = vpop.f32.mrf.mxu0  ;;  %v635_v45 = vadd.f32 %v5896_v0, %v5925_v12 }
 0x114   : > { %v5902_v3 = vpop.f32.mrf.mxu1  ;;  %v600_v38 = vadd.f32 %v5900_v2, %v5894_v63  ;;  %v597_v2 = vadd.f32 %v5890_v61, %v5925_v12 }
 0x116   : > { %4779 = vmatmul.msk.bf16.gmra.mxu0 %vm502_vm0, %v5736_v36  ;;  %4781 = vmatmul.msk.bf16.gmra.mxu1 %vm502_vm0, %v5736_v36  ;;  %v1153_v0 = vmax.f32 %v597_v2, 0.0 }
 0x117   : > { %4783 = vmatmul.msk.bf16.gmra.mxu2 %vm502_vm0, %v5736_v36 }
 0x118   : > { %4785 = vmatmul.msk.bf16.gmra.mxu3 %vm502_vm0, %v5736_v36 }
 0x11a   : > { %v5916_v7 = vpop.f32.mrf.mxu2 }
 0x11b   : > { %v5918_v8 = vpop.f32.mrf.mxu3  ;;  %v5920_v9 = vpop.f32.mrf.mxu0  ;;  %v638_v33 = vadd.f32 %v5916_v7, %v5894_v63  ;;  %v619_v7 = vadd.f32 %v5902_v3, %v5894_v63  ;;  %v1185_v3 = vmax.f32 %v600_v38, 0.0 }
 0x11c   : > { %v5922_v10 = vpop.f32.mrf.mxu1  ;;  %v602_v30 = vadd.f32 %v5920_v9, %v5914_v5  ;;  %v657_v18 = vadd.f32 %v5918_v8, %v5894_v63  ;;  %v633_v9 = vadd.f32 %v5886_v59, %v5904_v4  ;;  %v616_v8 = vadd.f32 %v5892_v62, %v5925_v12 }
 0x11d   : > { %v621_v16 = vadd.f32 %v5922_v10, %v5914_v5  ;;  %v652_v10 = vadd.f32 %v5888_v60, %v5904_v4  ;;  %v1187_v41 = vmax.f32 %v638_v33, 0.0  ;;  %v654_v60 = vadd.f32 %v5898_v1, %v5925_v12 }
 0x11e   : > { %v1188_v44 = vmax.f32 %v657_v18, 0.0  ;;  %v614_v62 = vadd.f32 %v5868_v46, %v5904_v4  ;;  %v1123_v48 = vmax.f32 %v633_v9, 0.0  ;;  %v1121_v1 = vmax.f32 %v595_v31, 0.0 }
 0x11f   : > { %v1218_v20 = vmax.f32 %v621_v16, 0.0  ;;  %v1124_v17 = vmax.f32 %v652_v10, 0.0  ;;  %v1156_v46 = vmax.f32 %v654_v60, 0.0 }
 0x120   : > { %v1122_v54 = vmax.f32 %v614_v62, 0.0 }
 0x121   : > { %v1254_v16 = vpack.c.bf16 %v1156_v46, %v1124_v17 }
 0x122   : > { %v639_v35 = vpop.f32.mrf.mxu2 }
 0x123   : > { %v658_v39 = vpop.f32.mrf.mxu3  ;;  %v5948_v40 = vpop.f32.mrf.mxu0  ;;  %v640_v37 = vadd.f32 %v639_v35, %v5914_v5  ;;  %v1217_v35 = vmax.f32 %v602_v30, 0.0 }
 0x124   : > { %v5952_v42 = vpop.f32.mrf.mxu1  ;;  %v659_v19 = vadd.f32 %v658_v39, %v5914_v5 }
 0x125   : > { %v1219_v59 = vmax.f32 %v640_v37, 0.0  ;;  %v1283_v49 = vpack.c.bf16 %v1217_v35, %v1185_v3 }
 0x126   : > { %4786 = vmatmul.msk.bf16.vlgmr.msra.gmra.mxu0 %vm502_vm0, %v5700_v6  ;;  %4788 = vmatmul.msk.bf16.vlgmr.msra.gmra.mxu1 %vm502_vm0, %v5700_v6  ;;  %v1220_v61 = vmax.f32 %v659_v19, 0.0 }
 0x127   : > { %4790 = vmatmul.msk.bf16.vlgmr.msra.gmra.mxu2 %vm502_vm0, %v5700_v6  ;;  %1338 = vmatpush.bf16.msra.mxu0 %v1279_v47  ;;  %v1186_v47 = vmax.f32 %v619_v7, 0.0  ;;  %v1285_v52 = vpack.c.bf16 %v1219_v59, %v1187_v41  ;;  %v671_v59 = vadd.f32 %v5948_v40, %v5904_v4 }
 0x128   : > { %4792 = vmatmul.msk.bf16.vlgmr.msra.gmra.mxu3 %vm502_vm0, %v5700_v6  ;;  %1352 = vmatpush.bf16.msra.mxu1 %v1280_v50  ;;  %v1154_v50 = vmax.f32 %v616_v8, 0.0 }
 0x129   : > { %1366 = vmatpush.bf16.msra.mxu2 %v1281_v51  ;;  %1380 = vmatpush.bf16.msra.mxu3 %v1282_v53  ;;  %v1155_v51 = vmax.f32 %v635_v45, 0.0  ;;  %v1284_v29 = vpack.c.bf16 %v1218_v20, %v1186_v47  ;;  %v1286_v53 = vpack.c.bf16 %v1220_v61, %v1188_v44  ;;  %v690_v47 = vadd.f32 %v5952_v42, %v5904_v4 }
 0x12a   : > { %v5964_v55 = vpop.f32.mrf.mxu2 }
 0x12b   : > { %v5966_v57 = vpop.f32.mrf.mxu3  ;;  %v5968_v13 = vpop.f32.mrf.mxu0  ;;  %1339 = vmatpush.bf16.msra.mxu0 %v1247_v56  ;;  %v1253_v30 = vpack.c.bf16 %v1155_v51, %v1123_v48 }
 0x12c   : > { %v5970_v15 = vpop.f32.mrf.mxu1  ;;  %1353 = vmatpush.bf16.msra.mxu1 %v1248_v58  ;;  %v1251_v58 = vpack.c.bf16 %v1153_v0, %v1121_v1 }
 0x12d   : > { %1367 = vmatpush.bf16.msra.mxu2 %v1249_v11  ;;  %1381 = vmatpush.bf16.msra.mxu3 %v1250_v14  ;;  %v1252_v14 = vpack.c.bf16 %v1154_v50, %v1122_v54 }
 0x132   : > { %v5972_v22 = vpop.f32.mrf.mxu2 }
 0x133   : > { %v5974_v23 = vpop.f32.mrf.mxu3  ;;  %v5976_v24 = vpop.f32.mrf.mxu0 }
 0x134   : > { %v5978_v25 = vpop.f32.mrf.mxu1 }
 0x136   : > { %4787 = vmatmul.msk.bf16.gmra.mxu0 %vm502_vm0, %v5736_v36  ;;  %4789 = vmatmul.msk.bf16.gmra.mxu1 %vm502_vm0, %v5736_v36 }
 0x137   : > { %4791 = vmatmul.msk.bf16.gmra.mxu2 %vm502_vm0, %v5736_v36 }
 0x138   : > { %4793 = vmatmul.msk.bf16.gmra.mxu3 %vm502_vm0, %v5736_v36 }
 0x13a   : > { %v5988_v26 = vpop.f32.mrf.mxu2 }
 0x13b   : > { %v5990_v27 = vpop.f32.mrf.mxu3  ;;  %v5992_v32 = vpop.f32.mrf.mxu0  ;;  %v714_v8 = vadd.f32 %v5988_v26, %v5894_v63  ;;  %v728_v26 = vadd.f32 %v5966_v57, %v5904_v4 }
 0x13c   : > { %v5994_v34 = vpop.f32.mrf.mxu1  ;;  %v678_v2 = vadd.f32 %v5992_v32, %v5914_v5  ;;  %v733_v41 = vadd.f32 %v5990_v27, %v5894_v63  ;;  %v709_v32 = vadd.f32 %v5964_v55, %v5904_v4  ;;  %v692_v27 = vadd.f32 %v5970_v15, %v5925_v12  ;;  %v6099_v55 = vld [vmem:[%s9041_s3] sm:$0xff] }
 0x13d   : > { %v697_v35 = vadd.f32 %v5994_v34, %v5914_v5  ;;  %v695_v34 = vadd.f32 %v5978_v25, %v5894_v63  ;;  %v1191_v57 = vmax.f32 %v714_v8, 0.0  ;;  %v1128_v17 = vmax.f32 %v728_v26, 0.0 }
 0x13e   : > { %v1192_v61 = vmax.f32 %v733_v41, 0.0  ;;  %v1127_v0 = vmax.f32 %v709_v32, 0.0  ;;  %v1158_v51 = vmax.f32 %v692_v27, 0.0 }
 0x13f   : > { %v1222_v60 = vmax.f32 %v697_v35, 0.0  ;;  %v1190_v48 = vmax.f32 %v695_v34, 0.0 }
 0x142   : > { %v715_v39 = vpop.f32.mrf.mxu2 }
 0x143   : > { %v734_v21 = vpop.f32.mrf.mxu3  ;;  %v6022_v43 = vpop.f32.mrf.mxu0  ;;  %v716_v45 = vadd.f32 %v715_v39, %v5914_v5  ;;  %v711_v39 = vadd.f32 %v5972_v22, %v5925_v12 }
 0x144   : > { %v6026_v28 = vpop.f32.mrf.mxu1  ;;  %v735_v20 = vadd.f32 %v734_v21, %v5914_v5  ;;  %v1221_v21 = vmax.f32 %v678_v2, 0.0 }
 0x145   : > { %v1223_v3 = vmax.f32 %v716_v45, 0.0 }
 0x146   : > { %4794 = vmatmul.msk.bf16.vlgmr.msrb.gmra.mxu0 %vm502_vm0, %v5700_v6  ;;  %4796 = vmatmul.msk.bf16.vlgmr.msrb.gmra.mxu1 %vm502_vm0, %v5700_v6  ;;  %v1224_v22 = vmax.f32 %v735_v20, 0.0 }
 0x147   : > { %4798 = vmatmul.msk.bf16.vlgmr.msrb.gmra.mxu2 %vm502_vm0, %v5700_v6  ;;  %1394 = vmatpush.bf16.msrb.mxu0 %v1283_v49  ;;  %v1289_v1 = vpack.c.bf16 %v1223_v3, %v1191_v57 }
 0x148   : > { %4800 = vmatmul.msk.bf16.vlgmr.msrb.gmra.mxu3 %vm502_vm0, %v5700_v6  ;;  %1408 = vmatpush.bf16.msrb.mxu1 %v1284_v29  ;;  %v1159_v29 = vmax.f32 %v711_v39, 0.0  ;;  %v1290_v46 = vpack.c.bf16 %v1224_v22, %v1192_v61 }
 0x149   : > { %1422 = vmatpush.bf16.msrb.mxu2 %v1285_v52  ;;  %1436 = vmatpush.bf16.msrb.mxu3 %v1286_v53  ;;  %v1288_v52 = vpack.c.bf16 %v1222_v60, %v1190_v48  ;;  %v1126_v53 = vmax.f32 %v690_v47, 0.0 }
 0x14a   : > { %v6038_v56 = vpop.f32.mrf.mxu2  ;;  %v1257_v2 = vpack.c.bf16 %v1159_v29, %v1127_v0 }
 0x14b   : > { %v6040_v11 = vpop.f32.mrf.mxu3  ;;  %v6042_v33 = vpop.f32.mrf.mxu0  ;;  %1395 = vmatpush.bf16.msrb.mxu0 %v1251_v58 }
 0x14c   : > { %v6044_v37 = vpop.f32.mrf.mxu1  ;;  %1409 = vmatpush.bf16.msrb.mxu1 %v1252_v14  ;;  %v1311_v14 = vld [vmem:[%s9042_s4] sm:$0xff] }
 0x14d   : > { %1423 = vmatpush.bf16.msrb.mxu2 %v1253_v30  ;;  %1437 = vmatpush.bf16.msrb.mxu3 %v1254_v16  ;;  %v1256_v16 = vpack.c.bf16 %v1158_v51, %v1126_v53 }
 0x14e   : > { %1315 = vperm.xlu2 %4944, %v1311_v14  }
 0x152   : > { %v6046_v6 = vpop.f32.mrf.mxu2 }
 0x153   : > { %v6048_v38 = vpop.f32.mrf.mxu3  ;;  %v6050_v18 = vpop.f32.mrf.mxu0 }
 0x154   : > { %v6052_v19 = vpop.f32.mrf.mxu1  ;;  %v752_v32 = vadd.f32 %v6050_v18, %v5894_v63  ;;  %v749_v18 = vadd.f32 %v6042_v33, %v5925_v12 }
 0x156   : > { %4795 = vmatmul.msk.bf16.gmra.mxu0 %vm502_vm0, %v5736_v36  ;;  %4797 = vmatmul.msk.bf16.gmra.mxu1 %vm502_vm0, %v5736_v36  ;;  %v1161_v61 = vmax.f32 %v749_v18, 0.0 }
 0x157   : > { %4799 = vmatmul.msk.bf16.gmra.mxu2 %vm502_vm0, %v5736_v36 }
 0x158   : > { %4801 = vmatmul.msk.bf16.gmra.mxu3 %vm502_vm0, %v5736_v36  ;;  %v676_v36 = vadd.f32 %v5976_v24, %v5894_v63  ;;  %v673_v24 = vadd.f32 %v5968_v13, %v5925_v12  ;;  %v730_v13 = vadd.f32 %v5974_v23, %v5925_v12  ;;  %v1125_v23 = vmax.f32 %v671_v59, 0.0 }
 0x15a   : > { %v6062_v31 = vpop.f32.mrf.mxu2  ;;  %v1189_v15 = vmax.f32 %v676_v36, 0.0  ;;  %v1157_v49 = vmax.f32 %v673_v24, 0.0  ;;  %v1160_v42 = vmax.f32 %v730_v13, 0.0  ;;  %v785_v24 = vadd.f32 %v6038_v56, %v5904_v4 }
 0x15b   : > { %v6064_v9 = vpop.f32.mrf.mxu3  ;;  %v6066_v7 = vpop.f32.mrf.mxu0  ;;  %v790_v41 = vadd.f32 %v6062_v31, %v5894_v63  ;;  %v771_v31 = vadd.f32 %v6052_v19, %v5894_v63  ;;  %v806_v19 = vadd.f32 %v6048_v38, %v5925_v12 }
 0x15c   : > { %v6068_v10 = vpop.f32.mrf.mxu1  ;;  %v1287_v50 = vpack.c.bf16 %v1221_v21, %v1189_v15  ;;  %v1255_v58 = vpack.c.bf16 %v1157_v49, %v1125_v23  ;;  %v1258_v35 = vpack.c.bf16 %v1160_v42, %v1128_v17  ;;  %v754_v36 = vadd.f32 %v6066_v7, %v5914_v5 }
 0x15d   : > { %v773_v20 = vadd.f32 %v6068_v10, %v5914_v5  ;;  %v809_v26 = vadd.f32 %v6064_v9, %v5894_v63  ;;  %v747_v7 = vadd.f32 %v6022_v43, %v5904_v4  ;;  %v804_v10 = vadd.f32 %v6040_v11, %v5904_v4 }
 0x15e   : > { %v768_v9 = vadd.f32 %v6044_v37, %v5925_v12  ;;  %v1225_v27 = vmax.f32 %v754_v36, 0.0  ;;  %v787_v43 = vadd.f32 %v6046_v6, %v5925_v12  ;;  %v1195_v21 = vmax.f32 %v790_v41, 0.0 }
 0x15f   : > { %v1193_v11 = vmax.f32 %v752_v32, 0.0  ;;  %v1196_v3 = vmax.f32 %v809_v26, 0.0  ;;  %v766_v37 = vadd.f32 %v6026_v28, %v5904_v4  ;;  %v1194_v13 = vmax.f32 %v771_v31, 0.0 }
 0x160   : > { %v1131_v15 = vmax.f32 %v785_v24, 0.0  ;;  %v1162_v6 = vmax.f32 %v768_v9, 0.0  ;;  %v1163_v47 = vmax.f32 %v787_v43, 0.0  ;;  %v1129_v38 = vmax.f32 %v747_v7, 0.0 }
 0x161   : > { %v1291_v22 = vpack.c.bf16 %v1225_v27, %v1193_v11  ;;  %v1132_v49 = vmax.f32 %v804_v10, 0.0  ;;  %v1164_v28 = vmax.f32 %v806_v19, 0.0  ;;  %v1130_v51 = vmax.f32 %v766_v37, 0.0 }
 0x162   : > { %v791_v40 = vpop.f32.mrf.mxu2  ;;  %v1261_v17 = vpack.c.bf16 %v1163_v47, %v1131_v15 }
 0x163   : > { %v810_v25 = vpop.f32.mrf.mxu3  ;;  %v6101_v44 = vpop.f32.mrf.mxu0  ;;  %v792_v59 = vadd.f32 %v791_v40, %v5914_v5  ;;  %v1226_v40 = vmax.f32 %v773_v20, 0.0  ;;  %v1260_v23 = vpack.c.bf16 %v1162_v6, %v1130_v51 }
 0x164   : > { %v6105_v62 = vpop.f32.mrf.mxu1  ;;  %v811_v34 = vadd.f32 %v810_v25, %v5914_v5 }
 0x165   : > { %v1227_v56 = vmax.f32 %v792_v59, 0.0  ;;  %v1292_v48 = vpack.c.bf16 %v1226_v40, %v1194_v13  ;;  %v842_v20 = vadd.f32 %v6105_v62, %v5904_v4 }
 0x166   : > { %4806 = vmatmul.msk.bf16.vlgmr.msra.gmra.mxu0 %vm1328_vm1, %v6099_v55  ;;  %4807 = vmatmul.msk.bf16.vlgmr.msra.gmra.mxu1 %vm1328_vm1, %v6099_v55  ;;  %v1228_v25 = vmax.f32 %v811_v34, 0.0 }
 0x167   : > { %4808 = vmatmul.msk.bf16.vlgmr.msra.gmra.mxu2 %vm1328_vm1, %v6099_v55  ;;  %1450 = vmatpush.bf16.msra.mxu0 %v1287_v50  ;;  %v1293_v0 = vpack.c.bf16 %v1227_v56, %v1195_v21  ;;  %v1134_v13 = vmax.f32 %v842_v20, 0.0 }
 0x168   : > { %4809 = vmatmul.msk.bf16.vlgmr.msra.gmra.mxu3 %vm1328_vm1, %v6099_v55  ;;  %1464 = vmatpush.bf16.msra.mxu1 %v1288_v52  ;;  %v1294_v50 = vpack.c.bf16 %v1228_v25, %v1196_v3  ;;  %v1259_v52 = vpack.c.bf16 %v1161_v61, %v1129_v38 }
 0x169   : > { %1478 = vmatpush.bf16.msra.mxu2 %v1289_v1  ;;  %1492 = vmatpush.bf16.msra.mxu3 %v1290_v46  ;;  %v1262_v46 = vpack.c.bf16 %v1164_v28, %v1132_v49 }
 0x16a   : > { %v6117_v54 = vpop.f32.mrf.mxu2 }
 0x16b   : > { %v6122_v30 = vpop.f32.mrf.mxu3  ;;  %v6124_v8 = vpop.f32.mrf.mxu0  ;;  %1451 = vmatpush.bf16.msra.mxu0 %v1255_v58  ;;  %v861_v62 = vadd.f32 %v6117_v54, %v5904_v4 }
 0x16c   : > { %v6126_v45 = vpop.f32.mrf.mxu1  ;;  %1465 = vmatpush.bf16.msra.mxu1 %v1256_v16  ;;  %v1312_v16 = vld [vmem:[%s9042_s4 + $0x8] sm:$0xff]  ;;  %v825_v59 = vadd.f32 %v6124_v8, %v5925_v12 }
 0x16d   : > { %1479 = vmatpush.bf16.msra.mxu2 %v1257_v2  ;;  %1493 = vmatpush.bf16.msra.mxu3 %v1258_v35  ;;  %v823_v35 = vadd.f32 %v6101_v44, %v5904_v4  ;;  %v844_v7 = vadd.f32 %v6126_v45, %v5925_v12  ;;  %v880_v45 = vadd.f32 %v6122_v30, %v5904_v4  ;;  %v1135_v15 = vmax.f32 %v861_v62, 0.0 }
 0x16e   : > { %1320 = vperm.xlu2 %4944, %v1312_v16   ;;  %v1165_v56 = vmax.f32 %v825_v59, 0.0 }
 0x16f   : > { %v1166_v54 = vmax.f32 %v844_v7, 0.0  ;;  %v1133_v30 = vmax.f32 %v823_v35, 0.0  ;;  %v1136_v61 = vmax.f32 %v880_v45, 0.0 }
 0x171   : > { %v1263_v6 = vpack.c.bf16 %v1165_v56, %v1133_v30 }
 0x172   : > { %v862_v39 = vpop.f32.mrf.mxu2 }
 0x173   : > { %v881_v57 = vpop.f32.mrf.mxu3  ;;  %v827_v60 = vpop.f32.mrf.mxu0  ;;  %v863_v24 = vadd.f32 %v862_v39, %v5925_v12 }
 0x174   : > { %v846_v33 = vpop.f32.mrf.mxu1  ;;  %v828_v2 = vadd.f32 %v827_v60, %v5894_v63  ;;  %v882_v8 = vadd.f32 %v881_v57, %v5925_v12 }
 0x175   : > { %v847_v36 = vadd.f32 %v846_v33, %v5894_v63  ;;  %v1167_v57 = vmax.f32 %v863_v24, 0.0 }
 0x176   : > { %4810 = vmatmul.msk.bf16.vlgmr.msrb.gmra.mxu0 %vm1328_vm1, %v6099_v55  ;;  %4811 = vmatmul.msk.bf16.vlgmr.msrb.gmra.mxu1 %vm1328_vm1, %v6099_v55  ;;  %v1197_v9 = vmax.f32 %v828_v2, 0.0  ;;  %v1168_v33 = vmax.f32 %v882_v8, 0.0 }
 0x177   : > { %4812 = vmatmul.msk.bf16.vlgmr.msrb.gmra.mxu2 %vm1328_vm1, %v6099_v55  ;;  %1506 = vmatpush.bf16.msrb.mxu0 %v1291_v22  ;;  %v1198_v39 = vmax.f32 %v847_v36, 0.0  ;;  %v1265_v38 = vpack.c.bf16 %v1167_v57, %v1135_v15 }
 0x178   : > { %4813 = vmatmul.msk.bf16.vlgmr.msrb.gmra.mxu3 %vm1328_vm1, %v6099_v55  ;;  %1520 = vmatpush.bf16.msrb.mxu1 %v1292_v48  ;;  %v1264_v48 = vpack.c.bf16 %v1166_v54, %v1134_v13  ;;  %v1266_v28 = vpack.c.bf16 %v1168_v33, %v1136_v61 }
 0x179   : > { %1534 = vmatpush.bf16.msrb.mxu2 %v1293_v0  ;;  %1548 = vmatpush.bf16.msrb.mxu3 %v1294_v50 }
 0x17a   : > { %v865_v29 = vpop.f32.mrf.mxu2 }
 0x17b   : > { %v884_v1 = vpop.f32.mrf.mxu3  ;;  %v829_v42 = vpop.f32.mrf.mxu0  ;;  %1507 = vmatpush.bf16.msrb.mxu0 %v1259_v52  ;;  %v866_v41 = vadd.f32 %v865_v29, %v5894_v63 }
 0x17c   : > { %v848_v53 = vpop.f32.mrf.mxu1  ;;  %1521 = vmatpush.bf16.msrb.mxu1 %v1260_v23  ;;  %v830_v58 = vadd.f32 %v829_v42, %v5914_v5  ;;  %v885_v32 = vadd.f32 %v884_v1, %v5894_v63 }
 0x17d   : > { %1535 = vmatpush.bf16.msrb.mxu2 %v1261_v17  ;;  %1549 = vmatpush.bf16.msrb.mxu3 %v1262_v46  ;;  %v849_v14 = vadd.f32 %v848_v53, %v5914_v5  ;;  %v1199_v21 = vmax.f32 %v866_v41, 0.0 }
 0x17e   : > { %v1229_v26 = vmax.f32 %v830_v58, 0.0  ;;  %v1200_v60 = vmax.f32 %v885_v32, 0.0 }
 0x17f   : > { %v1230_v44 = vmax.f32 %v849_v14, 0.0 }
 0x180   : > { %v1295_v19 = vpack.c.bf16 %v1229_v26, %v1197_v9 }
 0x181   : > { %v1296_v3 = vpack.c.bf16 %v1230_v44, %v1198_v39 }
 0x182   : > { %v867_v34 = vpop.f32.mrf.mxu2 }
 0x183   : > { %v868_v31 = vadd.f32 %v867_v34, %v5914_v5  ;;  %v886_v10 = vpop.f32.mrf.mxu3  ;;  %v6185_v18 = vpop.f32.mrf.mxu0 }
 0x184   : > { %v887_v27 = vadd.f32 %v886_v10, %v5914_v5  ;;  %v6191_v43 = vpop.f32.mrf.mxu1  ;;  %v899_v59 = vadd.f32 %v6185_v18, %v5904_v4 }
 0x185   : > { %v1231_v40 = vmax.f32 %v868_v31, 0.0  ;;  %v918_v26 = vadd.f32 %v6191_v43, %v5904_v4 }
 0x186   : > { %v1232_v11 = vmax.f32 %v887_v27, 0.0  ;;  %4814 = vmatmul.msk.bf16.vlgmr.msra.gmra.mxu0 %vm1328_vm1, %v6099_v55  ;;  %4815 = vmatmul.msk.bf16.vlgmr.msra.gmra.mxu1 %vm1328_vm1, %v6099_v55  ;;  %v1137_v27 = vmax.f32 %v899_v59, 0.0 }
 0x187   : > { %v1297_v25 = vpack.c.bf16 %v1231_v40, %v1199_v21  ;;  %4816 = vmatmul.msk.bf16.vlgmr.msra.gmra.mxu2 %vm1328_vm1, %v6099_v55  ;;  %1562 = vmatpush.bf16.msra.mxu0 %v1295_v19  ;;  %v1138_v21 = vmax.f32 %v918_v26, 0.0 }
 0x188   : > { %v1298_v37 = vpack.c.bf16 %v1232_v11, %v1200_v60  ;;  %4817 = vmatmul.msk.bf16.vlgmr.msra.gmra.mxu3 %vm1328_vm1, %v6099_v55  ;;  %1576 = vmatpush.bf16.msra.mxu1 %v1296_v3 }
 0x189   : > { %1590 = vmatpush.bf16.msra.mxu2 %v1297_v25 }
 0x18a   : > { %1604 = vmatpush.bf16.msra.mxu3 %v1298_v37  ;;  %v936_v22 = vpop.f32.mrf.mxu2 }
 0x18b   : > { %v955_v47 = vpop.f32.mrf.mxu3  ;;  %v900_v0 = vpop.f32.mrf.mxu0  ;;  %1563 = vmatpush.bf16.msra.mxu0 %v1263_v6  ;;  %v937_v40 = vadd.f32 %v936_v22, %v5904_v4 }
 0x18c   : > { %v919_v49 = vpop.f32.mrf.mxu1  ;;  %1577 = vmatpush.bf16.msra.mxu1 %v1264_v48  ;;  %v901_v16 = vadd.f32 %v900_v0, %v5925_v12  ;;  %v956_v19 = vadd.f32 %v955_v47, %v5904_v4 }
 0x18d   : > { %1591 = vmatpush.bf16.msra.mxu2 %v1265_v38  ;;  %v920_v36 = vadd.f32 %v919_v49, %v5925_v12  ;;  %v1139_v13 = vmax.f32 %v937_v40, 0.0 }
 0x18e   : > { %1605 = vmatpush.bf16.msra.mxu3 %v1266_v28  ;;  %v1169_v24 = vmax.f32 %v901_v16, 0.0  ;;  %v1140_v15 = vmax.f32 %v956_v19, 0.0 }
 0x18f   : > { %v1170_v10 = vmax.f32 %v920_v36, 0.0 }
 0x190   : > { %v1267_v57 = vpack.c.bf16 %v1169_v24, %v1137_v27 }
 0x191   : > { %v1268_v30 = vpack.c.bf16 %v1170_v10, %v1138_v21 }
 0x192   : > { %v938_v50 = vpop.f32.mrf.mxu2 }
 0x193   : > { %v957_v51 = vpop.f32.mrf.mxu3  ;;  %v903_v29 = vpop.f32.mrf.mxu0  ;;  %v939_v62 = vadd.f32 %v938_v50, %v5925_v12 }
 0x194   : > { %v922_v52 = vpop.f32.mrf.mxu1  ;;  %v904_v1 = vadd.f32 %v903_v29, %v5894_v63  ;;  %v958_v45 = vadd.f32 %v957_v51, %v5925_v12 }
 0x195   : > { %v923_v17 = vadd.f32 %v922_v52, %v5894_v63  ;;  %v1171_v3 = vmax.f32 %v939_v62, 0.0 }
 0x196   : > { %4818 = vmatmul.msk.bf16.vlgmr.msrb.gmra.mxu0 %vm1328_vm1, %v6099_v55  ;;  %4819 = vmatmul.msk.bf16.vlgmr.msrb.gmra.mxu1 %vm1328_vm1, %v6099_v55  ;;  %v1201_v2 = vmax.f32 %v904_v1, 0.0  ;;  %v1172_v33 = vmax.f32 %v958_v45, 0.0 }
 0x197   : > { %4820 = vmatmul.msk.bf16.vlgmr.msrb.gmra.mxu2 %vm1328_vm1, %v6099_v55  ;;  %v1202_v41 = vmax.f32 %v923_v17, 0.0  ;;  %v1269_v47 = vpack.c.bf16 %v1171_v3, %v1139_v13 }
 0x198   : > { %4821 = vmatmul.msk.bf16.vlgmr.msrb.gmra.mxu3 %vm1328_vm1, %v6099_v55  ;;  %v1270_v0 = vpack.c.bf16 %v1172_v33, %v1140_v15 }
 0x19a   : > { %v941_v23 = vpop.f32.mrf.mxu2 }
 0x19b   : > { %v960_v42 = vpop.f32.mrf.mxu3  ;;  %v905_v46 = vpop.f32.mrf.mxu0  ;;  %v942_v34 = vadd.f32 %v941_v23, %v5894_v63 }
 0x19c   : > { %v906_v53 = vadd.f32 %v905_v46, %v5914_v5  ;;  %v924_v58 = vpop.f32.mrf.mxu1  ;;  %v961_v44 = vadd.f32 %v960_v42, %v5894_v63 }
 0x19d   : > { %v925_v14 = vadd.f32 %v924_v58, %v5914_v5  ;;  %v1203_v56 = vmax.f32 %v942_v34, 0.0 }
 0x19e   : > { %v1233_v35 = vmax.f32 %v906_v53, 0.0  ;;  %v1204_v11 = vmax.f32 %v961_v44, 0.0 }
 0x19f   : > { %v1234_v20 = vmax.f32 %v925_v14, 0.0 }
 0x1a0   : > { %v1299_v32 = vpack.c.bf16 %v1233_v35, %v1201_v2 }
 0x1a1   : > { %v1300_v7 = vpack.c.bf16 %v1234_v20, %v1202_v41 }
 0x1a2   : > { %v943_v31 = vpop.f32.mrf.mxu2  ;;  %1618 = vmatpush.bf16.msrb.mxu0 %v1299_v32 }
 0x1a3   : > { %v944_v8 = vadd.f32 %v943_v31, %v5914_v5  ;;  %v962_v9 = vpop.f32.mrf.mxu3  ;;  %1632 = vmatpush.bf16.msrb.mxu1 %v1300_v7  ;;  %v974_v18 = vpop.f32.mrf.mxu0 }
 0x1a4   : > { %v963_v43 = vadd.f32 %v962_v9, %v5914_v5  ;;  %v993_v39 = vpop.f32.mrf.mxu1  ;;  %v975_v14 = vadd.f32 %v974_v18, %v5904_v4 }
 0x1a5   : > { %v1235_v60 = vmax.f32 %v944_v8, 0.0  ;;  %v994_v35 = vadd.f32 %v993_v39, %v5904_v4 }
 0x1a6   : > { %v1236_v54 = vmax.f32 %v963_v43, 0.0  ;;  %4822 = vmatmul.msk.bf16.vlgmr.msra.gmra.mxu0 %vm1328_vm1, %v6099_v55  ;;  %4823 = vmatmul.msk.bf16.vlgmr.msra.gmra.mxu1 %vm1328_vm1, %v6099_v55  ;;  %v1141_v7 = vmax.f32 %v975_v14, 0.0 }
 0x1a7   : > { %v1301_v25 = vpack.c.bf16 %v1235_v60, %v1203_v56  ;;  %4824 = vmatmul.msk.bf16.vlgmr.msra.gmra.mxu2 %vm1328_vm1, %v6099_v55  ;;  %1619 = vmatpush.bf16.msrb.mxu0 %v1267_v57  ;;  %v1142_v31 = vmax.f32 %v994_v35, 0.0 }
 0x1a8   : > { %v1302_v37 = vpack.c.bf16 %v1236_v54, %v1204_v11  ;;  %4825 = vmatmul.msk.bf16.vlgmr.msra.gmra.mxu3 %vm1328_vm1, %v6099_v55  ;;  %1633 = vmatpush.bf16.msrb.mxu1 %v1268_v30 }
 0x1a9   : > { %1646 = vmatpush.bf16.msrb.mxu2 %v1301_v25 }
 0x1aa   : > { %1660 = vmatpush.bf16.msrb.mxu3 %v1302_v37  ;;  %v1012_v61 = vpop.f32.mrf.mxu2 }
 0x1ab   : > { %v1031_v22 = vpop.f32.mrf.mxu3  ;;  %v976_v6 = vpop.f32.mrf.mxu0  ;;  %v1013_v39 = vadd.f32 %v1012_v61, %v5904_v4 }
 0x1ac   : > { %v995_v48 = vpop.f32.mrf.mxu1  ;;  %v977_v17 = vadd.f32 %v976_v6, %v5925_v12  ;;  %v1032_v60 = vadd.f32 %v1031_v22, %v5904_v4 }
 0x1ad   : > { %1647 = vmatpush.bf16.msrb.mxu2 %v1269_v47  ;;  %v996_v53 = vadd.f32 %v995_v48, %v5925_v12  ;;  %v1143_v30 = vmax.f32 %v1013_v39, 0.0 }
 0x1ae   : > { %1661 = vmatpush.bf16.msrb.mxu3 %v1270_v0  ;;  %v1173_v20 = vmax.f32 %v977_v17, 0.0  ;;  %v1144_v33 = vmax.f32 %v1032_v60, 0.0 }
 0x1af   : > { %v1174_v32 = vmax.f32 %v996_v53, 0.0 }
 0x1b0   : > { %v1271_v18 = vpack.c.bf16 %v1173_v20, %v1141_v7 }
 0x1b1   : > { %v1272_v21 = vpack.c.bf16 %v1174_v32, %v1142_v31  ;;  %v6278_v32 = vpop.permute.xlu2 %1315 }
 0x1b2   : > { %v1014_v38 = vpop.f32.mrf.mxu2 }
 0x1b3   : > { %v1033_v49 = vpop.f32.mrf.mxu3  ;;  %v979_v28 = vpop.f32.mrf.mxu0  ;;  %v1015_v10 = vadd.f32 %v1014_v38, %v5925_v12 }
 0x1b4   : > { %v998_v50 = vpop.f32.mrf.mxu1  ;;  %v980_v51 = vadd.f32 %v979_v28, %v5894_v63  ;;  %v1034_v27 = vadd.f32 %v1033_v49, %v5925_v12 }
 0x1b5   : > { %v999_v52 = vadd.f32 %v998_v50, %v5894_v63  ;;  %v1175_v54 = vmax.f32 %v1015_v10, 0.0 }
 0x1b6   : > { %4826 = vmatmul.msk.bf16.vlgmr.msrb.gmra.mxu0 %vm1328_vm1, %v6099_v55  ;;  %4827 = vmatmul.msk.bf16.vlgmr.msrb.gmra.mxu1 %vm1328_vm1, %v6099_v55  ;;  %v1205_v16 = vmax.f32 %v980_v51, 0.0  ;;  %v1176_v3 = vmax.f32 %v1034_v27, 0.0 }
 0x1b7   : > { %4828 = vmatmul.msk.bf16.vlgmr.msrb.gmra.mxu2 %vm1328_vm1, %v6099_v55  ;;  %v1206_v36 = vmax.f32 %v999_v52, 0.0  ;;  %v1273_v13 = vpack.c.bf16 %v1175_v54, %v1143_v30 }
 0x1b8   : > { %4829 = vmatmul.msk.bf16.vlgmr.msrb.gmra.mxu3 %vm1328_vm1, %v6099_v55  ;;  %v1274_v22 = vpack.c.bf16 %v1176_v3, %v1144_v33 }
 0x1ba   : > { %v1017_v29 = vpop.f32.mrf.mxu2 }
 0x1bb   : > { %v1036_v1 = vpop.f32.mrf.mxu3  ;;  %v981_v23 = vpop.f32.mrf.mxu0  ;;  %v1018_v26 = vadd.f32 %v1017_v29, %v5894_v63 }
 0x1bc   : > { %v982_v42 = vadd.f32 %v981_v23, %v5914_v5  ;;  %v1000_v46 = vpop.f32.mrf.mxu1  ;;  %v1037_v24 = vadd.f32 %v1036_v1, %v5894_v63 }
 0x1bd   : > { %v1001_v58 = vadd.f32 %v1000_v46, %v5914_v5  ;;  %v1207_v40 = vmax.f32 %v1018_v26, 0.0 }
 0x1be   : > { %v1237_v2 = vmax.f32 %v982_v42, 0.0  ;;  %v1208_v19 = vmax.f32 %v1037_v24, 0.0 }
 0x1bf   : > { %v1238_v41 = vmax.f32 %v1001_v58, 0.0 }
 0x1c0   : > { %v1303_v59 = vpack.c.bf16 %v1237_v2, %v1205_v16 }
 0x1c1   : > { %v1304_v34 = vpack.c.bf16 %v1238_v41, %v1206_v36 }
 0x1c2   : > { %v1019_v44 = vpop.f32.mrf.mxu2  ;;  %1674 = vmatpush.bf16.msra.mxu0 %v1303_v59 }
 0x1c3   : > { %v1020_v62 = vadd.f32 %v1019_v44, %v5914_v5  ;;  %v1038_v8 = vpop.f32.mrf.mxu3  ;;  %1688 = vmatpush.bf16.msra.mxu1 %v1304_v34  ;;  %v1050_v9 = vpop.f32.mrf.mxu0 }
 0x1c4   : > { %v1039_v45 = vadd.f32 %v1038_v8, %v5914_v5  ;;  %v1069_v43 = vpop.f32.mrf.mxu1  ;;  %v1051_v46 = vadd.f32 %v1050_v9, %v5904_v4 }
 0x1c5   : > { %v1239_v56 = vmax.f32 %v1020_v62, 0.0  ;;  %v1070_v14 = vadd.f32 %v1069_v43, %v5904_v4 }
 0x1c6   : > { %v1240_v11 = vmax.f32 %v1039_v45, 0.0  ;;  %1675 = vmatpush.bf16.msra.mxu0 %v1271_v18  ;;  %v1145_v26 = vmax.f32 %v1051_v46, 0.0 }
 0x1c7   : > { %v1305_v57 = vpack.c.bf16 %v1239_v56, %v1207_v40  ;;  %1689 = vmatpush.bf16.msra.mxu1 %v1272_v21  ;;  %v1146_v24 = vmax.f32 %v1070_v14, 0.0 }
 0x1c8   : > { %v1306_v25 = vpack.c.bf16 %v1240_v11, %v1208_v19 }
 0x1c9   : > { %1702 = vmatpush.bf16.msra.mxu2 %v1305_v57  ;;  %4830 = vmatmul.msk.bf16.vlgmr.msra.gmra.mxu0 %vm1328_vm1, %v6099_v55 }
 0x1ca   : > { %1716 = vmatpush.bf16.msra.mxu3 %v1306_v25  ;;  %v1088_v37 = vpop.f32.mrf.mxu2  ;;  %4831 = vmatmul.msk.bf16.vlgmr.msra.gmra.mxu1 %vm1328_vm1, %v6099_v55 }
 0x1cb   : > { %v1107_v15 = vpop.f32.mrf.mxu3  ;;  %v1052_v61 = vpop.f32.mrf.mxu0  ;;  %v1089_v44 = vadd.f32 %v1088_v37, %v5904_v4 }
 0x1cc   : > { %v1071_v6 = vpop.f32.mrf.mxu1  ;;  %v1053_v52 = vadd.f32 %v1052_v61, %v5925_v12  ;;  %v1108_v56 = vadd.f32 %v1107_v15, %v5904_v4 }
 0x1cd   : > { %1703 = vmatpush.bf16.msra.mxu2 %v1273_v13  ;;  %v1072_v17 = vadd.f32 %v1071_v6, %v5925_v12  ;;  %v1147_v30 = vmax.f32 %v1089_v44, 0.0 }
 0x1ce   : > { %1717 = vmatpush.bf16.msra.mxu3 %v1274_v22  ;;  %v1177_v35 = vmax.f32 %v1053_v52, 0.0  ;;  %v1148_v4 = vmax.f32 %v1108_v56, 0.0 }
 0x1cf   : > { %v1178_v41 = vmax.f32 %v1072_v17, 0.0 }
 0x1d0   : > { %4832 = vmatmul.msk.bf16.vlgmr.msra.gmra.mxu2 %vm1328_vm1, %v6099_v55  ;;  %v1275_v9 = vpack.c.bf16 %v1177_v35, %v1145_v26 }
 0x1d1   : > { %4833 = vmatmul.msk.bf16.vlgmr.msra.gmra.mxu3 %vm1328_vm1, %v6099_v55  ;;  %v1276_v43 = vpack.c.bf16 %v1178_v41, %v1146_v24  ;;  %v6339_v24 = vld [vmem:[%s5692_s15 + $0x118] sm:$0xff] }
 0x1d2   : > { %v1090_v47 = vpop.f32.mrf.mxu2  ;;  %v2423_v44 = vrot.slane %v6339_v24, 1 }
 0x1d3   : > { %v1109_v48 = vpop.f32.mrf.mxu3  ;;  %v1055_v0 = vpop.f32.mrf.mxu0  ;;  %v1091_v31 = vadd.f32 %v1090_v47, %v5925_v12 }
 0x1d4   : > { %v1074_v38 = vpop.f32.mrf.mxu1  ;;  %v1056_v49 = vadd.f32 %v1055_v0, %v5894_v63  ;;  %v1110_v18 = vadd.f32 %v1109_v48, %v5925_v12 }
 0x1d5   : > { %v1075_v50 = vadd.f32 %v1074_v38, %v5894_v63  ;;  %v1179_v12 = vmax.f32 %v1091_v31, 0.0  ;;  %v6343_v31 = vld [vmem:[%s5692_s15 + $0x120] sm:$0xff] }
 0x1d6   : > { %v1209_v53 = vmax.f32 %v1056_v49, 0.0  ;;  %v1180_v57 = vmax.f32 %v1110_v18, 0.0 }
 0x1d7   : > { %v1210_v16 = vmax.f32 %v1075_v50, 0.0  ;;  %v1277_v13 = vpack.c.bf16 %v1179_v12, %v1147_v30 }
 0x1d8   : > { %v1278_v6 = vpack.c.bf16 %v1180_v57, %v1148_v4 }
 0x1da   : > { %v1093_v28 = vpop.f32.mrf.mxu2 }
 0x1db   : > { %v1112_v51 = vpop.f32.mrf.mxu3  ;;  %v1057_v29 = vpop.f32.mrf.mxu0  ;;  %v1094_v20 = vadd.f32 %v1093_v28, %v5894_v63 }
 0x1dc   : > { %v1058_v1 = vadd.f32 %v1057_v29, %v5914_v5  ;;  %v1076_v23 = vpop.f32.mrf.mxu1  ;;  %v1113_v34 = vadd.f32 %v1112_v51, %v5894_v63 }
 0x1dd   : > { %v1077_v42 = vadd.f32 %v1076_v23, %v5914_v5  ;;  %v1211_v39 = vmax.f32 %v1094_v20, 0.0 }
 0x1de   : > { %v1241_v58 = vmax.f32 %v1058_v1, 0.0  ;;  %v1212_v60 = vmax.f32 %v1113_v34, 0.0  ;;  %v6335_v34 = vld [vmem:[%s5692_s15 + $0x110] sm:$0xff] }
 0x1df   : > { %v1242_v2 = vmax.f32 %v1077_v42, 0.0 }
 0x1e0   : > { %v1307_v36 = vpack.c.bf16 %v1241_v58, %v1209_v53 }
 0x1e1   : > { %v1308_v59 = vpack.c.bf16 %v1242_v2, %v1210_v16  ;;  %v6324_v2 = vld [vmem:[%s5692_s15 + $0x100] sm:$0xff] }
 0x1e2   : > { %v1095_v7 = vpop.f32.mrf.mxu2  ;;  %1730 = vmatpush.bf16.msrb.mxu0 %v1307_v36  ;;  %v2420_v35 = vrot.slane %v6324_v2, 1  ;;  %v6328_v36 = vld [vmem:[%s5692_s15 + $0x108] sm:$0xff] }
 0x1e3   : > { %v1096_v10 = vadd.f32 %v1095_v7, %v5914_v5  ;;  %v1114_v62 = vpop.f32.mrf.mxu3  ;;  %1744 = vmatpush.bf16.msrb.mxu1 %v1308_v59  ;;  %v1341_v8 = vpop.f32.mrf.mxu0  ;;  %v2421_v41 = vrot.slane %v6328_v36, 1  ;;  %v2422_v7 = vrot.slane %v6335_v34, 1 }
 0x1e4   : > { %v1115_v27 = vadd.f32 %v1114_v62, %v5914_v5  ;;  %v6287_v45 = vadd.f32 %v1341_v8, %v6278_v32  ;;  %v1355_v63 = vpop.f32.mrf.mxu1 }
 0x1e5   : > { %v1243_v21 = vmax.f32 %v1096_v10, 0.0  ;;  %v6290_v40 = vadd.f32 %v1355_v63, %v6278_v32  ;;  %v2424_v10 = vrot.slane %v6343_v31, 1 }
 0x1e6   : > { %v1244_v19 = vmax.f32 %v1115_v27, 0.0  ;;  %v1844_v11 = vmin.f32 %v6287_v45, 20.0  ;;  %1731 = vmatpush.bf16.msrb.mxu0 %v1275_v9  ;;  %v6348_v9 = vld [vmem:[%s5692_s15 + $0x128] sm:$0xff]  ;;  %vm1812_vm3 = vcmp.gt.f32.partialorder %v6287_v45, 20.0 }
 0x1e7   : > { %v1309_v54 = vpack.c.bf16 %v1243_v21, %v1211_v39  ;;  %v1845_v5 = vmin.f32 %v6290_v40, 20.0  ;;  %1745 = vmatpush.bf16.msrb.mxu1 %v1276_v43  ;;  %v2425_v18 = vrot.slane %v6348_v9, 1  ;;  %v6355_v39 = vpop.permute.xlu2 %1320  ;;  %vm1813_vm5 = vcmp.gt.f32.partialorder %v6290_v40, 20.0 }
 0x1e8   : > { %v1310_v3 = vpack.c.bf16 %v1244_v19, %v1212_v60  ;;  %v1876_v25 = vmul.f32 1.442695, %v1844_v11  ;;  %9192 = vst [vmem:[#allocation4_spill] sm:$0xff] %v6355_v39 }
 0x1e9   : > { %v1878_v33 = vmul.f32 1.442695, %v1845_v5  ;;  %1758 = vmatpush.bf16.msrb.mxu2 %v1309_v54  ;;  %4834 = vmatmul.msk.bf16.vlgmr.msrb.gmra.mxu0 %vm1328_vm1, %v6099_v55 }
 0x1ea   : > { %4945 = vpow2.f32 %v1876_v25  ;;  %1772 = vmatpush.bf16.msrb.mxu3 %v1310_v3  ;;  %v1369_v37 = vpop.f32.mrf.mxu2  ;;  %4835 = vmatmul.msk.bf16.vlgmr.msrb.gmra.mxu1 %vm1328_vm1, %v6099_v55 }
 0x1eb   : > { %4947 = vpow2.f32 %v1878_v33  ;;  %v6300_v15 = vadd.f32 %v1369_v37, %v6278_v32  ;;  %v1383_v61 = vpop.f32.mrf.mxu3  ;;  %v6302_v22 = vpop.f32.mrf.mxu0 }
 0x1ec   : > { %v6305_v47 = vadd.f32 %v1383_v61, %v6278_v32  ;;  %v6307_v48 = vpop.f32.mrf.mxu1  ;;  %v6365_v25 = vadd.f32 %v6302_v22, %v6355_v39 }
 0x1ed   : > { %v1846_v0 = vmin.f32 %v6300_v15, 20.0  ;;  %1759 = vmatpush.bf16.msrb.mxu2 %v1277_v13  ;;  %vm1814_vm6 = vcmp.gt.f32.partialorder %v6300_v15, 20.0 }
 0x1ee   : > { %v1847_v38 = vmin.f32 %v6305_v47, 20.0  ;;  %1773 = vmatpush.bf16.msrb.mxu3 %v1278_v6  ;;  %vm1815_vm8 = vcmp.gt.f32.partialorder %v6305_v47, 20.0 }
 0x1ef   : > { %v1880_v49 = vmul.f32 1.442695, %v1846_v0 }
 0x1f0   : > { %v4946_v28 = vpop.eup %4945  ;;  %4836 = vmatmul.msk.bf16.vlgmr.msrb.gmra.mxu2 %vm1328_vm1, %v6099_v55  ;;  %v1882_v52 = vmul.f32 1.442695, %v1847_v38 }
 0x1f1   : > { %v4948_v50 = vpop.eup %4947  ;;  %v1940_v51 = vadd.f32 1.0, %v4946_v28  ;;  %v1943_v29 = vmul.f32 -0.5, %v4946_v28  ;;  %4837 = vmatmul.msk.bf16.vlgmr.msrb.gmra.mxu3 %vm1328_vm1, %v6099_v55  ;;  %4949 = vpow2.f32 %v1880_v49  ;;  %v1946_v53 = vand.u32 2147483647, %v4946_v28 }
 0x1f2   : > { %v1949_v1 = vadd.f32 1.0, %v4948_v50  ;;  %v1952_v23 = vmul.f32 -0.5, %v4948_v50  ;;  %v6315_v17 = vpop.f32.mrf.mxu2  ;;  %v1955_v20 = vand.u32 2147483647, %v4948_v50 }
 0x1f3   : > { %4951 = vlog2.f32 %v1940_v51  ;;  %v1397_v42 = vpop.f32.mrf.mxu0  ;;  %v1944_v46 = vadd.f32 1.0, %v1943_v29  ;;  %v6331_v59 = vpop.f32.mrf.mxu3  ;;  %vm6351_vm2 = vcmp.lt.f32.partialorder %v1946_v53, 0.0004427343 }
 0x1f4   : > { %4953 = vlog2.f32 %v1949_v1  ;;  %v6318_v58 = vadd.f32 %v1397_v42, %v6278_v32  ;;  %v1411_v14 = vpop.f32.mrf.mxu1  ;;  %v1953_v16 = vadd.f32 1.0, %v1952_v23  ;;  %vm6358_vm4 = vcmp.lt.f32.partialorder %v1955_v20, 0.0004427343 }
 0x1f5   : > { %4955 = vpow2.f32 %v1882_v52  ;;  %v6321_v55 = vadd.f32 %v1411_v14, %v6278_v32  ;;  %v1945_v27 = vmul.f32 %v4946_v28, %v1944_v46  ;;  %v6379_v42 = vadd.f32 %v6307_v48, %v6355_v39 }
 0x1f6   : > { %v1848_v26 = vmin.f32 %v6318_v58, 20.0  ;;  %v1954_v56 = vmul.f32 %v4948_v50, %v1953_v16  ;;  %vm1816_vm11 = vcmp.gt.f32.partialorder %v6318_v58, 20.0 }
 0x1f7   : > { %v1849_v62 = vmin.f32 %v6321_v55, 20.0  ;;  %v4950_v8 = vpop.eup %4949  ;;  %vm1817_vm13 = vcmp.gt.f32.partialorder %v6321_v55, 20.0 }
 0x1f8   : > { %v1884_v43 = vmul.f32 1.442695, %v1848_v26  ;;  %v1958_v60 = vadd.f32 1.0, %v4950_v8  ;;  %v1961_v19 = vmul.f32 -0.5, %v4950_v8  ;;  %v1964_v0 = vand.u32 2147483647, %v4950_v8 }
 0x1f9   : > { %v4952_v21 = vpop.eup %4951  ;;  %v1886_v11 = vmul.f32 1.442695, %v1849_v62 }
 0x1fa   : > { %v4954_v12 = vpop.eup %4953  ;;  %v1942_v54 = vmul.f32 0.6931472, %v4952_v21  ;;  %4957 = vpow2.f32 %v1884_v43  ;;  %v1962_v33 = vadd.f32 1.0, %v1961_v19  ;;  %v1425_v13 = vpop.f32.mrf.mxu2  ;;  %vm6381_vm7 = vcmp.lt.f32.partialorder %v1964_v0, 0.0004427343 }
 0x1fb   : > { %v4956_v57 = vpop.eup %4955  ;;  %v1951_v3 = vmul.f32 0.6931472, %v4954_v12  ;;  %4959 = vlog2.f32 %v1958_v60  ;;  %v6374_v51 = vadd.f32 %v1425_v13, %v6278_v32  ;;  %v1439_v23 = vpop.f32.mrf.mxu3 }
 0x1fc   : > { %v1948_v30 = vsel %vm6351_vm2, %v1945_v27, %v1942_v54  ;;  %v1967_v4 = vadd.f32 1.0, %v4956_v57  ;;  %v1970_v37 = vmul.f32 -0.5, %v4956_v57  ;;  %4961 = vpow2.f32 %v1886_v11 }
 0x1fd   : > { %v2228_v61 = vsel %vm1812_vm3, %v6287_v45, %v1948_v30  ;;  %v1957_v6 = vsel %vm6358_vm4, %v1954_v56, %v1951_v3  ;;  %v1973_v50 = vand.u32 2147483647, %v4956_v57  ;;  %v1963_v1 = vmul.f32 %v4950_v8, %v1962_v33 }
 0x1fe   : > { %v2260_v38 = vsub.f32 0.0, %v2228_v61  ;;  %v2229_v49 = vsel %vm1813_vm5, %v6290_v40, %v1957_v6  ;;  %4963 = vlog2.f32 %v1967_v4  ;;  %v1971_v28 = vadd.f32 1.0, %v1970_v37 }
 0x1ff   : > { %v2261_v22 = vsub.f32 0.0, %v2229_v49  ;;  %v1850_v62 = vmin.f32 %v6374_v51, 20.0  ;;  %vm6387_vm9 = vcmp.lt.f32.partialorder %v1973_v50, 0.0004427343  ;;  %v6392_v63 = vadd.f32 %v1439_v23, %v6278_v32 }
 0x200   : > { %v4958_v29 = vpop.eup %4957  ;;  %v2292_v52 = vmul.f32 1.442695, %v2260_v38  ;;  %v1972_v27 = vmul.f32 %v4956_v57, %v1971_v28  ;;  %v6401_v54 = vadd.f32 %v6315_v17, %v6355_v39  ;;  %v6408_v37 = vadd.f32 %v6331_v59, %v6355_v39 }
 0x201   : > { %v4960_v46 = vpop.eup %4959  ;;  %v2294_v53 = vmul.f32 1.442695, %v2261_v22  ;;  %v1976_v16 = vadd.f32 1.0, %v4958_v29  ;;  %v1979_v20 = vmul.f32 -0.5, %v4958_v29  ;;  %v1982_v57 = vand.u32 2147483647, %v4958_v29 }
 0x202   : > { %4965 = vpow2.f32 %v2292_v52  ;;  %v1960_v26 = vmul.f32 0.6931472, %v4960_v46  ;;  %v4962_v8 = vpop.eup %4961  ;;  %v1888_v3 = vmul.f32 1.442695, %v1850_v62  ;;  %v1851_v4 = vmin.f32 %v6392_v63, 20.0 }
 0x203   : > { %4967 = vpow2.f32 %v2294_v53  ;;  %v1985_v56 = vadd.f32 1.0, %v4962_v8  ;;  %v1988_v60 = vmul.f32 -0.5, %v4962_v8  ;;  %v1980_v12 = vadd.f32 1.0, %v1979_v20  ;;  %v1399_v20 = vpop.f32.mrf.mxu0 }
 0x204   : > { %v4964_v43 = vpop.eup %4963  ;;  %v1966_v21 = vsel %vm6381_vm7, %v1963_v1, %v1960_v26  ;;  %4969 = vlog2.f32 %v1976_v16  ;;  %v1991_v6 = vand.u32 2147483647, %v4962_v8  ;;  %v1890_v28 = vmul.f32 1.442695, %v1851_v4 }
 0x205   : > { %v2230_v19 = vsel %vm1814_vm6, %v6300_v15, %v1966_v21  ;;  %v1969_v11 = vmul.f32 0.6931472, %v4964_v43  ;;  %4971 = vlog2.f32 %v1985_v56  ;;  %v1989_v33 = vadd.f32 1.0, %v1988_v60 }
 0x206   : > { %v2262_v5 = vsub.f32 0.0, %v2230_v19  ;;  %4973 = vpow2.f32 %v1888_v3  ;;  %v1981_v22 = vmul.f32 %v4958_v29, %v1980_v12  ;;  %vm6414_vm12 = vcmp.lt.f32.partialorder %v1982_v57, 0.0004427343 }
 0x207   : > { %v1975_v30 = vsel %vm6387_vm9, %v1972_v27, %v1969_v11  ;;  %v1990_v53 = vmul.f32 %v4962_v8, %v1989_v33  ;;  %vm6427_vm14 = vcmp.lt.f32.partialorder %v1991_v6, 0.0004427343  ;;  %v9044_v62 = vmov 0.0  }
 0x208   : > { %v4966_v13 = vpop.eup %4965  ;;  %v2296_v61 = vmul.f32 1.442695, %v2262_v5  ;;  %v2231_v17 = vsel %vm1815_vm8, %v6305_v47, %v1975_v30  ;;  %v6440_v27 = vadd.f32 %v1399_v20, %v6355_v39  ;;  %vm1818_vm1 = vcmp.gt.f32.partialorder %v6374_v51, 20.0 }
 0x209   : > { %v4968_v0 = vpop.eup %4967  ;;  %v2356_v38 = vsub.f32 1.0, %v4966_v13  ;;  %v2263_v49 = vsub.f32 0.0, %v2231_v17  ;;  %vm2710_vm2 = vcmask 1043456   ;;  %vm1819_vm4 = vcmp.gt.f32.partialorder %v6392_v63, 20.0 }
 0x20a   : > { %v4970_v50 = vpop.eup %4969  ;;  %v2357_v52 = vsub.f32 1.0, %v4968_v0  ;;  %4975 = vpow2.f32 %v2296_v61 }
 0x20b   : > { %v6420_v1 = vmul.f32 %v2420_v35, %v2356_v38  ;;  %v2298_v23 = vmul.f32 1.442695, %v2263_v49  ;;  %v1978_v46 = vmul.f32 0.6931472, %v4970_v50  ;;  %v4972_v14 = vpop.eup %4971  ;;  %4977 = vpow2.f32 %v1890_v28 }
 0x20c   : > { %v6424_v29 = vmul.f32 %v2421_v41, %v2357_v52  ;;  %v1987_v35 = vmul.f32 0.6931472, %v4972_v14  ;;  %v4974_v26 = vpop.eup %4973 }
 0x20d   : > { %vm2516_vm15 = vcmp.gt.f32.partialorder %v6420_v1, 0.1  ;;  %4979 = vpow2.f32 %v2298_v23  ;;  %v1984_v2 = vsel %vm6414_vm12, %v1981_v22, %v1978_v46  ;;  %v1994_v12 = vadd.f32 1.0, %v4974_v26 }
 0x20e   : > { %v4838_v41 = vsel %vm2516_vm15, 1.0, %v9044_v62  ;;  %vm2517_vm0 = vcmp.gt.f32.partialorder %v6424_v29, 0.1  ;;  %v2232_v8 = vsel %vm1816_vm11, %v6318_v58, %v1984_v2  ;;  %v1993_v56 = vsel %vm6427_vm14, %v1990_v53, %v1987_v35  ;;  %v1413_v2 = vpop.f32.mrf.mxu1 }
 0x20f   : > { %v2612_v48 = vperm.slane %v4838_v41, 0  ;;  %v6443_v43 = vsel %vm2517_vm0, 1.0, %v9044_v62  ;;  %v2264_v21 = vsub.f32 0.0, %v2232_v8  ;;  %v2233_v11 = vsel %vm1817_vm13, %v6321_v55, %v1993_v56 }
 0x210   : > { %v4976_v60 = vpop.eup %4975  ;;  %v2613_v19 = vperm.slane %v6443_v43, 0  ;;  %v1997_v5 = vmul.f32 -0.5, %v4974_v26  ;;  %v2265_v33 = vsub.f32 0.0, %v2233_v11  ;;  %4981 = vlog2.f32 %v1994_v12 }
 0x211   : > { %v6452_v57 = vmul.f32 %v2612_v48, %v6287_v45  ;;  %v2358_v3 = vsub.f32 1.0, %v4976_v60  ;;  %v2300_v30 = vmul.f32 1.442695, %v2264_v21  ;;  %v4978_v4 = vpop.eup %4977  ;;  %v2000_v22 = vand.u32 2147483647, %v4974_v26 }
 0x212   : > { %v1998_v13 = vadd.f32 1.0, %v1997_v5  ;;  %v6456_v17 = vmul.f32 %v2613_v19, %v6290_v40  ;;  %v2302_v45 = vmul.f32 1.442695, %v2265_v33  ;;  %v2003_v28 = vadd.f32 1.0, %v4978_v4 }
 0x213   : > { %v4980_v61 = vpop.eup %4979  ;;  %v6460_v6 = vmul.f32 %v2422_v7, %v2358_v3  ;;  %4983 = vpow2.f32 %v2300_v30  ;;  %v2709_v0 = vsel %vm2708_vm10, %v6452_v57, -inf  ;;  %v2006_v50 = vmul.f32 -0.5, %v4978_v4 }
 0x214   : > { %v2359_v38 = vsub.f32 1.0, %v4980_v61  ;;  %v1999_v49 = vmul.f32 %v4974_v26, %v1998_v13  ;;  %4985 = vpow2.f32 %v2302_v45  ;;  %v2009_v7 = vand.u32 2147483647, %v4978_v4 }
 0x215   : > { %vm2518_vm3 = vcmp.gt.f32.partialorder %v6460_v6, 0.1  ;;  %v6472_v59 = vmul.f32 %v2612_v48, %v6365_v25  ;;  %4987 = vlog2.f32 %v2003_v28  ;;  %v2007_v46 = vadd.f32 1.0, %v2006_v50 }
 0x216   : > { %v4840_v40 = vsel %vm2518_vm3, 1.0, %v9044_v62  ;;  %v6468_v52 = vmul.f32 %v2423_v44, %v2359_v38  ;;  %v4982_v14 = vpop.eup %4981  ;;  %vm6475_vm6 = vcmp.lt.f32.partialorder %v2000_v22, 0.0004427343  ;;  %v6482_v35 = vmul.f32 %v2613_v19, %v6379_v42 }
 0x217   : > { %v2614_v23 = vperm.slane %v4840_v40, 0  ;;  %v4031_v53 = vadd.f32 %v4840_v40, %v4838_v41  ;;  %v2711_v44 = vsel %vm2710_vm2, %v6472_v59, -inf  ;;  %v1996_v41 = vmul.f32 0.6931472, %v4982_v14 }
 0x218   : > { %vm2519_vm5 = vcmp.gt.f32.partialorder %v6468_v52, 0.1  ;;  %v1414_v8 = vadd.f32 %v1413_v2, %v6355_v39  ;;  %v2712_v60 = vmax.f32 %v2709_v0, %v2711_v44  ;;  %v2719_v42 = vsel %vm2708_vm10, %v6456_v17, -inf }
 0x219   : > { %v4984_v25 = vpop.eup %4983  ;;  %v6485_v20 = vmul.f32 %v2614_v23, %v6300_v15  ;;  %v6488_v26 = vsel %vm2519_vm5, 1.0, %v9044_v62  ;;  %v6493_v56 = vmul.f32 %v2614_v23, %v6401_v54  ;;  %v2002_v15 = vsel %vm6475_vm6, %v1999_v49, %v1996_v41 }
 0x21a   : > { %v2615_v48 = vperm.slane %v6488_v26, 0  ;;  %v2360_v21 = vsub.f32 1.0, %v4984_v25  ;;  %v4986_v11 = vpop.eup %4985  ;;  %v2008_v19 = vmul.f32 %v4978_v4, %v2007_v46  ;;  %vm6499_vm7 = vcmp.lt.f32.partialorder %v2009_v7, 0.0004427343 }
 0x21b   : > { %v2728_v5 = vsel %vm2708_vm10, %v6485_v20, -inf  ;;  %v2361_v3 = vsub.f32 1.0, %v4986_v11  ;;  %v2234_v30 = vsel %vm1818_vm1, %v6374_v51, %v2002_v15  ;;  %v4988_v33 = vpop.eup %4987  ;;  %v2713_v61 = vrot.slane %v2712_v60, 4 }
 0x21c   : > { %v6507_v54 = vmul.f32 %v2424_v10, %v2360_v21  ;;  %v2266_v13 = vsub.f32 0.0, %v2234_v30  ;;  %v2729_v4 = vsel %vm2710_vm2, %v6493_v56, -inf  ;;  %v2720_v45 = vsel %vm2710_vm2, %v6482_v35, -inf }
 0x21d   : > { %v6517_v0 = vmul.f32 %v2615_v48, %v6305_v47  ;;  %v6522_v10 = vmul.f32 %v2425_v18, %v2361_v3  ;;  %v2005_v38 = vmul.f32 0.6931472, %v4988_v33  ;;  %v2714_v28 = vmax.f32 %v2712_v60, %v2713_v61 }
 0x21e   : > { %vm2520_vm8 = vcmp.gt.f32.partialorder %v6507_v54, 0.1  ;;  %v2304_v22 = vmul.f32 1.442695, %v2266_v13  ;;  %v2730_v50 = vmax.f32 %v2728_v5, %v2729_v4  ;;  %v6542_v41 = vmul.f32 %v2615_v48, %v6408_v37  ;;  %v6552_v5 = vld [vmem:[%s5692_s15 + $0x130] sm:$0xff] }
 0x21f   : > { %v4842_v49 = vsel %vm2520_vm8, 1.0, %v9044_v62  ;;  %vm2521_vm9 = vcmp.gt.f32.partialorder %v6522_v10, 0.1  ;;  %v2011_v7 = vsel %vm6499_vm7, %v2008_v19, %v2005_v38  ;;  %v2715_v46 = vrot.slane %v2714_v28, 2 }
 0x220   : > { %v2616_v40 = vperm.slane %v4842_v49, 0  ;;  %v4061_v47 = vadd.f32 %v4842_v49, %v4031_v53  ;;  %v6529_v23 = vsel %vm2521_vm9, 1.0, %v9044_v62  ;;  %4989 = vpow2.f32 %v2304_v22 }
 0x221   : > { %v2235_v18 = vsel %vm1819_vm4, %v6392_v63, %v2011_v7  ;;  %v2617_v16 = vperm.slane %v6529_v23, 0  ;;  %v2716_v53 = vmax.f32 %v2714_v28, %v2715_v46  ;;  %v2731_v25 = vrot.slane %v2730_v50, 4 }
 0x222   : > { %v6535_v14 = vmul.f32 %v2616_v40, %v6318_v58  ;;  %v2267_v2 = vsub.f32 0.0, %v2235_v18  ;;  %v6539_v44 = vmul.f32 %v2616_v40, %v6440_v27  ;;  %v2721_v21 = vmax.f32 %v2719_v42, %v2720_v45  ;;  %v6570_v40 = vld [vmem:[%s5692_s15 + $0x138] sm:$0xff]  ;;  %v1427_v18 = vpop.f32.mrf.mxu2 }
 0x223   : > { %v6547_v11 = vmul.f32 %v2617_v16, %v6321_v55  ;;  %v2717_v19 = vrot.slane %v2716_v53, 1  ;;  %v2732_v12 = vmax.f32 %v2730_v50, %v2731_v25  ;;  %v2426_v3 = vrot.slane %v6552_v5, 1 }
 0x224   : > { %v2746_v60 = vsel %vm2708_vm10, %v6535_v14, -inf  ;;  %v2306_v58 = vmul.f32 1.442695, %v2267_v2  ;;  %v2747_v15 = vsel %vm2710_vm2, %v6539_v44, -inf  ;;  %v6555_v37 = vmul.f32 %v2617_v16, %v1414_v8 }
 0x225   : > { %v2748_v27 = vmax.f32 %v2746_v60, %v2747_v15  ;;  %v2722_v48 = vrot.slane %v2721_v21, 4  ;;  %v2718_v30 = vmax.f32 %v2716_v53, %v2717_v19  ;;  %v2733_v55 = vrot.slane %v2732_v12, 2 }
 0x226   : > { %4991 = vpow2.f32 %v2306_v58  ;;  %v4990_v42 = vpop.eup %4989  ;;  %v2737_v13 = vsel %vm2708_vm10, %v6517_v0, -inf  ;;  %v2755_v61 = vsel %vm2708_vm10, %v6547_v11, -inf  ;;  %v2738_v45 = vsel %vm2710_vm2, %v6542_v41, -inf }
 0x227   : > { %v2749_v33 = vrot.slane %v2748_v27, 4  ;;  %v2362_v4 = vsub.f32 1.0, %v4990_v42  ;;  %v2734_v38 = vmax.f32 %v2732_v12, %v2733_v55  ;;  %vm2998_vm11 = vcmp.ge.f32.partialorder %v6452_v57, %v2718_v30 }
 0x228   : > { %v2756_v8 = vsel %vm2710_vm2, %v6555_v37, -inf  ;;  %v4870_v28 = vsel %vm2998_vm11, 1.0, %v9044_v62  ;;  %v2723_v50 = vmax.f32 %v2721_v21, %v2722_v48  ;;  %v2427_v7 = vrot.slane %v6570_v40, 1 }
 0x229   : > { %v2750_v49 = vmax.f32 %v2748_v27, %v2749_v33  ;;  %v6566_v22 = vmul.f32 %v2426_v3, %v2362_v4  ;;  %v2735_v46 = vrot.slane %v2734_v38, 1  ;;  %v3094_v2 = vsub.f32 1.0, %v4870_v28 }
 0x22a   : > { %v1428_v25 = vadd.f32 %v1427_v18, %v6355_v39  ;;  %v2739_v60 = vmax.f32 %v2737_v13, %v2738_v45  ;;  %v2757_v58 = vmax.f32 %v2755_v61, %v2756_v8  ;;  %v2724_v42 = vrot.slane %v2723_v50, 2 }
 0x22b   : > { %v2751_v16 = vrot.slane %v2750_v49, 2  ;;  %vm2522_vm12 = vcmp.gt.f32.partialorder %v6566_v22, 0.1  ;;  %v2736_v19 = vmax.f32 %v2734_v38, %v2735_v46  ;;  %v3158_v21 = vrot.slane %v3094_v2, 4 }
 0x22c   : > { %v4992_v53 = vpop.eup %4991  ;;  %v4844_v15 = vsel %vm2522_vm12, 1.0, %v9044_v62 }
 0x22d   : > { %v2752_v12 = vmax.f32 %v2750_v49, %v2751_v16  ;;  %v2618_v27 = vperm.slane %v4844_v15, 0  ;;  %v6576_v3 = vadd.f32 %v4844_v15, %v4061_v47  ;;  %v2363_v48 = vsub.f32 1.0, %v4992_v53 }
 0x22e   : > { %vm3000_vm13 = vcmp.ge.f32.partialorder %v6485_v20, %v2736_v19  ;;  %v6580_v55 = vmul.f32 %v3158_v21, %v6420_v1  ;;  %v2758_v15 = vrot.slane %v2757_v58, 4 }
 0x22f   : > { %v2753_v30 = vrot.slane %v2752_v12, 1  ;;  %v6583_v33 = vmul.f32 %v2618_v27, %v6374_v51  ;;  %v6585_v13 = vmul.f32 %v2618_v27, %v1428_v25  ;;  %v4872_v61 = vsel %vm3000_vm13, 1.0, %v9044_v62  ;;  %v1441_v27 = vpop.f32.mrf.mxu3 }
 0x230   : > { %9207 = vst [vmem:[#allocation5_spill] sm:$0xff] %v6580_v55  ;;  %v6588_v4 = vmul.f32 %v2427_v7, %v2363_v48  ;;  %v3096_v47 = vsub.f32 1.0, %v4872_v61  ;;  %v6591_v38 = vsub.f32 1.0, %v6580_v55  ;;  %v2725_v51 = vmax.f32 %v2723_v50, %v2724_v42 }
 0x231   : > { %v2754_v45 = vmax.f32 %v2752_v12, %v2753_v30  ;;  %v2764_v49 = vsel %vm2708_vm10, %v6583_v33, -inf  ;;  %v2765_v1 = vsel %vm2710_vm2, %v6585_v13, -inf  ;;  %v2740_v50 = vrot.slane %v2739_v60, 4 }
 0x232   : > { %9208 = vst [vmem:[#allocation6_spill] sm:$0xff] %v6591_v38  ;;  %vm2523_vm14 = vcmp.gt.f32.partialorder %v6588_v4, 0.1  ;;  %v2766_v8 = vmax.f32 %v2764_v49, %v2765_v1  ;;  %v3160_v28 = vrot.slane %v3096_v47, 4  ;;  %v3286_v7 = vadd.f32 1e-10, %v6591_v38 }
 0x233   : > { %vm3002_vm15 = vcmp.ge.f32.partialorder %v6535_v14, %v2754_v45  ;;  %v6602_v46 = vsel %vm2523_vm14, 1.0, %v9044_v62  ;;  %v2726_v48 = vrot.slane %v2725_v51, 1  ;;  %v1442_v42 = vadd.f32 %v1441_v27, %v6355_v39 }
 0x234   : > { %v4874_v18 = vsel %vm3002_vm15, 1.0, %v9044_v62  ;;  %v2767_v16 = vrot.slane %v2766_v8, 4  ;;  %v6605_v53 = vmul.f32 %v3160_v28, %v6460_v6  ;;  %4993 = vlog2.f32 %v3286_v7 }
 0x235   : > { %v3098_v2 = vsub.f32 1.0, %v4874_v18  ;;  %v2619_v25 = vperm.slane %v6602_v46, 0  ;;  %v2741_v61 = vmax.f32 %v2739_v60, %v2740_v50  ;;  %v2727_v18 = vmax.f32 %v2725_v51, %v2726_v48 }
 0x236   : > { %9209 = vst [vmem:[#allocation7_spill] sm:$0xff] %v6605_v53  ;;  %v2768_v19 = vmax.f32 %v2766_v8, %v2767_v16  ;;  %v6609_v21 = vsub.f32 1.0, %v6605_v53  ;;  %v2759_v8 = vmax.f32 %v2757_v58, %v2758_v15  ;;  %v3863_v58 = vperm.slane %v6580_v55, 0 }
 0x237   : > { %v3162_v12 = vrot.slane %v3098_v2, 4  ;;  %v6613_v30 = vmul.f32 %v2619_v25, %v6392_v63  ;;  %v6619_v49 = vmul.f32 %v2619_v25, %v1442_v42  ;;  %v2742_v1 = vrot.slane %v2741_v61, 2 }
 0x238   : > { %9210 = vst [vmem:[#allocation8_spill] sm:$0xff] %v6609_v21  ;;  %v2769_v6 = vrot.slane %v2768_v19, 2  ;;  %v3288_v47 = vadd.f32 1e-10, %v6609_v21  ;;  %v2760_v27 = vrot.slane %v2759_v8, 2  ;;  %vm2999_vm0 = vcmp.ge.f32.partialorder %v6456_v17, %v2727_v18 }
 0x239   : > { %v6616_v45 = vmul.f32 %v3162_v12, %v6507_v54  ;;  %v2743_v2 = vmax.f32 %v2741_v61, %v2742_v1  ;;  %v2773_v63 = vsel %vm2708_vm10, %v6613_v30, -inf  ;;  %v2774_v25 = vsel %vm2710_vm2, %v6619_v49, -inf }
 0x23a   : > { %v4994_v28 = vpop.eup %4993  ;;  %v2770_v7 = vmax.f32 %v2768_v19, %v2769_v6  ;;  %4995 = vlog2.f32 %v3288_v47  ;;  %v2761_v12 = vmax.f32 %v2759_v8, %v2760_v27  ;;  %v2775_v15 = vmax.f32 %v2773_v63, %v2774_v25 }
 0x23b   : > { %9211 = vst [vmem:[#allocation9_spill] sm:$0xff] %v6616_v45  ;;  %v3317_v16 = vmul.f32 0.6931472, %v4994_v28  ;;  %v2744_v54 = vrot.slane %v2743_v2, 1  ;;  %v4871_v48 = vsel %vm2999_vm0, 1.0, %v9044_v62  ;;  %v4032_v1 = vadd.f32 %v6488_v26, %v6443_v43 }
 0x23c   : > { %v2771_v60 = vrot.slane %v2770_v7, 1  ;;  %v2762_v19 = vrot.slane %v2761_v12, 1  ;;  %v2776_v6 = vrot.slane %v2775_v15, 4  ;;  %v3095_v47 = vsub.f32 1.0, %v4871_v48 }
 0x23d   : > { %v4005_v50 = vmul.f32 1.442695, %v3317_v16  ;;  %v2745_v51 = vmax.f32 %v2743_v2, %v2744_v54  ;;  %v6639_v54 = vadd.f32 %v6529_v23, %v4032_v1  ;;  %v3895_v48 = vmul.f32 %v3863_v58, %v6452_v57 }
 0x23e   : > { %v2772_v42 = vmax.f32 %v2770_v7, %v2771_v60  ;;  %v2763_v7 = vmax.f32 %v2761_v12, %v2762_v19  ;;  %v2777_v27 = vmax.f32 %v2775_v15, %v2776_v6  ;;  %v3159_v63 = vrot.slane %v3095_v47, 4 }
 0x23f   : > { %4997 = vpow2.f32 %v4005_v50  ;;  %vm3001_vm3 = vcmp.ge.f32.partialorder %v6517_v0, %v2745_v51  ;;  %v3865_v60 = vperm.slane %v6605_v53, 0  ;;  %v3927_v6 = vmul.f32 %v3863_v58, %v6472_v59 }
 0x240   : > { %v4996_v61 = vpop.eup %4995  ;;  %vm3004_vm1 = vcmp.ge.f32.partialorder %v6583_v33, %v2772_v42  ;;  %v4873_v2 = vsel %vm3001_vm3, 1.0, %v9044_v62  ;;  %vm3003_vm4 = vcmp.ge.f32.partialorder %v6547_v11, %v2763_v7  ;;  %v2778_v26 = vrot.slane %v2777_v27, 2 }
 0x241   : > { %v4876_v8 = vsel %vm3004_vm1, 1.0, %v9044_v62  ;;  %v3321_v28 = vmul.f32 0.6931472, %v4996_v61  ;;  %v4875_v12 = vsel %vm3003_vm4, 1.0, %v9044_v62  ;;  %v6643_v25 = vmul.f32 %v3159_v63, %v6424_v29 }
 0x242   : > { %v3100_v18 = vsub.f32 1.0, %v4876_v8  ;;  %v3097_v51 = vsub.f32 1.0, %v4873_v2  ;;  %v3099_v19 = vsub.f32 1.0, %v4875_v12  ;;  %v3897_v61 = vmul.f32 %v3865_v60, %v6485_v20 }
 0x243   : > { %v6635_v50 = vadd.f32 %v3321_v28, %v3317_v16  ;;  %9212 = vst [vmem:[#allocation10_spill] sm:$0xff] %v6643_v25  ;;  %v3929_v29 = vmul.f32 %v3865_v60, %v6493_v56  ;;  %v6657_v47 = vsub.f32 1.0, %v6616_v45  ;;  %v2779_v8 = vmax.f32 %v2777_v27, %v2778_v26 }
 0x244   : > { %v3164_v43 = vrot.slane %v3100_v18, 4  ;;  %v3161_v7 = vrot.slane %v3097_v51, 4  ;;  %v3163_v18 = vrot.slane %v3099_v19, 4  ;;  %v3867_v59 = vperm.slane %v6616_v45, 0 }
 0x245   : > { %v6645_v42 = vpop.eup %4997  ;;  %v4035_v15 = vmul.f32 1.442695, %v6635_v50  ;;  %9215 = vst [vmem:[#allocation13_spill] sm:$0xff] %v6657_v47  ;;  %v2780_v2 = vrot.slane %v2779_v8, 1  ;;  %v3290_v60 = vadd.f32 1e-10, %v6657_v47 }
 0x246   : > { %9213 = vst [vmem:[#allocation11_spill] sm:$0xff] %v6645_v42  ;;  %v6649_v16 = vmul.f32 %v3164_v43, %v6566_v22  ;;  %v4013_v23 = vperm.slane %v6645_v42, 0  ;;  %v6669_v43 = vmul.f32 %v3161_v7, %v6468_v52  ;;  %v6672_v27 = vmul.f32 %v3163_v18, %v6522_v10 }
 0x247   : > { %4999 = vpow2.f32 %v4035_v15  ;;  %v6675_v26 = vsub.f32 1.0, %v6643_v25  ;;  %v3899_v12 = vmul.f32 %v3867_v59, %v6535_v14  ;;  %v3931_v15 = vmul.f32 %v3867_v59, %v6539_v44 }
 0x248   : > { %9214 = vst [vmem:[#allocation12_spill] sm:$0xff] %v6649_v16  ;;  %v6660_v1 = vsub.f32 1.0, %v6649_v16  ;;  %v3414_v22 = vmax.f32 %v6649_v16, 1e-30  ;;  %v4015_v28 = vmul.f32 %v4013_v23, %v3897_v61  ;;  %v4017_v57 = vmul.f32 %v4013_v23, %v3929_v29 }
 0x249   : > { %9217 = vst [vmem:[#allocation15_spill] sm:$0xff] %v6669_v43  ;;  %v2781_v19 = vmax.f32 %v2779_v8, %v2780_v2  ;;  %v6684_v23 = vsub.f32 1.0, %v6672_v27  ;;  %v3287_v52 = vadd.f32 1e-10, %v6675_v26  ;;  %v3864_v29 = vperm.slane %v6643_v25, 0 }
 0x24a   : > { %5001 = vlog2.f32 %v3414_v22  ;;  %v3606_v20 = vmax.f32 %v6660_v1, 1e-30  ;;  %v4019_v56 = vadd.f32 %v4015_v28, %v3895_v48  ;;  %v4021_v58 = vadd.f32 %v4017_v57, %v3927_v6  ;;  %9218 = vst [vmem:[#allocation16_spill] sm:$0xff] %v6672_v27 }
 0x24b   : > { %9219 = vst [vmem:[#allocation17_spill] sm:$0xff] %v6675_v26  ;;  %v6681_v48 = vsub.f32 1.0, %v6669_v43  ;;  %v3291_v22 = vadd.f32 1e-10, %v6684_v23  ;;  %vm3005_vm5 = vcmp.ge.f32.partialorder %v6613_v30, %v2781_v19  ;;  %v3868_v59 = vperm.slane %v6672_v27, 0 }
 0x24c   : > { %5003 = vlog2.f32 %v3606_v20  ;;  %9221 = vst [vmem:[#allocation19_spill] sm:$0xff] %v6684_v23  ;;  %v3866_v20 = vperm.slane %v6669_v43, 0  ;;  %v6699_v2 = vmul.f32 %v3864_v29, %v6456_v17  ;;  %vm3382_vm6 = vcmp.gt.f32.partialorder %v6649_v16, 0.0  ;;  %v1481_v23 = vpop.f32.mrf.mxu2 }
 0x24d   : > { %v6665_v63 = vpop.eup %4999  ;;  %9220 = vst [vmem:[#allocation18_spill] sm:$0xff] %v6681_v48  ;;  %5005 = vlog2.f32 %v3290_v60  ;;  %v3289_v44 = vadd.f32 1e-10, %v6681_v48  ;;  %vm3574_vm7 = vcmp.gt.f32.partialorder %v6660_v1, 0.0  ;;  %v6712_v17 = vmul.f32 %v3864_v29, %v6482_v35 }
 0x24e   : > { %9216 = vst [vmem:[#allocation14_spill] sm:$0xff] %v6665_v63  ;;  %v4043_v51 = vperm.slane %v6665_v63, 0  ;;  %5007 = vlog2.f32 %v3287_v52  ;;  %v3898_v60 = vmul.f32 %v3866_v20, %v6517_v0 }
 0x24f   : > { %5009 = vlog2.f32 %v3289_v44 }
 0x250   : > { %v5002_v10 = vpop.eup %5001  ;;  %v4045_v61 = vmul.f32 %v4043_v51, %v3899_v12  ;;  %v4047_v6 = vmul.f32 %v4043_v51, %v3931_v15  ;;  %5011 = vlog2.f32 %v3291_v22  ;;  %v6707_v12 = vmul.f32 %v3868_v59, %v6547_v11 }
 0x251   : > { %v3453_v14 = vmul.f32 0.6931472, %v5002_v10  ;;  %v3932_v11 = vmul.f32 %v3868_v59, %v6555_v37  ;;  %v6730_v37 = vadd.f32 %v1481_v23, %v6278_v32 }
 0x252   : > { %v5004_v8 = vpop.eup %5003  ;;  %v6690_v28 = vadd.f32 %v4045_v61, %v4019_v56  ;;  %v6692_v57 = vadd.f32 %v4047_v6, %v4021_v58  ;;  %v4877_v58 = vsel %vm3005_vm5, 1.0, %v9044_v62 }
 0x253   : > { %v3510_v7 = vmul.f32 %v3453_v14, %v6649_v16  ;;  %v3645_v18 = vmul.f32 0.6931472, %v5004_v8  ;;  %v5006_v15 = vpop.eup %5005  ;;  %v3101_v6 = vsub.f32 1.0, %v4877_v58  ;;  %v3930_v14 = vmul.f32 %v3866_v20, %v6542_v41 }
 0x254   : > { %v5008_v52 = vpop.eup %5007  ;;  %v3325_v22 = vmul.f32 0.6931472, %v5006_v15  ;;  %v6721_v58 = vadd.f32 %v6602_v46, %v6639_v54  ;;  %vm1822_vm14 = vcmp.gt.f32.partialorder %v6730_v37, 20.0 }
 0x255   : > { %v3702_v56 = vmul.f32 %v3645_v18, %v6660_v1  ;;  %v3542_v51 = vsel %vm3382_vm6, %v3510_v7, 0.0  ;;  %v5010_v61 = vpop.eup %5009  ;;  %v3319_v8 = vmul.f32 0.6931472, %v5008_v52  ;;  %v1453_v18 = vpop.f32.mrf.mxu0  ;;  %v3165_v62 = vrot.slane %v3101_v6, 4 }
 0x256   : > { %v5012_v44 = vpop.eup %5011  ;;  %v3323_v0 = vmul.f32 0.6931472, %v5010_v61  ;;  %v6724_v41 = vadd.f32 %v1453_v18, %v6278_v32  ;;  %v1854_v61 = vmin.f32 %v6730_v37, 20.0 }
 0x257   : > { %v3734_v19 = vsel %vm3574_vm7, %v3702_v56, 0.0  ;;  %v3327_v7 = vmul.f32 0.6931472, %v5012_v44  ;;  %v1467_v56 = vpop.f32.mrf.mxu1  ;;  %v4007_v35 = vmul.f32 1.442695, %v3319_v8  ;;  %v6733_v59 = vmul.f32 %v3165_v62, %v6588_v4  ;;  %v1495_v44 = vpop.f32.mrf.mxu3 }
 0x258   : > { %v6709_v10 = vadd.f32 %v3734_v19, %v3542_v51  ;;  %v6717_v51 = vadd.f32 %v6635_v50, %v3325_v22  ;;  %v4034_v29 = vadd.f32 %v3323_v0, %v3319_v8  ;;  %v6727_v20 = vadd.f32 %v1467_v56, %v6278_v32 }
 0x259   : > { %5013 = vpow2.f32 %v4007_v35  ;;  %v1852_v19 = vmin.f32 %v6724_v41, 20.0  ;;  %v3870_v62 = vperm.slane %v6733_v59, 0  ;;  %v1896_v4 = vmul.f32 1.442695, %v1854_v61 }
 0x25a   : > { %9222 = vst [vmem:[#allocation20_spill] sm:$0xff] %v6709_v10  ;;  %v4037_v50 = vmul.f32 1.442695, %v4034_v29  ;;  %v6735_v15 = vadd.f32 %v4034_v29, %v3327_v7  ;;  %v1853_v46 = vmin.f32 %v6727_v20, 20.0  ;;  %v4065_v54 = vmul.f32 1.442695, %v6717_v51 }
 0x25b   : > { %v1892_v23 = vmul.f32 1.442695, %v1852_v19  ;;  %v3962_v22 = vmul.f32 %v6339_v24, %v6669_v43  ;;  %v6748_v0 = vadd.f32 %v1495_v44, %v6278_v32  ;;  %v3902_v29 = vmul.f32 %v3870_v62, %v6613_v30 }
 0x25c   : > { %5015 = vpow2.f32 %v4037_v50  ;;  %v4067_v52 = vmul.f32 1.442695, %v6735_v15  ;;  %v1894_v6 = vmul.f32 1.442695, %v1853_v46  ;;  %v3960_v24 = vmul.f32 %v6328_v36, %v6643_v25 }
 0x25d   : > { %v3964_v50 = vmul.f32 %v6348_v9, %v6672_v27  ;;  %v3966_v19 = vmul.f32 %v6570_v40, %v6733_v59  ;;  %v6770_v44 = vpop.f32.mrf.mxu0  ;;  %vm1820_vm9 = vcmp.gt.f32.partialorder %v6724_v41, 20.0  ;;  %vm1821_vm13 = vcmp.gt.f32.partialorder %v6727_v20, 20.0 }
 0x25e   : > { %5017 = vpow2.f32 %v4067_v52  ;;  %vm1823_vm0 = vcmp.gt.f32.partialorder %v6748_v0, 20.0 }
 0x25f   : > { %5019 = vpow2.f32 %v1892_v23  ;;  %v6745_v8 = vpop.eup %5013 }
 0x260   : > { %9223 = vst [vmem:[#allocation21_spill] sm:$0xff] %v6745_v8  ;;  %5021 = vpow2.f32 %v4065_v54  ;;  %v4010_v18 = vmul.f32 %v6745_v8, %v6669_v43  ;;  %v4014_v7 = vperm.slane %v6745_v8, 0  ;;  %v4024_v56 = vmul.f32 %v6745_v8, %v3962_v22 }
 0x261   : > { %5023 = vpow2.f32 %v1894_v6 }
 0x262   : > { %v6754_v35 = vpop.eup %5015  ;;  %5025 = vpow2.f32 %v1896_v4  ;;  %v4012_v46 = vadd.f32 %v4010_v18, %v6643_v25  ;;  %v4016_v54 = vmul.f32 %v4014_v7, %v3898_v60  ;;  %v4018_v52 = vmul.f32 %v4014_v7, %v3930_v14 }
 0x263   : > { %9224 = vst [vmem:[#allocation22_spill] sm:$0xff] %v6754_v35  ;;  %v4026_v23 = vadd.f32 %v4024_v56, %v3960_v24  ;;  %v4040_v30 = vmul.f32 %v6754_v35, %v6672_v27  ;;  %v4044_v6 = vperm.slane %v6754_v35, 0  ;;  %v4054_v36 = vmul.f32 %v6754_v35, %v3964_v50 }
 0x264   : > { %v6764_v61 = vpop.eup %5017  ;;  %v4020_v4 = vadd.f32 %v4016_v54, %v6699_v2  ;;  %v4022_v40 = vadd.f32 %v4018_v52, %v6712_v17  ;;  %v1855_v14 = vmin.f32 %v6748_v0, 20.0  ;;  %v3934_v35 = vmul.f32 %v3870_v62, %v6619_v49 }
 0x265   : > { %9225 = vst [vmem:[#allocation23_spill] sm:$0xff] %v6764_v61  ;;  %v5020_v9 = vpop.eup %5019  ;;  %v4070_v60 = vmul.f32 %v6764_v61, %v6733_v59  ;;  %v4042_v18 = vadd.f32 %v4040_v30, %v4012_v46  ;;  %v4046_v7 = vmul.f32 %v4044_v6, %v6707_v12  ;;  %v4048_v56 = vmul.f32 %v4044_v6, %v3932_v11 }
 0x266   : > { %v6777_v22 = vpop.eup %5021  ;;  %v4056_v24 = vadd.f32 %v4054_v36, %v4026_v23  ;;  %v4074_v8 = vperm.slane %v6764_v61, 0  ;;  %v4084_v2 = vmul.f32 %v6764_v61, %v3966_v19  ;;  %v2012_v17 = vadd.f32 1.0, %v5020_v9 }
 0x267   : > { %9226 = vst [vmem:[#allocation24_spill] sm:$0xff] %v6777_v22  ;;  %v5024_v50 = vpop.eup %5023  ;;  %v4050_v52 = vadd.f32 %v4046_v7, %v4020_v4  ;;  %v4052_v48 = vadd.f32 %v4048_v56, %v4022_v40  ;;  %v6783_v26 = vadd.f32 %v4070_v60, %v4042_v18  ;;  %v2015_v27 = vmul.f32 -0.5, %v5020_v9  ;;  %v6791_v4 = vpop.f32.mrf.mxu1  ;;  %v5411_v7 = vld [vmem:[%s5692_s15 + $0x100] sm:$0xff] }
 0x268   : > { %v5026_v54 = vpop.eup %5025  ;;  %v4076_v43 = vmul.f32 %v4074_v8, %v3902_v29  ;;  %v4078_v46 = vmul.f32 %v4074_v8, %v3934_v35  ;;  %v6785_v30 = vadd.f32 %v4084_v2, %v4056_v24  ;;  %5027 = vlog2.f32 %v2012_v17 }
 0x269   : > { %9227 = vst [vmem:[#allocation25_spill] sm:$0xff] %v6783_v26  ;;  %v2016_v12 = vadd.f32 1.0, %v2015_v27  ;;  %v2021_v11 = vadd.f32 1.0, %v5024_v50  ;;  %v2024_v23 = vmul.f32 -0.5, %v5024_v50  ;;  %v1898_v49 = vmul.f32 1.442695, %v1855_v14  ;;  %v1509_v27 = vpop.f32.mrf.mxu0 }
 0x26a   : > { %v6787_v62 = vadd.f32 %v4076_v43, %v4050_v52  ;;  %v6789_v6 = vadd.f32 %v4078_v46, %v4052_v48  ;;  %v2018_v19 = vand.u32 2147483647, %v5020_v9  ;;  %v2030_v36 = vadd.f32 1.0, %v5026_v54 }
 0x26b   : > { %5029 = vlog2.f32 %v2021_v11  ;;  %v2025_v40 = vadd.f32 1.0, %v2024_v23  ;;  %v2033_v8 = vmul.f32 -0.5, %v5026_v54  ;;  %v2017_v35 = vmul.f32 %v5020_v9, %v2016_v12 }
 0x26c   : > { %5031 = vlog2.f32 %v2030_v36  ;;  %v2027_v29 = vand.u32 2147483647, %v5024_v50  ;;  %v3961_v43 = vmul.f32 %v6335_v34, %v6605_v53  ;;  %vm6795_vm8 = vcmp.lt.f32.partialorder %v2018_v19, 0.0004427343 }
 0x26d   : > { %5033 = vpow2.f32 %v1898_v49  ;;  %v2034_v14 = vadd.f32 1.0, %v2033_v8  ;;  %v2036_v18 = vand.u32 2147483647, %v5026_v54  ;;  %v3959_v56 = vmul.f32 %v5411_v7, %v6580_v55 }
 0x26e   : > { %v5028_v60 = vpop.eup %5027  ;;  %v3963_v24 = vmul.f32 %v6343_v31, %v6616_v45  ;;  %v3869_v2 = vperm.slane %v6649_v16, 0  ;;  %v4023_v17 = vmul.f32 %v6645_v42, %v3961_v43  ;;  %v2026_v52 = vmul.f32 %v5024_v50, %v2025_v40 }
 0x26f   : > { %v2014_v9 = vmul.f32 0.6931472, %v5028_v60  ;;  %v6806_v34 = vadd.f32 %v1509_v27, %v6278_v32  ;;  %vm6811_vm11 = vcmp.lt.f32.partialorder %v2027_v29, 0.0004427343  ;;  %v2035_v31 = vmul.f32 %v5026_v54, %v2034_v14  ;;  %v1523_v7 = vpop.f32.mrf.mxu1 }
 0x270   : > { %v3965_v49 = vmul.f32 %v6552_v5, %v6649_v16  ;;  %vm6818_vm12 = vcmp.lt.f32.partialorder %v2036_v18, 0.0004427343  ;;  %v6826_v5 = vpop.f32.mrf.mxu2  ;;  %v3901_v43 = vmul.f32 %v3869_v2, %v6583_v33 }
 0x271   : > { %v5030_v46 = vpop.eup %5029  ;;  %v2020_v12 = vsel %vm6795_vm8, %v2017_v35, %v2014_v9  ;;  %v1856_v60 = vmin.f32 %v6806_v34, 20.0  ;;  %v4073_v9 = vperm.slane %v6777_v22, 0  ;;  %vm1824_vm8 = vcmp.gt.f32.partialorder %v6806_v34, 20.0 }
 0x272   : > { %v5032_v23 = vpop.eup %5031  ;;  %v2236_v50 = vsel %vm1820_vm9, %v6724_v41, %v2020_v12  ;;  %v2023_v19 = vmul.f32 0.6931472, %v5030_v46  ;;  %v4053_v12 = vmul.f32 %v6665_v63, %v3963_v24  ;;  %v3933_v24 = vmul.f32 %v3869_v2, %v6585_v13 }
 0x273   : > { %v5034_v40 = vpop.eup %5033  ;;  %v2268_v8 = vsub.f32 0.0, %v2236_v50  ;;  %v2032_v35 = vmul.f32 0.6931472, %v5032_v23 }
 0x274   : > { %v2029_v54 = vsel %vm6811_vm11, %v2026_v52, %v2023_v19  ;;  %v2039_v29 = vadd.f32 1.0, %v5034_v40  ;;  %v2042_v27 = vmul.f32 -0.5, %v5034_v40  ;;  %v2045_v33 = vand.u32 2147483647, %v5034_v40 }
 0x275   : > { %v2308_v48 = vmul.f32 1.442695, %v2268_v8  ;;  %v2237_v14 = vsel %vm1821_vm13, %v6727_v20, %v2029_v54  ;;  %v2038_v18 = vsel %vm6818_vm12, %v2035_v31, %v2032_v35  ;;  %v1900_v19 = vmul.f32 1.442695, %v1856_v60  ;;  %v1497_v60 = vpop.f32.mrf.mxu3 }
 0x276   : > { %v2269_v46 = vsub.f32 0.0, %v2237_v14  ;;  %v2238_v52 = vsel %vm1822_vm14, %v6730_v37, %v2038_v18  ;;  %5035 = vlog2.f32 %v2039_v29  ;;  %v2043_v23 = vadd.f32 1.0, %v2042_v27  ;;  %v6849_v18 = vld [vmem:[%s5692_s15 + $0x140] sm:$0xff] }
 0x277   : > { %5037 = vpow2.f32 %v2308_v48  ;;  %v2270_v11 = vsub.f32 0.0, %v2238_v52  ;;  %v6837_v8 = vadd.f32 %v1523_v7, %v6278_v32  ;;  %v4025_v31 = vadd.f32 %v4023_v17, %v3959_v56 }
 0x278   : > { %v2310_v50 = vmul.f32 1.442695, %v2269_v46  ;;  %v4075_v35 = vmul.f32 %v4073_v9, %v3901_v43  ;;  %v4083_v54 = vmul.f32 %v6777_v22, %v3965_v49  ;;  %v6841_v14 = vsub.f32 1.0, %v6733_v59 }
 0x279   : > { %v2312_v36 = vmul.f32 1.442695, %v2270_v11  ;;  %v4055_v29 = vadd.f32 %v4053_v12, %v4025_v31  ;;  %v2044_v27 = vmul.f32 %v5034_v40, %v2043_v23  ;;  %vm6844_vm15 = vcmp.lt.f32.partialorder %v2045_v33, 0.0004427343  ;;  %v1537_v12 = vpop.f32.mrf.mxu2  ;;  %v6870_v23 = vld [vmem:[%s5692_s15 + $0x148] sm:$0xff]  ;;  %v6877_v31 = vld [vmem:[%s5692_s15 + $0x150] sm:$0xff] }
 0x27a   : > { %5039 = vpow2.f32 %v2310_v50  ;;  %v2428_v56 = vrot.slane %v6849_v18, 1  ;;  %v1857_v17 = vmin.f32 %v6837_v8, 20.0  ;;  %v3292_v43 = vadd.f32 1e-10, %v6660_v1 }
 0x27b   : > { %5041 = vpow2.f32 %v2312_v36  ;;  %v6854_v13 = vmul.f32 %v4073_v9, %v3933_v24  ;;  %v6858_v40 = vadd.f32 %v4075_v35, %v6690_v28  ;;  %v6860_v7 = vadd.f32 %v4083_v54, %v4055_v29 }
 0x27c   : > { %v5036_v48 = vpop.eup %5035  ;;  %5043 = vpow2.f32 %v1900_v19  ;;  %v3293_v46 = vadd.f32 1e-10, %v6841_v14  ;;  %v1456_v1 = vadd.f32 %v6770_v44, %v6355_v39  ;;  %v1470_v9 = vadd.f32 %v6791_v4, %v6355_v39 }
 0x27d   : > { %v5038_v49 = vpop.eup %5037  ;;  %v2041_v2 = vmul.f32 0.6931472, %v5036_v48  ;;  %v2429_v28 = vrot.slane %v6870_v23, 1  ;;  %v2430_v36 = vrot.slane %v6877_v31, 1  ;;  %v1902_v35 = vmul.f32 1.442695, %v1857_v17 }
 0x27e   : > { %v2364_v52 = vsub.f32 1.0, %v5038_v49  ;;  %5045 = vlog2.f32 %v3292_v43  ;;  %v6881_v4 = vadd.f32 %v1537_v12, %v6278_v32  ;;  %v9236_v49 = vmov 0.0   ;;  %v6892_v43 = vld [vmem:[%s5692_s15 + $0x158] sm:$0xff] }
 0x27f   : > { %v2047_v11 = vsel %vm6844_vm15, %v2044_v27, %v2041_v2  ;;  %5047 = vlog2.f32 %v3293_v46  ;;  %v1484_v27 = vadd.f32 %v6826_v5, %v6355_v39  ;;  %v6945_v10 = vadd.f32 %v6854_v13, %v6692_v57  ;;  %4629 = vst [vmem:[%s7898_s18 + $0x10] sm:$0xc0] %v9236_v49 }
 0x280   : > { %v5040_v50 = vpop.eup %5039  ;;  %v2239_v33 = vsel %vm1823_vm0, %v6748_v0, %v2047_v11  ;;  %v6874_v19 = vmul.f32 %v2428_v56, %v2364_v52  ;;  %v2431_v52 = vrot.slane %v6892_v43, 1  ;;  %5049 = vpow2.f32 %v1902_v35  ;;  %4630 = vst [vmem:[%s7898_s18 + $0x18] sm:$0xc0] %v9236_v49 }
 0x281   : > { %v5042_v54 = vpop.eup %5041  ;;  %v2271_v44 = vsub.f32 0.0, %v2239_v33  ;;  %v2365_v24 = vsub.f32 1.0, %v5040_v50  ;;  %v1858_v46 = vmin.f32 %v6881_v4, 20.0  ;;  %vm1825_vm11 = vcmp.gt.f32.partialorder %v6837_v8, 20.0 }
 0x282   : > { %v6883_v29 = vpop.eup %5043  ;;  %vm2524_vm1 = vcmp.gt.f32.partialorder %v6874_v19, 0.1  ;;  %v2366_v48 = vsub.f32 1.0, %v5042_v54  ;;  %vm1826_vm15 = vcmp.gt.f32.partialorder %v6881_v4, 20.0 }
 0x283   : > { %v2314_v56 = vmul.f32 1.442695, %v2271_v44  ;;  %v4846_v17 = vsel %vm2524_vm1, 1.0, %v9236_v49  ;;  %v6889_v2 = vmul.f32 %v2429_v28, %v2365_v24  ;;  %v2048_v5 = vadd.f32 1.0, %v6883_v29 }
 0x284   : > { %v2620_v12 = vperm.slane %v4846_v17, 0  ;;  %v4121_v11 = vadd.f32 %v4846_v17, %v6576_v3  ;;  %v6896_v50 = vmul.f32 %v2430_v36, %v2366_v48  ;;  %v5046_v3 = vpop.eup %5045  ;;  %v2051_v24 = vmul.f32 -0.5, %v6883_v29 }
 0x285   : > { %5051 = vpow2.f32 %v2314_v56  ;;  %vm2525_vm3 = vcmp.gt.f32.partialorder %v6889_v2, 0.1  ;;  %v5048_v48 = vpop.eup %5047 }
 0x286   : > { %v6902_v28 = vmul.f32 %v2620_v12, %v6724_v41  ;;  %v6904_v33 = vmul.f32 %v2620_v12, %v1456_v1  ;;  %v4847_v54 = vsel %vm2525_vm3, 1.0, %v9236_v49  ;;  %vm2526_vm4 = vcmp.gt.f32.partialorder %v6896_v50, 0.1 }
 0x287   : > { %v2621_v36 = vperm.slane %v4847_v54, 0  ;;  %v4122_v35 = vadd.f32 %v4847_v54, %v6721_v58  ;;  %v4848_v44 = vsel %vm2526_vm4, 1.0, %v9236_v49  ;;  %v3329_v1 = vmul.f32 0.6931472, %v5046_v3  ;;  %v6920_v54 = vpop.eup %5049 }
 0x288   : > { %v2782_v56 = vsel %vm2708_vm10, %v6902_v28, -inf  ;;  %v2783_v41 = vsel %vm2710_vm2, %v6904_v33, -inf  ;;  %v2622_v17 = vperm.slane %v4848_v44, 0  ;;  %v3331_v58 = vmul.f32 0.6931472, %v5048_v48 }
 0x289   : > { %v2784_v12 = vmax.f32 %v2782_v56, %v2783_v41  ;;  %v6916_v26 = vmul.f32 %v2621_v36, %v6727_v20  ;;  %v6918_v61 = vmul.f32 %v2621_v36, %v1470_v9  ;;  %v6927_v21 = vadd.f32 %v4848_v44, %v4121_v11 }
 0x28a   : > { %v6923_v25 = vmul.f32 %v2622_v17, %v6730_v37  ;;  %v6925_v47 = vmul.f32 %v2622_v17, %v1484_v27  ;;  %5053 = vlog2.f32 %v2048_v5  ;;  %v6934_v9 = vadd.f32 %v6735_v15, %v3331_v58  ;;  %v1551_v5 = vpop.f32.mrf.mxu3 }
 0x28b   : > { %v5052_v38 = vpop.eup %5051  ;;  %v2785_v3 = vrot.slane %v2784_v12, 4  ;;  %v2791_v56 = vsel %vm2708_vm10, %v6916_v26, -inf  ;;  %v2792_v20 = vsel %vm2710_vm2, %v6918_v61, -inf  ;;  %v1904_v11 = vmul.f32 1.442695, %v1858_v46 }
 0x28c   : > { %v2793_v36 = vmax.f32 %v2791_v56, %v2792_v20  ;;  %v2800_v37 = vsel %vm2708_vm10, %v6923_v25, -inf  ;;  %v2801_v27 = vsel %vm2710_vm2, %v6925_v47, -inf  ;;  %v6941_v48 = vadd.f32 %v6717_v51, %v3329_v1 }
 0x28d   : > { %v2786_v44 = vmax.f32 %v2784_v12, %v2785_v3  ;;  %v2802_v41 = vmax.f32 %v2800_v37, %v2801_v27  ;;  %v2367_v17 = vsub.f32 1.0, %v5052_v38  ;;  %v1498_v58 = vadd.f32 %v1497_v60, %v6355_v39 }
 0x28e   : > { %v2794_v15 = vrot.slane %v2793_v36, 4  ;;  %v2057_v56 = vadd.f32 1.0, %v6920_v54  ;;  %v6952_v46 = vadd.f32 %v1551_v5, %v6278_v32  ;;  %v2052_v12 = vadd.f32 1.0, %v2051_v24 }
 0x28f   : > { %v2787_v20 = vrot.slane %v2786_v44, 2  ;;  %v2803_v22 = vrot.slane %v2802_v41, 4  ;;  %v6949_v16 = vmul.f32 %v2431_v52, %v2367_v17  ;;  %v2054_v38 = vand.u32 2147483647, %v6883_v29 }
 0x290   : > { %v5054_v51 = vpop.eup %5053  ;;  %v2795_v1 = vmax.f32 %v2793_v36, %v2794_v15  ;;  %5055 = vpow2.f32 %v1904_v11  ;;  %v4095_v13 = vmul.f32 1.442695, %v6941_v48  ;;  %v2060_v52 = vmul.f32 -0.5, %v6920_v54 }
 0x291   : > { %v2788_v57 = vmax.f32 %v2786_v44, %v2787_v20  ;;  %v2804_v3 = vmax.f32 %v2802_v41, %v2803_v22  ;;  %vm2527_vm5 = vcmp.gt.f32.partialorder %v6949_v16, 0.1  ;;  %5057 = vlog2.f32 %v2057_v56 }
 0x292   : > { %v2796_v60 = vrot.slane %v2795_v1, 2  ;;  %v4849_v37 = vsel %vm2527_vm5, 1.0, %v9236_v49  ;;  %v2050_v15 = vmul.f32 0.6931472, %v5054_v51  ;;  %v2053_v11 = vmul.f32 %v6883_v29, %v2052_v12 }
 0x293   : > { %v2789_v27 = vrot.slane %v2788_v57, 1  ;;  %v2805_v5 = vrot.slane %v2804_v3, 2  ;;  %v2623_v17 = vperm.slane %v4849_v37, 0  ;;  %v6959_v36 = vadd.f32 %v4849_v37, %v4122_v35 }
 0x294   : > { %v2797_v24 = vmax.f32 %v2795_v1, %v2796_v60  ;;  %v1859_v44 = vmin.f32 %v6952_v46, 20.0  ;;  %5059 = vpow2.f32 %v4095_v13  ;;  %v4097_v41 = vmul.f32 1.442695, %v6934_v9 }
 0x295   : > { %v2790_v22 = vmax.f32 %v2788_v57, %v2789_v27  ;;  %v2806_v20 = vmax.f32 %v2804_v3, %v2805_v5  ;;  %v6967_v63 = vmul.f32 %v2623_v17, %v6748_v0  ;;  %v6969_v45 = vmul.f32 %v2623_v17, %v1498_v58 }
 0x296   : > { %v6964_v55 = vpop.eup %5055  ;;  %v2798_v56 = vrot.slane %v2797_v24, 1  ;;  %vm6971_vm6 = vcmp.lt.f32.partialorder %v2054_v38, 0.0004427343  ;;  %v2061_v51 = vadd.f32 1.0, %v2060_v52  ;;  %v2063_v13 = vand.u32 2147483647, %v6920_v54 }
 0x297   : > { %vm3006_vm7 = vcmp.ge.f32.partialorder %v6902_v28, %v2790_v22  ;;  %v2807_v29 = vrot.slane %v2806_v20, 1  ;;  %v5058_v1 = vpop.eup %5057  ;;  %v1906_v0 = vmul.f32 1.442695, %v1859_v44  ;;  %5061 = vpow2.f32 %v4097_v41 }
 0x298   : > { %v4878_v12 = vsel %vm3006_vm7, 1.0, %v9236_v49  ;;  %v2799_v57 = vmax.f32 %v2797_v24, %v2798_v56  ;;  %v2056_v38 = vsel %vm6971_vm6, %v2053_v11, %v2050_v15  ;;  %v2809_v60 = vsel %vm2708_vm10, %v6967_v63, -inf }
 0x299   : > { %v3102_v3 = vsub.f32 1.0, %v4878_v12  ;;  %v2808_v58 = vmax.f32 %v2806_v20, %v2807_v29  ;;  %v2810_v37 = vsel %vm2710_vm2, %v6969_v45, -inf  ;;  %v2066_v52 = vadd.f32 1.0, %v6964_v55 }
 0x29a   : > { %vm3007_vm9 = vcmp.ge.f32.partialorder %v6916_v26, %v2799_v57  ;;  %v6988_v27 = vpop.eup %5059  ;;  %v2062_v24 = vmul.f32 %v6920_v54, %v2061_v51  ;;  %v2059_v44 = vmul.f32 0.6931472, %v5058_v1  ;;  %v2069_v22 = vmul.f32 -0.5, %v6964_v55 }
 0x29b   : > { %9239 = vst [vmem:[#allocation26_spill] sm:$0xff] %v6988_v27  ;;  %v3166_v5 = vrot.slane %v3102_v3, 4  ;;  %v4879_v17 = vsel %vm3007_vm9, 1.0, %v9236_v49  ;;  %vm3008_vm12 = vcmp.ge.f32.partialorder %v6923_v25, %v2808_v58  ;;  %v2811_v20 = vmax.f32 %v2809_v60, %v2810_v37 }
 0x29c   : > { %v3103_v15 = vsub.f32 1.0, %v4879_v17  ;;  %v4880_v11 = vsel %vm3008_vm12, 1.0, %v9236_v49  ;;  %vm6998_vm13 = vcmp.lt.f32.partialorder %v2063_v13, 0.0004427343  ;;  %5063 = vpow2.f32 %v1906_v0 }
 0x29d   : > { %v6996_v41 = vmul.f32 %v3166_v5, %v6874_v19  ;;  %v4103_v35 = vperm.slane %v6988_v27, 0  ;;  %v7006_v54 = vsel %vm1824_vm8, %v6806_v34, %v2056_v38  ;;  %5065 = vlog2.f32 %v2066_v52  ;;  %v7008_v51 = vpop.eup %5061 }
 0x29e   : > { %v3167_v29 = vrot.slane %v3103_v15, 4  ;;  %9242 = vst [vmem:[#allocation27_spill] sm:$0xff] %v7008_v51  ;;  %v3104_v57 = vsub.f32 1.0, %v4880_v11  ;;  %v2065_v3 = vsel %vm6998_vm13, %v2062_v24, %v2059_v44  ;;  %v2070_v58 = vadd.f32 1.0, %v2069_v22 }
 0x29f   : > { %v7011_v19 = vsub.f32 1.0, %v6996_v41  ;;  %v3416_v1 = vmax.f32 %v6996_v41, 1e-30  ;;  %v3871_v12 = vperm.slane %v6996_v41, 0  ;;  %v3967_v13 = vmul.f32 %v6849_v18, %v6996_v41 }
 0x2a0   : > { %v7018_v0 = vmul.f32 %v3167_v29, %v6889_v2  ;;  %v2812_v60 = vrot.slane %v2811_v20, 4  ;;  %v2072_v37 = vand.u32 2147483647, %v6964_v55  ;;  %v4104_v18 = vperm.slane %v7008_v51, 0 }
 0x2a1   : > { %5067 = vlog2.f32 %v3416_v1  ;;  %v3608_v38 = vmax.f32 %v7011_v19, 1e-30  ;;  %v3903_v52 = vmul.f32 %v3871_v12, %v6902_v28  ;;  %v3935_v5 = vmul.f32 %v3871_v12, %v6904_v33 }
 0x2a2   : > { %v4113_v17 = vmul.f32 %v6988_v27, %v3967_v13  ;;  %v7028_v2 = vpop.eup %5063  ;;  %v3872_v24 = vperm.slane %v7018_v0, 0  ;;  %v3168_v15 = vrot.slane %v3104_v57, 4  ;;  %v2241_v11 = vsel %vm1825_vm11, %v6837_v8, %v2065_v3 }
 0x2a3   : > { %5069 = vlog2.f32 %v3608_v38  ;;  %v5066_v44 = vpop.eup %5065  ;;  %v3294_v22 = vadd.f32 1e-10, %v7011_v19  ;;  %v4105_v28 = vmul.f32 %v4103_v35, %v3903_v52  ;;  %v4107_v56 = vmul.f32 %v4103_v35, %v3935_v5 }
 0x2a4   : > { %v7036_v33 = vadd.f32 %v4113_v17, %v6860_v7  ;;  %v3904_v29 = vmul.f32 %v3872_v24, %v6916_v26  ;;  %v2813_v1 = vmax.f32 %v2811_v20, %v2812_v60  ;;  %v2071_v12 = vmul.f32 %v6964_v55, %v2070_v58 }
 0x2a5   : > { %vm7040_vm14 = vcmp.lt.f32.partialorder %v2072_v37, 0.0004427343  ;;  %v7045_v57 = vadd.f32 %v4105_v28, %v6858_v40  ;;  %v7048_v3 = vadd.f32 %v4107_v56, %v6945_v10  ;;  %v3936_v35 = vmul.f32 %v3872_v24, %v6918_v61 }
 0x2a6   : > { %v3968_v7 = vmul.f32 %v6870_v23, %v7018_v0  ;;  %v7054_v26 = vsub.f32 1.0, %v7018_v0  ;;  %v7058_v55 = vmul.f32 %v7008_v51, %v7018_v0  ;;  %v4106_v20 = vmul.f32 %v4104_v18, %v3904_v29 }
 0x2a7   : > { %v5068_v38 = vpop.eup %5067  ;;  %v7061_v40 = vmul.f32 %v3168_v15, %v6896_v50  ;;  %v4108_v10 = vmul.f32 %v4104_v18, %v3936_v35  ;;  %5071 = vlog2.f32 %v3294_v22  ;;  %v2068_v5 = vmul.f32 0.6931472, %v5066_v44 }
 0x2a8   : > { %9245 = vst [vmem:[#allocation28_spill] sm:$0xff] %v7058_v55  ;;  %v3457_v58 = vmul.f32 0.6931472, %v5068_v38  ;;  %v4114_v60 = vmul.f32 %v7008_v51, %v3968_v7  ;;  %v7065_v23 = vadd.f32 %v4106_v20, %v6787_v62  ;;  %v2272_v62 = vsub.f32 0.0, %v7006_v54 }
 0x2a9   : > { %v5070_v61 = vpop.eup %5069  ;;  %v7068_v37 = vsub.f32 1.0, %v7061_v40  ;;  %v3418_v52 = vmax.f32 %v7061_v40, 1e-30  ;;  %v7073_v50 = vadd.f32 %v4108_v10, %v6789_v6  ;;  %vm3384_vm0 = vcmp.gt.f32.partialorder %v6996_v41, 0.0 }
 0x2aa   : > { %v3512_v17 = vmul.f32 %v3457_v58, %v6996_v41  ;;  %v3649_v24 = vmul.f32 0.6931472, %v5070_v61  ;;  %v7076_v18 = vadd.f32 %v4114_v60, %v6785_v30  ;;  %v3295_v22 = vadd.f32 1e-10, %v7054_v26 }
 0x2ab   : > { %5073 = vlog2.f32 %v3418_v52  ;;  %v3610_v15 = vmax.f32 %v7068_v37, 1e-30  ;;  %v2273_v28 = vsub.f32 0.0, %v2241_v11  ;;  %vm3576_vm1 = vcmp.gt.f32.partialorder %v7011_v19, 0.0 }
 0x2ac   : > { %v3704_v44 = vmul.f32 %v3649_v24, %v7011_v19  ;;  %v2814_v6 = vrot.slane %v2813_v1, 2  ;;  %v2074_v30 = vsel %vm7040_vm14, %v2071_v12, %v2068_v5  ;;  %v3544_v29 = vsel %vm3384_vm0, %v3512_v17, 0.0 }
 0x2ad   : > { %5075 = vlog2.f32 %v3610_v15  ;;  %v5072_v56 = vpop.eup %5071  ;;  %v2075_v54 = vadd.f32 1.0, %v7028_v2  ;;  %v2316_v58 = vmul.f32 1.442695, %v2272_v62  ;;  %v2318_v10 = vmul.f32 1.442695, %v2273_v28 }
 0x2ae   : > { %v3736_v35 = vsel %vm3576_vm1, %v3704_v44, 0.0  ;;  %v3333_v38 = vmul.f32 0.6931472, %v5072_v56  ;;  %v2815_v20 = vmax.f32 %v2813_v1, %v2814_v6  ;;  %5077 = vlog2.f32 %v3295_v22 }
 0x2af   : > { %v7088_v7 = vadd.f32 %v3736_v35, %v3544_v29  ;;  %v2242_v19 = vsel %vm1826_vm15, %v6881_v4, %v2074_v30  ;;  %5079 = vlog2.f32 %v2075_v54  ;;  %v2078_v15 = vmul.f32 -0.5, %v7028_v2 }
 0x2b0   : > { %v7094_v13 = vadd.f32 %v6941_v48, %v3333_v38  ;;  %v2816_v12 = vrot.slane %v2815_v20, 1  ;;  %v2274_v61 = vsub.f32 0.0, %v2242_v19  ;;  %5081 = vpow2.f32 %v2316_v58 }
 0x2b1   : > { %v5074_v11 = vpop.eup %5073  ;;  %5083 = vpow2.f32 %v2318_v10  ;;  %vm3386_vm3 = vcmp.gt.f32.partialorder %v7061_v40, 0.0  ;;  %vm3578_vm5 = vcmp.gt.f32.partialorder %v7068_v37, 0.0  ;;  %v3873_v22 = vperm.slane %v7061_v40, 0 }
 0x2b2   : > { %v3461_v60 = vmul.f32 0.6931472, %v5074_v11  ;;  %v4125_v5 = vmul.f32 1.442695, %v7094_v13  ;;  %v2817_v17 = vmax.f32 %v2815_v20, %v2816_v12  ;;  %v2320_v48 = vmul.f32 1.442695, %v2274_v61 }
 0x2b3   : > { %v5076_v52 = vpop.eup %5075  ;;  %v2079_v56 = vadd.f32 1.0, %v2078_v15  ;;  %v2081_v29 = vand.u32 2147483647, %v7028_v2  ;;  %v3969_v12 = vmul.f32 %v6877_v31, %v7061_v40  ;;  %vm1827_vm6 = vcmp.gt.f32.partialorder %v6952_v46, 20.0 }
 0x2b4   : > { %v3514_v1 = vmul.f32 %v3461_v60, %v7061_v40  ;;  %v3653_v24 = vmul.f32 0.6931472, %v5076_v52  ;;  %5085 = vpow2.f32 %v4125_v5  ;;  %vm3009_vm4 = vcmp.ge.f32.partialorder %v6967_v63, %v2817_v17  ;;  %v5078_v62 = vpop.eup %5077 }
 0x2b5   : > { %v4881_v28 = vsel %vm3009_vm4, 1.0, %v9236_v49  ;;  %v3335_v30 = vmul.f32 0.6931472, %v5078_v62  ;;  %v5080_v35 = vpop.eup %5079  ;;  %5087 = vpow2.f32 %v2320_v48  ;;  %v2080_v61 = vmul.f32 %v7028_v2, %v2079_v56  ;;  %v5416_v48 = vld [vmem:[%s5692_s15 + $0x160] sm:$0xff] }
 0x2b6   : > { %v3706_v44 = vmul.f32 %v3653_v24, %v7068_v37  ;;  %v3105_v6 = vsub.f32 1.0, %v4881_v28  ;;  %v3546_v54 = vsel %vm3386_vm3, %v3514_v1, 0.0  ;;  %v5082_v20 = vpop.eup %5081  ;;  %v2077_v60 = vmul.f32 0.6931472, %v5080_v35 }
 0x2b7   : > { %v7109_v19 = vadd.f32 %v6934_v9, %v3335_v30  ;;  %v5084_v11 = vpop.eup %5083  ;;  %v3905_v5 = vmul.f32 %v3873_v22, %v6923_v25  ;;  %v3937_v17 = vmul.f32 %v3873_v22, %v6925_v47  ;;  %vm7119_vm7 = vcmp.lt.f32.partialorder %v2081_v29, 0.0004427343  ;;  %v7131_v47 = vld [vmem:[%s5692_s15 + $0x168] sm:$0xff] }
 0x2b8   : > { %v3738_v38 = vsel %vm3578_vm5, %v3706_v44, 0.0  ;;  %v3169_v10 = vrot.slane %v3105_v6, 4  ;;  %v2368_v2 = vsub.f32 1.0, %v5082_v20  ;;  %v2432_v25 = vrot.slane %v5416_v48, 1 }
 0x2b9   : > { %v7106_v58 = vadd.f32 %v3738_v38, %v3546_v54  ;;  %v4127_v15 = vmul.f32 1.442695, %v7109_v19  ;;  %v2369_v62 = vsub.f32 1.0, %v5084_v11  ;;  %v2433_v44 = vrot.slane %v7131_v47, 1  ;;  %v1511_v38 = vpop.f32.mrf.mxu0 }
 0x2ba   : > { %v7114_v52 = vpop.eup %5085  ;;  %v7126_v24 = vmul.f32 %v3169_v10, %v6949_v16  ;;  %v2083_v30 = vsel %vm7119_vm7, %v2080_v61, %v2077_v60  ;;  %v3296_v56 = vadd.f32 1e-10, %v7068_v37  ;;  %v1512_v20 = vadd.f32 %v1511_v38, %v6355_v39 }
 0x2bb   : > { %9246 = vst [vmem:[#allocation29_spill] sm:$0xff] %v7106_v58  ;;  %v4133_v1 = vperm.slane %v7114_v52, 0  ;;  %v4143_v31 = vmul.f32 %v7114_v52, %v3969_v12  ;;  %v5088_v16 = vpop.eup %5087  ;;  %v7153_v10 = vmul.f32 %v2432_v25, %v2368_v2  ;;  %v7155_v37 = vmul.f32 %v2433_v44, %v2369_v62  ;;  %v5418_v12 = vld [vmem:[%s5692_s15 + $0x170] sm:$0xff]  ;;  %v1525_v2 = vpop.f32.mrf.mxu1 }
 0x2bc   : > { %9247 = vst [vmem:[#allocation30_spill] sm:$0xff] %v7114_v52  ;;  %v7147_v54 = vsub.f32 1.0, %v7126_v24  ;;  %5089 = vpow2.f32 %v4127_v15  ;;  %v2434_v60 = vrot.slane %v5418_v12, 1  ;;  %v3970_v25 = vmul.f32 %v6892_v43, %v7126_v24  ;;  %v1539_v12 = vpop.f32.mrf.mxu2 }
 0x2bd   : > { %v4135_v22 = vmul.f32 %v4133_v1, %v3905_v5  ;;  %v4137_v28 = vmul.f32 %v4133_v1, %v3937_v17  ;;  %v7135_v6 = vadd.f32 %v4143_v31, %v7036_v33  ;;  %v2243_v33 = vsel %vm1827_vm6, %v6952_v46, %v2083_v30 }
 0x2be   : > { %v2275_v11 = vsub.f32 0.0, %v2243_v33  ;;  %vm2528_vm8 = vcmp.gt.f32.partialorder %v7153_v10, 0.1  ;;  %5091 = vlog2.f32 %v3296_v56  ;;  %vm2529_vm9 = vcmp.gt.f32.partialorder %v7155_v37, 0.1 }
 0x2bf   : > { %9250 = vst [vmem:[#allocation31_spill] sm:$0xff] %v7135_v6  ;;  %v7141_v29 = vadd.f32 %v4135_v22, %v7045_v57  ;;  %v7144_v35 = vadd.f32 %v4137_v28, %v7048_v3  ;;  %v3874_v57 = vperm.slane %v7126_v24, 0  ;;  %v2370_v3 = vsub.f32 1.0, %v5088_v16 }
 0x2c0   : > { %v3297_v61 = vadd.f32 1e-10, %v7147_v54  ;;  %v2322_v5 = vmul.f32 1.442695, %v2275_v11  ;;  %v4850_v17 = vsel %vm2528_vm8, 1.0, %v9236_v49  ;;  %v4851_v9 = vsel %vm2529_vm9, 1.0, %v9236_v49 }
 0x2c1   : > { %9251 = vst [vmem:[#allocation32_spill] sm:$0xff] %v7141_v29  ;;  %v2624_v1 = vperm.slane %v4850_v17, 0  ;;  %v4181_v31 = vadd.f32 %v4850_v17, %v6927_v21  ;;  %v2625_v15 = vperm.slane %v4851_v9, 0  ;;  %v7166_v48 = vadd.f32 %v4851_v9, %v6959_v36 }
 0x2c2   : > { %5093 = vpow2.f32 %v2322_v5  ;;  %v1526_v62 = vadd.f32 %v1525_v2, %v6355_v39  ;;  %v7171_v44 = vmul.f32 %v2434_v60, %v2370_v3  ;;  %v3906_v22 = vmul.f32 %v3874_v57, %v6967_v63  ;;  %v7180_v16 = vpop.eup %5089 }
 0x2c3   : > { %v3938_v28 = vmul.f32 %v3874_v57, %v6969_v45  ;;  %v7176_v30 = vmul.f32 %v2624_v1, %v6806_v34  ;;  %v7178_v21 = vmul.f32 %v2624_v1, %v1512_v20  ;;  %9253 = vst [vmem:[#allocation34_spill] sm:$0xff] %v7180_v16  ;;  %v7183_v36 = vmul.f32 %v2625_v15, %v6837_v8 }
 0x2c4   : > { %v7185_v43 = vmul.f32 %v2625_v15, %v1526_v62  ;;  %5095 = vlog2.f32 %v3297_v61  ;;  %vm2530_vm11 = vcmp.gt.f32.partialorder %v7171_v44, 0.1  ;;  %v5092_v56 = vpop.eup %5091  ;;  %v7190_v63 = vmul.f32 %v7180_v16, %v7126_v24  ;;  %v7216_v15 = vld [vmem:[%s5692_s15 + $0x178] sm:$0xff] }
 0x2c5   : > { %9252 = vst [vmem:[#allocation33_spill] sm:$0xff] %v7176_v30  ;;  %v4134_v45 = vperm.slane %v7180_v16, 0  ;;  %v4144_v34 = vmul.f32 %v7180_v16, %v3970_v25  ;;  %v2818_v38 = vsel %vm2708_vm10, %v7176_v30, -inf  ;;  %v2819_v8 = vsel %vm2710_vm2, %v7178_v21, -inf }
 0x2c6   : > { %9254 = vst [vmem:[#allocation35_spill] sm:$0xff] %v7190_v63  ;;  %v3337_v33 = vmul.f32 0.6931472, %v5092_v56  ;;  %v2820_v3 = vmax.f32 %v2818_v38, %v2819_v8  ;;  %v2827_v61 = vsel %vm2708_vm10, %v7183_v36, -inf  ;;  %v2828_v5 = vsel %vm2710_vm2, %v7185_v43, -inf }
 0x2c7   : > { %v4136_v20 = vmul.f32 %v4134_v45, %v3906_v22  ;;  %v4138_v57 = vmul.f32 %v4134_v45, %v3938_v28  ;;  %v7199_v11 = vadd.f32 %v4144_v34, %v7076_v18  ;;  %v1540_v17 = vadd.f32 %v1539_v12, %v6355_v39 }
 0x2c8   : > { %v5094_v60 = vpop.eup %5093  ;;  %v4852_v9 = vsel %vm2530_vm11, 1.0, %v9236_v49  ;;  %v2821_v2 = vrot.slane %v2820_v3, 4  ;;  %v2435_v25 = vrot.slane %v7216_v15, 1  ;;  %v7220_v22 = vadd.f32 %v7094_v13, %v3337_v33 }
 0x2c9   : > { %v7210_v1 = vadd.f32 %v4136_v20, %v7065_v23  ;;  %v7213_v18 = vadd.f32 %v4138_v57, %v7073_v50  ;;  %v2829_v28 = vmax.f32 %v2827_v61, %v2828_v5  ;;  %v2626_v56 = vperm.slane %v4852_v9, 0 }
 0x2ca   : > { %v5096_v62 = vpop.eup %5095  ;;  %v7222_v45 = vadd.f32 %v4852_v9, %v4181_v31  ;;  %v2822_v34 = vmax.f32 %v2820_v3, %v2821_v2  ;;  %v2371_v23 = vsub.f32 1.0, %v5094_v60  ;;  %v1565_v3 = vpop.f32.mrf.mxu0  ;;  %v4155_v5 = vmul.f32 1.442695, %v7220_v22 }
 0x2cb   : > { %v3339_v38 = vmul.f32 0.6931472, %v5096_v62  ;;  %v2830_v8 = vrot.slane %v2829_v28, 4  ;;  %v7225_v50 = vmul.f32 %v2626_v56, %v6881_v4  ;;  %v7227_v20 = vmul.f32 %v2626_v56, %v1540_v17  ;;  %v1553_v4 = vpop.f32.mrf.mxu3 }
 0x2cc   : > { %v2823_v57 = vrot.slane %v2822_v34, 2  ;;  %v7232_v6 = vmul.f32 %v2435_v25, %v2371_v23  ;;  %5097 = vpow2.f32 %v4155_v5  ;;  %vm3383_vm3 = vcmp.gt.f32.partialorder %v6733_v59, 0.0 }
 0x2cd   : > { %9255 = vst [vmem:[#allocation36_spill] sm:$0xff] %v7225_v50  ;;  %v7230_v12 = vadd.f32 %v7109_v19, %v3339_v38  ;;  %v2831_v13 = vmax.f32 %v2829_v28, %v2830_v8  ;;  %v2836_v31 = vsel %vm2708_vm10, %v7225_v50, -inf  ;;  %v2837_v33 = vsel %vm2710_vm2, %v7227_v20, -inf }
 0x2ce   : > { %v2824_v60 = vmax.f32 %v2822_v34, %v2823_v57  ;;  %v2838_v61 = vmax.f32 %v2836_v31, %v2837_v33  ;;  %vm2531_vm12 = vcmp.gt.f32.partialorder %v7232_v6, 0.1  ;;  %v1554_v19 = vadd.f32 %v1553_v4, %v6355_v39 }
 0x2cf   : > { %v2832_v17 = vrot.slane %v2831_v13, 2  ;;  %v4853_v9 = vsel %vm2531_vm12, 1.0, %v9236_v49  ;;  %v7243_v28 = vadd.f32 %v1565_v3, %v6278_v32  ;;  %v4157_v33 = vmul.f32 1.442695, %v7230_v12 }
 0x2d0   : > { %v2825_v2 = vrot.slane %v2824_v60, 1  ;;  %v2839_v25 = vrot.slane %v2838_v61, 4  ;;  %v2627_v62 = vperm.slane %v4853_v9, 0  ;;  %v7246_v34 = vadd.f32 %v4853_v9, %v7166_v48  ;;  %v1579_v48 = vpop.f32.mrf.mxu1 }
 0x2d1   : > { %v2833_v56 = vmax.f32 %v2831_v13, %v2832_v17  ;;  %v1860_v13 = vmin.f32 %v7243_v28, 20.0  ;;  %v5478_v17 = vmov 0.6931472   ;;  %v7263_v5 = vadd.f32 %v1579_v48, %v6278_v32 }
 0x2d2   : > { %v2826_v38 = vmax.f32 %v2824_v60, %v2825_v2  ;;  %v2840_v23 = vmax.f32 %v2838_v61, %v2839_v25  ;;  %v7249_v8 = vmul.f32 %v2627_v62, %v6952_v46  ;;  %v7251_v57 = vmul.f32 %v2627_v62, %v1554_v19  ;;  %v7266_v16 = vpop.eup %5097 }
 0x2d3   : > { %v2834_v31 = vrot.slane %v2833_v56, 1  ;;  %5099 = vrcp.f32 %v5478_v17  ;;  %9256 = vst [vmem:[#allocation37_spill] sm:$0xff] %v7266_v16  ;;  %v3415_v17 = vmax.f32 %v6733_v59, 1e-30  ;;  %vm3575_vm4 = vcmp.gt.f32.partialorder %v6841_v14, 0.0 }
 0x2d4   : > { %vm3010_vm13 = vcmp.ge.f32.partialorder %v7176_v30, %v2826_v38  ;;  %v2845_v3 = vsel %vm2708_vm10, %v7249_v8, -inf  ;;  %v2841_v4 = vrot.slane %v2840_v23, 2  ;;  %v2846_v46 = vsel %vm2710_vm2, %v7251_v57, -inf }
 0x2d5   : > { %v4882_v60 = vsel %vm3010_vm13, 1.0, %v9236_v49  ;;  %v2835_v61 = vmax.f32 %v2833_v56, %v2834_v31  ;;  %v2847_v9 = vmax.f32 %v2845_v3, %v2846_v46  ;;  %5101 = vpow2.f32 %v4157_v33 }
 0x2d6   : > { %v3106_v19 = vsub.f32 1.0, %v4882_v60  ;;  %v1908_v38 = vmul.f32 1.442695, %v1860_v13  ;;  %v2842_v31 = vmax.f32 %v2840_v23, %v2841_v4  ;;  %v1861_v3 = vmin.f32 %v7263_v5, 20.0 }
 0x2d7   : > { %vm3011_vm14 = vcmp.ge.f32.partialorder %v7183_v36, %v2835_v61  ;;  %v2848_v62 = vrot.slane %v2847_v9, 4  ;;  %v3607_v13 = vmax.f32 %v6841_v14, 1e-30  ;;  %v9084_v23 = vperm.slane %v7266_v16, 0 }
 0x2d8   : > { %v3170_v2 = vrot.slane %v3106_v19, 4  ;;  %v4883_v25 = vsel %vm3011_vm14, 1.0, %v9236_v49  ;;  %5103 = vpow2.f32 %v1908_v38  ;;  %vm1828_vm6 = vcmp.gt.f32.partialorder %v7243_v28, 20.0 }
 0x2d9   : > { %v3107_v56 = vsub.f32 1.0, %v4883_v25  ;;  %v7272_v61 = vpop.eup %5099  ;;  %v2849_v48 = vmax.f32 %v2847_v9, %v2848_v62  ;;  %v1910_v25 = vmul.f32 1.442695, %v1861_v3  ;;  %5105 = vlog2.f32 %v3607_v13 }
 0x2da   : > { %v7269_v63 = vmul.f32 %v3170_v2, %v7153_v10  ;;  %v2843_v10 = vrot.slane %v2842_v31, 1  ;;  %v3825_v2 = vmul.f32 0.6931472, %v7272_v61  ;;  %5107 = vlog2.f32 %v3415_v17 }
 0x2db   : > { %v3171_v60 = vrot.slane %v3107_v56, 4  ;;  %v7275_v46 = vpop.eup %5101  ;;  %v2850_v56 = vrot.slane %v2849_v48, 2  ;;  %5109 = vpow2.f32 %v1910_v25  ;;  %vm3829_vm1 = vweird.f32 %v7272_v61 }
 0x2dc   : > { %9257 = vst [vmem:[#allocation38_spill] sm:$0xff] %v7269_v63  ;;  %v9078_v33 = vperm.slane %v7269_v63, 0  ;;  %v7284_v19 = vsub.f32 1.0, %v7269_v63  ;;  %v2844_v51 = vmax.f32 %v2842_v31, %v2843_v10  ;;  %v3826_v3 = vsub.f32 1.0, %v3825_v2 }
 0x2dd   : > { %9258 = vst [vmem:[#allocation39_spill] sm:$0xff] %v7275_v46  ;;  %v7280_v4 = vmul.f32 %v3171_v60, %v7155_v37  ;;  %v4164_v37 = vperm.slane %v7275_v46, 0  ;;  %vm1829_vm8 = vcmp.gt.f32.partialorder %v7263_v5, 20.0 }
 0x2de   : > { %v3939_v9 = vmul.f32 %v9078_v33, %v7178_v21  ;;  %v5104_v55 = vpop.eup %5103  ;;  %v3298_v29 = vadd.f32 1e-10, %v7284_v19  ;;  %vm3012_vm15 = vcmp.ge.f32.partialorder %v7225_v50, %v2844_v51 }
 0x2df   : > { %9259 = vst [vmem:[#allocation40_spill] sm:$0xff] %v7280_v4  ;;  %v7291_v62 = vsub.f32 1.0, %v7280_v4  ;;  %v3876_v38 = vperm.slane %v7280_v4, 0  ;;  %v3972_v52 = vmul.f32 %v7131_v47, %v7280_v4  ;;  %v5106_v2 = vpop.eup %5105  ;;  %v4884_v51 = vsel %vm3012_vm15, 1.0, %v9236_v49 }
 0x2e0   : > { %v4167_v60 = vmul.f32 %v9084_v23, %v3939_v9  ;;  %v2851_v9 = vmax.f32 %v2849_v48, %v2850_v56  ;;  %5111 = vlog2.f32 %v3298_v29  ;;  %v2087_v48 = vmul.f32 -0.5, %v5104_v55 }
 0x2e1   : > { %9260 = vst [vmem:[#allocation41_spill] sm:$0xff] %v7291_v62  ;;  %v3908_v21 = vmul.f32 %v3876_v38, %v7183_v36  ;;  %v3940_v30 = vmul.f32 %v3876_v38, %v7185_v43  ;;  %v3299_v13 = vadd.f32 1e-10, %v7291_v62  ;;  %v4174_v10 = vmul.f32 %v7275_v46, %v3972_v52  ;;  %v1593_v43 = vpop.f32.mrf.mxu2 }
 0x2e2   : > { %v7300_v33 = vadd.f32 %v4167_v60, %v7144_v35  ;;  %v2084_v36 = vadd.f32 1.0, %v5104_v55  ;;  %v2852_v35 = vrot.slane %v2851_v9, 1  ;;  %v3827_v52 = vmul.f32 %v7272_v61, %v3826_v3 }
 0x2e3   : > { %v4166_v16 = vmul.f32 %v4164_v37, %v3908_v21  ;;  %v4168_v31 = vmul.f32 %v4164_v37, %v3940_v30  ;;  %v7315_v38 = vadd.f32 %v4174_v10, %v7199_v11  ;;  %v5108_v30 = vpop.eup %5107  ;;  %5113 = vlog2.f32 %v3299_v13 }
 0x2e4   : > { %v2853_v25 = vmax.f32 %v2851_v9, %v2852_v35  ;;  %5115 = vlog2.f32 %v2084_v36  ;;  %v7320_v29 = vadd.f32 %v1593_v43, %v6278_v32  ;;  %v3108_v37 = vsub.f32 1.0, %v4884_v51  ;;  %v9261_v35 = vld [vmem:[#allocation9_spill] sm:$0xff]  ;;  %v9262_v43 = vld [vmem:[#allocation14_spill] sm:$0xff] }
 0x2e5   : > { %v7309_v17 = vadd.f32 %v4166_v16, %v7210_v1  ;;  %v7312_v47 = vadd.f32 %v4168_v31, %v7213_v18  ;;  %v5110_v16 = vpop.eup %5109  ;;  %v3647_v1 = vmul.f32 0.6931472, %v5106_v2  ;;  %v3455_v18 = vmul.f32 0.6931472, %v5108_v30 }
 0x2e6   : > { %vm3013_vm0 = vcmp.ge.f32.partialorder %v7249_v8, %v2853_v25  ;;  %v2088_v11 = vadd.f32 1.0, %v2087_v48  ;;  %v5112_v56 = vpop.eup %5111  ;;  %v3828_v60 = vadd.f32 %v7272_v61, %v3827_v52  ;;  %v2090_v21 = vand.u32 2147483647, %v5104_v55 }
 0x2e7   : > { %v3341_v3 = vmul.f32 0.6931472, %v5112_v56  ;;  %v4885_v13 = vsel %vm3013_vm0, 1.0, %v9236_v49  ;;  %v2093_v9 = vadd.f32 1.0, %v5110_v16  ;;  %v1862_v31 = vmin.f32 %v7320_v29, 20.0 }
 0x2e8   : > { %v4009_v36 = vmul.f32 %v6645_v42, %v6605_v53  ;;  %v4039_v2 = vmul.f32 %v9262_v43, %v9261_v35  ;;  %v3703_v48 = vmul.f32 %v3647_v1, %v6841_v14  ;;  %v3511_v52 = vmul.f32 %v3455_v18, %v6733_v59 }
 0x2e9   : > { %v5114_v10 = vpop.eup %5113  ;;  %v3172_v51 = vrot.slane %v3108_v37, 4  ;;  %v2089_v25 = vmul.f32 %v5104_v55, %v2088_v11  ;;  %v7336_v56 = vadd.f32 %v7220_v22, %v3341_v3  ;;  %v3109_v23 = vsub.f32 1.0, %v4885_v13  ;;  %v1607_v11 = vpop.f32.mrf.mxu3 }
 0x2ea   : > { %v5116_v30 = vpop.eup %5115  ;;  %v3343_v46 = vmul.f32 0.6931472, %v5114_v10  ;;  %vm7338_vm5 = vcmp.lt.f32.partialorder %v2090_v21, 0.0004427343  ;;  %5117 = vlog2.f32 %v2093_v9  ;;  %v2096_v35 = vmul.f32 -0.5, %v5110_v16 }
 0x2eb   : > { %v2086_v43 = vmul.f32 0.6931472, %v5116_v30  ;;  %v1912_v1 = vmul.f32 1.442695, %v1862_v31  ;;  %v3735_v53 = vsel %vm3575_vm4, %v3703_v48, 0.0  ;;  %v3173_v50 = vrot.slane %v3109_v23, 4  ;;  %v7364_v30 = vpop.f32.mrf.mxu0 }
 0x2ec   : > { %v4185_v18 = vmul.f32 1.442695, %v7336_v56  ;;  %v7344_v14 = vadd.f32 %v7230_v12, %v3343_v46  ;;  %v7347_v55 = vmul.f32 %v3172_v51, %v7171_v44  ;;  %v2097_v37 = vadd.f32 1.0, %v2096_v35  ;;  %v9267_v23 = vld [vmem:[#allocation5_spill] sm:$0xff] }
 0x2ed   : > { %v2092_v22 = vsel %vm7338_vm5, %v2089_v25, %v2086_v43  ;;  %v2099_v13 = vand.u32 2147483647, %v5110_v16  ;;  %v3543_v12 = vsel %vm3383_vm3, %v3511_v52, 0.0  ;;  %v7357_v46 = vmul.f32 %v3173_v50, %v7232_v6 }
 0x2ee   : > { %9265 = vst [vmem:[#allocation42_spill] sm:$0xff] %v7347_v55  ;;  %5119 = vpow2.f32 %v4185_v18  ;;  %v4187_v21 = vmul.f32 1.442695, %v7344_v14  ;;  %v2244_v3 = vsel %vm1828_vm6, %v7243_v28, %v2092_v22  ;;  %v4011_v9 = vadd.f32 %v4009_v36, %v9267_v23  ;;  %v9272_v36 = vld [vmem:[#allocation24_spill] sm:$0xff] }
 0x2ef   : > { %9266 = vst [vmem:[#allocation43_spill] sm:$0xff] %v7357_v46  ;;  %v2276_v44 = vsub.f32 0.0, %v2244_v3  ;;  %5121 = vpow2.f32 %v1912_v1  ;;  %v3767_v42 = vadd.f32 %v3735_v53, %v3543_v12  ;;  %v7361_v31 = vadd.f32 %v1607_v11, %v6278_v32  ;;  %v9271_v53 = vld [vmem:[#allocation12_spill] sm:$0xff] }
 0x2f0   : > { %v5118_v10 = vpop.eup %5117  ;;  %v9091_v35 = vperm.slane %v7347_v55, 0  ;;  %5123 = vpow2.f32 %v4187_v21  ;;  %v2098_v48 = vmul.f32 %v5110_v16, %v2097_v37  ;;  %v7369_v59 = vsel %vm3829_vm1, %v7272_v61, %v3828_v60  ;;  %v9274_v1 = vld [vmem:[#allocation20_spill] sm:$0xff] }
 0x2f1   : > { %v2324_v43 = vmul.f32 1.442695, %v2276_v44  ;;  %9268 = vst [vmem:[#allocation44_spill] sm:$0xff] %v7369_v59  ;;  %v4041_v6 = vadd.f32 %v4039_v2, %v4011_v9  ;;  %vm7371_vm7 = vcmp.lt.f32.partialorder %v2099_v13, 0.0004427343  ;;  %v4069_v52 = vmul.f32 %v9272_v36, %v9271_v53  ;;  %v7403_v53 = vpop.f32.mrf.mxu1 }
 0x2f2   : > { %v3878_v51 = vperm.slane %v7357_v46, 0  ;;  %v2095_v25 = vmul.f32 0.6931472, %v5118_v10  ;;  %v3798_v18 = vsub.f32 0.0, %v9274_v1  ;;  %v3799_v22 = vsub.f32 0.0, %v3767_v42 }
 0x2f3   : > { %5125 = vpow2.f32 %v2324_v43  ;;  %v1863_v61 = vmin.f32 %v7361_v31, 20.0  ;;  %v7384_v2 = vsub.f32 1.0, %v7347_v55  ;;  %v3941_v37 = vmul.f32 %v9091_v35, %v7227_v20 }
 0x2f4   : > { %v7378_v16 = vpop.eup %5119  ;;  %v2101_v21 = vsel %vm7371_vm7, %v2098_v48, %v2095_v25  ;;  %v3974_v3 = vmul.f32 %v7216_v15, %v7357_v46  ;;  %v3910_v20 = vmul.f32 %v3878_v51, %v7249_v8  ;;  %v3942_v10 = vmul.f32 %v3878_v51, %v7251_v57 }
 0x2f5   : > { %9273 = vst [vmem:[#allocation12_spill] sm:$0xff] %v7378_v16  ;;  %v5122_v60 = vpop.eup %5121  ;;  %v9092_v11 = vperm.slane %v7378_v16, 0  ;;  %v2245_v13 = vsel %vm1829_vm8, %v7263_v5, %v2101_v21  ;;  %v1914_v15 = vmul.f32 1.442695, %v1863_v61  ;;  %v3300_v61 = vadd.f32 1e-10, %v7384_v2 }
 0x2f6   : > { %9275 = vst [vmem:[#allocation20_spill] sm:$0xff] %v7384_v2  ;;  %v2102_v12 = vadd.f32 1.0, %v5122_v60  ;;  %v2105_v44 = vmul.f32 -0.5, %v5122_v60  ;;  %v7395_v9 = vpop.eup %5123  ;;  %v2277_v43 = vsub.f32 0.0, %v2245_v13  ;;  %v2108_v51 = vand.u32 2147483647, %v5122_v60 }
 0x2f7   : > { %9276 = vst [vmem:[#allocation45_spill] sm:$0xff] %v7395_v9  ;;  %v4197_v42 = vmul.f32 %v9092_v11, %v3941_v37  ;;  %v4194_v48 = vperm.slane %v7395_v9, 0  ;;  %v4204_v50 = vmul.f32 %v7395_v9, %v3974_v3  ;;  %v5420_v37 = vld [vmem:[%s5692_s15 + $0x180] sm:$0xff]  ;;  %v7412_v13 = vadd.f32 %v4069_v52, %v4041_v6 }
 0x2f8   : > { %5127 = vlog2.f32 %v2102_v12  ;;  %v2326_v21 = vmul.f32 1.442695, %v2277_v43  ;;  %v2106_v35 = vadd.f32 1.0, %v2105_v44  ;;  %v2436_v11 = vrot.slane %v5420_v37, 1  ;;  %v1621_v12 = vpop.f32.mrf.mxu0 }
 0x2f9   : > { %v5126_v25 = vpop.eup %5125  ;;  %v7406_v1 = vadd.f32 %v4197_v42, %v7300_v33  ;;  %v4196_v8 = vmul.f32 %v4194_v48, %v3910_v20  ;;  %v4198_v36 = vmul.f32 %v4194_v48, %v3942_v10  ;;  %v7410_v57 = vadd.f32 %v4204_v50, %v7315_v38  ;;  %9278 = vst [vmem:[#allocation47_spill] sm:$0xff] %v7412_v13 }
 0x2fa   : > { %5129 = vpow2.f32 %v2326_v21  ;;  %v2372_v3 = vsub.f32 1.0, %v5126_v25  ;;  %v3417_v33 = vmax.f32 %v7018_v0, 1e-30  ;;  %v7423_v38 = vmul.f32 %v7369_v59, %v3798_v18  ;;  %v7448_v18 = vld [vmem:[%s5692_s15 + $0x188] sm:$0xff] }
 0x2fb   : > { %9277 = vst [vmem:[#allocation46_spill] sm:$0xff] %v7410_v57  ;;  %v7417_v42 = vadd.f32 %v4196_v8, %v7309_v17  ;;  %v7420_v44 = vadd.f32 %v4198_v36, %v7312_v47  ;;  %5131 = vpow2.f32 %v1914_v15  ;;  %v7426_v6 = vmul.f32 %v7369_v59, %v3799_v22 }
 0x2fc   : > { %9279 = vst [vmem:[#allocation48_spill] sm:$0xff] %v7423_v38  ;;  %v2107_v52 = vmul.f32 %v5122_v60, %v2106_v35  ;;  %v7428_v20 = vmul.f32 %v2436_v11, %v2372_v3  ;;  %v7432_v43 = vmul.f32 %v6988_v27, %v6996_v41  ;;  %vm1830_vm9 = vcmp.gt.f32.partialorder %v7320_v29, 20.0  ;;  %v1635_v3 = vpop.f32.mrf.mxu1 }
 0x2fd   : > { %9280 = vst [vmem:[#allocation49_spill] sm:$0xff] %v7426_v6  ;;  %vm7435_vm11 = vcmp.lt.f32.partialorder %v2108_v51, 0.0004427343  ;;  %v7440_v47 = vadd.f32 %v1621_v12, %v6278_v32  ;;  %v7443_v36 = vsub.f32 1.0, %v7357_v46  ;;  %5133 = vlog2.f32 %v3300_v61 }
 0x2fe   : > { %v5128_v10 = vpop.eup %5127  ;;  %9281 = vst [vmem:[#allocation50_spill] sm:$0xff] %v7432_v43  ;;  %vm2532_vm12 = vcmp.gt.f32.partialorder %v7428_v20, 0.1  ;;  %5135 = vlog2.f32 %v3417_v33  ;;  %v2437_v22 = vrot.slane %v7448_v18, 1  ;;  %v3609_v48 = vmax.f32 %v7054_v26, 1e-30 }
 0x2ff   : > { %9284 = vst [vmem:[#allocation51_spill] sm:$0xff] %v7443_v36  ;;  %v2104_v35 = vmul.f32 0.6931472, %v5128_v10  ;;  %v4854_v41 = vsel %vm2532_vm12, 1.0, %v9236_v49  ;;  %v1864_v60 = vmin.f32 %v7440_v47, 20.0  ;;  %v1568_v8 = vadd.f32 %v7364_v30, %v6355_v39 }
 0x300   : > { %v5130_v11 = vpop.eup %5129  ;;  %v2628_v15 = vperm.slane %v4854_v41, 0  ;;  %v7456_v25 = vadd.f32 %v4854_v41, %v7222_v45  ;;  %v3301_v12 = vadd.f32 1e-10, %v7443_v36  ;;  %v7471_v41 = vpop.f32.mrf.mxu2  ;;  %vm1831_vm14 = vcmp.gt.f32.partialorder %v7361_v31, 20.0 }
 0x301   : > { %v2110_v50 = vsel %vm7435_vm11, %v2107_v52, %v2104_v35  ;;  %v5132_v21 = vpop.eup %5131  ;;  %v2373_v51 = vsub.f32 1.0, %v5130_v11  ;;  %v1916_v61 = vmul.f32 1.442695, %v1864_v60  ;;  %v7474_v11 = vadd.f32 %v1635_v3, %v6278_v32 }
 0x302   : > { %v2246_v37 = vsel %vm1830_vm9, %v7320_v29, %v2110_v50  ;;  %v2111_v10 = vadd.f32 1.0, %v5132_v21  ;;  %v2114_v52 = vmul.f32 -0.5, %v5132_v21  ;;  %v7465_v17 = vmul.f32 %v2628_v15, %v7243_v28 }
 0x303   : > { %v2278_v33 = vsub.f32 0.0, %v2246_v37  ;;  %v7467_v45 = vmul.f32 %v2628_v15, %v1568_v8  ;;  %v7469_v35 = vmul.f32 %v2437_v22, %v2373_v51  ;;  %5137 = vpow2.f32 %v1916_v61  ;;  %v5134_v50 = vpop.eup %5133 }
 0x304   : > { %9285 = vst [vmem:[#allocation52_spill] sm:$0xff] %v7465_v17  ;;  %5139 = vlog2.f32 %v2111_v10  ;;  %v2115_v60 = vadd.f32 1.0, %v2114_v52  ;;  %v5136_v37 = vpop.eup %5135  ;;  %v2854_v57 = vsel %vm2708_vm10, %v7465_v17, -inf  ;;  %v3345_v15 = vmul.f32 0.6931472, %v5134_v50 }
 0x305   : > { %v2328_v30 = vmul.f32 1.442695, %v2278_v33  ;;  %v2855_v28 = vsel %vm2710_vm2, %v7467_v45, -inf  ;;  %vm2533_vm13 = vcmp.gt.f32.partialorder %v7469_v35, 0.1  ;;  %v1582_v61 = vadd.f32 %v7403_v53, %v6355_v39 }
 0x306   : > { %v2117_v22 = vand.u32 2147483647, %v5132_v21  ;;  %v2856_v8 = vmax.f32 %v2854_v57, %v2855_v28  ;;  %v4855_v51 = vsel %vm2533_vm13, 1.0, %v9236_v49  ;;  %v3419_v10 = vmax.f32 %v7126_v24, 1e-30 }
 0x307   : > { %5141 = vpow2.f32 %v2328_v30  ;;  %v2629_v3 = vperm.slane %v4855_v51, 0  ;;  %v7485_v33 = vadd.f32 %v4855_v51, %v7246_v34  ;;  %v1865_v50 = vmin.f32 %v7474_v11, 20.0 }
 0x308   : > { %5143 = vlog2.f32 %v3301_v12  ;;  %v2857_v52 = vrot.slane %v2856_v8, 4  ;;  %v2116_v57 = vmul.f32 %v5132_v21, %v2115_v60  ;;  %v7492_v28 = vadd.f32 %v7336_v56, %v3345_v15  ;;  %v5422_v21 = vld [vmem:[%s5692_s15 + $0x190] sm:$0xff]  ;;  %v1649_v27 = vpop.f32.mrf.mxu2 }
 0x309   : > { %5145 = vlog2.f32 %v3609_v48  ;;  %v7489_v30 = vpop.eup %5137  ;;  %v7495_v53 = vmul.f32 %v2629_v3, %v7263_v5  ;;  %v7497_v12 = vmul.f32 %v2629_v3, %v1582_v61  ;;  %vm7500_vm15 = vcmp.lt.f32.partialorder %v2117_v22, 0.0004427343 }
 0x30a   : > { %v5140_v34 = vpop.eup %5139  ;;  %v2858_v51 = vmax.f32 %v2856_v8, %v2857_v52  ;;  %v2120_v9 = vadd.f32 1.0, %v7489_v30  ;;  %v2438_v60 = vrot.slane %v5422_v21, 1  ;;  %v3459_v61 = vmul.f32 0.6931472, %v5136_v37 }
 0x30b   : > { %v2113_v36 = vmul.f32 0.6931472, %v5140_v34  ;;  %v2863_v56 = vsel %vm2708_vm10, %v7495_v53, -inf  ;;  %v2864_v5 = vsel %vm2710_vm2, %v7497_v12, -inf  ;;  %v1918_v22 = vmul.f32 1.442695, %v1865_v50 }
 0x30c   : > { %v2859_v3 = vrot.slane %v2858_v51, 2  ;;  %v2865_v46 = vmax.f32 %v2863_v56, %v2864_v5  ;;  %vm3385_vm0 = vcmp.gt.f32.partialorder %v7018_v0, 0.0  ;;  %v4215_v52 = vmul.f32 1.442695, %v7492_v28 }
 0x30d   : > { %v5142_v15 = vpop.eup %5141  ;;  %v2119_v8 = vsel %vm7500_vm15, %v2116_v57, %v2113_v36  ;;  %5147 = vlog2.f32 %v2120_v9  ;;  %v2123_v48 = vmul.f32 -0.5, %v7489_v30  ;;  %vm3577_vm1 = vcmp.gt.f32.partialorder %v7054_v26, 0.0 }
 0x30e   : > { %v5144_v6 = vpop.eup %5143  ;;  %v2374_v34 = vsub.f32 1.0, %v5142_v15  ;;  %v2247_v21 = vsel %vm1831_vm14, %v7361_v31, %v2119_v8  ;;  %v2860_v37 = vmax.f32 %v2858_v51, %v2859_v3  ;;  %v2866_v43 = vrot.slane %v2865_v46, 4 }
 0x30f   : > { %v5146_v38 = vpop.eup %5145  ;;  %v3347_v56 = vmul.f32 0.6931472, %v5144_v6  ;;  %5149 = vlog2.f32 %v3419_v10  ;;  %v2279_v50 = vsub.f32 0.0, %v2247_v21  ;;  %v7525_v15 = vadd.f32 %v1649_v27, %v6278_v32  ;;  %v7528_v6 = vpop.f32.mrf.mxu3 }
 0x310   : > { %v7517_v5 = vmul.f32 %v2438_v60, %v2374_v34  ;;  %v2861_v36 = vrot.slane %v2860_v37, 1  ;;  %v2867_v57 = vmax.f32 %v2865_v46, %v2866_v43  ;;  %v3651_v8 = vmul.f32 0.6931472, %v5146_v38 }
 0x311   : > { %v7522_v9 = vadd.f32 %v7344_v14, %v3347_v56  ;;  %v2330_v51 = vmul.f32 1.442695, %v2279_v50  ;;  %5151 = vpow2.f32 %v1918_v22  ;;  %v3513_v10 = vmul.f32 %v3459_v61, %v7018_v0 }
 0x312   : > { %vm2534_vm3 = vcmp.gt.f32.partialorder %v7517_v5, 0.1  ;;  %v2862_v60 = vmax.f32 %v2860_v37, %v2861_v36  ;;  %5153 = vpow2.f32 %v4215_v52  ;;  %v2868_v3 = vrot.slane %v2867_v57, 2 }
 0x313   : > { %v5148_v34 = vpop.eup %5147  ;;  %v3611_v46 = vmax.f32 %v7147_v54, 1e-30  ;;  %5155 = vpow2.f32 %v2330_v51  ;;  %v4856_v14 = vsel %vm2534_vm3, 1.0, %v9236_v49  ;;  %v2124_v27 = vadd.f32 1.0, %v2123_v48 }
 0x314   : > { %vm3014_vm4 = vcmp.ge.f32.partialorder %v7465_v17, %v2862_v60  ;;  %v2869_v38 = vmax.f32 %v2867_v57, %v2868_v3  ;;  %v2126_v43 = vand.u32 2147483647, %v7489_v30  ;;  %v1866_v21 = vmin.f32 %v7525_v15, 20.0 }
 0x315   : > { %v5150_v22 = vpop.eup %5149  ;;  %v3705_v61 = vmul.f32 %v3651_v8, %v7054_v26  ;;  %v4886_v52 = vsel %vm3014_vm4, 1.0, %v9236_v49  ;;  %v4217_v37 = vmul.f32 1.442695, %v7522_v9  ;;  %v7540_v56 = vadd.f32 %v4856_v14, %v7456_v25 }
 0x316   : > { %v3545_v48 = vsel %vm3385_vm0, %v3513_v10, 0.0  ;;  %v3110_v36 = vsub.f32 1.0, %v4886_v52  ;;  %v2870_v57 = vrot.slane %v2869_v38, 1  ;;  %5157 = vlog2.f32 %v3611_v46 }
 0x317   : > { %v7545_v51 = vpop.eup %5151  ;;  %v2630_v60 = vperm.slane %v4856_v14, 0  ;;  %v2122_v8 = vmul.f32 0.6931472, %v5148_v34  ;;  %v2125_v3 = vmul.f32 %v7489_v30, %v2124_v27  ;;  %vm7550_vm5 = vcmp.lt.f32.partialorder %v2126_v43, 0.0004427343  ;;  %v5423_v34 = vld [vmem:[%s5692_s15 + $0x198] sm:$0xff] }
 0x318   : > { %v7548_v13 = vpop.eup %5153  ;;  %v3174_v23 = vrot.slane %v3110_v36, 4  ;;  %v2871_v25 = vmax.f32 %v2869_v38, %v2870_v57  ;;  %v1920_v0 = vmul.f32 1.442695, %v1866_v21  ;;  %v3737_v52 = vsel %vm3577_vm1, %v3705_v61, 0.0  ;;  %v1663_v61 = vpop.f32.mrf.mxu3 }
 0x319   : > { %9288 = vst [vmem:[#allocation53_spill] sm:$0xff] %v7548_v13  ;;  %v5156_v10 = vpop.eup %5155  ;;  %5159 = vpow2.f32 %v4217_v37  ;;  %v1596_v46 = vadd.f32 %v7471_v41, %v6355_v39  ;;  %v2439_v14 = vrot.slane %v5423_v34, 1  ;;  %v2129_v38 = vadd.f32 1.0, %v7545_v51 }
 0x31a   : > { %v7560_v30 = vmul.f32 %v3174_v23, %v7428_v20  ;;  %vm3015_vm6 = vcmp.ge.f32.partialorder %v7495_v53, %v2871_v25  ;;  %v2375_v27 = vsub.f32 1.0, %v5156_v10  ;;  %v7566_v21 = vmul.f32 %v2630_v60, %v7320_v29 }
 0x31b   : > { %v4887_v43 = vsel %vm3015_vm6, 1.0, %v9236_v49  ;;  %v7568_v26 = vmul.f32 %v2630_v60, %v1596_v46  ;;  %v2128_v41 = vsel %vm7550_vm5, %v2125_v3, %v2122_v8  ;;  %v7572_v37 = vadd.f32 %v3737_v52, %v3545_v48 }
 0x31c   : > { %v9102_v23 = vperm.slane %v7560_v30, 0  ;;  %v9101_v20 = vperm.slane %v7548_v13, 0  ;;  %5161 = vpow2.f32 %v1920_v0  ;;  %v7576_v36 = vpop.eup %5157  ;;  %v7578_v57 = vmul.f32 0.6931472, %v5150_v22 }
 0x31d   : > { %9291 = vst [vmem:[#allocation54_spill] sm:$0xff] %v7568_v26  ;;  %v3111_v25 = vsub.f32 1.0, %v4887_v43  ;;  %v7580_v29 = vmul.f32 %v2439_v14, %v2375_v27  ;;  %vm1832_vm7 = vcmp.gt.f32.partialorder %v7440_v47, 20.0  ;;  %5163 = vlog2.f32 %v2129_v38 }
 0x31e   : > { %v3943_v17 = vmul.f32 %v9102_v23, %v7467_v45  ;;  %v2248_v48 = vsel %vm1832_vm7, %v7440_v47, %v2128_v41  ;;  %v7588_v60 = vadd.f32 %v1663_v61, %v6278_v32  ;;  %v2872_v22 = vsel %vm2708_vm10, %v7566_v21, -inf }
 0x31f   : > { %v7590_v8 = vpop.eup %5159  ;;  %v3175_v3 = vrot.slane %v3111_v25, 4  ;;  %v2873_v0 = vsel %vm2710_vm2, %v7568_v26, -inf  ;;  %vm2535_vm8 = vcmp.gt.f32.partialorder %v7580_v29, 0.1  ;;  %v3420_v10 = vmax.f32 %v7269_v63, 1e-30 }
 0x320   : > { %9292 = vst [vmem:[#allocation55_spill] sm:$0xff] %v7590_v8  ;;  %v4227_v45 = vmul.f32 %v9101_v20, %v3943_v17  ;;  %v4857_v52 = vsel %vm2535_vm8, 1.0, %v9236_v49  ;;  %v2132_v46 = vmul.f32 -0.5, %v7545_v51  ;;  %v2280_v38 = vsub.f32 0.0, %v2248_v48 }
 0x321   : > { %v7603_v34 = vmul.f32 %v3175_v3, %v7469_v35  ;;  %v2631_v14 = vperm.slane %v4857_v52, 0  ;;  %v7606_v27 = vadd.f32 %v4857_v52, %v7485_v33  ;;  %v2874_v61 = vmax.f32 %v2872_v22, %v2873_v0 }
 0x322   : > { %v7608_v43 = vpop.eup %5161  ;;  %v7611_v41 = vadd.f32 %v4227_v45, %v7406_v1  ;;  %v1610_v25 = vadd.f32 %v7528_v6, %v6355_v39  ;;  %v1867_v17 = vmin.f32 %v7588_v60, 20.0  ;;  %v4224_v33 = vperm.slane %v7590_v8, 0 }
 0x323   : > { %9293 = vst [vmem:[#allocation56_spill] sm:$0xff] %v7603_v34  ;;  %v7617_v20 = vsub.f32 1.0, %v7603_v34  ;;  %v3880_v35 = vperm.slane %v7603_v34, 0  ;;  %v2135_v48 = vand.u32 2147483647, %v7545_v51  ;;  %v5164_v3 = vpop.eup %5163  ;;  %v3976_v1 = vmul.f32 %v7448_v18, %v7603_v34  ;;  %v9318_v34 = vld [vmem:[#allocation32_spill] sm:$0xff] }
 0x324   : > { %9294 = vst [vmem:[#allocation57_spill] sm:$0xff] %v7611_v41  ;;  %v7625_v22 = vmul.f32 %v2631_v14, %v7361_v31  ;;  %v7627_v0 = vmul.f32 %v2631_v14, %v1610_v25  ;;  %v2133_v6 = vadd.f32 1.0, %v2132_v46  ;;  %v2332_v23 = vmul.f32 1.442695, %v2280_v38 }
 0x325   : > { %9295 = vst [vmem:[#allocation58_spill] sm:$0xff] %v7617_v20  ;;  %v3303_v45 = vadd.f32 1e-10, %v7617_v20  ;;  %v3912_v52 = vmul.f32 %v3880_v35, %v7495_v53  ;;  %v2138_v50 = vadd.f32 1.0, %v7608_v43  ;;  %v3944_v41 = vmul.f32 %v3880_v35, %v7497_v12 }
 0x326   : > { %v7634_v26 = vmul.f32 %v7590_v8, %v3976_v1  ;;  %v2875_v13 = vrot.slane %v2874_v61, 4  ;;  %v2881_v31 = vsel %vm2708_vm10, %v7625_v22, -inf  ;;  %v3612_v18 = vmax.f32 %v7284_v19, 1e-30 }
 0x327   : > { %v4226_v14 = vmul.f32 %v4224_v33, %v3912_v52  ;;  %v2882_v46 = vsel %vm2710_vm2, %v7627_v0, -inf  ;;  %v2131_v25 = vmul.f32 0.6931472, %v5164_v3  ;;  %v4228_v53 = vmul.f32 %v4224_v33, %v3944_v41 }
 0x328   : > { %9296 = vst [vmem:[#allocation59_spill] sm:$0xff] %v7634_v26  ;;  %v2883_v38 = vmax.f32 %v2881_v31, %v2882_v46  ;;  %5165 = vlog2.f32 %v3303_v45  ;;  %vm7641_vm9 = vcmp.lt.f32.partialorder %v2135_v48, 0.0004427343  ;;  %v2134_v35 = vmul.f32 %v7545_v51, %v2133_v6 }
 0x329   : > { %v7646_v12 = vadd.f32 %v4226_v14, %v7417_v42  ;;  %5167 = vpow2.f32 %v2332_v23  ;;  %v1922_v1 = vmul.f32 1.442695, %v1867_v17  ;;  %v7650_v52 = vadd.f32 %v4228_v53, %v7420_v44 }
 0x32a   : > { %v2876_v26 = vmax.f32 %v2874_v61, %v2875_v13  ;;  %v2884_v8 = vrot.slane %v2883_v38, 4  ;;  %5169 = vlog2.f32 %v2138_v50  ;;  %v3801_v41 = vsub.f32 0.0, %v7572_v37 }
 0x32b   : > { %vm1833_vm11 = vcmp.gt.f32.partialorder %v7474_v11, 20.0  ;;  %v2137_v33 = vsel %vm7641_vm9, %v2134_v35, %v2131_v25  ;;  %v2141_v42 = vmul.f32 -0.5, %v7608_v43  ;;  %5171 = vlog2.f32 %v3612_v18  ;;  %v9307_v25 = vld [vmem:[#allocation33_spill] sm:$0xff] }
 0x32c   : > { %v2885_v23 = vmax.f32 %v2883_v38, %v2884_v8  ;;  %v2249_v51 = vsel %vm1833_vm11, %v7474_v11, %v2137_v33  ;;  %v2144_v17 = vand.u32 2147483647, %v7608_v43  ;;  %v3515_v13 = vmul.f32 %v7578_v57, %v7126_v24 }
 0x32d   : > { %5173 = vlog2.f32 %v3420_v10  ;;  %v2281_v44 = vsub.f32 0.0, %v2249_v51  ;;  %v2142_v50 = vadd.f32 1.0, %v2141_v42  ;;  %v3655_v61 = vmul.f32 0.6931472, %v7576_v36  ;;  %v9302_v36 = vld [vmem:[#allocation30_spill] sm:$0xff] }
 0x32e   : > { %v5166_v37 = vpop.eup %5165  ;;  %v2877_v48 = vrot.slane %v2876_v26, 2  ;;  %v2886_v20 = vrot.slane %v2885_v23, 2  ;;  %5175 = vpow2.f32 %v1922_v1  ;;  %v9299_v6 = vsub.f32 0.0, %v7088_v7 }
 0x32f   : > { %v5168_v3 = vpop.eup %5167  ;;  %v3351_v45 = vmul.f32 0.6931472, %v5166_v37  ;;  %v2334_v31 = vmul.f32 1.442695, %v2281_v44  ;;  %v2143_v18 = vmul.f32 %v7608_v43, %v2142_v50  ;;  %v7669_v10 = vmul.f32 %v7369_v59, %v3801_v41 }
 0x330   : > { %v7665_v8 = vmul.f32 %v7369_v59, %v9299_v6  ;;  %v5170_v57 = vpop.eup %5169  ;;  %v7674_v46 = vmul.f32 %v9302_v36, %v7061_v40  ;;  %vm7676_vm12 = vcmp.lt.f32.partialorder %v2144_v17, 0.0004427343  ;;  %vm3387_vm13 = vcmp.gt.f32.partialorder %v7126_v24, 0.0 }
 0x331   : > { %9301 = vst [vmem:[#allocation61_spill] sm:$0xff] %v7669_v10  ;;  %v2887_v7 = vmax.f32 %v2885_v23, %v2886_v20  ;;  %v7682_v53 = vadd.f32 %v7522_v9, %v3351_v45  ;;  %v2140_v43 = vmul.f32 0.6931472, %v5170_v57  ;;  %v5172_v38 = vpop.eup %5171  ;;  %v7684_v35 = vsel %vm3387_vm13, %v3515_v13, 0.0  ;;  %v5424_v13 = vld [vmem:[%s5692_s15 + $0x1a0] sm:$0xff]  ;;  %v1637_v20 = vpop.f32.mrf.mxu1 }
 0x332   : > { %9300 = vst [vmem:[#allocation60_spill] sm:$0xff] %v7665_v8  ;;  %v7687_v1 = vmul.f32 %v3655_v61, %v7147_v54  ;;  %v2878_v40 = vmax.f32 %v2876_v26, %v2877_v48  ;;  %5177 = vpow2.f32 %v2334_v31  ;;  %v2376_v23 = vsub.f32 1.0, %v5168_v3  ;;  %v1623_v48 = vpop.f32.mrf.mxu0 }
 0x333   : > { %9303 = vst [vmem:[#allocation62_spill] sm:$0xff] %v7674_v46  ;;  %v5174_v41 = vpop.eup %5173  ;;  %v2888_v33 = vrot.slane %v2887_v7, 1  ;;  %v4247_v42 = vmul.f32 1.442695, %v7682_v53  ;;  %v2146_v24 = vsel %vm7676_vm12, %v2143_v18, %v2140_v43  ;;  %vm3580_vm14 = vcmp.gt.f32.partialorder %v7284_v19, 0.0 }
 0x334   : > { %9306 = vst [vmem:[#allocation63_spill] sm:$0xff] %v7684_v35  ;;  %v5176_v9 = vpop.eup %5175  ;;  %v3421_v51 = vmax.f32 %v7280_v4, 1e-30  ;;  %v3613_v17 = vmax.f32 %v7291_v62, 1e-30  ;;  %vm1834_vm15 = vcmp.gt.f32.partialorder %v7525_v15, 20.0 }
 0x335   : > { %v2440_v26 = vrot.slane %v5424_v13, 1  ;;  %v3657_v44 = vmul.f32 0.6931472, %v5172_v38  ;;  %v2889_v50 = vmax.f32 %v2887_v7, %v2888_v33  ;;  %v2250_v37 = vsel %vm1834_vm15, %v7525_v15, %v2146_v24 }
 0x336   : > { %v2147_v61 = vadd.f32 1.0, %v5176_v9  ;;  %v3465_v6 = vmul.f32 0.6931472, %v5174_v41  ;;  %v7699_v3 = vsub.f32 1.0, %v7560_v30  ;;  %5179 = vpow2.f32 %v4247_v42 }
 0x337   : > { %v2150_v45 = vmul.f32 -0.5, %v5176_v9  ;;  %v2879_v31 = vrot.slane %v2878_v40, 1  ;;  %vm3017_vm0 = vcmp.ge.f32.partialorder %v7625_v22, %v2889_v50  ;;  %v7702_v18 = vmul.f32 %v2440_v26, %v2376_v23 }
 0x338   : > { %5181 = vlog2.f32 %v2147_v61  ;;  %v5178_v57 = vpop.eup %5177  ;;  %v9308_v7 = vperm.slane %v7269_v63, 0  ;;  %v4889_v38 = vsel %vm3017_vm0, 1.0, %v9236_v49  ;;  %v2282_v41 = vsub.f32 0.0, %v2250_v37 }
 0x339   : > { %v2151_v33 = vadd.f32 1.0, %v2150_v45  ;;  %v3708_v24 = vmul.f32 %v3657_v44, %v7284_v19  ;;  %5183 = vlog2.f32 %v3421_v51  ;;  %v3113_v42 = vsub.f32 1.0, %v4889_v38  ;;  %v5425_v38 = vld [vmem:[%s5692_s15 + $0x1a8] sm:$0xff] }
 0x33a   : > { %v7707_v43 = vmul.f32 %v9308_v7, %v9307_v25  ;;  %v2153_v13 = vand.u32 2147483647, %v5176_v9  ;;  %v3516_v50 = vmul.f32 %v3465_v6, %v7269_v63  ;;  %5185 = vlog2.f32 %v3613_v17 }
 0x33b   : > { %v3302_v23 = vadd.f32 1e-10, %v7699_v3  ;;  %vm2536_vm1 = vcmp.gt.f32.partialorder %v7702_v18, 0.1  ;;  %v2880_v26 = vmax.f32 %v2878_v40, %v2879_v31  ;;  %v3177_v61 = vrot.slane %v3113_v42, 4  ;;  %v1691_v42 = vpop.f32.mrf.mxu1 }
 0x33c   : > { %v4858_v25 = vsel %vm2536_vm1, 1.0, %v9236_v49  ;;  %v2377_v7 = vsub.f32 1.0, %v5178_v57  ;;  %v7715_v37 = vpop.eup %5179  ;;  %v2336_v45 = vmul.f32 1.442695, %v2282_v41  ;;  %v2152_v44 = vmul.f32 %v5176_v9, %v2151_v33 }
 0x33d   : > { %9309 = vst [vmem:[#allocation33_spill] sm:$0xff] %v7715_v37  ;;  %v7718_v51 = vadd.f32 %v4858_v25, %v7540_v56  ;;  %v2441_v14 = vrot.slane %v5425_v38, 1  ;;  %vm3388_vm3 = vcmp.gt.f32.partialorder %v7269_v63, 0.0  ;;  %v3740_v17 = vsel %vm3580_vm14, %v3708_v24, 0.0  ;;  %v1677_v24 = vpop.f32.mrf.mxu0  ;;  %v9331_v63 = vld [vmem:[#allocation53_spill] sm:$0xff] }
 0x33e   : > { %v5182_v6 = vpop.eup %5181  ;;  %v3422_v40 = vmax.f32 %v7347_v55, 1e-30  ;;  %v7726_v31 = vmul.f32 %v3177_v61, %v7580_v29  ;;  %vm7728_vm4 = vcmp.lt.f32.partialorder %v2153_v13, 0.0004427343  ;;  %5187 = vlog2.f32 %v3302_v23 }
 0x33f   : > { %vm1835_vm5 = vcmp.gt.f32.partialorder %v7588_v60, 20.0  ;;  %v2149_v56 = vmul.f32 0.6931472, %v5182_v6  ;;  %v7733_v9 = vmul.f32 %v2441_v14, %v2377_v7  ;;  %v5184_v41 = vpop.eup %5183  ;;  %vm3016_vm6 = vcmp.ge.f32.partialorder %v7566_v21, %v2880_v26 }
 0x340   : > { %9310 = vst [vmem:[#allocation64_spill] sm:$0xff] %v7726_v31  ;;  %v7737_v19 = vsub.f32 1.0, %v7726_v31  ;;  %v3882_v33 = vperm.slane %v7726_v31, 0  ;;  %v4254_v29 = vperm.slane %v7715_v37, 0  ;;  %v5186_v13 = vpop.eup %5185  ;;  %5189 = vpow2.f32 %v2336_v45 }
 0x341   : > { %v2155_v23 = vsel %vm7728_vm4, %v2152_v44, %v2149_v56  ;;  %v2632_v61 = vperm.slane %v4858_v25, 0  ;;  %vm2537_vm7 = vcmp.gt.f32.partialorder %v7733_v9, 0.1  ;;  %vm3579_vm8 = vcmp.gt.f32.partialorder %v7147_v54, 0.0 }
 0x342   : > { %9313 = vst [vmem:[#allocation65_spill] sm:$0xff] %v7737_v19  ;;  %v3305_v14 = vadd.f32 1e-10, %v7737_v19  ;;  %v3914_v7 = vmul.f32 %v3882_v33, %v7625_v22  ;;  %v3946_v38 = vmul.f32 %v3882_v33, %v7627_v0  ;;  %v1624_v6 = vadd.f32 %v1623_v48, %v6355_v39 }
 0x343   : > { %v2251_v45 = vsel %vm1835_vm5, %v7588_v60, %v2155_v23  ;;  %v1638_v57 = vadd.f32 %v1637_v20, %v6355_v39  ;;  %v7754_v25 = vadd.f32 %v1677_v24, %v6278_v32  ;;  %v7757_v44 = vadd.f32 %v1691_v42, %v6278_v32 }
 0x344   : > { %v4256_v56 = vmul.f32 %v4254_v29, %v3914_v7  ;;  %v4258_v37 = vmul.f32 %v4254_v29, %v3946_v38  ;;  %v2283_v19 = vsub.f32 0.0, %v2251_v45  ;;  %v4859_v22 = vsel %vm2537_vm7, 1.0, %v9236_v49  ;;  %v5188_v0 = vpop.eup %5187 }
 0x345   : > { %v7761_v48 = vmul.f32 %v2632_v61, %v7440_v47  ;;  %v7763_v33 = vmul.f32 %v2632_v61, %v1624_v6  ;;  %v2633_v23 = vperm.slane %v4859_v22, 0  ;;  %5191 = vlog2.f32 %v3305_v14  ;;  %v9314_v47 = vld [vmem:[#allocation37_spill] sm:$0xff] }
 0x346   : > { %v7766_v20 = vadd.f32 %v4256_v56, %v7646_v12  ;;  %v7769_v24 = vadd.f32 %v4258_v37, %v7650_v52  ;;  %v2338_v42 = vmul.f32 1.442695, %v2283_v19  ;;  %v7772_v29 = vadd.f32 %v4859_v22, %v7606_v27  ;;  %v5190_v7 = vpop.eup %5189 }
 0x347   : > { %v3548_v38 = vsel %vm3388_vm3, %v3516_v50, 0.0  ;;  %v9315_v61 = vperm.slane %v9314_v47, 0  ;;  %v7780_v14 = vmul.f32 %v2633_v23, %v7474_v11  ;;  %v7782_v12 = vmul.f32 %v2633_v23, %v1638_v57  ;;  %v5426_v23 = vld [vmem:[%s5692_s15 + $0x1b0] sm:$0xff] }
 0x348   : > { %v7784_v45 = vadd.f32 %v3740_v17, %v3548_v38  ;;  %v4888_v27 = vsel %vm3016_vm6, 1.0, %v9236_v49  ;;  %5193 = vpow2.f32 %v2338_v42  ;;  %v1868_v52 = vmin.f32 %v7754_v25, 20.0 }
 0x349   : > { %v4165_v6 = vmul.f32 %v9315_v61, %v7707_v43  ;;  %5195 = vlog2.f32 %v3422_v40  ;;  %v2890_v50 = vsel %vm2708_vm10, %v7761_v48, -inf  ;;  %v2891_v11 = vsel %vm2710_vm2, %v7763_v33, -inf }
 0x34a   : > { %9316 = vst [vmem:[#allocation66_spill] sm:$0xff] %v7784_v45  ;;  %v2899_v43 = vsel %vm2708_vm10, %v7780_v14, -inf  ;;  %v2900_v37 = vsel %vm2710_vm2, %v7782_v12, -inf  ;;  %v1924_v17 = vmul.f32 1.442695, %v1868_v52  ;;  %v1869_v26 = vmin.f32 %v7757_v44, 20.0 }
 0x34b   : > { %v2378_v19 = vsub.f32 1.0, %v5190_v7  ;;  %v5192_v57 = vpop.eup %5191  ;;  %v7802_v40 = vsel %vm3579_vm8, %v7687_v1, 0.0  ;;  %v3112_v56 = vsub.f32 1.0, %v4888_v27  ;;  %v2901_v22 = vmax.f32 %v2899_v43, %v2900_v37 }
 0x34c   : > { %9317 = vst [vmem:[#allocation67_spill] sm:$0xff] %v7802_v40  ;;  %v2442_v42 = vrot.slane %v5426_v23, 1  ;;  %v3349_v38 = vmul.f32 0.6931472, %v5188_v0  ;;  %v2892_v61 = vmax.f32 %v2890_v50, %v2891_v11  ;;  %5197 = vpow2.f32 %v1924_v17  ;;  %v1651_v0 = vpop.f32.mrf.mxu2 }
 0x34d   : > { %v1926_v31 = vmul.f32 1.442695, %v1869_v26  ;;  %v7806_v10 = vadd.f32 %v4165_v6, %v9318_v34  ;;  %v7808_v52 = vmul.f32 0.6931472, %v5184_v41  ;;  %v2902_v7 = vrot.slane %v2901_v22, 4  ;;  %v5427_v26 = vld [vmem:[%s5692_s15 + $0x1b8] sm:$0xff] }
 0x34e   : > { %v7810_v4 = vmul.f32 %v2442_v42, %v2378_v19  ;;  %v5194_v54 = vpop.eup %5193  ;;  %v7813_v27 = vmul.f32 0.6931472, %v5186_v13  ;;  %v3355_v43 = vmul.f32 0.6931472, %v5192_v57  ;;  %v3176_v37 = vrot.slane %v3112_v56, 4 }
 0x34f   : > { %9319 = vst [vmem:[#allocation32_spill] sm:$0xff] %v7808_v52  ;;  %5199 = vpow2.f32 %v1926_v31  ;;  %v5196_v50 = vpop.eup %5195  ;;  %v2903_v34 = vmax.f32 %v2901_v22, %v2902_v7  ;;  %v7818_v41 = vadd.f32 %v7492_v28, %v3349_v38  ;;  %v2893_v6 = vrot.slane %v2892_v61, 4 }
 0x350   : > { %9320 = vst [vmem:[#allocation68_spill] sm:$0xff] %v7813_v27  ;;  %vm2538_vm9 = vcmp.gt.f32.partialorder %v7810_v4, 0.1  ;;  %v2443_v19 = vrot.slane %v5427_v26, 1  ;;  %v2379_v57 = vsub.f32 1.0, %v5194_v54  ;;  %v7827_v22 = vadd.f32 %v7682_v53, %v3355_v43 }
 0x351   : > { %v4860_v17 = vsel %vm2538_vm9, 1.0, %v9236_v49  ;;  %v2904_v13 = vrot.slane %v2903_v34, 2  ;;  %v3469_v1 = vmul.f32 0.6931472, %v5196_v50  ;;  %v3424_v56 = vmax.f32 %v7560_v30, 1e-30 }
 0x352   : > { %v2634_v23 = vperm.slane %v4860_v17, 0  ;;  %v7823_v31 = vadd.f32 %v4860_v17, %v7718_v51  ;;  %v5198_v42 = vpop.eup %5197  ;;  %v1652_v28 = vadd.f32 %v1651_v0, %v6355_v39  ;;  %v7831_v38 = vmul.f32 %v3176_v37, %v7517_v5  ;;  %v9322_v51 = vld [vmem:[#allocation36_spill] sm:$0xff] }
 0x353   : > { %v2905_v7 = vmax.f32 %v2903_v34, %v2904_v13  ;;  %v2156_v26 = vadd.f32 1.0, %v5198_v42  ;;  %v2159_v11 = vmul.f32 -0.5, %v5198_v42  ;;  %v9323_v54 = vperm.slane %v7347_v55, 0 }
 0x354   : > { %9321 = vst [vmem:[#allocation69_spill] sm:$0xff] %v7831_v38  ;;  %v4245_v50 = vmul.f32 1.442695, %v7818_v41  ;;  %v7840_v27 = vmul.f32 %v2634_v23, %v7525_v15  ;;  %v7842_v53 = vmul.f32 %v2634_v23, %v1652_v28  ;;  %v2894_v43 = vmax.f32 %v2892_v61, %v2893_v6 }
 0x355   : > { %v7833_v52 = vpop.eup %5199  ;;  %v3909_v17 = vmul.f32 %v9323_v54, %v9322_v51  ;;  %v2906_v0 = vrot.slane %v2905_v7, 1  ;;  %5201 = vlog2.f32 %v2156_v26  ;;  %v7844_v5 = vmul.f32 %v2443_v19, %v2379_v57  ;;  %v1705_v57 = vpop.f32.mrf.mxu2 }
 0x356   : > { %v7847_v37 = vmul.f32 %v3469_v1, %v7347_v55  ;;  %5203 = vlog2.f32 %v3424_v56  ;;  %v4277_v34 = vmul.f32 1.442695, %v7827_v22  ;;  %v2165_v13 = vadd.f32 1.0, %v7833_v52  ;;  %v1665_v26 = vpop.f32.mrf.mxu3 }
 0x357   : > { %v7852_v51 = vsub.f32 1.0, %v7831_v38  ;;  %v2907_v15 = vmax.f32 %v2905_v7, %v2906_v0  ;;  %v2160_v54 = vadd.f32 1.0, %v2159_v11  ;;  %v2908_v61 = vsel %vm2708_vm10, %v7840_v27, -inf  ;;  %v9325_v11 = vld [vmem:[#allocation52_spill] sm:$0xff] }
 0x358   : > { %v9324_v6 = vperm.slane %v7378_v16, 0  ;;  %5205 = vlog2.f32 %v2165_v13  ;;  %v2168_v1 = vmul.f32 -0.5, %v7833_v52  ;;  %v2909_v23 = vsel %vm2710_vm2, %v7842_v53, -inf }
 0x359   : > { %5207 = vpow2.f32 %v4245_v50  ;;  %v2895_v56 = vrot.slane %v2894_v43, 2  ;;  %v2162_v28 = vand.u32 2147483647, %v5198_v42  ;;  %vm2539_vm11 = vcmp.gt.f32.partialorder %v7844_v5, 0.1 }
 0x35a   : > { %v7858_v19 = vmul.f32 %v9324_v6, %v3909_v17  ;;  %v9326_v7 = vperm.slane %v7560_v30, 0  ;;  %vm3019_vm12 = vcmp.ge.f32.partialorder %v7780_v14, %v2907_v15  ;;  %5209 = vpow2.f32 %v4277_v34 }
 0x35b   : > { %v2910_v17 = vmax.f32 %v2908_v61, %v2909_v23  ;;  %v5202_v13 = vpop.eup %5201  ;;  %v3304_v6 = vadd.f32 1e-10, %v7852_v51  ;;  %vm1836_vm13 = vcmp.gt.f32.partialorder %v7754_v25, 20.0  ;;  %v2161_v50 = vmul.f32 %v5198_v42, %v2160_v54 }
 0x35c   : > { %v7867_v0 = vmul.f32 %v9326_v7, %v9325_v11  ;;  %v7873_v62 = vadd.f32 %v1705_v57, %v6278_v32  ;;  %v7875_v40 = vpop.eup %5203  ;;  %v4891_v35 = vsel %vm3019_vm12, 1.0, %v9236_v49  ;;  %v2158_v11 = vmul.f32 0.6931472, %v5202_v13 }
 0x35d   : > { %v2169_v7 = vadd.f32 1.0, %v2168_v1  ;;  %v4861_v15 = vsel %vm2539_vm11, 1.0, %v9236_v49  ;;  %v2896_v34 = vmax.f32 %v2894_v43, %v2895_v56  ;;  %v3115_v61 = vsub.f32 1.0, %v4891_v35 }
 0x35e   : > { %vm2163_vm14 = vcmp.lt.f32.partialorder %v2162_v28, 0.0004427343  ;;  %v2171_v23 = vand.u32 2147483647, %v7833_v52  ;;  %v5206_v36 = vpop.eup %5205  ;;  %v2911_v42 = vrot.slane %v2910_v17, 4  ;;  %v2635_v54 = vperm.slane %v4861_v15, 0 }
 0x35f   : > { %v2164_v16 = vsel %vm2163_vm14, %v2161_v50, %v2158_v11  ;;  %v7881_v57 = vadd.f32 %v4861_v15, %v7772_v29  ;;  %v7885_v47 = vpop.eup %5207  ;;  %v3179_v13 = vrot.slane %v3115_v61, 4  ;;  %v1666_v35 = vadd.f32 %v1665_v26, %v6355_v39 }
 0x360   : > { %9327 = vst [vmem:[#allocation36_spill] sm:$0xff] %v7885_v47  ;;  %v2252_v43 = vsel %vm1836_vm13, %v7754_v25, %v2164_v16  ;;  %v1870_v1 = vmin.f32 %v7873_v62, 20.0  ;;  %v7892_v56 = vpop.eup %5209  ;;  %v2167_v50 = vmul.f32 0.6931472, %v5206_v36  ;;  %v2170_v29 = vmul.f32 %v7833_v52, %v2169_v7 }
 0x361   : > { %9328 = vst [vmem:[#allocation52_spill] sm:$0xff] %v7892_v56  ;;  %v2284_v28 = vsub.f32 0.0, %v2252_v43  ;;  %v7896_v11 = vmul.f32 %v2635_v54, %v7588_v60  ;;  %5211 = vlog2.f32 %v3304_v6  ;;  %v7903_v16 = vmul.f32 %v3179_v13, %v7733_v9  ;;  %v1719_v9 = vpop.f32.mrf.mxu3 }
 0x362   : > { %vm1837_vm15 = vcmp.gt.f32.partialorder %v7757_v44, 20.0  ;;  %vm2172_vm0 = vcmp.lt.f32.partialorder %v2171_v23, 0.0004427343  ;;  %v2912_v26 = vmax.f32 %v2910_v17, %v2911_v42  ;;  %v7908_v60 = vmul.f32 %v2635_v54, %v1666_v35 }
 0x363   : > { %9329 = vst [vmem:[#allocation70_spill] sm:$0xff] %v7903_v16  ;;  %v2340_v36 = vmul.f32 1.442695, %v2284_v28  ;;  %v2173_v52 = vsel %vm2172_vm0, %v2170_v29, %v2167_v50  ;;  %v2897_v7 = vrot.slane %v2896_v34, 1  ;;  %v7911_v15 = vsub.f32 1.0, %v7903_v16 }
 0x364   : > { %v3884_v61 = vperm.slane %v7903_v16, 0  ;;  %v4284_v6 = vperm.slane %v7892_v56, 0  ;;  %vm3390_vm1 = vcmp.gt.f32.partialorder %v7347_v55, 0.0  ;;  %v2253_v23 = vsel %vm1837_vm15, %v7757_v44, %v2173_v52 }
 0x365   : > { %9330 = vst [vmem:[#allocation71_spill] sm:$0xff] %v7911_v15  ;;  %5213 = vpow2.f32 %v2340_v36  ;;  %v2917_v13 = vsel %vm2708_vm10, %v7896_v11, -inf  ;;  %v1928_v17 = vmul.f32 1.442695, %v1870_v1  ;;  %v3426_v42 = vmax.f32 %v7831_v38, 1e-30 }
 0x366   : > { %v3307_v54 = vadd.f32 1e-10, %v7911_v15  ;;  %v3916_v43 = vmul.f32 %v3884_v61, %v7780_v14  ;;  %v3948_v35 = vmul.f32 %v3884_v61, %v7782_v12  ;;  %v2285_v28 = vsub.f32 0.0, %v2253_v23 }
 0x367   : > { %v2913_v50 = vrot.slane %v2912_v26, 2  ;;  %v2918_v29 = vsel %vm2710_vm2, %v7908_v60, -inf  ;;  %v7926_v36 = vadd.f32 %v1719_v9, %v6278_v32  ;;  %v5212_v52 = vpop.eup %5211  ;;  %v9332_v15 = vperm.slane %v9331_v63, 0 }
 0x368   : > { %v4286_v56 = vmul.f32 %v4284_v6, %v3916_v43  ;;  %v4288_v16 = vmul.f32 %v4284_v6, %v3948_v35  ;;  %v2919_v1 = vmax.f32 %v2917_v13, %v2918_v29  ;;  %5215 = vlog2.f32 %v3307_v54 }
 0x369   : > { %v4225_v8 = vmul.f32 %v9332_v15, %v7867_v0  ;;  %v2898_v14 = vmax.f32 %v2896_v34, %v2897_v7  ;;  %v2342_v45 = vmul.f32 1.442695, %v2285_v28  ;;  %5217 = vpow2.f32 %v1928_v17 }
 0x36a   : > { %5219 = vlog2.f32 %v3426_v42  ;;  %v7932_v12 = vadd.f32 %v4286_v56, %v7766_v20  ;;  %v7935_v61 = vadd.f32 %v4288_v16, %v7769_v24  ;;  %v2920_v9 = vrot.slane %v2919_v1, 4  ;;  %v5428_v56 = vld [vmem:[%s5692_s15 + $0x1c0] sm:$0xff] }
 0x36b   : > { %v5214_v23 = vpop.eup %5213  ;;  %v4199_v6 = vadd.f32 %v7858_v19, %v7806_v10  ;;  %v3881_v13 = vperm.slane %v7831_v38, 0  ;;  %v2914_v54 = vmax.f32 %v2912_v26, %v2913_v50  ;;  %v1871_v0 = vmin.f32 %v7926_v36, 20.0 }
 0x36c   : > { %v3473_v34 = vmul.f32 0.6931472, %v7875_v40  ;;  %v3353_v7 = vmul.f32 0.6931472, %v5212_v52  ;;  %5221 = vpow2.f32 %v2342_v45  ;;  %v2921_v15 = vmax.f32 %v2919_v1, %v2920_v9  ;;  %v9334_v1 = vld [vmem:[#allocation54_spill] sm:$0xff] }
 0x36d   : > { %vm3018_vm3 = vcmp.ge.f32.partialorder %v7761_v48, %v2898_v14  ;;  %v1930_v20 = vmul.f32 1.442695, %v1871_v0  ;;  %v2380_v24 = vsub.f32 1.0, %v5214_v23  ;;  %v2444_v16 = vrot.slane %v5428_v56, 1 }
 0x36e   : > { %v5216_v17 = vpop.eup %5215  ;;  %v7947_v10 = vsel %vm3390_vm1, %v7847_v37, 0.0  ;;  %v7949_v19 = vadd.f32 %v4225_v8, %v4199_v6  ;;  %v4253_v26 = vperm.slane %v7885_v47, 0  ;;  %v2922_v40 = vrot.slane %v2921_v15, 2 }
 0x36f   : > { %9333 = vst [vmem:[#allocation72_spill] sm:$0xff] %v7947_v10  ;;  %v5218_v42 = vpop.eup %5217  ;;  %v3913_v45 = vmul.f32 %v3881_v13, %v7566_v21  ;;  %v2915_v43 = vrot.slane %v2914_v54, 1  ;;  %v3359_v35 = vmul.f32 0.6931472, %v5216_v17  ;;  %5223 = vpow2.f32 %v1930_v20 }
 0x370   : > { %v5220_v28 = vpop.eup %5219  ;;  %v4890_v50 = vsel %vm3018_vm3, 1.0, %v9236_v49  ;;  %v7957_v29 = vadd.f32 %v7818_v41, %v3353_v7  ;;  %v2923_v37 = vmax.f32 %v2921_v15, %v2922_v40  ;;  %v2174_v8 = vadd.f32 1.0, %v5218_v42 }
 0x371   : > { %v7960_v52 = vmul.f32 %v3473_v34, %v7560_v30  ;;  %v3945_v9 = vmul.f32 %v3881_v13, %v9334_v1  ;;  %v2177_v21 = vmul.f32 -0.5, %v5218_v42  ;;  %v7963_v23 = vmul.f32 %v2444_v16, %v2380_v24  ;;  %v5429_v16 = vld [vmem:[%s5692_s15 + $0x1c8] sm:$0xff] }
 0x372   : > { %v5222_v6 = vpop.eup %5221  ;;  %v7965_v0 = vmul.f32 %v4253_v26, %v3913_v45  ;;  %v2924_v20 = vrot.slane %v2923_v37, 1  ;;  %v7968_v14 = vadd.f32 %v7827_v22, %v3359_v35  ;;  %5225 = vlog2.f32 %v2174_v8  ;;  %v1679_v22 = vpop.f32.mrf.mxu0 }
 0x373   : > { %v7970_v41 = vmul.f32 0.6931472, %v5220_v28  ;;  %v7972_v7 = vmul.f32 %v4253_v26, %v3945_v9  ;;  %v3114_v34 = vsub.f32 1.0, %v4890_v50  ;;  %v2916_v15 = vmax.f32 %v2914_v54, %v2915_v43 }
 0x374   : > { %v7975_v56 = vmul.f32 1.442695, %v7957_v29  ;;  %v2925_v13 = vmax.f32 %v2923_v37, %v2924_v20  ;;  %v4307_v24 = vmul.f32 1.442695, %v7968_v14  ;;  %v2445_v17 = vrot.slane %v5429_v16, 1  ;;  %v1693_v16 = vpop.f32.mrf.mxu1 }
 0x375   : > { %v5224_v40 = vpop.eup %5223  ;;  %v2178_v45 = vadd.f32 1.0, %v2177_v21  ;;  %v2180_v1 = vand.u32 2147483647, %v5218_v42  ;;  %vm2540_vm4 = vcmp.gt.f32.partialorder %v7963_v23, 0.1  ;;  %v2381_v35 = vsub.f32 1.0, %v5222_v6 }
 0x376   : > { %vm3021_vm5 = vcmp.ge.f32.partialorder %v7896_v11, %v2925_v13  ;;  %5227 = vpow2.f32 %v4307_v24  ;;  %v2183_v26 = vadd.f32 1.0, %v5224_v40  ;;  %v2186_v54 = vmul.f32 -0.5, %v5224_v40 }
 0x377   : > { %v7981_v43 = vrot.slane %v3114_v34, 4  ;;  %vm3020_vm6 = vcmp.ge.f32.partialorder %v7840_v27, %v2916_v15  ;;  %v4893_v28 = vsel %vm3021_vm5, 1.0, %v9236_v49  ;;  %vm1838_vm7 = vcmp.gt.f32.partialorder %v7873_v62, 20.0 }
 0x378   : > { %v5226_v50 = vpop.eup %5225  ;;  %v3117_v37 = vsub.f32 1.0, %v4893_v28  ;;  %5229 = vlog2.f32 %v2183_v26  ;;  %v1680_v8 = vadd.f32 %v1679_v22, %v6355_v39  ;;  %v4862_v9 = vsel %vm2540_vm4, 1.0, %v9236_v49 }
 0x379   : > { %v2176_v21 = vmul.f32 0.6931472, %v5226_v50  ;;  %v2179_v6 = vmul.f32 %v5218_v42, %v2178_v45  ;;  %vm2181_vm8 = vcmp.lt.f32.partialorder %v2180_v1, 0.0004427343  ;;  %vm1839_vm9 = vcmp.gt.f32.partialorder %v7926_v36, 20.0 }
 0x37a   : > { %v2636_v20 = vperm.slane %v4862_v9, 0  ;;  %v3181_v34 = vrot.slane %v3117_v37, 4  ;;  %v2187_v13 = vadd.f32 1.0, %v2186_v54  ;;  %v7990_v24 = vadd.f32 %v4862_v9, %v7823_v31 }
 0x37b   : > { %v7992_v47 = vmul.f32 %v2445_v17, %v2381_v35  ;;  %v4892_v22 = vsel %vm3020_vm6, 1.0, %v9236_v49  ;;  %v2182_v26 = vsel %vm2181_vm8, %v2179_v6, %v2176_v21  ;;  %v2189_v17 = vand.u32 2147483647, %v5224_v40 }
 0x37c   : > { %v7998_v28 = vmul.f32 %v2636_v20, %v7754_v25  ;;  %v8000_v42 = vmul.f32 %v2636_v20, %v1680_v8  ;;  %v8002_v45 = vpop.eup %5227  ;;  %v8005_v1 = vmul.f32 %v3181_v34, %v7844_v5  ;;  %v2254_v31 = vsel %vm1838_vm7, %v7873_v62, %v2182_v26  ;;  %v1733_v26 = vpop.f32.mrf.mxu0 }
 0x37d   : > { %9335 = vst [vmem:[#allocation54_spill] sm:$0xff] %v8002_v45  ;;  %vm2541_vm11 = vcmp.gt.f32.partialorder %v7992_v47, 0.1  ;;  %v2286_v15 = vsub.f32 0.0, %v2254_v31  ;;  %v1694_v54 = vadd.f32 %v1693_v16, %v6355_v39  ;;  %v4314_v8 = vperm.slane %v8002_v45, 0 }
 0x37e   : > { %9336 = vst [vmem:[#allocation73_spill] sm:$0xff] %v8005_v1  ;;  %v2926_v35 = vsel %vm2708_vm10, %v7998_v28, -inf  ;;  %v2927_v25 = vsel %vm2710_vm2, %v8000_v42, -inf  ;;  %v5230_v50 = vpop.eup %5229  ;;  %v8017_v5 = vsub.f32 1.0, %v8005_v1  ;;  %v3886_v37 = vperm.slane %v8005_v1, 0 }
 0x37f   : > { %v2188_v9 = vmul.f32 %v5224_v40, %v2187_v13  ;;  %v2344_v21 = vmul.f32 1.442695, %v2286_v15  ;;  %v2185_v6 = vmul.f32 0.6931472, %v5230_v50  ;;  %v2928_v20 = vmax.f32 %v2926_v35, %v2927_v25 }
 0x380   : > { %9337 = vst [vmem:[#allocation74_spill] sm:$0xff] %v8017_v5  ;;  %v4863_v34 = vsel %vm2541_vm11, 1.0, %v9236_v49  ;;  %v3309_v31 = vadd.f32 1e-10, %v8017_v5  ;;  %v3918_v63 = vmul.f32 %v3886_v37, %v7896_v11  ;;  %v3950_v16 = vmul.f32 %v3886_v37, %v7908_v60 }
 0x381   : > { %vm2190_vm12 = vcmp.lt.f32.partialorder %v2189_v17, 0.0004427343  ;;  %5231 = vpow2.f32 %v2344_v21  ;;  %v2929_v10 = vrot.slane %v2928_v20, 4  ;;  %v2637_v1 = vperm.slane %v4863_v34, 0 }
 0x382   : > { %v2191_v55 = vsel %vm2190_vm12, %v2188_v9, %v2185_v6  ;;  %v4316_v59 = vmul.f32 %v4314_v8, %v3918_v63  ;;  %v4318_v45 = vmul.f32 %v4314_v8, %v3950_v16  ;;  %v8029_v13 = vadd.f32 %v1733_v26, %v6278_v32 }
 0x383   : > { %v2255_v40 = vsel %vm1839_vm9, %v7926_v36, %v2191_v55  ;;  %v2930_v35 = vmax.f32 %v2928_v20, %v2929_v10  ;;  %v8032_v11 = vmul.f32 %v2637_v1, %v7757_v44  ;;  %v8034_v60 = vmul.f32 %v2637_v1, %v1694_v54  ;;  %v1747_v55 = vpop.f32.mrf.mxu1  ;;  %v9340_v20 = vld [vmem:[#allocation57_spill] sm:$0xff] }
 0x384   : > { %v2287_v15 = vsub.f32 0.0, %v2255_v40  ;;  %v3116_v17 = vsub.f32 1.0, %v4892_v22  ;;  %v8037_v25 = vadd.f32 %v4316_v59, %v7932_v12  ;;  %v8040_v63 = vadd.f32 %v4318_v45, %v7935_v61  ;;  %v5430_v12 = vld [vmem:[%s5692_s15 + $0x1d0] sm:$0xff] }
 0x385   : > { %5233 = vlog2.f32 %v3309_v31  ;;  %v2931_v37 = vrot.slane %v2930_v35, 2  ;;  %v2935_v8 = vsel %vm2708_vm10, %v8032_v11, -inf  ;;  %v2936_v44 = vsel %vm2710_vm2, %v8034_v60, -inf  ;;  %v1707_v31 = vpop.f32.mrf.mxu2 }
 0x386   : > { %v2346_v50 = vmul.f32 1.442695, %v2287_v15  ;;  %v8048_v10 = vmul.f32 %v7981_v43, %v7702_v18  ;;  %v2937_v22 = vmax.f32 %v2935_v8, %v2936_v44  ;;  %v8051_v59 = vadd.f32 %v4863_v34, %v7881_v57  ;;  %v5431_v44 = vld [vmem:[%s5692_s15 + $0x1d8] sm:$0xff] }
 0x387   : > { %v2446_v61 = vrot.slane %v5430_v12, 1  ;;  %v5232_v45 = vpop.eup %5231  ;;  %v2932_v1 = vmax.f32 %v2930_v35, %v2931_v37  ;;  %v1872_v54 = vmin.f32 %v8029_v13, 20.0  ;;  %v8056_v9 = vadd.f32 %v1747_v55, %v6278_v32 }
 0x388   : > { %9338 = vst [vmem:[#allocation75_spill] sm:$0xff] %v8048_v10  ;;  %5235 = vpow2.f32 %v2346_v50  ;;  %v8060_v21 = vadd.f32 %v7965_v0, %v7949_v19  ;;  %v3180_v18 = vrot.slane %v3116_v17, 4  ;;  %v2938_v43 = vrot.slane %v2937_v22, 4 }
 0x389   : > { %v2382_v6 = vsub.f32 1.0, %v5232_v45  ;;  %v8064_v57 = vmul.f32 %v7970_v41, %v7831_v38  ;;  %v8068_v34 = vadd.f32 %v7972_v7, %v9340_v20  ;;  %v2933_v26 = vrot.slane %v2932_v1, 1 }
 0x38a   : > { %v1932_v16 = vmul.f32 1.442695, %v1872_v54  ;;  %v8071_v15 = vsub.f32 1.0, %v8048_v10  ;;  %5237 = vpow2.f32 %v7975_v56  ;;  %v2939_v19 = vmax.f32 %v2937_v22, %v2938_v43 }
 0x38b   : > { %9339 = vst [vmem:[#allocation76_spill] sm:$0xff] %v8064_v57  ;;  %v5234_v40 = vpop.eup %5233  ;;  %v8074_v0 = vmul.f32 %v2446_v61, %v2382_v6  ;;  %v2934_v35 = vmax.f32 %v2932_v1, %v2933_v26  ;;  %v1873_v17 = vmin.f32 %v8056_v9, 20.0  ;;  %v8078_v7 = vmul.f32 %v3180_v18, %v7810_v4 }
 0x38c   : > { %9341 = vst [vmem:[#allocation57_spill] sm:$0xff] %v8071_v15  ;;  %v3363_v41 = vmul.f32 0.6931472, %v5234_v40  ;;  %5239 = vpow2.f32 %v1932_v16  ;;  %v2940_v55 = vrot.slane %v2939_v19, 2  ;;  %v1708_v50 = vadd.f32 %v1707_v31, %v6355_v39 }
 0x38d   : > { %9342 = vst [vmem:[#allocation77_spill] sm:$0xff] %v8078_v7  ;;  %vm2542_vm13 = vcmp.gt.f32.partialorder %v8074_v0, 0.1  ;;  %vm3022_vm14 = vcmp.ge.f32.partialorder %v7998_v28, %v2934_v35  ;;  %v2447_v22 = vrot.slane %v5431_v44, 1  ;;  %v1934_v43 = vmul.f32 1.442695, %v1873_v17 }
 0x38e   : > { %v5236_v37 = vpop.eup %5235  ;;  %v8084_v56 = vadd.f32 %v7968_v14, %v3363_v41  ;;  %v4864_v8 = vsel %vm2542_vm13, 1.0, %v9236_v49  ;;  %v4894_v12 = vsel %vm3022_vm14, 1.0, %v9236_v49  ;;  %v2941_v61 = vmax.f32 %v2939_v19, %v2940_v55  ;;  %v1721_v19 = vpop.f32.mrf.mxu3 }
 0x38f   : > { %v2638_v4 = vperm.slane %v4864_v8, 0  ;;  %v8090_v45 = vadd.f32 %v4864_v8, %v7990_v24  ;;  %v3118_v1 = vsub.f32 1.0, %v4894_v12  ;;  %v2383_v18 = vsub.f32 1.0, %v5236_v37  ;;  %v1761_v37 = vpop.f32.mrf.mxu2 }
 0x390   : > { %v4337_v54 = vmul.f32 1.442695, %v8084_v56  ;;  %v8093_v6 = vpop.eup %5237  ;;  %v3306_v14 = vadd.f32 1e-10, %v8071_v15  ;;  %v2942_v20 = vrot.slane %v2941_v61, 1  ;;  %v8102_v40 = vsub.f32 1.0, %v8078_v7 }
 0x391   : > { %9343 = vst [vmem:[#allocation78_spill] sm:$0xff] %v8093_v6  ;;  %v8097_v26 = vmul.f32 %v2638_v4, %v7873_v62  ;;  %v8099_v31 = vmul.f32 %v2638_v4, %v1708_v50  ;;  %v3182_v24 = vrot.slane %v3118_v1, 4  ;;  %v8104_v35 = vmul.f32 %v2447_v22, %v2383_v18 }
 0x392   : > { %v5240_v16 = vpop.eup %5239  ;;  %9344 = vst [vmem:[#allocation79_spill] sm:$0xff] %v8102_v40  ;;  %5241 = vpow2.f32 %v4337_v54  ;;  %v2943_v41 = vmax.f32 %v2941_v61, %v2942_v20  ;;  %v1722_v44 = vadd.f32 %v1721_v19, %v6355_v39  ;;  %v3308_v12 = vadd.f32 1e-10, %v8102_v40 }
 0x393   : > { %v2944_v17 = vsel %vm2708_vm10, %v8097_v26, -inf  ;;  %v2945_v55 = vsel %vm2710_vm2, %v8099_v31, -inf  ;;  %v2192_v62 = vadd.f32 1.0, %v5240_v16  ;;  %vm2543_vm15 = vcmp.gt.f32.partialorder %v8104_v35, 0.1 }
 0x394   : > { %v2946_v50 = vmax.f32 %v2944_v17, %v2945_v55  ;;  %v2195_v8 = vmul.f32 -0.5, %v5240_v16  ;;  %5243 = vpow2.f32 %v1934_v43  ;;  %vm3023_vm0 = vcmp.ge.f32.partialorder %v8032_v11, %v2943_v41 }
 0x395   : > { %v4865_v22 = vsel %vm2543_vm15, 1.0, %v9236_v49  ;;  %5245 = vlog2.f32 %v2192_v62  ;;  %v4895_v61 = vsel %vm3023_vm0, 1.0, %v9236_v49  ;;  %v8117_v1 = vadd.f32 %v1761_v37, %v6278_v32 }
 0x396   : > { %v2947_v4 = vrot.slane %v2946_v50, 4  ;;  %v8120_v54 = vmul.f32 %v3182_v24, %v7963_v23  ;;  %v3119_v18 = vsub.f32 1.0, %v4895_v61  ;;  %v2639_v43 = vperm.slane %v4865_v22, 0 }
 0x397   : > { %v8123_v20 = vadd.f32 %v4865_v22, %v8051_v59  ;;  %5247 = vlog2.f32 %v3306_v14  ;;  %v2196_v55 = vadd.f32 1.0, %v2195_v8  ;;  %v2198_v23 = vand.u32 2147483647, %v5240_v16 }
 0x398   : > { %9345 = vst [vmem:[#allocation80_spill] sm:$0xff] %v8120_v54  ;;  %v8125_v19 = vpop.eup %5241  ;;  %v2948_v17 = vmax.f32 %v2946_v50, %v2947_v4  ;;  %v3183_v62 = vrot.slane %v3119_v18, 4  ;;  %v8129_v5 = vmul.f32 %v2639_v43, %v7926_v36  ;;  %v8131_v37 = vmul.f32 %v2639_v43, %v1722_v44 }
 0x399   : > { %9346 = vst [vmem:[#allocation81_spill] sm:$0xff] %v8125_v19  ;;  %5249 = vlog2.f32 %v3308_v12  ;;  %vm1840_vm1 = vcmp.gt.f32.partialorder %v8029_v13, 20.0  ;;  %v1874_v59 = vmin.f32 %v8117_v1, 20.0  ;;  %v8138_v14 = vsub.f32 1.0, %v8120_v54 }
 0x39a   : > { %v8133_v24 = vpop.eup %5243  ;;  %v2949_v61 = vrot.slane %v2948_v17, 2  ;;  %v8141_v50 = vmul.f32 %v3183_v62, %v7992_v47  ;;  %v2953_v36 = vsel %vm2708_vm10, %v8129_v5, -inf  ;;  %v2954_v8 = vsel %vm2710_vm2, %v8131_v37, -inf }
 0x39b   : > { %v5246_v22 = vpop.eup %5245  ;;  %v4344_v44 = vperm.slane %v8125_v19, 0  ;;  %v2955_v4 = vmax.f32 %v2953_v36, %v2954_v8  ;;  %v2197_v18 = vmul.f32 %v5240_v16, %v2196_v55  ;;  %vm2199_vm3 = vcmp.lt.f32.partialorder %v2198_v23, 0.0004427343 }
 0x39c   : > { %9347 = vst [vmem:[#allocation82_spill] sm:$0xff] %v8141_v50  ;;  %v2950_v12 = vmax.f32 %v2948_v17, %v2949_v61  ;;  %v8149_v43 = vsub.f32 1.0, %v8141_v50  ;;  %v3888_v41 = vperm.slane %v8141_v50, 0  ;;  %v2194_v58 = vmul.f32 0.6931472, %v5246_v22 }
 0x39d   : > { %v5248_v47 = vpop.eup %5247  ;;  %v2956_v46 = vrot.slane %v2955_v4, 4  ;;  %v2201_v57 = vadd.f32 1.0, %v8133_v24  ;;  %v2204_v2 = vmul.f32 -0.5, %v8133_v24  ;;  %v3310_v15 = vadd.f32 1e-10, %v8138_v14 }
 0x39e   : > { %9348 = vst [vmem:[#allocation83_spill] sm:$0xff] %v8149_v43  ;;  %v2951_v62 = vrot.slane %v2950_v12, 1  ;;  %v3311_v40 = vadd.f32 1e-10, %v8149_v43  ;;  %v3920_v17 = vmul.f32 %v3888_v41, %v8032_v11  ;;  %v3952_v16 = vmul.f32 %v3888_v41, %v8034_v60 }
 0x39f   : > { %v2200_v55 = vsel %vm2199_vm3, %v2197_v18, %v2194_v58  ;;  %v5250_v61 = vpop.eup %5249  ;;  %v2957_v8 = vmax.f32 %v2955_v4, %v2956_v46  ;;  %5251 = vlog2.f32 %v2201_v57  ;;  %v3357_v22 = vmul.f32 0.6931472, %v5248_v47 }
 0x3a0   : > { %v2952_v36 = vmax.f32 %v2950_v12, %v2951_v62  ;;  %v2256_v23 = vsel %vm1840_vm1, %v8029_v13, %v2200_v55  ;;  %v4346_v19 = vmul.f32 %v4344_v44, %v3920_v17  ;;  %v4348_v50 = vmul.f32 %v4344_v44, %v3952_v16 }
 0x3a1   : > { %5253 = vlog2.f32 %v3311_v40  ;;  %v2958_v11 = vrot.slane %v2957_v8, 2  ;;  %v2288_v43 = vsub.f32 0.0, %v2256_v23  ;;  %v2205_v41 = vadd.f32 1.0, %v2204_v2  ;;  %v1775_v40 = vpop.f32.mrf.mxu3 }
 0x3a2   : > { %vm3024_vm4 = vcmp.ge.f32.partialorder %v8097_v26, %v2952_v36  ;;  %v8163_v58 = vadd.f32 %v4346_v19, %v8037_v25  ;;  %v8166_v46 = vadd.f32 %v4348_v50, %v8040_v63  ;;  %v1936_v44 = vmul.f32 1.442695, %v1874_v59 }
 0x3a3   : > { %v4896_v60 = vsel %vm3024_vm4, 1.0, %v9236_v49  ;;  %v2959_v12 = vmax.f32 %v2957_v8, %v2958_v11  ;;  %v2348_v4 = vmul.f32 1.442695, %v2288_v43  ;;  %v4283_v18 = vperm.slane %v8093_v6, 0 }
 0x3a4   : > { %v3120_v57 = vsub.f32 1.0, %v4896_v60  ;;  %v4303_v47 = vadd.f32 %v7957_v29, %v3357_v22  ;;  %v3361_v62 = vmul.f32 0.6931472, %v5250_v61  ;;  %v2207_v17 = vand.u32 2147483647, %v8133_v24 }
 0x3a5   : > { %v5252_v25 = vpop.eup %5251  ;;  %v9349_v63 = vperm.slane %v8048_v10, 0  ;;  %v2960_v16 = vrot.slane %v2959_v12, 1  ;;  %5255 = vpow2.f32 %v2348_v4  ;;  %v2206_v59 = vmul.f32 %v8133_v24, %v2205_v41 }
 0x3a6   : > { %v3184_v50 = vrot.slane %v3120_v57, 4  ;;  %5257 = vlog2.f32 %v3310_v15  ;;  %v2203_v43 = vmul.f32 0.6931472, %v5252_v25  ;;  %v8177_v55 = vadd.f32 %v1775_v40, %v6278_v32 }
 0x3a7   : > { %v3915_v19 = vmul.f32 %v9349_v63, %v7761_v48  ;;  %v5254_v2 = vpop.eup %5253  ;;  %v2961_v29 = vmax.f32 %v2959_v12, %v2960_v16  ;;  %vm2208_vm5 = vcmp.lt.f32.partialorder %v2207_v17, 0.0004427343  ;;  %5259 = vpow2.f32 %v1936_v44 }
 0x3a8   : > { %9350 = vst [vmem:[#allocation84_spill] sm:$0xff] %v8177_v55  ;;  %v3367_v61 = vmul.f32 0.6931472, %v5254_v2  ;;  %v9351_v36 = vmov %v9349_v63  ;;  %v4305_v8 = vmul.f32 1.442695, %v4303_v47  ;;  %v4333_v23 = vadd.f32 %v4303_v47, %v3361_v62 }
 0x3a9   : > { %v3947_v48 = vmul.f32 %v9351_v36, %v7763_v33  ;;  %v2209_v22 = vsel %vm2208_vm5, %v2206_v59, %v2203_v43  ;;  %v8183_v15 = vmul.f32 %v3184_v50, %v8074_v0  ;;  %vm3025_vm6 = vcmp.ge.f32.partialorder %v8129_v5, %v2961_v29  ;;  %v5432_v33 = vld [vmem:[%s5692_s15 + $0x1e0] sm:$0xff]  ;;  %v1735_v36 = vpop.f32.mrf.mxu0 }
 0x3aa   : > { %v8187_v32 = vadd.f32 %v8084_v56, %v3367_v61  ;;  %vm1841_vm7 = vcmp.gt.f32.partialorder %v8056_v9, 20.0  ;;  %v3428_v24 = vmax.f32 %v8048_v10, 1e-30  ;;  %v4897_v11 = vsel %vm3025_vm6, 1.0, %v9236_v49 }
 0x3ab   : > { %9352 = vst [vmem:[#allocation85_spill] sm:$0xff] %v8183_v15  ;;  %v2257_v60 = vsel %vm1841_vm7, %v8056_v9, %v2209_v22  ;;  %v2448_v41 = vrot.slane %v5432_v33, 1  ;;  %v5256_v57 = vpop.eup %5255  ;;  %v4285_v12 = vmul.f32 %v4283_v18, %v3915_v19  ;;  %v4287_v4 = vmul.f32 %v4283_v18, %v3947_v48 }
 0x3ac   : > { %v3121_v0 = vsub.f32 1.0, %v4897_v11  ;;  %v1875_v44 = vmin.f32 %v8177_v55, 20.0  ;;  %v5258_v40 = vpop.eup %5257  ;;  %5261 = vpow2.f32 %v4305_v8  ;;  %v4367_v56 = vmul.f32 1.442695, %v8187_v32 }
 0x3ad   : > { %v2289_v47 = vsub.f32 0.0, %v2257_v60  ;;  %v2384_v62 = vsub.f32 1.0, %v5256_v57  ;;  %v8196_v17 = vpop.eup %5259  ;;  %v3885_v25 = vperm.slane %v8078_v7, 0  ;;  %v4335_v63 = vmul.f32 1.442695, %v4333_v23 }
 0x3ae   : > { %v8200_v50 = vsub.f32 1.0, %v8183_v15  ;;  %v3185_v16 = vrot.slane %v3121_v0, 4  ;;  %5263 = vpow2.f32 %v4367_v56  ;;  %v2210_v2 = vadd.f32 1.0, %v8196_v17 }
 0x3af   : > { %v2350_v18 = vmul.f32 1.442695, %v2289_v47  ;;  %v8202_v19 = vmul.f32 %v2448_v41, %v2384_v62  ;;  %5265 = vlog2.f32 %v3428_v24  ;;  %v3365_v43 = vmul.f32 0.6931472, %v5258_v40 }
 0x3b0   : > { %v8206_v59 = vmul.f32 %v3185_v16, %v8104_v35  ;;  %v1938_v29 = vmul.f32 1.442695, %v1875_v44  ;;  %v8209_v61 = vadd.f32 %v4285_v12, %v8060_v21  ;;  %v2213_v48 = vmul.f32 -0.5, %v8196_v17 }
 0x3b1   : > { %5267 = vpow2.f32 %v2350_v18  ;;  %vm2544_vm8 = vcmp.gt.f32.partialorder %v8202_v19, 0.1  ;;  %v8214_v8 = vadd.f32 %v4287_v4, %v8068_v34  ;;  %v3917_v21 = vmul.f32 %v3885_v25, %v7840_v27 }
 0x3b2   : > { %9353 = vst [vmem:[#allocation86_spill] sm:$0xff] %v8206_v59  ;;  %5269 = vpow2.f32 %v4335_v63  ;;  %v8217_v22 = vsub.f32 1.0, %v8206_v59  ;;  %v3890_v35 = vperm.slane %v8206_v59, 0  ;;  %v8220_v24 = vpop.eup %5261  ;;  %v3312_v11 = vadd.f32 1e-10, %v8200_v50 }
 0x3b3   : > { %9355 = vst [vmem:[#allocation88_spill] sm:$0xff] %v8220_v24  ;;  %v4866_v60 = vsel %vm2544_vm8, 1.0, %v9236_v49  ;;  %5271 = vlog2.f32 %v2210_v2  ;;  %v8227_v33 = vadd.f32 %v4333_v23, %v3365_v43  ;;  %v1736_v34 = vadd.f32 %v1735_v36, %v6355_v39 }
 0x3b4   : > { %9354 = vst [vmem:[#allocation87_spill] sm:$0xff] %v8217_v22  ;;  %v2640_v41 = vperm.slane %v4866_v60, 0  ;;  %5273 = vpow2.f32 %v1938_v29  ;;  %v8230_v57 = vpop.eup %5263  ;;  %v3313_v12 = vadd.f32 1e-10, %v8217_v22  ;;  %v3922_v4 = vmul.f32 %v3890_v35, %v8129_v5  ;;  %v5433_v5 = vld [vmem:[%s5692_s15 + $0x1e8] sm:$0xff] }
 0x3b5   : > { %9356 = vst [vmem:[#allocation89_spill] sm:$0xff] %v8230_v57  ;;  %v8235_v27 = vadd.f32 %v4866_v60, %v8090_v45  ;;  %v2214_v0 = vadd.f32 1.0, %v2213_v48  ;;  %v8237_v44 = vpop.eup %5265  ;;  %v3954_v23 = vmul.f32 %v3890_v35, %v8131_v37  ;;  %v4374_v40 = vperm.slane %v8230_v57, 0 }
 0x3b6   : > { %v8242_v56 = vmul.f32 %v2640_v41, %v8029_v13  ;;  %v8244_v47 = vmul.f32 %v2640_v41, %v1736_v34  ;;  %v4313_v63 = vperm.slane %v8220_v24, 0  ;;  %5275 = vlog2.f32 %v3312_v11 }
 0x3b7   : > { %v5268_v62 = vpop.eup %5267  ;;  %v2449_v16 = vrot.slane %v5433_v5, 1  ;;  %v2216_v45 = vand.u32 2147483647, %v8196_v17  ;;  %v4376_v2 = vmul.f32 %v4374_v40, %v3922_v4  ;;  %v4378_v43 = vmul.f32 %v4374_v40, %v3954_v23 }
 0x3b8   : > { %v8249_v18 = vpop.eup %5269  ;;  %v2962_v37 = vsel %vm2708_vm10, %v8242_v56, -inf  ;;  %v2963_v13 = vsel %vm2710_vm2, %v8244_v47, -inf  ;;  %v4365_v36 = vmul.f32 1.442695, %v8227_v33  ;;  %v2385_v35 = vsub.f32 1.0, %v5268_v62  ;;  %v1749_v62 = vpop.f32.mrf.mxu1 }
 0x3b9   : > { %9357 = vst [vmem:[#allocation90_spill] sm:$0xff] %v8249_v18  ;;  %v5272_v29 = vpop.eup %5271  ;;  %v2964_v48 = vmax.f32 %v2962_v37, %v2963_v13  ;;  %v2215_v11 = vmul.f32 %v8196_v17, %v2214_v0  ;;  %v8260_v34 = vadd.f32 %v4376_v2, %v8163_v58  ;;  %v8263_v41 = vadd.f32 %v4378_v43, %v8166_v46 }
 0x3ba   : > { %v8257_v60 = vpop.eup %5273  ;;  %5277 = vlog2.f32 %v3313_v12  ;;  %v2212_v4 = vmul.f32 0.6931472, %v5272_v29  ;;  %v8266_v5 = vmul.f32 %v2449_v16, %v2385_v35  ;;  %vm2217_vm9 = vcmp.lt.f32.partialorder %v2216_v45, 0.0004427343 }
 0x3bb   : > { %v2965_v40 = vrot.slane %v2964_v48, 4  ;;  %v3949_v17 = vmul.f32 %v3885_v25, %v7842_v53  ;;  %v4315_v0 = vmul.f32 %v4313_v63, %v3917_v21  ;;  %vm1842_vm11 = vcmp.gt.f32.partialorder %v8117_v1, 20.0 }
 0x3bc   : > { %v2218_v58 = vsel %vm2217_vm9, %v2215_v11, %v2212_v4  ;;  %v5276_v2 = vpop.eup %5275  ;;  %5279 = vpow2.f32 %v4365_v36  ;;  %vm2545_vm12 = vcmp.gt.f32.partialorder %v8266_v5, 0.1  ;;  %v3887_v16 = vperm.slane %v8120_v54, 0 }
 0x3bd   : > { %v2966_v46 = vmax.f32 %v2964_v48, %v2965_v40  ;;  %v2258_v12 = vsel %vm1842_vm11, %v8117_v1, %v2218_v58  ;;  %v4317_v43 = vmul.f32 %v4313_v63, %v3949_v17  ;;  %v4867_v45 = vsel %vm2545_vm12, 1.0, %v9236_v49  ;;  %v9359_v58 = vld [vmem:[#allocation5_spill] sm:$0xff] }
 0x3be   : > { %v2290_v37 = vsub.f32 0.0, %v2258_v12  ;;  %v1750_v53 = vadd.f32 %v1749_v62, %v6355_v39  ;;  %v2641_v25 = vperm.slane %v4867_v45, 0  ;;  %v8278_v21 = vadd.f32 %v4867_v45, %v8123_v20 }
 0x3bf   : > { %v2967_v13 = vrot.slane %v2966_v46, 2  ;;  %v4319_v36 = vadd.f32 %v4315_v0, %v8209_v61  ;;  %v4343_v48 = vperm.slane %v8249_v18, 0  ;;  %v3369_v35 = vmul.f32 0.6931472, %v5276_v2 }
 0x3c0   : > { %9358 = vst [vmem:[#allocation91_spill] sm:$0xff] %v8278_v21  ;;  %v5278_v29 = vpop.eup %5277  ;;  %v2352_v11 = vmul.f32 1.442695, %v2290_v37  ;;  %v8283_v4 = vmul.f32 %v2641_v25, %v8056_v9  ;;  %v8285_v40 = vmul.f32 %v2641_v25, %v1750_v53  ;;  %v2219_v17 = vadd.f32 1.0, %v8257_v60  ;;  %v9361_v53 = vld [vmem:[#allocation7_spill] sm:$0xff] }
 0x3c1   : > { %v2968_v63 = vmax.f32 %v2966_v46, %v2967_v13  ;;  %v4321_v62 = vadd.f32 %v4317_v43, %v8214_v8  ;;  %v3919_v20 = vmul.f32 %v3887_v16, %v7998_v28  ;;  %v3408_v12 = vmax.f32 %v9359_v58, 1e-30 }
 0x3c2   : > { %5281 = vpow2.f32 %v2352_v11  ;;  %v8291_v61 = vpop.eup %5279  ;;  %v2971_v2 = vsel %vm2708_vm10, %v8283_v4, -inf  ;;  %v2972_v9 = vsel %vm2710_vm2, %v8285_v40, -inf  ;;  %v3371_v46 = vmul.f32 0.6931472, %v5278_v29  ;;  %v9363_v29 = vld [vmem:[#allocation9_spill] sm:$0xff] }
 0x3c3   : > { %9360 = vst [vmem:[#allocation5_spill] sm:$0xff] %v8291_v61  ;;  %v2969_v0 = vrot.slane %v2968_v63, 1  ;;  %v3951_v45 = vmul.f32 %v3887_v16, %v8000_v42  ;;  %v4345_v37 = vmul.f32 %v4343_v48, %v3919_v20  ;;  %v8299_v8 = vadd.f32 %v8227_v33, %v3369_v35  ;;  %v5434_v16 = vld [vmem:[%s5692_s15 + $0x1f0] sm:$0xff] }
 0x3c4   : > { %v2973_v28 = vmax.f32 %v2971_v2, %v2972_v9  ;;  %v3889_v43 = vperm.slane %v8183_v15, 0  ;;  %5283 = vlog2.f32 %v2219_v17  ;;  %v3410_v25 = vmax.f32 %v9361_v53, 1e-30 }
 0x3c5   : > { %v2970_v13 = vmax.f32 %v2968_v63, %v2969_v0  ;;  %v4347_v11 = vmul.f32 %v4343_v48, %v3951_v45  ;;  %v4373_v23 = vperm.slane %v8291_v61, 0  ;;  %5285 = vlog2.f32 %v3408_v12 }
 0x3c6   : > { %v2974_v21 = vrot.slane %v2973_v28, 4  ;;  %v8306_v42 = vadd.f32 %v8187_v32, %v3371_v46  ;;  %v2450_v33 = vrot.slane %v5434_v16, 1  ;;  %v3412_v35 = vmax.f32 %v9363_v29, 1e-30  ;;  %v1763_v16 = vpop.f32.mrf.mxu2 }
 0x3c7   : > { %vm3026_vm13 = vcmp.ge.f32.partialorder %v8242_v56, %v2970_v13  ;;  %v4395_v17 = vmul.f32 1.442695, %v8299_v8  ;;  %v2222_v48 = vmul.f32 -0.5, %v8257_v60  ;;  %v3921_v2 = vmul.f32 %v3889_v43, %v8097_v26 }
 0x3c8   : > { %9362 = vst [vmem:[#allocation7_spill] sm:$0xff] %v8306_v42  ;;  %v5282_v20 = vpop.eup %5281  ;;  %v4898_v63 = vsel %vm3026_vm13, 1.0, %v9236_v49  ;;  %v2975_v0 = vmax.f32 %v2973_v28, %v2974_v21  ;;  %5287 = vlog2.f32 %v3410_v25  ;;  %v4349_v45 = vadd.f32 %v4345_v37, %v4319_v36 }
 0x3c9   : > { %v3122_v12 = vsub.f32 1.0, %v4898_v63  ;;  %v2386_v9 = vsub.f32 1.0, %v5282_v20  ;;  %v4351_v32 = vadd.f32 %v4347_v11, %v4321_v62  ;;  %v3953_v46 = vmul.f32 %v3889_v43, %v8099_v31 }
 0x3ca   : > { %v2976_v13 = vrot.slane %v2975_v0, 2  ;;  %v5284_v57 = vpop.eup %5283  ;;  %v4375_v22 = vmul.f32 %v4373_v23, %v3921_v2  ;;  %v4397_v59 = vmul.f32 1.442695, %v8306_v42  ;;  %5289 = vlog2.f32 %v3412_v35 }
 0x3cb   : > { %v8316_v61 = vmul.f32 %v2450_v33, %v2386_v9  ;;  %v5286_v21 = vpop.eup %5285  ;;  %v4377_v28 = vmul.f32 %v4373_v23, %v3953_v46  ;;  %5291 = vpow2.f32 %v4395_v17  ;;  %vm1843_vm14 = vcmp.gt.f32.partialorder %v8177_v55, 20.0 }
 0x3cc   : > { %v2977_v26 = vmax.f32 %v2975_v0, %v2976_v13  ;;  %v2223_v25 = vadd.f32 1.0, %v2222_v48  ;;  %v3186_v36 = vrot.slane %v3122_v12, 4  ;;  %v2225_v62 = vand.u32 2147483647, %v8257_v60  ;;  %v9364_v48 = vld [vmem:[#allocation6_spill] sm:$0xff] }
 0x3cd   : > { %v1764_v31 = vadd.f32 %v1763_v16, %v6355_v39  ;;  %vm2546_vm15 = vcmp.gt.f32.partialorder %v8316_v61, 0.1  ;;  %v2221_v43 = vmul.f32 0.6931472, %v5284_v57  ;;  %vm3376_vm0 = vcmp.gt.f32.partialorder %v9359_v58, 0.0 }
 0x3ce   : > { %v2978_v37 = vrot.slane %v2977_v26, 1  ;;  %v8323_v11 = vsel %vm2546_vm15, 1.0, %v9236_v49  ;;  %v5288_v23 = vpop.eup %5287  ;;  %v8326_v33 = vadd.f32 %v4375_v22, %v4349_v45  ;;  %5293 = vpow2.f32 %v4397_v59 }
 0x3cf   : > { %v2642_v35 = vperm.slane %v8323_v11, 0  ;;  %v3441_v20 = vmul.f32 0.6931472, %v5286_v21  ;;  %v8329_v63 = vadd.f32 %v4377_v28, %v4351_v32  ;;  %v2224_v0 = vmul.f32 %v8257_v60, %v2223_v25  ;;  %v9369_v32 = vld [vmem:[#allocation8_spill] sm:$0xff]  ;;  %v9370_v21 = vld [vmem:[#allocation13_spill] sm:$0xff] }
 0x3d0   : > { %v2979_v17 = vmax.f32 %v2977_v26, %v2978_v37  ;;  %v3600_v2 = vmax.f32 %v9364_v48, 1e-30  ;;  %v5290_v57 = vpop.eup %5289  ;;  %v8334_v12 = vmul.f32 %v3186_v36, %v8202_v19  ;;  %vm8336_vm1 = vcmp.lt.f32.partialorder %v2225_v62, 0.0004427343 }
 0x3d1   : > { %v8341_v59 = vmul.f32 %v2642_v35, %v8117_v1  ;;  %v8343_v22 = vmul.f32 %v2642_v35, %v1764_v31  ;;  %v8345_v45 = vpop.eup %5291  ;;  %v2227_v60 = vsel %vm8336_vm1, %v2224_v0, %v2221_v43  ;;  %vm3378_vm4 = vcmp.gt.f32.partialorder %v9361_v53, 0.0 }
 0x3d2   : > { %9365 = vst [vmem:[#allocation9_spill] sm:$0xff] %v8334_v12  ;;  %vm3027_vm3 = vcmp.ge.f32.partialorder %v8283_v4, %v2979_v17  ;;  %v3445_v19 = vmul.f32 0.6931472, %v5288_v23  ;;  %v3602_v46 = vmax.f32 %v9369_v32, 1e-30  ;;  %v3504_v16 = vmul.f32 %v3441_v20, %v9359_v58 }
 0x3d3   : > { %9368 = vst [vmem:[#allocation6_spill] sm:$0xff] %v8345_v45  ;;  %v4899_v13 = vsel %vm3027_vm3, 1.0, %v9236_v49  ;;  %v2980_v1 = vsel %vm2708_vm10, %v8341_v59, -inf  ;;  %v3604_v28 = vmax.f32 %v9370_v21, 1e-30  ;;  %v2981_v25 = vsel %vm2710_vm2, %v8343_v22, -inf }
 0x3d4   : > { %v3123_v26 = vsub.f32 1.0, %v4899_v13  ;;  %vm3380_vm5 = vcmp.gt.f32.partialorder %v9363_v29, 0.0  ;;  %v3449_v36 = vmul.f32 0.6931472, %v5290_v57  ;;  %5295 = vlog2.f32 %v3600_v2  ;;  %v8360_v62 = vpop.eup %5293 }
 0x3d5   : > { %9371 = vst [vmem:[#allocation8_spill] sm:$0xff] %v8360_v62  ;;  %v3891_v31 = vperm.slane %v8334_v12, 0  ;;  %v4403_v37 = vperm.slane %v8345_v45, 0  ;;  %v8367_v43 = vsel %vm1843_vm14, %v8177_v55, %v2227_v60  ;;  %v2982_v23 = vmax.f32 %v2980_v1, %v2981_v25 }
 0x3d6   : > { %v3187_v35 = vrot.slane %v3123_v26, 4  ;;  %v8370_v20 = vsub.f32 1.0, %v8334_v12  ;;  %v3432_v17 = vmax.f32 %v8120_v54, 1e-30  ;;  %5297 = vlog2.f32 %v3602_v46 }
 0x3d7   : > { %v2983_v0 = vrot.slane %v2982_v23, 4  ;;  %v9372_v2 = vmax.f32 %v8078_v7, 1e-30  ;;  %v3506_v57 = vmul.f32 %v3445_v19, %v9361_v53  ;;  %v8378_v9 = vsel %vm3376_vm0, %v3504_v16, 0.0 }
 0x3d8   : > { %vm3392_vm6 = vcmp.gt.f32.partialorder %v7560_v30, 0.0  ;;  %v8382_v60 = vmul.f32 %v3187_v35, %v8266_v5  ;;  %v4404_v13 = vperm.slane %v8360_v62, 0  ;;  %v3508_v1 = vmul.f32 %v3449_v36, %v9363_v29 }
 0x3d9   : > { %5299 = vlog2.f32 %v9372_v2  ;;  %v3923_v46 = vmul.f32 %v3891_v31, %v8242_v56  ;;  %v3955_v26 = vmul.f32 %v3891_v31, %v8244_v47  ;;  %v2984_v25 = vmax.f32 %v2982_v23, %v2983_v0 }
 0x3da   : > { %9373 = vst [vmem:[#allocation13_spill] sm:$0xff] %v8382_v60  ;;  %5301 = vlog2.f32 %v3604_v28  ;;  %v3434_v19 = vmax.f32 %v8183_v15, 1e-30  ;;  %v5296_v58 = vpop.eup %5295  ;;  %v3892_v16 = vperm.slane %v8382_v60, 0  ;;  %v3314_v2 = vadd.f32 1e-10, %v8370_v20 }
 0x3db   : > { %v3481_v5 = vmul.f32 0.6931472, %v8237_v44  ;;  %5303 = vlog2.f32 %v3432_v17  ;;  %v4405_v35 = vmul.f32 %v4403_v37, %v3923_v46  ;;  %v4407_v42 = vmul.f32 %v4403_v37, %v3955_v26 }
 0x3dc   : > { %v2985_v62 = vrot.slane %v2984_v25, 2  ;;  %v8394_v28 = vsel %vm3378_vm4, %v3506_v57, 0.0  ;;  %v5298_v56 = vpop.eup %5297  ;;  %v3924_v47 = vmul.f32 %v3892_v16, %v8283_v4  ;;  %v3956_v36 = vmul.f32 %v3892_v16, %v8285_v40 }
 0x3dd   : > { %vm3394_vm7 = vcmp.gt.f32.partialorder %v7831_v38, 0.0  ;;  %v3436_v31 = vmax.f32 %v8334_v12, 1e-30  ;;  %vm3396_vm8 = vcmp.gt.f32.partialorder %v8048_v10, 0.0  ;;  %5305 = vlog2.f32 %v3434_v19 }
 0x3de   : > { %v2986_v0 = vmax.f32 %v2984_v25, %v2985_v62  ;;  %v8403_v44 = vsel %vm3380_vm5, %v3508_v1, 0.0  ;;  %v3633_v53 = vmul.f32 0.6931472, %v5296_v58  ;;  %v4406_v17 = vmul.f32 %v4404_v13, %v3924_v47  ;;  %v9377_v58 = vld [vmem:[#allocation79_spill] sm:$0xff] }
 0x3df   : > { %v5300_v23 = vpop.eup %5299  ;;  %v4408_v57 = vmul.f32 %v4404_v13, %v3956_v36  ;;  %5307 = vlog2.f32 %v3314_v2  ;;  %v3524_v4 = vmul.f32 %v3481_v5, %v8048_v10  ;;  %v8407_v40 = vadd.f32 %v4405_v35, %v8326_v33  ;;  %v9378_v5 = vld [vmem:[#allocation20_spill] sm:$0xff] }
 0x3e0   : > { %v5302_v37 = vpop.eup %5301  ;;  %v8410_v46 = vadd.f32 %v4407_v42, %v8329_v63  ;;  %v2987_v62 = vrot.slane %v2986_v0, 1  ;;  %vm3398_vm9 = vcmp.gt.f32.partialorder %v8078_v7, 0.0  ;;  %v3616_v29 = vmax.f32 %v7699_v3, 1e-30  ;;  %v9376_v63 = vld [vmem:[#allocation57_spill] sm:$0xff] }
 0x3e1   : > { %v5304_v1 = vpop.eup %5303  ;;  %v8415_v26 = vadd.f32 %v4406_v17, %v8260_v34  ;;  %v8418_v13 = vadd.f32 %v4408_v57, %v8263_v41  ;;  %v3485_v25 = vmul.f32 0.6931472, %v5300_v23  ;;  %v3618_v19 = vmax.f32 %v7852_v51, 1e-30  ;;  %v9380_v17 = vld [vmem:[#allocation76_spill] sm:$0xff] }
 0x3e2   : > { %v2988_v33 = vmax.f32 %v2986_v0, %v2987_v62  ;;  %5309 = vlog2.f32 %v3436_v31  ;;  %v8424_v42 = vsel %vm3392_vm6, %v7960_v52, 0.0  ;;  %vm3570_vm11 = vcmp.gt.f32.partialorder %v9369_v32, 0.0 }
 0x3e3   : > { %9374 = vst [vmem:[#allocation92_spill] sm:$0xff] %v8415_v26  ;;  %vm3572_vm12 = vcmp.gt.f32.partialorder %v9370_v21, 0.0  ;;  %v3620_v34 = vmax.f32 %v9376_v63, 1e-30  ;;  %v3622_v16 = vmax.f32 %v9377_v58, 1e-30  ;;  %v5306_v47 = vpop.eup %5305  ;;  %v3526_v0 = vmul.f32 %v3485_v25, %v8078_v7 }
 0x3e4   : > { %9375 = vst [vmem:[#allocation93_spill] sm:$0xff] %v8418_v13  ;;  %v3637_v41 = vmul.f32 0.6931472, %v5298_v56  ;;  %v3641_v2 = vmul.f32 0.6931472, %v5302_v37  ;;  %vm3028_vm13 = vcmp.ge.f32.partialorder %v8341_v59, %v2988_v33  ;;  %vm3400_vm14 = vcmp.gt.f32.partialorder %v8120_v54, 0.0 }
 0x3e5   : > { %v9379_v35 = vmax.f32 %v9378_v5, 1e-30  ;;  %v3489_v52 = vmul.f32 0.6931472, %v5304_v1  ;;  %v3624_v36 = vmax.f32 %v8138_v14, 1e-30  ;;  %v5308_v31 = vpop.eup %5307 }
 0x3e6   : > { %v4900_v23 = vsel %vm3028_vm13, 1.0, %v9236_v49  ;;  %vm3568_vm15 = vcmp.gt.f32.partialorder %v9364_v48, 0.0  ;;  %v3626_v56 = vmax.f32 %v8200_v50, 1e-30  ;;  %v8442_v57 = vsel %vm3394_vm7, %v9380_v17, 0.0  ;;  %v9382_v13 = vld [vmem:[#allocation50_spill] sm:$0xff] }
 0x3e7   : > { %5311 = vlog2.f32 %v9379_v35  ;;  %v3124_v37 = vsub.f32 1.0, %v4900_v23  ;;  %v3628_v62 = vmax.f32 %v8370_v20, 1e-30  ;;  %v3698_v1 = vmul.f32 %v3637_v41, %v9369_v32  ;;  %v9381_v23 = vld [vmem:[#allocation47_spill] sm:$0xff] }
 0x3e8   : > { %5313 = vlog2.f32 %v3616_v29  ;;  %v8447_v29 = vsel %vm3396_vm8, %v3524_v4, 0.0  ;;  %v3700_v25 = vmul.f32 %v3641_v2, %v9370_v21  ;;  %v5310_v33 = vpop.eup %5309  ;;  %v3493_v35 = vmul.f32 0.6931472, %v5306_v47 }
 0x3e9   : > { %5315 = vlog2.f32 %v3618_v19  ;;  %v3188_v19 = vrot.slane %v3124_v37, 4  ;;  %v4101_v17 = vadd.f32 %v9382_v13, %v9381_v23  ;;  %v8453_v60 = vmul.f32 0.6931472, %v5308_v31  ;;  %v9384_v13 = vld [vmem:[#allocation62_spill] sm:$0xff] }
 0x3ea   : > { %5317 = vlog2.f32 %v3620_v34  ;;  %v3528_v34 = vmul.f32 %v3489_v52, %v8120_v54  ;;  %v8458_v4 = vsel %vm3398_vm9, %v3526_v0, 0.0  ;;  %vm3582_vm0 = vcmp.gt.f32.partialorder %v9378_v5, 0.0 }
 0x3eb   : > { %5319 = vlog2.f32 %v3622_v16  ;;  %v8461_v41 = vmul.f32 %v3188_v19, %v8316_v61  ;;  %v3696_v2 = vmul.f32 %v3633_v53, %v9364_v48  ;;  %v8466_v47 = vadd.f32 %v9384_v13, %v4101_v17 }
 0x3ec   : > { %5321 = vlog2.f32 %v3624_v36  ;;  %vm3402_vm1 = vcmp.gt.f32.partialorder %v8183_v15, 0.0  ;;  %vm3404_vm3 = vcmp.gt.f32.partialorder %v8334_v12, 0.0  ;;  %v3497_v52 = vmul.f32 0.6931472, %v5310_v33 }
 0x3ed   : > { %v5312_v26 = vpop.eup %5311  ;;  %5323 = vlog2.f32 %v3626_v56  ;;  %9383 = vst [vmem:[#allocation57_spill] sm:$0xff] %v8461_v41  ;;  %vm3584_vm4 = vcmp.gt.f32.partialorder %v7699_v3, 0.0  ;;  %v3730_v61 = vsel %vm3570_vm11, %v3698_v1, 0.0  ;;  %v3732_v0 = vsel %vm3572_vm12, %v3700_v25, 0.0 }
 0x3ee   : > { %v5314_v16 = vpop.eup %5313  ;;  %5325 = vlog2.f32 %v3628_v62  ;;  %v3661_v31 = vmul.f32 0.6931472, %v5312_v26  ;;  %v8476_v53 = vsub.f32 1.0, %v8461_v41  ;;  %v3438_v37 = vmax.f32 %v8461_v41, 1e-30 }
 0x3ef   : > { %v5316_v36 = vpop.eup %5315  ;;  %vm3586_vm5 = vcmp.gt.f32.partialorder %v7852_v51, 0.0  ;;  %vm3588_vm6 = vcmp.gt.f32.partialorder %v9376_v63, 0.0  ;;  %v3665_v62 = vmul.f32 0.6931472, %v5314_v16  ;;  %v3530_v26 = vmul.f32 %v3493_v35, %v8183_v15 }
 0x3f0   : > { %v5318_v56 = vpop.eup %5317  ;;  %v3560_v32 = vsel %vm3400_vm14, %v3528_v34, 0.0  ;;  %vm3590_vm7 = vcmp.gt.f32.partialorder %v9377_v58, 0.0  ;;  %v3669_v21 = vmul.f32 0.6931472, %v5316_v36  ;;  %vm3592_vm8 = vcmp.gt.f32.partialorder %v8138_v14, 0.0 }
 0x3f1   : > { %v5320_v33 = vpop.eup %5319  ;;  %v3673_v1 = vmul.f32 0.6931472, %v5318_v56  ;;  %v3728_v23 = vsel %vm3568_vm15, %v3696_v2, 0.0  ;;  %v3762_v17 = vadd.f32 %v3730_v61, %v8394_v28  ;;  %v3764_v16 = vadd.f32 %v3732_v0, %v8403_v44 }
 0x3f2   : > { %v5322_v25 = vpop.eup %5321  ;;  %v3677_v19 = vmul.f32 0.6931472, %v5320_v33  ;;  %vm3594_vm9 = vcmp.gt.f32.partialorder %v8200_v50, 0.0  ;;  %v3630_v35 = vmax.f32 %v8476_v53, 1e-30  ;;  %v3710_v36 = vmul.f32 %v3661_v31, %v9378_v5  ;;  %v9385_v5 = vld [vmem:[#allocation29_spill] sm:$0xff] }
 0x3f3   : > { %v5324_v13 = vpop.eup %5323  ;;  %v3681_v34 = vmul.f32 0.6931472, %v5322_v25  ;;  %5327 = vlog2.f32 %v3438_v37  ;;  %v3532_v55 = vmul.f32 %v3497_v52, %v8334_v12  ;;  %v3712_v48 = vmul.f32 %v3665_v62, %v7699_v3 }
 0x3f4   : > { %v5326_v56 = vpop.eup %5325  ;;  %v3685_v33 = vmul.f32 0.6931472, %v5324_v13  ;;  %v3714_v28 = vmul.f32 %v3669_v21, %v7852_v51  ;;  %v3716_v44 = vmul.f32 %v3673_v1, %v9376_v63  ;;  %v3760_v61 = vadd.f32 %v3728_v23, %v8378_v9 }
 0x3f5   : > { %v3689_v2 = vmul.f32 0.6931472, %v5326_v56  ;;  %vm3596_vm11 = vcmp.gt.f32.partialorder %v8370_v20, 0.0  ;;  %v3718_v0 = vmul.f32 %v3677_v19, %v9377_v58  ;;  %v3794_v25 = vsub.f32 0.0, %v3762_v17 }
 0x3f6   : > { %v3796_v31 = vsub.f32 0.0, %v3764_v16  ;;  %5329 = vlog2.f32 %v3630_v35  ;;  %v3720_v37 = vmul.f32 %v3681_v34, %v8138_v14  ;;  %v3722_v52 = vmul.f32 %v3685_v33, %v8200_v50  ;;  %v9387_v35 = vld [vmem:[#allocation44_spill] sm:$0xff]  ;;  %v9389_v33 = vld [vmem:[#allocation66_spill] sm:$0xff] }
 0x3f7   : > { %v3742_v62 = vsel %vm3582_vm0, %v3710_v36, 0.0  ;;  %v3562_v21 = vsel %vm3402_vm1, %v3530_v26, 0.0  ;;  %v3564_v9 = vsel %vm3404_vm3, %v3532_v55, 0.0  ;;  %v3724_v1 = vmul.f32 %v3689_v2, %v8370_v20  ;;  %v9388_v36 = vld [vmem:[#allocation72_spill] sm:$0xff] }
 0x3f8   : > { %v3744_v19 = vsel %vm3584_vm4, %v3712_v48, 0.0  ;;  %v3746_v23 = vsel %vm3586_vm5, %v3714_v28, 0.0  ;;  %v3748_v17 = vsel %vm3588_vm6, %v3716_v44, 0.0  ;;  %v3792_v16 = vsub.f32 0.0, %v3760_v61 }
 0x3f9   : > { %v9386_v13 = vsub.f32 0.0, %v9385_v5  ;;  %v5328_v26 = vpop.eup %5327  ;;  %v3750_v55 = vsel %vm3590_vm7, %v3718_v0, 0.0  ;;  %v3774_v56 = vadd.f32 %v3742_v62, %v9388_v36  ;;  %v3833_v3 = vmul.f32 %v9387_v35, %v3794_v25  ;;  %v9391_v25 = vld [vmem:[#allocation48_spill] sm:$0xff] }
 0x3fa   : > { %v9390_v48 = vsub.f32 0.0, %v9389_v33  ;;  %v3752_v63 = vsel %vm3592_vm8, %v3720_v37, 0.0  ;;  %v3754_v2 = vsel %vm3594_vm9, %v3722_v52, 0.0  ;;  %v3776_v28 = vadd.f32 %v3744_v19, %v8424_v42  ;;  %v9392_v62 = vld [vmem:[#allocation24_spill] sm:$0xff]  ;;  %v9394_v42 = vld [vmem:[#allocation26_spill] sm:$0xff] }
 0x3fb   : > { %v3841_v34 = vmul.f32 %v9387_v35, %v9386_v13  ;;  %v3835_v44 = vmul.f32 %v9387_v35, %v3796_v31  ;;  %v3756_v58 = vsel %vm3596_vm11, %v3724_v1, 0.0  ;;  %v3778_v61 = vadd.f32 %v3746_v23, %v8442_v57  ;;  %v9393_v52 = vld [vmem:[#allocation60_spill] sm:$0xff]  ;;  %v9396_v33 = vld [vmem:[#allocation14_spill] sm:$0xff] }
 0x3fc   : > { %v3843_v51 = vmul.f32 %v9387_v35, %v9390_v48  ;;  %v3780_v0 = vadd.f32 %v3748_v17, %v8447_v29  ;;  %v4087_v5 = vmul.f32 %v9392_v62, %v9391_v25  ;;  %v5330_v13 = vpop.eup %5329  ;;  %v3501_v14 = vmul.f32 0.6931472, %v5328_v26  ;;  %v9395_v29 = vld [vmem:[#allocation11_spill] sm:$0xff] }
 0x3fd   : > { %v3782_v37 = vadd.f32 %v3750_v55, %v8458_v4  ;;  %v3831_v50 = vmul.f32 %v9387_v35, %v3792_v16  ;;  %v4117_v19 = vmul.f32 %v9394_v42, %v9393_v52  ;;  %v3784_v31 = vadd.f32 %v3752_v63, %v3560_v32  ;;  %v9397_v4 = vld [vmem:[#allocation38_spill] sm:$0xff]  ;;  %v9398_v55 = vld [vmem:[#allocation37_spill] sm:$0xff]  ;;  %v9400_v63 = vld [vmem:[#allocation12_spill] sm:$0xff] }
 0x3fe   : > { %v3786_v36 = vadd.f32 %v3754_v2, %v3562_v21  ;;  %v3806_v20 = vsub.f32 0.0, %v3774_v56  ;;  %v3893_v1 = vperm.slane %v8461_v41, 0  ;;  %v3788_v57 = vadd.f32 %v3756_v58, %v3564_v9  ;;  %v9399_v56 = vld [vmem:[#allocation42_spill] sm:$0xff]  ;;  %v9402_v42 = vld [vmem:[#allocation36_spill] sm:$0xff] }
 0x3ff   : > { %v3808_v23 = vsub.f32 0.0, %v3776_v28  ;;  %v4027_v17 = vmul.f32 %v9395_v29, %v3833_v3  ;;  %v4057_v48 = vmul.f32 %v9396_v33, %v3835_v44  ;;  %v3693_v25 = vmul.f32 0.6931472, %v5330_v13  ;;  %v9401_v44 = vld [vmem:[#allocation53_spill] sm:$0xff] }
 0x400   : > { %v3810_v26 = vsub.f32 0.0, %v3778_v61  ;;  %v3812_v62 = vsub.f32 0.0, %v3780_v0  ;;  %v4159_v16 = vmul.f32 %v9398_v55, %v9397_v4  ;;  %v8547_v39 = vmul.f32 %v3501_v14, %v8461_v41 }
 0x401   : > { %v3814_v32 = vsub.f32 0.0, %v3782_v37  ;;  %v4029_v21 = vadd.f32 %v4027_v17, %v3831_v50  ;;  %v4189_v2 = vmul.f32 %v9400_v63, %v9399_v56  ;;  %v3816_v9 = vsub.f32 0.0, %v3784_v31  ;;  %v9403_v17 = vld [vmem:[#allocation30_spill] sm:$0xff] }
 0x402   : > { %v3818_v28 = vsub.f32 0.0, %v3786_v36  ;;  %v4161_v3 = vadd.f32 %v4159_v16, %v8466_v47  ;;  %v4219_v58 = vmul.f32 %v9401_v44, %v7560_v30  ;;  %v3820_v61 = vsub.f32 0.0, %v3788_v57 }
 0x403   : > { %v3845_v0 = vmul.f32 %v9387_v35, %v3806_v20  ;;  %v3847_v13 = vmul.f32 %v9387_v35, %v3808_v23  ;;  %v4059_v52 = vadd.f32 %v4057_v48, %v4029_v21  ;;  %v3726_v14 = vmul.f32 %v3693_v25, %v8476_v53 }
 0x404   : > { %v3849_v37 = vmul.f32 %v9387_v35, %v3810_v26  ;;  %v4191_v50 = vadd.f32 %v4189_v2, %v4161_v3  ;;  %v4249_v31 = vmul.f32 %v9402_v42, %v7831_v38  ;;  %v3851_v36 = vmul.f32 %v9387_v35, %v3812_v62  ;;  %v9405_v2 = vld [vmem:[#allocation15_spill] sm:$0xff] }
 0x405   : > { %v3853_v47 = vmul.f32 %v9387_v35, %v3814_v32  ;;  %v4089_v29 = vadd.f32 %v4087_v5, %v4059_v52  ;;  %v4147_v57 = vmul.f32 %v9403_v17, %v3841_v34  ;;  %vm3598_vm12 = vcmp.gt.f32.partialorder %v8476_v53, 0.0  ;;  %v9404_v32 = vld [vmem:[#allocation10_spill] sm:$0xff]  ;;  %v9407_v52 = vld [vmem:[#allocation17_spill] sm:$0xff] }
 0x406   : > { %v3855_v20 = vmul.f32 %v9387_v35, %v3816_v9  ;;  %v3857_v23 = vmul.f32 %v9387_v35, %v3818_v28  ;;  %v4221_v33 = vadd.f32 %v4219_v58, %v4191_v50  ;;  %v4279_v48 = vmul.f32 %v8093_v6, %v8048_v10 }
 0x407   : > { %v4119_v25 = vadd.f32 %v4117_v19, %v4089_v29  ;;  %v4177_v26 = vmul.f32 %v9398_v55, %v3843_v51  ;;  %v4423_v62 = vadd.f32 %v8299_v8, %v8453_v60  ;;  %v8573_v5 = vadd.f32 %v8323_v11, %v8235_v27  ;;  %v9406_v51 = vld [vmem:[#allocation16_spill] sm:$0xff] }
 0x408   : > { %v4251_v34 = vadd.f32 %v4249_v31, %v4221_v33  ;;  %v4309_v16 = vmul.f32 %v8220_v24, %v8078_v7  ;;  %v3409_v21 = vmax.f32 %v9404_v32, 1e-30  ;;  %v3411_v9 = vmax.f32 %v9405_v2, 1e-30  ;;  %v9408_v31 = vld [vmem:[#allocation18_spill] sm:$0xff]  ;;  %v9410_v33 = vld [vmem:[#allocation19_spill] sm:$0xff] }
 0x409   : > { %v4149_v28 = vadd.f32 %v4147_v57, %v4119_v25  ;;  %v4207_v19 = vmul.f32 %v9400_v63, %v3845_v0  ;;  %v4425_v3 = vmul.f32 1.442695, %v4423_v62  ;;  %v3413_v58 = vmax.f32 %v9406_v51, 1e-30  ;;  %v9409_v57 = vld [vmem:[#allocation5_spill] sm:$0xff] }
 0x40a   : > { %v4237_v8 = vmul.f32 %v9401_v44, %v3847_v13  ;;  %v4281_v60 = vadd.f32 %v4279_v48, %v4251_v34  ;;  %v4339_v27 = vmul.f32 %v8249_v18, %v8120_v54  ;;  %5331 = vlog2.f32 %v3409_v21 }
 0x40b   : > { %v4179_v11 = vadd.f32 %v4177_v26, %v4149_v28  ;;  %5333 = vpow2.f32 %v4425_v3  ;;  %v3601_v50 = vmax.f32 %v9407_v52, 1e-30  ;;  %v3603_v29 = vmax.f32 %v9408_v31, 1e-30 }
 0x40c   : > { %v4311_v17 = vadd.f32 %v4309_v16, %v4281_v60  ;;  %v4369_v0 = vmul.f32 %v9409_v57, %v8183_v15  ;;  %5335 = vlog2.f32 %v3411_v9  ;;  %v3605_v25 = vmax.f32 %v9410_v33, 1e-30 }
 0x40d   : > { %v3859_v13 = vmul.f32 %v9387_v35, %v3820_v61  ;;  %v4209_v48 = vadd.f32 %v4207_v19, %v4179_v11  ;;  %v4267_v62 = vmul.f32 %v9402_v42, %v3849_v37  ;;  %5337 = vlog2.f32 %v3413_v58 }
 0x40e   : > { %v3925_v26 = vmul.f32 %v3893_v1, %v8341_v59  ;;  %v4341_v34 = vadd.f32 %v4339_v27, %v4311_v17  ;;  %v4399_v16 = vmul.f32 %v8345_v45, %v8334_v12  ;;  %5339 = vlog2.f32 %v3601_v50 }
 0x40f   : > { %v8598_v21 = vsel %vm3598_vm12, %v3726_v14, 0.0  ;;  %v4239_v9 = vadd.f32 %v4237_v8, %v4209_v48  ;;  %v4297_v61 = vmul.f32 %v8093_v6, %v3851_v36  ;;  %5341 = vlog2.f32 %v3603_v29 }
 0x410   : > { %v5332_v28 = vpop.eup %5331  ;;  %v3957_v37 = vmul.f32 %v3893_v1, %v8343_v22  ;;  %v4327_v59 = vmul.f32 %v8220_v24, %v3853_v47  ;;  %v4371_v19 = vadd.f32 %v4369_v0, %v4341_v34  ;;  %vm3377_vm13 = vcmp.gt.f32.partialorder %v9404_v32, 0.0 }
 0x411   : > { %5343 = vlog2.f32 %v3605_v25  ;;  %v8606_v3 = vpop.eup %5333  ;;  %v4269_v53 = vadd.f32 %v4267_v62, %v4239_v9  ;;  %v4357_v14 = vmul.f32 %v8249_v18, %v3855_v20  ;;  %v4387_v58 = vmul.f32 %v9409_v57, %v3857_v23 }
 0x412   : > { %9411 = vst [vmem:[#allocation79_spill] sm:$0xff] %v8606_v3  ;;  %v3443_v36 = vmul.f32 0.6931472, %v5332_v28  ;;  %v5336_v8 = vpop.eup %5335  ;;  %v4401_v60 = vadd.f32 %v4399_v16, %v4371_v19  ;;  %v4417_v27 = vmul.f32 %v8345_v45, %v3859_v13  ;;  %v4429_v22 = vmul.f32 %v8606_v3, %v8461_v41 }
 0x413   : > { %v4433_v1 = vperm.slane %v8606_v3, 0  ;;  %v5338_v47 = vpop.eup %5337  ;;  %v4299_v11 = vadd.f32 %v4297_v61, %v4269_v53  ;;  %vm3379_vm14 = vcmp.gt.f32.partialorder %v9405_v2, 0.0  ;;  %vm3381_vm15 = vcmp.gt.f32.partialorder %v9406_v51, 0.0 }
 0x414   : > { %v3447_v50 = vmul.f32 0.6931472, %v5336_v8  ;;  %v5340_v20 = vpop.eup %5339  ;;  %vm3406_vm0 = vcmp.gt.f32.partialorder %v8461_v41, 0.0  ;;  %v4431_v23 = vadd.f32 %v4429_v22, %v4401_v60  ;;  %vm3569_vm1 = vcmp.gt.f32.partialorder %v9407_v52, 0.0  ;;  %v5438_v41 = vld [vmem:[%s5692_s15 + $0x1b8] sm:$0xff] }
 0x415   : > { %v4435_v29 = vmul.f32 %v4433_v1, %v3925_v26  ;;  %v4437_v17 = vmul.f32 %v4433_v1, %v3957_v37  ;;  %v5342_v0 = vpop.eup %5341  ;;  %v4329_v25 = vadd.f32 %v4327_v59, %v4299_v11  ;;  %v3451_v13 = vmul.f32 0.6931472, %v5338_v47  ;;  %v9412_v47 = vld [vmem:[#allocation49_spill] sm:$0xff]  ;;  %v9413_v11 = vld [vmem:[#allocation23_spill] sm:$0xff] }
 0x416   : > { %v3505_v48 = vmul.f32 %v3443_v36, %v9404_v32  ;;  %vm3571_vm3 = vcmp.gt.f32.partialorder %v9408_v31, 0.0  ;;  %v3507_v9 = vmul.f32 %v3447_v50, %v9405_v2  ;;  %v3635_v26 = vmul.f32 0.6931472, %v5340_v20 }
 0x417   : > { %v5344_v62 = vpop.eup %5343  ;;  %v8621_v34 = vadd.f32 %v4435_v29, %v8407_v40  ;;  %v8624_v16 = vadd.f32 %v4437_v17, %v8410_v46  ;;  %v4359_v61 = vadd.f32 %v4357_v14, %v4329_v25  ;;  %v4453_v28 = vmax.f32 %v4431_v23, 0.0 }
 0x418   : > { %vm3573_vm4 = vcmp.gt.f32.partialorder %v9410_v33, 0.0  ;;  %v3639_v37 = vmul.f32 0.6931472, %v5342_v0  ;;  %v3509_v40 = vmul.f32 %v3451_v13, %v9406_v51  ;;  %v3643_v53 = vmul.f32 0.6931472, %v5344_v62  ;;  %v9415_v62 = vld [vmem:[#allocation63_spill] sm:$0xff] }
 0x419   : > { %v4467_v59 = vsel %vm2708_vm10, %v8621_v34, -inf  ;;  %v4468_v19 = vsel %vm2710_vm2, %v8624_v16, -inf  ;;  %v4389_v36 = vadd.f32 %v4387_v58, %v4359_v61  ;;  %v3537_v8 = vsel %vm3377_vm13, %v3505_v48, 0.0  ;;  %v9418_v51 = vld [vmem:[#allocation68_spill] sm:$0xff] }
 0x41a   : > { %v4469_v46 = vmax.f32 %v4467_v59, %v4468_v19  ;;  %v3697_v14 = vmul.f32 %v3635_v26, %v9407_v52  ;;  %v3539_v60 = vsel %vm3379_vm14, %v3507_v9, 0.0  ;;  %v3699_v22 = vmul.f32 %v3639_v37, %v9408_v31  ;;  %v9416_v52 = vld [vmem:[#allocation67_spill] sm:$0xff]  ;;  %v9417_v26 = vld [vmem:[#allocation41_spill] sm:$0xff]  ;;  %v9420_v37 = vld [vmem:[#allocation28_spill] sm:$0xff] }
 0x41b   : > { %v3701_v1 = vmul.f32 %v3643_v53, %v9410_v33  ;;  %v4088_v50 = vmul.f32 %v9413_v11, %v9412_v47  ;;  %v8642_v20 = vadd.f32 %v4417_v27, %v4389_v36  ;;  %v8644_v23 = vmin.f32 %v4453_v28, 1.0  ;;  %v9419_v28 = vld [vmem:[#allocation25_spill] sm:$0xff] }
 0x41c   : > { %v4470_v58 = vrot.slane %v4469_v46, 4  ;;  %v3729_v32 = vsel %vm3569_vm1, %v3697_v14, 0.0  ;;  %v3541_v29 = vsel %vm3381_vm15, %v3509_v40, 0.0  ;;  %v3731_v2 = vsel %vm3571_vm3, %v3699_v22, 0.0 }
 0x41d   : > { %9414 = vst [vmem:[#allocation20_spill] sm:$0xff] %v8644_v23  ;;  %v3733_v17 = vsel %vm3573_vm4, %v3701_v1, 0.0  ;;  %v3761_v0 = vadd.f32 %v3729_v32, %v3537_v8  ;;  %v3566_v27 = vsel %vm3406_vm0, %v8547_v39, 0.0  ;;  %v3763_v13 = vadd.f32 %v3731_v2, %v3539_v60  ;;  %v9422_v8 = vld [vmem:[#allocation32_spill] sm:$0xff]  ;;  %v9424_v32 = vld [vmem:[#allocation27_spill] sm:$0xff] }
 0x41e   : > { %v4471_v25 = vmax.f32 %v4469_v46, %v4470_v58  ;;  %v3765_v48 = vadd.f32 %v3733_v17, %v3541_v29  ;;  %v3771_v9 = vadd.f32 %v9416_v52, %v9415_v62  ;;  %v3709_v61 = vmul.f32 %v9418_v51, %v9417_v26  ;;  %v9421_v46 = vld [vmem:[#allocation40_spill] sm:$0xff]  ;;  %v9423_v58 = vld [vmem:[#allocation61_spill] sm:$0xff]  ;;  %v9427_v51 = vld [vmem:[#allocation43_spill] sm:$0xff] }
 0x41f   : > { %v3790_v31 = vadd.f32 %v8598_v21, %v3566_v27  ;;  %v4102_v33 = vadd.f32 %v9420_v37, %v9419_v28  ;;  %v3793_v19 = vsub.f32 0.0, %v3761_v0  ;;  %v3795_v40 = vsub.f32 0.0, %v3763_v13  ;;  %v9426_v27 = vld [vmem:[#allocation22_spill] sm:$0xff]  ;;  %v9428_v28 = vld [vmem:[#allocation35_spill] sm:$0xff] }
 0x420   : > { %v4472_v59 = vrot.slane %v4471_v25, 2  ;;  %v3797_v53 = vsub.f32 0.0, %v3765_v48  ;;  %vm3581_vm5 = vcmp.gt.f32.partialorder %v9417_v26, 0.0  ;;  %v2291_v39 = vsub.f32 0.0, %v8367_v43  ;;  %v9425_v43 = vld [vmem:[#allocation21_spill] sm:$0xff] }
 0x421   : > { %v4457_v36 = vsub.f32 1.0, %v8644_v23  ;;  %v3517_v14 = vmul.f32 %v9422_v8, %v9421_v46  ;;  %v3834_v22 = vmul.f32 %v9387_v35, %v3795_v40  ;;  %v3803_v1 = vsub.f32 0.0, %v3771_v9 }
 0x422   : > { %v4473_v60 = vmax.f32 %v4471_v25, %v4472_v59  ;;  %v3836_v21 = vmul.f32 %v9387_v35, %v3797_v53  ;;  %v3741_v47 = vsel %vm3581_vm5, %v3709_v61, 0.0  ;;  %v3822_v11 = vsub.f32 0.0, %v3790_v31 }
 0x423   : > { %v4118_v29 = vmul.f32 %v9424_v32, %v9423_v58  ;;  %v3832_v17 = vmul.f32 %v9387_v35, %v3793_v19  ;;  %v4028_v0 = vmul.f32 %v9425_v43, %v3834_v22  ;;  %vm3389_vm6 = vcmp.gt.f32.partialorder %v9421_v46, 0.0  ;;  %v9432_v32 = vld [vmem:[#allocation56_spill] sm:$0xff] }
 0x424   : > { %v4474_v2 = vrot.slane %v4473_v60, 1  ;;  %v4058_v13 = vmul.f32 %v9426_v27, %v3836_v21  ;;  %v2354_v25 = vmul.f32 1.442695, %v2291_v39  ;;  %v4459_v48 = vperm.slane %v4457_v36, 0  ;;  %v9429_v36 = vld [vmem:[#allocation34_spill] sm:$0xff]  ;;  %v9430_v21 = vld [vmem:[#allocation51_spill] sm:$0xff] }
 0x425   : > { %v3549_v62 = vsel %vm3389_vm6, %v3517_v14, 0.0  ;;  %v4030_v26 = vadd.f32 %v4028_v0, %v3832_v17  ;;  %v3423_v61 = vmax.f32 %v9427_v51, 1e-30  ;;  %v3842_v31 = vmul.f32 %v9387_v35, %v3803_v1  ;;  %v9433_v43 = vld [vmem:[#allocation64_spill] sm:$0xff] }
 0x426   : > { %v4475_v52 = vmax.f32 %v4473_v60, %v4474_v2  ;;  %v3773_v9 = vadd.f32 %v3741_v47, %v3549_v62  ;;  %v4132_v37 = vadd.f32 %v9428_v28, %v4102_v33  ;;  %v3861_v59 = vmul.f32 %v9387_v35, %v3822_v11  ;;  %v9431_v33 = vld [vmem:[#allocation39_spill] sm:$0xff] }
 0x427   : > { %v4060_v53 = vadd.f32 %v4058_v13, %v4030_v26  ;;  %5345 = vpow2.f32 %v2354_v25  ;;  %v4461_v39 = vadd.f32 %v4459_v48, %v8621_v34  ;;  %v4148_v8 = vmul.f32 %v9429_v36, %v3842_v31 }
 0x428   : > { %v4485_v19 = vsub.f32 %v8621_v34, %v4475_v52  ;;  %v4487_v40 = vsub.f32 %v8624_v16, %v4475_v52  ;;  %5347 = vlog2.f32 %v3423_v61  ;;  %v3615_v1 = vmax.f32 %v9430_v21, 1e-30  ;;  %v8698_v52 = vld [vmem:[%s5692_s15 + $0x1f8] sm:$0xff]  ;;  %v9434_v61 = vld [vmem:[#allocation70_spill] sm:$0xff] }
 0x429   : > { %v4090_v22 = vadd.f32 %v4088_v50, %v4060_v53  ;;  %v4160_v47 = vmul.f32 %v9431_v33, %v9421_v46  ;;  %v3805_v11 = vsub.f32 0.0, %v3773_v9  ;;  %v4447_v58 = vmul.f32 %v8606_v3, %v3861_v59 }
 0x42a   : > { %v4489_v14 = vmul.f32 1.442695, %v4485_v19  ;;  %v4493_v60 = vmul.f32 1.442695, %v4487_v40  ;;  %v3425_v2 = vmax.f32 %v9432_v32, 1e-30 }
 0x42b   : > { %v4120_v16 = vadd.f32 %v4118_v29, %v4090_v22  ;;  %v4463_v34 = vmax.f32 %v4461_v39, 0.0  ;;  %v8690_v17 = vadd.f32 %v4160_v47, %v4132_v37  ;;  %v3427_v50 = vmax.f32 %v9433_v43, 1e-30 }
 0x42c   : > { %5349 = vpow2.f32 %v4489_v14  ;;  %v4449_v13 = vadd.f32 %v4447_v58, %v8642_v20  ;;  %v3844_v48 = vmul.f32 %v9387_v35, %v3805_v11  ;;  %v2451_v26 = vrot.slane %v8698_v52, 1  ;;  %v1777_v14 = vpop.f32.mrf.mxu3  ;;  %v9435_v11 = vld [vmem:[#allocation58_spill] sm:$0xff] }
 0x42d   : > { %5351 = vpow2.f32 %v4493_v60  ;;  %v4150_v0 = vadd.f32 %v4148_v8, %v4120_v16  ;;  %v5346_v27 = vpop.eup %5345  ;;  %v4465_v25 = vmin.f32 %v4463_v34, 1.0  ;;  %v3429_v31 = vmax.f32 %v9434_v61, 1e-30  ;;  %v9436_v34 = vld [vmem:[#allocation4_spill] sm:$0xff] }
 0x42e   : > { %5353 = vlog2.f32 %v3615_v1  ;;  %v5348_v46 = vpop.eup %5347  ;;  %v2387_v62 = vsub.f32 1.0, %v5346_v27  ;;  %v4178_v28 = vmul.f32 %v9431_v33, %v3844_v48  ;;  %v4563_v59 = vsub.f32 0.0, %v4449_v13  ;;  %v9437_v48 = vld [vmem:[#allocation65_spill] sm:$0xff] }
 0x42f   : > { %5355 = vlog2.f32 %v3425_v2  ;;  %v4575_v40 = vrot.slane %v4465_v25, 1  ;;  %v3471_v39 = vmul.f32 0.6931472, %v5348_v46  ;;  %v3617_v58 = vmax.f32 %v9435_v11, 1e-30 }
 0x430   : > { %5357 = vlog2.f32 %v3427_v50  ;;  %v8707_v53 = vmul.f32 %v2451_v26, %v2387_v62  ;;  %v4565_v8 = vmul.f32 1.442695, %v4563_v59  ;;  %v8712_v1 = vadd.f32 %v4178_v28, %v4150_v0  ;;  %v5436_v0 = vld [vmem:[%s5692_s15 + $0x198] sm:$0xff]  ;;  %v9439_v59 = vld [vmem:[#allocation73_spill] sm:$0xff] }
 0x431   : > { %5359 = vlog2.f32 %v3429_v31  ;;  %4579 = vst [vmem:[%s7898_s18] sm:$0x7] %v4575_v40  ;;  %vm3391_vm8 = vcmp.gt.f32.partialorder %v9427_v51, 0.0  ;;  %v1778_v50 = vadd.f32 %v1777_v14, %v9436_v34  ;;  %v3519_v13 = vmul.f32 %v3471_v39, %v9427_v51 }
 0x432   : > { %v8695_v29 = vpop.eup %5349  ;;  %vm2547_vm7 = vcmp.gt.f32.partialorder %v8707_v53, 0.1  ;;  %5361 = vpow2.f32 %v4565_v8  ;;  %v3978_v25 = vmul.f32 %v5436_v0, %v9433_v43  ;;  %v3619_v62 = vmax.f32 %v9437_v48, 1e-30 }
 0x433   : > { %v8701_v9 = vpop.eup %5351  ;;  %v4501_v20 = vrot.slane %v8695_v29, 4  ;;  %v8715_v47 = vsel %vm2547_vm7, 1.0, %v9236_v49  ;;  %vm4559_vm9 = vcmp.gt.f32.partialorder %v8644_v23, 0.01  ;;  %5363 = vlog2.f32 %v3617_v58 }
 0x434   : > { %v4502_v37 = vrot.slane %v8701_v9, 4  ;;  %v5354_v19 = vpop.eup %5353  ;;  %v2643_v27 = vperm.slane %v8715_v47, 0  ;;  %vm4557_vm11 = vcmp.gt.f32.partialorder %v8573_v5, 0.0  ;;  %vm3583_vm12 = vcmp.gt.f32.partialorder %v9430_v21, 0.0 }
 0x435   : > { %v5356_v60 = vpop.eup %5355  ;;  %v3663_v16 = vmul.f32 0.6931472, %v5354_v19  ;;  %v3431_v19 = vmax.f32 %v9439_v59, 1e-30  ;;  %5365 = vlog2.f32 %v3619_v62  ;;  %vm4561_vm13 = vmand %vm4557_vm11, %vm4559_vm9  ;;  %vm3393_vm14 = vcmp.gt.f32.partialorder %v9432_v32, 0.0 }
 0x436   : > { %v4503_v36 = vsel %vm2710_vm2, %v4501_v20, %v4502_v37  ;;  %v5358_v33 = vpop.eup %5357  ;;  %v3475_v46 = vmul.f32 0.6931472, %v5356_v60  ;;  %v9438_v20 = vld [vmem:[#allocation84_spill] sm:$0xff]  ;;  %v8728_v37 = vmul.f32 %v2643_v27, %v1778_v50  ;;  %v9440_v60 = vld [vmem:[#allocation82_spill] sm:$0xff]  ;;  %v8772_v57 = vmul.f32 %v5438_v41, %v9439_v59  ;;  %v9448_v41 = vld [vmem:[#allocation87_spill] sm:$0xff] }
 0x437   : > { %v4509_v22 = vrot.slane %v4503_v36, 4  ;;  %v3479_v26 = vmul.f32 0.6931472, %v5358_v33  ;;  %v8726_v28 = vmul.f32 %v2643_v27, %v9438_v20  ;;  %v3711_v40 = vmul.f32 %v3663_v16, %v9430_v21  ;;  %v5360_v39 = vpop.eup %5359  ;;  %v9441_v16 = vld [vmem:[#allocation13_spill] sm:$0xff]  ;;  %v9443_v20 = vld [vmem:[#allocation86_spill] sm:$0xff] }
 0x438   : > { %v2990_v14 = vsel %vm2710_vm2, %v8728_v37, -inf  ;;  %v5362_v33 = vpop.eup %5361  ;;  %v8741_v27 = vsub.f32 1.0, %v9441_v16  ;;  %v3435_v3 = vmax.f32 %v9443_v20, 1e-30  ;;  %5367 = vlog2.f32 %v3431_v19  ;;  %v9445_v19 = vld [vmem:[#allocation33_spill] sm:$0xff] }
 0x439   : > { %v4510_v2 = vadd.f32 %v4509_v22, %v4503_v36  ;;  %v2989_v8 = vsel %vm2708_vm10, %v8726_v28, -inf  ;;  %v3433_v22 = vmax.f32 %v9440_v60, 1e-30  ;;  %v4569_v50 = vsub.f32 1.0, %v5362_v33  ;;  %v5364_v62 = vpop.eup %5363 }
 0x43a   : > { %v2991_v34 = vmax.f32 %v2989_v8, %v2990_v14  ;;  %v3743_v45 = vsel %vm3583_vm12, %v3711_v40, 0.0  ;;  %v3483_v21 = vmul.f32 0.6931472, %v5360_v39  ;;  %v3551_v14 = vsel %vm3391_vm8, %v3519_v13, 0.0 }
 0x43b   : > { %v4511_v31 = vrot.slane %v4510_v2, 2  ;;  %v8749_v8 = vsel %vm4561_vm13, %v4569_v50, 0.0  ;;  %5369 = vlog2.f32 %v3433_v22  ;;  %v3521_v23 = vmul.f32 %v3475_v46, %v9432_v32  ;;  %v5437_v50 = vld [vmem:[%s5692_s15 + $0x1a8] sm:$0xff] }
 0x43c   : > { %9444 = vst [vmem:[#allocation76_spill] sm:$0xff] %v8749_v8  ;;  %v8756_v40 = vmul.f32 %v9445_v19, %v3978_v25  ;;  %v3315_v39 = vadd.f32 1e-10, %v8741_v27  ;;  %v8761_v13 = vadd.f32 %v3743_v45, %v3551_v14  ;;  %v3525_v46 = vmul.f32 %v3483_v21, %v9434_v61  ;;  %v9446_v25 = vld [vmem:[#allocation74_spill] sm:$0xff] }
 0x43d   : > { %v4512_v36 = vadd.f32 %v4511_v31, %v4510_v2  ;;  %v9442_v2 = vld [vmem:[#allocation71_spill] sm:$0xff]  ;;  %v2992_v31 = vrot.slane %v2991_v34, 4  ;;  %vm3395_vm15 = vcmp.gt.f32.partialorder %v9433_v43, 0.0  ;;  %vm3397_vm0 = vcmp.gt.f32.partialorder %v9434_v61, 0.0 }
 0x43e   : > { %v3621_v0 = vmax.f32 %v9442_v2, 1e-30  ;;  %v3667_v14 = vmul.f32 0.6931472, %v5364_v62  ;;  %vm3585_vm1 = vcmp.gt.f32.partialorder %v9435_v11, 0.0  ;;  %vm3587_vm3 = vcmp.gt.f32.partialorder %v9437_v48, 0.0 }
 0x43f   : > { %v4513_v58 = vrot.slane %v4512_v36, 1  ;;  %v2993_v33 = vmax.f32 %v2991_v34, %v2992_v31  ;;  %v3523_v34 = vmul.f32 %v3479_v26, %v9433_v43  ;;  %v3623_v31 = vmax.f32 %v9446_v25, 1e-30  ;;  %v9447_v26 = vld [vmem:[#allocation83_spill] sm:$0xff] }
 0x440   : > { %5371 = vlog2.f32 %v3621_v0  ;;  %v8766_v0 = vmul.f32 %v5437_v50, %v9434_v61  ;;  %v3625_v21 = vmax.f32 %v9447_v26, 1e-30  ;;  %vm3589_vm4 = vcmp.gt.f32.partialorder %v9442_v2, 0.0 }
 0x441   : > { %v8747_v5 = vadd.f32 %v4513_v58, %v4512_v36  ;;  %v5366_v36 = vpop.eup %5365  ;;  %v2994_v22 = vrot.slane %v2993_v33, 2  ;;  %v3437_v58 = vmax.f32 %v9441_v16, 1e-30  ;;  %v8784_v24 = vsel %vm3395_vm15, %v3523_v34, 0.0 }
 0x442   : > { %v5368_v8 = vpop.eup %5367  ;;  %v3671_v7 = vmul.f32 0.6931472, %v5366_v36  ;;  %vm4585_vm6 = vcmask 1046528   ;;  %vm3591_vm8 = vcmp.gt.f32.partialorder %v9446_v25, 0.0  ;;  %vm3399_vm12 = vcmp.gt.f32.partialorder %v9439_v59, 0.0 }
 0x443   : > { %5373 = vrcp.f32 %v8747_v5  ;;  %v2995_v12 = vmax.f32 %v2993_v33, %v2994_v22  ;;  %v5370_v45 = vpop.eup %5369  ;;  %v3627_v33 = vmax.f32 %v9448_v41, 1e-30  ;;  %v4532_v22 = vand.u32 2147483648, %v8747_v5 }
 0x444   : > { %5375 = vlog2.f32 %v3435_v3  ;;  %v8778_v3 = vsel %vm3393_vm14, %v3521_v23, 0.0  ;;  %v3629_v23 = vmax.f32 %v8741_v27, 1e-30  ;;  %v3487_v34 = vmul.f32 0.6931472, %v5368_v8 }
 0x445   : > { %5377 = vlog2.f32 %v3315_v39  ;;  %v2996_v18 = vrot.slane %v2995_v12, 1  ;;  %v8786_v39 = vsel %vm3397_vm0, %v3525_v46, 0.0  ;;  %vm4526_vm9 = vweird.f32 %v8747_v5 }
 0x446   : > { %v5372_v50 = vpop.eup %5371  ;;  %5379 = vlog2.f32 %v3437_v58  ;;  %v4530_v58 = vand.u32 2147483647, %v8747_v5  ;;  %vm3593_vm13 = vcmp.gt.f32.partialorder %v9447_v26, 0.0  ;;  %vm3401_vm15 = vcmp.gt.f32.partialorder %v9440_v60, 0.0 }
 0x447   : > { %5381 = vlog2.f32 %v3623_v31  ;;  %v2997_v6 = vmax.f32 %v2995_v12, %v2996_v18  ;;  %v3675_v10 = vmul.f32 0.6931472, %v5372_v50  ;;  %v3713_v31 = vmul.f32 %v3667_v14, %v9435_v11 }
 0x448   : > { %5383 = vlog2.f32 %v3625_v21  ;;  %v3491_v18 = vmul.f32 0.6931472, %v5370_v45  ;;  %vm8802_vm11 = vcmp.eq.f32.partialorder %v4530_v58, 8.507059e+37  ;;  %v4533_v14 = vor.u32 1.1754944e-38, %v4532_v22 }
 0x449   : > { %v5374_v15 = vpop.eup %5373  ;;  %vm3029_vm5 = vcmp.ge.f32.partialorder %v8726_v28, %v2997_v6  ;;  %5385 = vlog2.f32 %v3627_v33  ;;  %vm3403_vm0 = vcmp.gt.f32.partialorder %v9443_v20, 0.0 }
 0x44a   : > { %v5376_v62 = vpop.eup %5375  ;;  %v4522_v54 = vmul.f32 %v5374_v15, %v8747_v5  ;;  %v4901_v38 = vsel %vm3029_vm5, 1.0, %v9236_v49  ;;  %5387 = vlog2.f32 %v3629_v23  ;;  %vm4527_vm7 = vweird.f32 %v5374_v15 }
 0x44b   : > { %v8796_v42 = vpop.eup %5377  ;;  %v3495_v12 = vmul.f32 0.6931472, %v5376_v62  ;;  %v3125_v8 = vsub.f32 1.0, %v4901_v38  ;;  %v3717_v49 = vmul.f32 %v3675_v10, %v9442_v2  ;;  %v3527_v38 = vmul.f32 %v3487_v34, %v9439_v59  ;;  %vm8811_vm14 = vmor %vm4526_vm9, %vm4527_vm7 }
 0x44c   : > { %v4523_v46 = vsub.f32 1.0, %v4522_v54  ;;  %v5380_v36 = vpop.eup %5379  ;;  %v3715_v54 = vmul.f32 %v3671_v7, %v9437_v48  ;;  %v3529_v22 = vmul.f32 %v3491_v18, %v9440_v60  ;;  %vm3405_vm5 = vcmp.gt.f32.partialorder %v9441_v16, 0.0 }
 0x44d   : > { %v5382_v6 = vpop.eup %5381  ;;  %v3189_v50 = vrot.slane %v3125_v8, 4  ;;  %v3499_v23 = vmul.f32 0.6931472, %v5380_v36  ;;  %v3531_v10 = vmul.f32 %v3495_v12, %v9443_v20  ;;  %vm3595_vm7 = vcmp.gt.f32.partialorder %v9448_v41, 0.0 }
 0x44e   : > { %v4524_v44 = vmul.f32 %v5374_v15, %v4523_v46  ;;  %v3679_v33 = vmul.f32 0.6931472, %v5382_v6  ;;  %v5384_v7 = vpop.eup %5383  ;;  %v3747_v11 = vsel %vm3587_vm3, %v3715_v54, 0.0  ;;  %v3749_v12 = vsel %vm3589_vm4, %v3717_v49, 0.0 }
 0x44f   : > { %v5386_v62 = vpop.eup %5385  ;;  %v8822_v34 = vmul.f32 %v3189_v50, %v8707_v53  ;;  %v3683_v46 = vmul.f32 0.6931472, %v5384_v7  ;;  %v3533_v50 = vmul.f32 %v3499_v23, %v9441_v16 }
 0x450   : > { %v4525_v45 = vadd.f32 %v5374_v15, %v4524_v44  ;;  %v3745_v44 = vsel %vm3585_vm1, %v3713_v31, 0.0  ;;  %v5388_v31 = vpop.eup %5387  ;;  %v3719_v53 = vmul.f32 %v3679_v33, %v9446_v25  ;;  %vm3597_vm1 = vcmp.gt.f32.partialorder %v8741_v27, 0.0 }
 0x451   : > { %v8838_v6 = vsub.f32 1.0, %v8822_v34  ;;  %v3777_v48 = vadd.f32 %v3745_v44, %v8778_v3  ;;  %v3439_v54 = vmax.f32 %v8822_v34, 1e-30  ;;  %v3691_v21 = vmul.f32 0.6931472, %v5388_v31 }
 0x452   : > { %v4529_v58 = vsel %vm8811_vm14, %v5374_v15, %v4525_v45  ;;  %v3687_v15 = vmul.f32 0.6931472, %v5386_v62  ;;  %v3779_v45 = vadd.f32 %v3747_v11, %v8784_v24  ;;  %v3751_v3 = vsel %vm3591_vm8, %v3719_v53, 0.0  ;;  %v5439_v53 = vld [vmem:[%s5692_s15 + $0x1c8] sm:$0xff] }
 0x453   : > { %v4534_v18 = vsel %vm8802_vm11, %v4533_v14, %v4529_v58  ;;  %v3721_v14 = vmul.f32 %v3683_v46, %v9447_v26  ;;  %5389 = vlog2.f32 %v3439_v54  ;;  %v3725_v24 = vmul.f32 %v3691_v21, %v8741_v27 }
 0x454   : > { %v4535_v36 = vmul.f32 %v8695_v29, %v4534_v18  ;;  %v4551_v8 = vmul.f32 %v8701_v9, %v4534_v18  ;;  %v3631_v29 = vmax.f32 %v8838_v6, 1e-30  ;;  %v3781_v9 = vadd.f32 %v3749_v12, %v8786_v39 }
 0x455   : > { %v3723_v33 = vmul.f32 %v3687_v15, %v9448_v41  ;;  %v3809_v5 = vsub.f32 0.0, %v3777_v48  ;;  %v3559_v39 = vsel %vm3399_vm12, %v3527_v38, 0.0  ;;  %v3753_v23 = vsel %vm3593_vm13, %v3721_v14, 0.0 }
 0x456   : > { %v4586_v2 = vrot.slane %v4535_v36, 1  ;;  %v4587_v49 = vrot.slane %v4551_v8, 1  ;;  %5391 = vlog2.f32 %v3631_v29  ;;  %v3811_v44 = vsub.f32 0.0, %v3779_v45 }
 0x457   : > { %v9453_v62 = vsub.f32 0.0, %v8761_v13  ;;  %v8862_v58 = vmul.f32 0.6931472, %v8796_v42  ;;  %v3783_v46 = vadd.f32 %v3751_v3, %v3559_v39  ;;  %v3813_v11 = vsub.f32 0.0, %v3781_v9  ;;  %v9457_v3 = vld [vmem:[#allocation59_spill] sm:$0xff] }
 0x458   : > { %v4588_v7 = vsel %vm4585_vm6, %v4586_v2, %v4587_v49  ;;  %4598 = vst [vmem:[%s7898_s18 + $0x10] sm:$0x7] %v4587_v49  ;;  %v3561_v31 = vsel %vm3401_vm15, %v3529_v22, 0.0  ;;  %v3563_v26 = vsel %vm3403_vm0, %v3531_v10, 0.0  ;;  %v3565_v38 = vsel %vm3405_vm5, %v3533_v50, 0.0  ;;  %v5440_v22 = vld [vmem:[%s5692_s15 + $0x1d8] sm:$0xff] }
 0x459   : > { %4596 = vst [vmem:[%s7898_s18] sm:$0xf8] %v4588_v7  ;;  %v3846_v25 = vmul.f32 %v9387_v35, %v9453_v62  ;;  %v3755_v13 = vsel %vm3595_vm7, %v3723_v33, 0.0  ;;  %v3757_v18 = vsel %vm3597_vm1, %v3725_v24, 0.0  ;;  %v3785_v15 = vadd.f32 %v3753_v23, %v3561_v31  ;;  %v5390_v12 = vpop.eup %5389  ;;  %v9454_v10 = vld [vmem:[#allocation45_spill] sm:$0xff]  ;;  %v9455_v2 = vld [vmem:[#allocation55_spill] sm:$0xff]  ;;  %v9456_v33 = vld [vmem:[#allocation46_spill] sm:$0xff] }
 0x45a   : > { %v3848_v42 = vmul.f32 %v9387_v35, %v3809_v5  ;;  %v3984_v27 = vmul.f32 %v5439_v53, %v9440_v60  ;;  %v3850_v36 = vmul.f32 %v9387_v35, %v3811_v44  ;;  %v3986_v8 = vmul.f32 %v5440_v22, %v9443_v20 }
 0x45b   : > { %v4190_v48 = vmul.f32 %v9454_v10, %v9427_v51  ;;  %v4208_v54 = vmul.f32 %v9454_v10, %v3846_v25  ;;  %v3787_v21 = vadd.f32 %v3755_v13, %v3563_v26  ;;  %v3815_v14 = vsub.f32 0.0, %v3783_v46  ;;  %v9458_v46 = vld [vmem:[#allocation52_spill] sm:$0xff]  ;;  %v9460_v10 = vld [vmem:[#allocation81_spill] sm:$0xff] }
 0x45c   : > { %v5392_v41 = vpop.eup %5391  ;;  %v3852_v45 = vmul.f32 %v9387_v35, %v3813_v11  ;;  %v4220_v49 = vmul.f32 %v9455_v2, %v9432_v32  ;;  %v3789_v29 = vadd.f32 %v3757_v18, %v3565_v38  ;;  %v4236_v7 = vadd.f32 %v9457_v3, %v9456_v33 }
 0x45d   : > { %v4192_v9 = vadd.f32 %v4190_v48, %v8690_v17  ;;  %v4210_v50 = vadd.f32 %v4208_v54, %v8712_v1  ;;  %vm3407_vm3 = vcmp.gt.f32.partialorder %v8822_v34, 0.0  ;;  %v3695_v51 = vmul.f32 0.6931472, %v5392_v41 }
 0x45e   : > { %v3817_v24 = vsub.f32 0.0, %v3785_v15  ;;  %v4238_v5 = vmul.f32 %v9455_v2, %v3848_v42  ;;  %v4250_v39 = vmul.f32 %v9445_v19, %v9433_v43  ;;  %v3503_v23 = vmul.f32 0.6931472, %v5390_v12 }
 0x45f   : > { %v4222_v44 = vadd.f32 %v4220_v49, %v4192_v9  ;;  %v4266_v32 = vadd.f32 %v8756_v40, %v4236_v7  ;;  %v4268_v17 = vmul.f32 %v9445_v19, %v3850_v36  ;;  %v3819_v62 = vsub.f32 0.0, %v3787_v21  ;;  %v9459_v19 = vld [vmem:[#allocation54_spill] sm:$0xff]  ;;  %v5441_v49 = vld [vmem:[%s5692_s15 + $0x1e8] sm:$0xff] }
 0x460   : > { %v3854_v1 = vmul.f32 %v9387_v35, %v3815_v14  ;;  %v4240_v25 = vadd.f32 %v4238_v5, %v4210_v50  ;;  %v4280_v11 = vmul.f32 %v9458_v46, %v9434_v61  ;;  %v3821_v31 = vsub.f32 0.0, %v3789_v29 }
 0x461   : > { %v4252_v26 = vadd.f32 %v4250_v39, %v4222_v44  ;;  %v4294_v38 = vmul.f32 %v9458_v46, %v8766_v0  ;;  %v4298_v43 = vmul.f32 %v9458_v46, %v3852_v45  ;;  %v3727_v13 = vmul.f32 %v3695_v51, %v8838_v6 }
 0x462   : > { %v3856_v40 = vmul.f32 %v9387_v35, %v3817_v24  ;;  %v4270_v18 = vadd.f32 %v4268_v17, %v4240_v25  ;;  %v4310_v15 = vmul.f32 %v9459_v19, %v9439_v59  ;;  %v3535_v42 = vmul.f32 %v3503_v23, %v8822_v34  ;;  %v9462_v24 = vld [vmem:[#allocation8_spill] sm:$0xff]  ;;  %v9464_v25 = vld [vmem:[#allocation91_spill] sm:$0xff] }
 0x463   : > { %v4282_v53 = vadd.f32 %v4280_v11, %v4252_v26  ;;  %v4296_v61 = vadd.f32 %v4294_v38, %v4266_v32  ;;  %v4324_v12 = vmul.f32 %v9459_v19, %v8772_v57  ;;  %v3858_v0 = vmul.f32 %v9387_v35, %v3819_v62 }
 0x464   : > { %v4300_v36 = vadd.f32 %v4298_v43, %v4270_v18  ;;  %v4328_v22 = vmul.f32 %v9459_v19, %v3854_v1  ;;  %v4340_v48 = vmul.f32 %v9460_v10, %v9440_v60  ;;  %vm3599_vm4 = vcmp.gt.f32.partialorder %v8838_v6, 0.0  ;;  %v9461_v60 = vld [vmem:[#allocation89_spill] sm:$0xff] }
 0x465   : > { %v3860_v59 = vmul.f32 %v9387_v35, %v3821_v31  ;;  %v4312_v54 = vadd.f32 %v4310_v15, %v4282_v53  ;;  %v4326_v41 = vadd.f32 %v4324_v12, %v4296_v61  ;;  %v3759_v21 = vsel %vm3599_vm4, %v3727_v13, 0.0 }
 0x466   : > { %v4330_v14 = vadd.f32 %v4328_v22, %v4300_v36  ;;  %v4354_v45 = vmul.f32 %v9460_v10, %v3984_v27  ;;  %v4358_v57 = vmul.f32 %v9460_v10, %v3856_v40  ;;  %v3567_v2 = vsel %vm3407_vm3, %v3535_v42, 0.0  ;;  %v9465_v22 = vld [vmem:[#allocation92_spill] sm:$0xff] }
 0x467   : > { %v3988_v29 = vmul.f32 %v5441_v49, %v9441_v16  ;;  %v4342_v9 = vadd.f32 %v4340_v48, %v4312_v54  ;;  %v4370_v6 = vmul.f32 %v9461_v60, %v9443_v20  ;;  %v4384_v3 = vmul.f32 %v9461_v60, %v3986_v8  ;;  %v9463_v20 = vld [vmem:[#allocation7_spill] sm:$0xff] }
 0x468   : > { %v4356_v50 = vadd.f32 %v4354_v45, %v4326_v41  ;;  %v4360_v33 = vadd.f32 %v4358_v57, %v4330_v14  ;;  %v4388_v7 = vmul.f32 %v9461_v60, %v3858_v0  ;;  %v3791_v51 = vadd.f32 %v3759_v21, %v3567_v2  ;;  %v9468_v41 = vld [vmem:[#allocation53_spill] sm:$0xff]  ;;  %v5445_v14 = vld [vmem:[%s5692_s15 + $0x190] sm:$0xff] }
 0x469   : > { %v4372_v27 = vadd.f32 %v4370_v6, %v4342_v9  ;;  %v4400_v5 = vmul.f32 %v9462_v24, %v9441_v16  ;;  %v4414_v44 = vmul.f32 %v9462_v24, %v3988_v29  ;;  %v4418_v32 = vmul.f32 %v9462_v24, %v3860_v59  ;;  %v9469_v45 = vld [vmem:[#allocation69_spill] sm:$0xff]  ;;  %v9470_v9 = vld [vmem:[#allocation36_spill] sm:$0xff] }
 0x46a   : > { %v4386_v39 = vadd.f32 %v4384_v3, %v4356_v50  ;;  %v4390_v23 = vadd.f32 %v4388_v7, %v4360_v33  ;;  %v4424_v62 = vadd.f32 %v9463_v20, %v8862_v58  ;;  %v8932_v46 = vadd.f32 %v8715_v47, %v9464_v25  ;;  %v5442_v58 = vld [vmem:[%s5692_s15 + $0x160] sm:$0xff]  ;;  %v9471_v50 = vld [vmem:[#allocation75_spill] sm:$0xff] }
 0x46b   : > { %v4402_v17 = vadd.f32 %v4400_v5, %v4372_v27  ;;  %v3823_v16 = vsub.f32 0.0, %v3791_v51  ;;  %v3894_v31 = vperm.slane %v8822_v34, 0  ;;  %v3990_v38 = vmul.f32 %v8698_v52, %v8822_v34  ;;  %v5446_v6 = vld [vmem:[%s5692_s15 + $0x1a0] sm:$0xff]  ;;  %v5447_v51 = vld [vmem:[%s5692_s15 + $0x1b0] sm:$0xff]  ;;  %v9472_v27 = vld [vmem:[#allocation77_spill] sm:$0xff] }
 0x46c   : > { %v4416_v1 = vadd.f32 %v4414_v44, %v4386_v39  ;;  %v4420_v8 = vadd.f32 %v4418_v32, %v4390_v23  ;;  %v4427_v11 = vmul.f32 1.442695, %v4424_v62  ;;  %v3971_v13 = vmul.f32 %v5442_v58, %v9397_v4  ;;  %v5444_v4 = vld [vmem:[%s5692_s15 + $0x180] sm:$0xff]  ;;  %v9473_v39 = vld [vmem:[#allocation78_spill] sm:$0xff] }
 0x46d   : > { %v3862_v26 = vmul.f32 %v9387_v35, %v3823_v16  ;;  %v3926_v40 = vmul.f32 %v3894_v31, %v8726_v28  ;;  %v3958_v47 = vmul.f32 %v3894_v31, %v8728_v37  ;;  %v5443_v35 = vld [vmem:[%s5692_s15 + $0x170] sm:$0xff]  ;;  %v3975_v28 = vmul.f32 %v5444_v4, %v7560_v30  ;;  %v9474_v20 = vld [vmem:[#allocation80_spill] sm:$0xff] }
 0x46e   : > { %5393 = vpow2.f32 %v4427_v11  ;;  %v4173_v53 = vmul.f32 %v9398_v55, %v3971_v13  ;;  %v3973_v52 = vmul.f32 %v5443_v35, %v9399_v56  ;;  %v9466_v55 = vld [vmem:[#allocation93_spill] sm:$0xff]  ;;  %v9467_v56 = vld [vmem:[#allocation31_spill] sm:$0xff]  ;;  %v3977_v57 = vmul.f32 %v5445_v14, %v9469_v45  ;;  %v5449_v31 = vld [vmem:[%s5692_s15 + $0x1d0] sm:$0xff] }
 0x46f   : > { %v4233_v21 = vmul.f32 %v9468_v41, %v3975_v28  ;;  %v3979_v33 = vmul.f32 %v5446_v6, %v9471_v50  ;;  %v3981_v24 = vmul.f32 %v5447_v51, %v9472_v27  ;;  %v9477_v58 = vld [vmem:[#allocation90_spill] sm:$0xff]  ;;  %v4606_v50 = vlaneseq }
 0x470   : > { %v4175_v54 = vadd.f32 %v4173_v53, %v9467_v56  ;;  %v4263_v60 = vmul.f32 %v9470_v9, %v3977_v57  ;;  %v9481_v4 = vld [vmem:[#allocation6_spill] sm:$0xff]  ;;  %vm4603_vm11 = vcmask 1040384  }
 0x471   : > { %v4293_v23 = vmul.f32 %v9473_v39, %v3979_v33  ;;  %vm8992_vm12 = vcmp.lt.s32.totalorder %v4606_v50, 256 }
 0x474   : > { %v5394_v43 = vpop.eup %5393 }
 0x475   : > { %v4430_v18 = vmul.f32 %v5394_v43, %v8822_v34  ;;  %v4434_v19 = vperm.slane %v5394_v43, 0  ;;  %v4444_v15 = vmul.f32 %v5394_v43, %v3990_v38  ;;  %v4448_v42 = vmul.f32 %v5394_v43, %v3862_v26  ;;  %v9476_v26 = vld [vmem:[#allocation85_spill] sm:$0xff] }
 0x476   : > { %v4203_v34 = vmul.f32 %v9400_v63, %v3973_v52  ;;  %v3985_v38 = vmul.f32 %v5449_v31, %v9476_v26  ;;  %v5451_v52 = vld [vmem:[%s5692_s15 + $0x1f0] sm:$0xff] }
 0x477   : > { %v4432_v61 = vadd.f32 %v4430_v18, %v4402_v17  ;;  %v4436_v12 = vmul.f32 %v4434_v19, %v3926_v40  ;;  %v4438_v0 = vmul.f32 %v4434_v19, %v3958_v47  ;;  %v8946_v36 = vadd.f32 %v4444_v15, %v4416_v1  ;;  %v5448_v17 = vld [vmem:[%s5692_s15 + $0x1c0] sm:$0xff]  ;;  %v9478_v18 = vld [vmem:[#allocation9_spill] sm:$0xff] }
 0x478   : > { %v8950_v37 = vadd.f32 %v4448_v42, %v4420_v8  ;;  %v4205_v29 = vadd.f32 %v4203_v34, %v4175_v54  ;;  %v3983_v62 = vmul.f32 %v5448_v17, %v9474_v20  ;;  %v9475_v8 = vld [vmem:[#allocation88_spill] sm:$0xff]  ;;  %v9479_v42 = vld [vmem:[#allocation5_spill] sm:$0xff] }
 0x479   : > { %v4440_v10 = vadd.f32 %v4436_v12, %v9465_v22  ;;  %v4442_v48 = vadd.f32 %v4438_v0, %v9466_v55  ;;  %v4454_v59 = vmax.f32 %v4432_v61, 0.0  ;;  %v4323_v25 = vmul.f32 %v9475_v8, %v3981_v24  ;;  %v5450_v47 = vld [vmem:[%s5692_s15 + $0x1e0] sm:$0xff]  ;;  %v9480_v61 = vld [vmem:[#allocation57_spill] sm:$0xff]  ;;  %v9482_v55 = vld [vmem:[#allocation79_spill] sm:$0xff] }
 0x47a   : > { %v4235_v5 = vadd.f32 %v4233_v21, %v4205_v29  ;;  %v4353_v13 = vmul.f32 %v9477_v58, %v3983_v62  ;;  %v3987_v19 = vmul.f32 %v5450_v47, %v9478_v18  ;;  %v4383_v53 = vmul.f32 %v9479_v42, %v3985_v38 }
 0x47b   : > { %v8959_v2 = vmin.f32 %v4454_v59, 1.0  ;;  %v4476_v30 = vsel %vm2708_vm10, %v4440_v10, -inf  ;;  %v4477_v63 = vsel %vm2710_vm2, %v4442_v48, -inf  ;;  %v3989_v12 = vmul.f32 %v5451_v52, %v9480_v61  ;;  %v4653_v61 = vld [vmem:[%s7898_s18] sm:$0xff] (%p5539_p5) }
 0x47c   : > { %v4478_v49 = vmax.f32 %v4476_v30, %v4477_v63  ;;  %v4265_v1 = vadd.f32 %v4263_v60, %v4235_v5  ;;  %v4413_v28 = vmul.f32 %v9481_v4, %v3987_v19  ;;  %v4554_v63 = vmax.f32 %v8946_v36, 0.0  ;;  %4654 = vst [vmem:[%s4640_s16] sm:$0xff] (%p5539_p5), %v4653_v61 }
 0x47d   : > { %v4458_v3 = vsub.f32 1.0, %v8959_v2  ;;  %v4443_v59 = vmul.f32 %v9482_v55, %v3989_v12  ;;  %vm4558_vm10 = vcmp.gt.f32.partialorder %v8932_v46, 0.0  ;;  %vm4560_vm8 = vcmp.gt.f32.partialorder %v8959_v2, 0.01 }
 0x47e   : > { %v4479_v7 = vrot.slane %v4478_v49, 4  ;;  %v4295_v43 = vadd.f32 %v4293_v23, %v4265_v1  ;;  %v4556_v29 = vmin.f32 %v4554_v63, 6.0  ;;  %vm8986_vm9 = vmand %vm4558_vm10, %vm4560_vm8  ;;  %v4564_v36 = vsub.f32 0.0, %v8950_v37  ;;  %v9487_v37 = vld [vmem:[#allocation20_spill] sm:$0xff] }
 0x47f   : > { %v4460_v44 = vperm.slane %v4458_v3, 0  ;;  %v4615_v27 = vrot.slane %v8959_v2, 7 }
 0x480   : > { %v4480_v32 = vmax.f32 %v4478_v49, %v4479_v7  ;;  %v4325_v15 = vadd.f32 %v4323_v25, %v4295_v43  ;;  %v4567_v5 = vmul.f32 1.442695, %v4564_v36 }
 0x481   : > { %v4462_v11 = vadd.f32 %v4460_v44, %v4440_v10  ;;  %v4616_v23 = vsel %vm4603_vm11, %v9487_v37, %v4615_v27 }
 0x482   : > { %v4481_v16 = vrot.slane %v4480_v32, 2  ;;  %v4355_v0 = vadd.f32 %v4353_v13, %v4325_v15  ;;  %4903 = vst.msk [vmem:[%s7898_s18 + $0x14] ss:$8 sm:$0x3] %vm8992_vm12, %v4616_v23 }
 0x483   : > { %v4464_v57 = vmax.f32 %v4462_v11, 0.0  ;;  %v9488_v11 = vld [vmem:[#allocation76_spill] sm:$0xff] }
 0x484   : > { %v4482_v40 = vmax.f32 %v4480_v32, %v4481_v16  ;;  %v4385_v22 = vadd.f32 %v4383_v53, %v4355_v0 }
 0x485   : > { %v4466_v49 = vmin.f32 %v4464_v57, 1.0 }
 0x486   : > { %v4483_v35 = vrot.slane %v4482_v40, 1  ;;  %v4415_v41 = vadd.f32 %v4413_v28, %v4385_v22 }
 0x487   : > { %v4576_v7 = vrot.slane %v4466_v49, 1 }
 0x488   : > { %v4484_v34 = vmax.f32 %v4482_v40, %v4483_v35  ;;  %v4445_v45 = vadd.f32 %v4443_v59, %v4415_v41 }
 0x489   : > { %4580 = vst [vmem:[%s7898_s18 + $0x8] sm:$0x7] %v4576_v7 }
 0x48a   : > { %v4486_v56 = vsub.f32 %v4440_v10, %v4484_v34  ;;  %v4488_v54 = vsub.f32 %v4442_v48, %v4484_v34  ;;  %v4553_v30 = vmax.f32 %v4445_v45, 0.0  ;;  %v4602_v48 = vrot.slane %v4556_v29, 7 }
 0x48c   : > { %v4491_v21 = vmul.f32 1.442695, %v4486_v56  ;;  %v4495_v14 = vmul.f32 1.442695, %v4488_v54  ;;  %v4555_v60 = vmin.f32 %v4553_v30, 6.0 }
 0x48e   : > { %5395 = vpow2.f32 %v4491_v21  ;;  %v4604_v46 = vsel %vm4603_vm11, %v4555_v60, %v4602_v48 }
 0x48f   : > { %5397 = vpow2.f32 %v4495_v14  ;;  %4902 = vst.msk [vmem:[%s7898_s18 + $0x13] ss:$8 sm:$0x3] %vm8992_vm12, %v4604_v46 }
 0x490   : > { %5399 = vpow2.f32 %v4567_v5 }
 0x494   : > { %v5396_v9 = vpop.eup %5395 }
 0x495   : > { %v5398_v6 = vpop.eup %5397  ;;  %v4504_v10 = vrot.slane %v5396_v9, 4 }
 0x496   : > { %v4505_v33 = vrot.slane %v5398_v6, 4  ;;  %v5400_v2 = vpop.eup %5399 }
 0x497   : > { %v4570_v62 = vsub.f32 1.0, %v5400_v2 }
 0x498   : > { %v4506_v24 = vsel %vm2710_vm2, %v4504_v10, %v4505_v33 }
 0x499   : > { %v4515_v39 = vrot.slane %v4506_v24, 4  ;;  %v4572_v8 = vsel %vm8986_vm9, %v4570_v62, 0.0 }
 0x49a   : > { %v4623_v25 = vrot.slane %v4572_v8, 7 }
 0x49b   : > { %v4516_v44 = vadd.f32 %v4515_v39, %v4506_v24 }
 0x49c   : > { %v4624_v16 = vsel %vm4603_vm11, %v9488_v11, %v4623_v25 }
 0x49d   : > { %v4517_v32 = vrot.slane %v4516_v44, 2  ;;  %4904 = vst.msk [vmem:[%s7898_s18 + $0x15] ss:$8 sm:$0x3] %vm8992_vm12, %v4624_v16 }
 0x49f   : > { %v4518_v17 = vadd.f32 %v4517_v32, %v4516_v44 }
 0x4a1   : > { %v4519_v20 = vrot.slane %v4518_v17, 1 }
 0x4a3   : > { %v4520_v1 = vadd.f32 %v4519_v20, %v4518_v17 }
 0x4a4   : > { %v4657_v0 = vld [vmem:[%s7898_s18 + $0x10] sm:$0xff] (%p5539_p5) }
 0x4a5   : > { %5401 = vrcp.f32 %v4520_v1  ;;  %v4547_v43 = vand.u32 2147483648, %v4520_v1  ;;  %v4545_v13 = vand.u32 2147483647, %v4520_v1  ;;  %vm4541_vm13 = vweird.f32 %v4520_v1  ;;  %4658 = vst [vmem:[%s4640_s16 + $0x20] sm:$0xff] (%p5539_p5), %v4657_v0 }
 0x4a7   : > { %v4548_v47 = vor.u32 1.1754944e-38, %v4547_v43  ;;  %vm4546_vm15 = vcmp.eq.f32.partialorder %v4545_v13, 8.507059e+37 }
 0x4ab   : > { %v5402_v31 = vpop.eup %5401 }
 0x4ac   : > { %v4537_v26 = vmul.f32 %v5402_v31, %v4520_v1  ;;  %vm4542_vm2 = vweird.f32 %v5402_v31 }
 0x4ad   : > { %vm4543_vm14 = vmor %vm4541_vm13, %vm4542_vm2 }
 0x4ae   : > { %v4538_v38 = vsub.f32 1.0, %v4537_v26 }
 0x4b0   : > { %v4539_v58 = vmul.f32 %v5402_v31, %v4538_v38 }
 0x4b2   : > { %v4540_v40 = vadd.f32 %v5402_v31, %v4539_v58 }
 0x4b4   : > { %v4544_v18 = vsel %vm4543_vm14, %v5402_v31, %v4540_v40 }
 0x4b5   : > { %v4549_v19 = vsel %vm4546_vm15, %v4548_v47, %v4544_v18 }
 0x4b6   : > { %v4550_v15 = vmul.f32 %v5396_v9, %v4549_v19  ;;  %v4552_v42 = vmul.f32 %v5398_v6, %v4549_v19 }
 0x4b7   : > { %4637 = sbr.rel (!%p5539_p5) target bundleno = 1220 (0x4c4), region = 67 }
 0x4b8   : > { %v4589_v53 = vrot.slane %v4550_v15, 1  ;;  %v4590_v35 = vrot.slane %v4552_v42, 1 }
 0x4ba   : > { %v4591_v52 = vsel %vm4585_vm6, %v4589_v53, %v4590_v35  ;;  %4599 = vst [vmem:[%s7898_s18 + $0x18] sm:$0x7] %v4590_v35 }
 0x4bb   : > { %4597 = vst [vmem:[%s7898_s18 + $0x8] sm:$0xf8] %v4591_v52 }
 0x4c1   : > { %v4659_v4 = vld [vmem:[%s7898_s18 + $0x18] sm:$0xff] }
 0x4c2   : > { %v4655_v12 = vld [vmem:[%s7898_s18 + $0x8] sm:$0xff]  ;;  %4660 = vst [vmem:[%s4640_s16 + $0x28] sm:$0xff] %v4659_v4 }
 0x4c3   : > { %4656 = vst [vmem:[%s4640_s16 + $0x8] sm:$0xff] %v4655_v12 }
 0x4c4 PF: > { %p12_p10 = scmp.ge.s32.totalorder %s5526_s22, 4   ;;  %s9489_s18 = smov %s5470_s19 }
 0x4c5   : > { %s9490_s19 = smov %s5537_s25  ;;  %s9491_s20 = smov %s5526_s22 }
 0x4c6   :  { %14 = sbr.rel (!%p12_p10) target bundleno = 2 (0x2), region = 124 }

</bundles_post_ra>
